<compile_context>
chip_gen: v7x
topology: tpu7x:2x2x1
jax: 0.10.0
libtpu: 0.0.40
codegen_flags: <defaults>
</compile_context>

<pallas_src>
import functools

import jax
import jax.numpy as jnp
from jax import lax
from jax.experimental import pallas as pl
from jax.experimental.pallas import tpu as pltpu


def _round_up(x, m):
    return (x + m - 1) // m * m


def _pad_gate_cols(w, H, Hp):
    """(..., 4H) -> (..., 4Hp): each H-wide gate block (i,f,g,o) zero-padded to Hp."""
    if Hp == H:
        return w
    pad = [(0, 0)] * (w.ndim - 1) + [(0, Hp - H)]
    blocks = [jnp.pad(w[..., gi * H:(gi + 1) * H], pad) for gi in range(4)]
    return jnp.concatenate(blocks, axis=-1)


def _pad_rows(w, Kp):
    """(K, N) -> (Kp, N) zero-padded along rows."""
    K = w.shape[0]
    if Kp == K:
        return w
    return jnp.pad(w, ((0, Kp - K), (0, 0)))


def _lstm_kernel(
    x_ref,      # (TS, Bb, Hp)  raw inputs, dot_dtype
    len_ref,    # (Bb, 1) int32 sequence lengths (0 on padded batch rows)
    wih0_ref,   # (Hp, 4Hp)     dot_dtype
    wf_ref,     # (Hp, 8Hp)     [W_hh0 | W_ih1], dot_dtype
    whh1_ref,   # (Hp, 4Hp)     dot_dtype
    b0_ref,     # (1, 4Hp)      f32  (b_ih0 + b_hh0)
    b1_ref,     # (1, 4Hp)      f32  (b_ih1 + b_hh1)
    w7_ref,     # (Hp, OUTP)    dot_dtype
    b7_ref,     # (1, OUTP)     f32
    y_ref,      # (Bb, OUTP)    f32 output: Linear(last hidden)
    r0, c0, h1, c1, last,   # VMEM scratch, f32
):
    TS, Bb, Hp = x_ref.shape
    t_blk = pl.program_id(1)
    n_t = pl.num_programs(1)
    dot_dtype = wf_ref.dtype

    @pl.when(t_blk == 0)
    def _():
        r0[...] = jnp.zeros_like(r0)
        c0[...] = jnp.zeros_like(c0)
        h1[...] = jnp.zeros_like(h1)
        c1[...] = jnp.zeros_like(c1)
        last[...] = jnp.zeros_like(last)

    # Hoisted loads (constant across the unrolled time loop).
    lens = len_ref[...]
    wf = wf_ref[...]
    whh1 = whh1_ref[...]
    b1 = b1_ref[...]

    # Layer-0 input projection for the whole block: one large MXU dot that is
    # off the serial h0 dependency chain (bias b0 folded in here).
    xb = x_ref[...].reshape(TS * Bb, Hp)
    xp0 = jnp.dot(xb, wih0_ref[...], preferred_element_type=jnp.float32) + b0_ref[...]

    r0v = r0[...]          # h0 @ W_hh0 contribution carried from previous step
    c0v = c0[...]
    h1v = h1[...]
    c1v = c1[...]
    lastv = last[...]

    def sigmoid(z):
        # Single EUP push (+2 cheap VPU ops) instead of exp/add/reciprocal.
        return 0.5 * jnp.tanh(0.5 * z) + 0.5

    def gates_to_hc(gates, c):
        # Gate slices are vreg-aligned because Hp is a multiple of 128.
        i = sigmoid(gates[:, 0 * Hp:1 * Hp])
        f = sigmoid(gates[:, 1 * Hp:2 * Hp])
        g = jnp.tanh(gates[:, 2 * Hp:3 * Hp])
        o = sigmoid(gates[:, 3 * Hp:4 * Hp])
        c_new = f * c + i * g
        h_new = o * jnp.tanh(c_new)
        return h_new, c_new

    # Fully unrolled (static) time loop inside the block.
    for ts in range(TS):
        t = t_blk * TS + ts

        # Layer 0: the recurrent contribution h0(t-1) @ W_hh0 was produced by
        # the previous step's fused dot (zero at t == 0).
        gates0 = xp0[ts * Bb:(ts + 1) * Bb] + r0v
        h0v, c0v = gates_to_hc(gates0, c0v)

        # Fused (Bb, Hp) @ (Hp, 8Hp) dot:
        #   [:, :4Hp]  -> next step's layer-0 recurrent contribution
        #   [:, 4Hp:]  -> layer-1 input contribution for this step
        fused = jnp.dot(h0v.astype(dot_dtype), wf, preferred_element_type=jnp.float32)
        r0v = fused[:, :4 * Hp]

        gates1 = (fused[:, 4 * Hp:]
                  + jnp.dot(h1v.astype(dot_dtype), whh1,
                            preferred_element_type=jnp.float32)
                  + b1)
        h1v, c1v = gates_to_hc(gates1, c1v)

        # Capture layer-1 hidden at each sequence's last valid timestep
        # (== pad_packed_sequence + gather at length-1).
        lastv = jnp.where((lens - 1) == t, h1v, lastv)

    r0[...] = r0v
    c0[...] = c0v
    h1[...] = h1v
    c1[...] = c1v
    last[...] = lastv

    @pl.when(t_blk == n_t - 1)
    def _():
        # Final Linear; BatchNorm (full-batch stats) runs in a follow-up kernel.
        y_ref[...] = (jnp.dot(lastv.astype(dot_dtype), w7_ref[...],
                              preferred_element_type=jnp.float32) + b7_ref[...])


def _bn_kernel(y_ref, gamma_ref, beta_ref, out_ref, *, n_valid):
    # BatchNorm1d, training-mode batch statistics, biased variance, eps=1e-5.
    y = y_ref[...]
    rows = lax.broadcasted_iota(jnp.int32, (y.shape[0], 1), 0)
    valid = (rows < n_valid).astype(jnp.float32)        # mask padded batch rows
    inv_n = 1.0 / float(n_valid)
    mean = jnp.sum(y * valid, axis=0, keepdims=True) * inv_n
    cen = (y - mean) * valid
    var = jnp.sum(cen * cen, axis=0, keepdims=True) * inv_n
    out_ref[...] = (y - mean) * lax.rsqrt(var + 1e-5) * gamma_ref[...] + beta_ref[...]


def lstm_net_forward(x_bth, lengths, params, *, ts_block=32, batch_block=8,
                     dot_dtype=jnp.bfloat16):
    """x_bth: (B, T, H) float32 (batch_first, like PyTorch). lengths: (B,) int32."""
    B, T, H = x_bth.shape
    out_num = params["w7"].shape[0]

    Hp = _round_up(H, 128)                               # vreg-aligned gate blocks
    OUTP = _round_up(out_num, 128)                       # lane-dense output stores
    Bb = _round_up(min(batch_block, max(B, 1)), 8)       # rows per batch block
    Bp = _round_up(max(B, Bb), Bb)
    n_bblk = Bp // Bb
    TS = min(ts_block, T)
    Tp = _round_up(T, TS)
    n_tblk = Tp // TS

    # --- weight prep: pre-transpose so the kernel does plain x @ W ----------
    wih0 = _pad_rows(_pad_gate_cols(params["w_ih0"].T, H, Hp), Hp)             # (Hp, 4Hp)
    b0 = _pad_gate_cols((params["b_ih0"] + params["b_hh0"])[None, :], H, Hp)   # (1, 4Hp)
    whh0 = _pad_rows(_pad_gate_cols(params["w_hh0"].T, H, Hp), Hp)             # (Hp, 4Hp)
    wih1 = _pad_rows(_pad_gate_cols(params["w_ih1"].T, H, Hp), Hp)             # (Hp, 4Hp)
    wf = jnp.concatenate([whh0, wih1], axis=1)                                 # (Hp, 8Hp)
    whh1 = _pad_rows(_pad_gate_cols(params["w_hh1"].T, H, Hp), Hp)             # (Hp, 4Hp)
    b1 = _pad_gate_cols((params["b_ih1"] + params["b_hh1"])[None, :], H, Hp)   # (1, 4Hp)
    w7 = jnp.pad(_pad_rows(params["w7"].T, Hp), ((0, 0), (0, OUTP - out_num)))  # (Hp, OUTP)
    b7 = jnp.pad(params["b7"], (0, OUTP - out_num)).reshape(1, OUTP)
    gamma = jnp.pad(params["bn_gamma"], (0, OUTP - out_num)).reshape(1, OUTP)
    beta = jnp.pad(params["bn_beta"], (0, OUTP - out_num)).reshape(1, OUTP)

    # MXU operands in dot_dtype (bf16 by default); accumulation stays f32.
    wih0 = wih0.astype(dot_dtype)
    wf = wf.astype(dot_dtype)
    whh1 = whh1.astype(dot_dtype)
    w7 = w7.astype(dot_dtype)

    # Raw x stream (time-major, padded) in dot_dtype: 4-8x fewer streamed HBM
    # bytes than streaming precomputed (T, B, 4Hp) f32 gate projections.
    x_tbh = jnp.transpose(x_bth, (1, 0, 2)).astype(jnp.float32)                # (T, B, H)
    xpad = jnp.pad(x_tbh, ((0, Tp - T), (0, Bp - B), (0, Hp - H))).astype(dot_dtype)
    len2d = jnp.pad(lengths.astype(jnp.int32), (0, Bp - B)).reshape(Bp, 1)

    # --- explicit VMEM budget (default scoped limit is only 16-32 MiB) ------
    dsz = jnp.dtype(dot_dtype).itemsize
    footprint = (
        2 * TS * Bb * Hp * dsz                                             # streamed x (2 bufs)
        + 2 * (Hp * 4 * Hp + Hp * 8 * Hp + Hp * 4 * Hp + Hp * OUTP) * dsz  # weights (safety: 2 bufs)
        + TS * Bb * 4 * Hp * 4                                             # projected-gates temp
        + (4 * Hp + 4 * Hp) * Bb * 4                                       # r0/c0/h1/c1/last scratch
        + 2 * Bb * OUTP * 4                                                # output block
        + (3 * 4 * Hp + 2 * OUTP) * 4 * 2                                  # biases
    )
    try:
        vmem_cap = int(0.75 * pltpu.get_tpu_info().vmem_capacity_bytes)   # ~48 MiB on v7x
    except Exception:
        vmem_cap = 96 << 20
    vmem_limit = int(min(max(2 * footprint + (4 << 20), 32 << 20), vmem_cap))

    def weight_spec(shape):
        # Grid-invariant: single-buffered to halve resident VMEM.
        return pl.BlockSpec(shape, lambda b, g: (0, 0), pipeline_mode=pl.Buffered(1))

    grid_spec = pltpu.PrefetchScalarGridSpec(
        num_scalar_prefetch=0,
        grid=(n_bblk, n_tblk),
        in_specs=[
            pl.BlockSpec((TS, Bb, Hp), lambda b, g: (g, b, 0)),   # streamed x
            pl.BlockSpec((Bb, 1), lambda b, g: (b, 0)),           # lengths
            weight_spec((Hp, 4 * Hp)),     # W_ih0
            weight_spec((Hp, 8 * Hp)),     # [W_hh0 | W_ih1]
            weight_spec((Hp, 4 * Hp)),     # W_hh1
            weight_spec((1, 4 * Hp)),      # b0
            weight_spec((1, 4 * Hp)),      # b1
            weight_spec((Hp, OUTP)),       # W7
            weight_spec((1, OUTP)),        # b7
        ],
        out_specs=pl.BlockSpec((Bb, OUTP), lambda b, g: (b, 0)),
        scratch_shapes=[
            pltpu.VMEM((Bb, 4 * Hp), jnp.float32),   # r0: h0 @ W_hh0 carry
            pltpu.VMEM((Bb, Hp), jnp.float32),       # c0
            pltpu.VMEM((Bb, Hp), jnp.float32),       # h1
            pltpu.VMEM((Bb, Hp), jnp.float32),       # c1
            pltpu.VMEM((Bb, Hp), jnp.float32),       # last h1
        ],
    )

    y_p = pl.pallas_call(
        _lstm_kernel,
        out_shape=jax.ShapeDtypeStruct((Bp, OUTP), jnp.float32),
        grid_spec=grid_spec,
        compiler_params=pltpu.CompilerParams(
            # Batch blocks are independent (v7x megacore); time is serial.
            dimension_semantics=("parallel", "arbitrary"),
            vmem_limit_bytes=vmem_limit),
    )(xpad, len2d, wih0, wf, whh1, b0, b1, w7, b7)

    # BatchNorm over the full batch (needs statistics across all batch blocks).
    out_p = pl.pallas_call(
        functools.partial(_bn_kernel, n_valid=B),
        out_shape=jax.ShapeDtypeStruct((Bp, OUTP), jnp.float32),
    )(y_p, gamma, beta)
    return out_p[:B, :out_num]


def init_params(key, input_num, out_num):
    H = input_num
    k_lstm = 1.0 / jnp.sqrt(H)
    k_lin = 1.0 / jnp.sqrt(H)
    ks = jax.random.split(key, 10)
    u = lambda k, shape, s: jax.random.uniform(k, shape, jnp.float32, -s, s)
    return {
        "w_ih0": u(ks[0], (4 * H, H), k_lstm),
        "w_hh0": u(ks[1], (4 * H, H), k_lstm),
        "b_ih0": u(ks[2], (4 * H,), k_lstm),
        "b_hh0": u(ks[3], (4 * H,), k_lstm),
        "w_ih1": u(ks[4], (4 * H, H), k_lstm),
        "w_hh1": u(ks[5], (4 * H, H), k_lstm),
        "b_ih1": u(ks[6], (4 * H,), k_lstm),
        "b_hh1": u(ks[7], (4 * H,), k_lstm),
        "w7": u(ks[8], (out_num, H), k_lin),
        "b7": u(ks[9], (out_num,), k_lin),
        "bn_gamma": jnp.ones((out_num,), jnp.float32),
        "bn_beta": jnp.zeros((out_num,), jnp.float32),
    }


def reference_forward(x_bth, lengths, params, dot_dtype=jnp.float32):
    """Pure-JAX reference mirroring PyTorch semantics (dot_dtype=f32 is exact;
    dot_dtype=bf16 mirrors the kernel's bf16-operand / f32-accumulation mode)."""
    B, T, H = x_bth.shape
    x = jnp.transpose(x_bth, (1, 0, 2)).astype(jnp.float32)  # (T, B, H)
    cast = lambda a: a.astype(dot_dtype)

    def run_layer(xs, w_ih, w_hh, b_ih, b_hh):
        wiT = cast(w_ih.T)
        whT = cast(w_hh.T)

        def step(carry, x_t):
            h, c = carry
            gates = (jnp.dot(cast(x_t), wiT, preferred_element_type=jnp.float32)
                     + jnp.dot(cast(h), whT, preferred_element_type=jnp.float32)
                     + b_ih + b_hh)
            i, f, g, o = jnp.split(gates, 4, axis=-1)
            c = jax.nn.sigmoid(f) * c + jax.nn.sigmoid(i) * jnp.tanh(g)
            h = jax.nn.sigmoid(o) * jnp.tanh(c)
            return (h, c), h

        init = (jnp.zeros((B, H), jnp.float32), jnp.zeros((B, H), jnp.float32))
        _, hs = lax.scan(step, init, xs)
        return hs  # (T, B, H)

    h0_seq = run_layer(x, params["w_ih0"], params["w_hh0"], params["b_ih0"], params["b_hh0"])
    h1_seq = run_layer(h0_seq, params["w_ih1"], params["w_hh1"], params["b_ih1"], params["b_hh1"])
    last = h1_seq[lengths - 1, jnp.arange(B), :]                # (B, H)
    y = jnp.dot(cast(last), cast(params["w7"].T),
                preferred_element_type=jnp.float32) + params["b7"]
    mean = jnp.mean(y, axis=0, keepdims=True)
    var = jnp.mean((y - mean) ** 2, axis=0, keepdims=True)
    return (y - mean) * lax.rsqrt(var + 1e-5) * params["bn_gamma"] + params["bn_beta"]


if __name__ == "__main__":
    B, T, H, OUT = 10, 20, 32, 16
    key = jax.random.PRNGKey(0)
    k_par, k_x = jax.random.split(key)
    params = init_params(k_par, H, OUT)
    x = jax.random.normal(k_x, (B, T, H), jnp.float32)
    lengths = jnp.array([20, 13, 1, 20, 7, 16, 4, 9, 20, 2], dtype=jnp.int32)

    # 1) Exact-semantics f32 path: tight check against the pure-JAX reference.
    out_f32 = jax.block_until_ready(
        lstm_net_forward(x, lengths, params, ts_block=10, dot_dtype=jnp.float32))
    ref_f32 = jax.block_until_ready(reference_forward(x, lengths, params))
    assert out_f32.shape == (B, OUT)
    err_f32 = float(jnp.max(jnp.abs(out_f32 - ref_f32)))
    assert jnp.allclose(out_f32, ref_f32, atol=5e-4, rtol=5e-4), ("f32 mismatch", err_f32)

    # 2) Production path: bf16 MXU operands / f32 accumulation, checked against
    #    a bf16-operand reference (recurrent bf16 drift makes an f32 reference
    #    comparison meaningful only at ~1e-2 after BatchNorm amplification).
    out_bf16 = jax.block_until_ready(
        lstm_net_forward(x, lengths, params, ts_block=10))
    ref_bf16 = jax.block_until_ready(
        reference_forward(x, lengths, params, dot_dtype=jnp.bfloat16))
    err_bf16 = float(jnp.max(jnp.abs(out_bf16 - ref_bf16)))
    assert jnp.allclose(out_bf16, ref_bf16, atol=5e-3, rtol=5e-3), ("bf16 mismatch", err_bf16)

    print("KERNEL_OK")
</pallas_src>

<mosaic_0001>
module attributes {stable_mosaic.version = 11 : i64} {
  func.func @_lstm_kernel(%arg0: i32, %arg1: i32, %arg2: memref<10x8x128xf32, #tpu.memory_space<vmem>>, %arg3: memref<8x1xi32, #tpu.memory_space<vmem>>, %arg4: memref<128x512xf32, #tpu.memory_space<vmem>>, %arg5: memref<128x1024xf32, #tpu.memory_space<vmem>>, %arg6: memref<128x512xf32, #tpu.memory_space<vmem>>, %arg7: memref<1x512xf32, #tpu.memory_space<vmem>>, %arg8: memref<1x512xf32, #tpu.memory_space<vmem>>, %arg9: memref<128x128xf32, #tpu.memory_space<vmem>>, %arg10: memref<1x128xf32, #tpu.memory_space<vmem>>, %arg11: memref<8x128xf32, #tpu.memory_space<vmem>>, %arg12: memref<8x512xf32, #tpu.memory_space<vmem>>, %arg13: memref<8x128xf32, #tpu.memory_space<vmem>>, %arg14: memref<8x128xf32, #tpu.memory_space<vmem>>, %arg15: memref<8x128xf32, #tpu.memory_space<vmem>>, %arg16: memref<8x128xf32, #tpu.memory_space<vmem>>) attributes {dimension_semantics = [#tpu.dimension_semantics<parallel>, #tpu.dimension_semantics<arbitrary>], iteration_bounds = array<i64: 2, 2>, scalar_prefetch = 0 : i64, scratch_operands = 5 : i64, tpu.core_type = #tpu.core_type<tc>, window_params = [{transform_indices = @transform_0, window_bounds = array<i64: 10, 8, 128>}, {transform_indices = @transform_1, window_bounds = array<i64: 8, 1>}, {pipeline_mode = #tpu.pipeline_mode<synchronous>, transform_indices = @transform_2, window_bounds = array<i64: 128, 512>}, {pipeline_mode = #tpu.pipeline_mode<synchronous>, transform_indices = @transform_3, window_bounds = array<i64: 128, 1024>}, {pipeline_mode = #tpu.pipeline_mode<synchronous>, transform_indices = @transform_4, window_bounds = array<i64: 128, 512>}, {pipeline_mode = #tpu.pipeline_mode<synchronous>, transform_indices = @transform_5, window_bounds = array<i64: 1, 512>}, {pipeline_mode = #tpu.pipeline_mode<synchronous>, transform_indices = @transform_6, window_bounds = array<i64: 1, 512>}, {pipeline_mode = #tpu.pipeline_mode<synchronous>, transform_indices = @transform_7, window_bounds = array<i64: 128, 128>}, {pipeline_mode = #tpu.pipeline_mode<synchronous>, transform_indices = @transform_8, window_bounds = array<i64: 1, 128>}, {transform_indices = @transform_9, window_bounds = array<i64: 8, 128>}]} {
    %c0_i32 = arith.constant 0 : i32
    %0 = arith.cmpi eq, %arg1, %c0_i32 : i32
    %1 = arith.extui %0 : i1 to i32
    %c0_i32_0 = arith.constant 0 : i32
    %2 = arith.cmpi ne, %1, %c0_i32_0 : i32
    scf.if %2 {
      %cst_257 = arith.constant 0.000000e+00 : f32
      %827 = vector.broadcast %cst_257 : f32 to vector<8x512xf32>
      %c0_258 = arith.constant 0 : index
      %c0_259 = arith.constant 0 : index
      %828 = vector.load %arg12[%c0_258, %c0_259] : memref<8x512xf32, #tpu.memory_space<vmem>>, vector<8x512xf32>
      tpu.vector_store %arg12[%c0_258, %c0_259], %827 {strides = array<i32>} : memref<8x512xf32, #tpu.memory_space<vmem>>, vector<8x512xf32>,
      %cst_260 = arith.constant 0.000000e+00 : f32
      %829 = vector.broadcast %cst_260 : f32 to vector<8x128xf32>
      %c0_261 = arith.constant 0 : index
      %c0_262 = arith.constant 0 : index
      %830 = vector.load %arg13[%c0_261, %c0_262] : memref<8x128xf32, #tpu.memory_space<vmem>>, vector<8x128xf32>
      tpu.vector_store %arg13[%c0_261, %c0_262], %829 {strides = array<i32>} : memref<8x128xf32, #tpu.memory_space<vmem>>, vector<8x128xf32>,
      %cst_263 = arith.constant 0.000000e+00 : f32
      %831 = vector.broadcast %cst_263 : f32 to vector<8x128xf32>
      %c0_264 = arith.constant 0 : index
      %c0_265 = arith.constant 0 : index
      %832 = vector.load %arg14[%c0_264, %c0_265] : memref<8x128xf32, #tpu.memory_space<vmem>>, vector<8x128xf32>
      tpu.vector_store %arg14[%c0_264, %c0_265], %831 {strides = array<i32>} : memref<8x128xf32, #tpu.memory_space<vmem>>, vector<8x128xf32>,
      %cst_266 = arith.constant 0.000000e+00 : f32
      %833 = vector.broadcast %cst_266 : f32 to vector<8x128xf32>
      %c0_267 = arith.constant 0 : index
      %c0_268 = arith.constant 0 : index
      %834 = vector.load %arg15[%c0_267, %c0_268] : memref<8x128xf32, #tpu.memory_space<vmem>>, vector<8x128xf32>
      tpu.vector_store %arg15[%c0_267, %c0_268], %833 {strides = array<i32>} : memref<8x128xf32, #tpu.memory_space<vmem>>, vector<8x128xf32>,
      %cst_269 = arith.constant 0.000000e+00 : f32
      %835 = vector.broadcast %cst_269 : f32 to vector<8x128xf32>
      %c0_270 = arith.constant 0 : index
      %c0_271 = arith.constant 0 : index
      %836 = vector.load %arg16[%c0_270, %c0_271] : memref<8x128xf32, #tpu.memory_space<vmem>>, vector<8x128xf32>
      tpu.vector_store %arg16[%c0_270, %c0_271], %835 {strides = array<i32>} : memref<8x128xf32, #tpu.memory_space<vmem>>, vector<8x128xf32>,
    } else {
    }
    %c0 = arith.constant 0 : index
    %c0_1 = arith.constant 0 : index
    %3 = vector.load %arg3[%c0, %c0_1] : memref<8x1xi32, #tpu.memory_space<vmem>>, vector<8x1xi32>
    %c0_2 = arith.constant 0 : index
    %c0_3 = arith.constant 0 : index
    %4 = vector.load %arg5[%c0_2, %c0_3] : memref<128x1024xf32, #tpu.memory_space<vmem>>, vector<128x1024xf32>
    %c0_4 = arith.constant 0 : index
    %c0_5 = arith.constant 0 : index
    %5 = vector.load %arg6[%c0_4, %c0_5] : memref<128x512xf32, #tpu.memory_space<vmem>>, vector<128x512xf32>
    %c0_6 = arith.constant 0 : index
    %c0_7 = arith.constant 0 : index
    %6 = vector.load %arg8[%c0_6, %c0_7] : memref<1x512xf32, #tpu.memory_space<vmem>>, vector<1x512xf32>
    %c0_8 = arith.constant 0 : index
    %c0_9 = arith.constant 0 : index
    %c0_10 = arith.constant 0 : index
    %7 = vector.load %arg2[%c0_8, %c0_9, %c0_10] : memref<10x8x128xf32, #tpu.memory_space<vmem>>, vector<10x8x128xf32>
    %8 = vector.shape_cast %7 : vector<10x8x128xf32> to vector<80x128xf32>
    %c0_11 = arith.constant 0 : index
    %c0_12 = arith.constant 0 : index
    %9 = vector.load %arg4[%c0_11, %c0_12] : memref<128x512xf32, #tpu.memory_space<vmem>>, vector<128x512xf32>
    %cst = arith.constant dense<0.000000e+00> : vector<80x512xf32>
    %10 = tpu.matmul %8, %9, %cst {dimension_numbers = #tpu.dot_dimension_numbers<[1], [0], [0], [1], [0, 0, 1, 1], [], []>} : vector<80x128xf32>, vector<128x512xf32>, vector<80x512xf32> -> vector<80x512xf32>
    %c0_13 = arith.constant 0 : index
    %c0_14 = arith.constant 0 : index
    %11 = vector.load %arg7[%c0_13, %c0_14] : memref<1x512xf32, #tpu.memory_space<vmem>>, vector<1x512xf32>
    %12 = vector.broadcast %11 : vector<1x512xf32> to vector<80x512xf32>
    %13 = arith.addf %10, %12 : vector<80x512xf32>
    %c0_15 = arith.constant 0 : index
    %c0_16 = arith.constant 0 : index
    %14 = vector.load %arg12[%c0_15, %c0_16] : memref<8x512xf32, #tpu.memory_space<vmem>>, vector<8x512xf32>
    %c0_17 = arith.constant 0 : index
    %c0_18 = arith.constant 0 : index
    %15 = vector.load %arg13[%c0_17, %c0_18] : memref<8x128xf32, #tpu.memory_space<vmem>>, vector<8x128xf32>
    %c0_19 = arith.constant 0 : index
    %c0_20 = arith.constant 0 : index
    %16 = vector.load %arg14[%c0_19, %c0_20] : memref<8x128xf32, #tpu.memory_space<vmem>>, vector<8x128xf32>
    %c0_21 = arith.constant 0 : index
    %c0_22 = arith.constant 0 : index
    %17 = vector.load %arg15[%c0_21, %c0_22] : memref<8x128xf32, #tpu.memory_space<vmem>>, vector<8x128xf32>
    %c0_23 = arith.constant 0 : index
    %c0_24 = arith.constant 0 : index
    %18 = vector.load %arg16[%c0_23, %c0_24] : memref<8x128xf32, #tpu.memory_space<vmem>>, vector<8x128xf32>
    %c10_i32 = arith.constant 10 : i32
    %19 = arith.muli %arg1, %c10_i32 : i32
    %c0_i32_25 = arith.constant 0 : i32
    %20 = arith.addi %19, %c0_i32_25 : i32
    %21 = vector.extract_strided_slice %13 {offsets = [0, 0], sizes = [8, 512], strides = [1, 1]} : vector<80x512xf32> to vector<8x512xf32>
    %22 = arith.addf %21, %14 : vector<8x512xf32>
    %23 = vector.extract_strided_slice %22 {offsets = [0, 0], sizes = [8, 128], strides = [1, 1]} : vector<8x512xf32> to vector<8x128xf32>
    %cst_26 = arith.constant 5.000000e-01 : f32
    %24 = vector.broadcast %cst_26 : f32 to vector<8x128xf32>
    %25 = arith.mulf %24, %23 : vector<8x128xf32>
    %26 = math.tanh %25 : vector<8x128xf32>
    %cst_27 = arith.constant 5.000000e-01 : f32
    %27 = vector.broadcast %cst_27 : f32 to vector<8x128xf32>
    %28 = arith.mulf %27, %26 : vector<8x128xf32>
    %cst_28 = arith.constant 5.000000e-01 : f32
    %29 = vector.broadcast %cst_28 : f32 to vector<8x128xf32>
    %30 = arith.addf %28, %29 : vector<8x128xf32>
    %31 = vector.extract_strided_slice %22 {offsets = [0, 128], sizes = [8, 128], strides = [1, 1]} : vector<8x512xf32> to vector<8x128xf32>
    %cst_29 = arith.constant 5.000000e-01 : f32
    %32 = vector.broadcast %cst_29 : f32 to vector<8x128xf32>
    %33 = arith.mulf %32, %31 : vector<8x128xf32>
    %34 = math.tanh %33 : vector<8x128xf32>
    %cst_30 = arith.constant 5.000000e-01 : f32
    %35 = vector.broadcast %cst_30 : f32 to vector<8x128xf32>
    %36 = arith.mulf %35, %34 : vector<8x128xf32>
    %cst_31 = arith.constant 5.000000e-01 : f32
    %37 = vector.broadcast %cst_31 : f32 to vector<8x128xf32>
    %38 = arith.addf %36, %37 : vector<8x128xf32>
    %39 = vector.extract_strided_slice %22 {offsets = [0, 256], sizes = [8, 128], strides = [1, 1]} : vector<8x512xf32> to vector<8x128xf32>
    %40 = math.tanh %39 : vector<8x128xf32>
    %41 = vector.extract_strided_slice %22 {offsets = [0, 384], sizes = [8, 128], strides = [1, 1]} : vector<8x512xf32> to vector<8x128xf32>
    %cst_32 = arith.constant 5.000000e-01 : f32
    %42 = vector.broadcast %cst_32 : f32 to vector<8x128xf32>
    %43 = arith.mulf %42, %41 : vector<8x128xf32>
    %44 = math.tanh %43 : vector<8x128xf32>
    %cst_33 = arith.constant 5.000000e-01 : f32
    %45 = vector.broadcast %cst_33 : f32 to vector<8x128xf32>
    %46 = arith.mulf %45, %44 : vector<8x128xf32>
    %cst_34 = arith.constant 5.000000e-01 : f32
    %47 = vector.broadcast %cst_34 : f32 to vector<8x128xf32>
    %48 = arith.addf %46, %47 : vector<8x128xf32>
    %49 = arith.mulf %38, %15 : vector<8x128xf32>
    %50 = arith.mulf %30, %40 : vector<8x128xf32>
    %51 = arith.addf %49, %50 : vector<8x128xf32>
    %52 = math.tanh %51 : vector<8x128xf32>
    %53 = arith.mulf %48, %52 : vector<8x128xf32>
    %cst_35 = arith.constant dense<0.000000e+00> : vector<8x1024xf32>
    %54 = tpu.matmul %53, %4, %cst_35 {dimension_numbers = #tpu.dot_dimension_numbers<[1], [0], [0], [1], [0, 0, 1, 1], [], []>} : vector<8x128xf32>, vector<128x1024xf32>, vector<8x1024xf32> -> vector<8x1024xf32>
    %55 = vector.extract_strided_slice %54 {offsets = [0, 0], sizes = [8, 512], strides = [1, 1]} : vector<8x1024xf32> to vector<8x512xf32>
    %56 = vector.extract_strided_slice %54 {offsets = [0, 512], sizes = [8, 512], strides = [1, 1]} : vector<8x1024xf32> to vector<8x512xf32>
    %cst_36 = arith.constant dense<0.000000e+00> : vector<8x512xf32>
    %57 = tpu.matmul %16, %5, %cst_36 {dimension_numbers = #tpu.dot_dimension_numbers<[1], [0], [0], [1], [0, 0, 1, 1], [], []>} : vector<8x128xf32>, vector<128x512xf32>, vector<8x512xf32> -> vector<8x512xf32>
    %58 = arith.addf %56, %57 : vector<8x512xf32>
    %59 = vector.broadcast %6 : vector<1x512xf32> to vector<8x512xf32>
    %60 = arith.addf %58, %59 : vector<8x512xf32>
    %61 = vector.extract_strided_slice %60 {offsets = [0, 0], sizes = [8, 128], strides = [1, 1]} : vector<8x512xf32> to vector<8x128xf32>
    %cst_37 = arith.constant 5.000000e-01 : f32
    %62 = vector.broadcast %cst_37 : f32 to vector<8x128xf32>
    %63 = arith.mulf %62, %61 : vector<8x128xf32>
    %64 = math.tanh %63 : vector<8x128xf32>
    %cst_38 = arith.constant 5.000000e-01 : f32
    %65 = vector.broadcast %cst_38 : f32 to vector<8x128xf32>
    %66 = arith.mulf %65, %64 : vector<8x128xf32>
    %cst_39 = arith.constant 5.000000e-01 : f32
    %67 = vector.broadcast %cst_39 : f32 to vector<8x128xf32>
    %68 = arith.addf %66, %67 : vector<8x128xf32>
    %69 = vector.extract_strided_slice %60 {offsets = [0, 128], sizes = [8, 128], strides = [1, 1]} : vector<8x512xf32> to vector<8x128xf32>
    %cst_40 = arith.constant 5.000000e-01 : f32
    %70 = vector.broadcast %cst_40 : f32 to vector<8x128xf32>
    %71 = arith.mulf %70, %69 : vector<8x128xf32>
    %72 = math.tanh %71 : vector<8x128xf32>
    %cst_41 = arith.constant 5.000000e-01 : f32
    %73 = vector.broadcast %cst_41 : f32 to vector<8x128xf32>
    %74 = arith.mulf %73, %72 : vector<8x128xf32>
    %cst_42 = arith.constant 5.000000e-01 : f32
    %75 = vector.broadcast %cst_42 : f32 to vector<8x128xf32>
    %76 = arith.addf %74, %75 : vector<8x128xf32>
    %77 = vector.extract_strided_slice %60 {offsets = [0, 256], sizes = [8, 128], strides = [1, 1]} : vector<8x512xf32> to vector<8x128xf32>
    %78 = math.tanh %77 : vector<8x128xf32>
    %79 = vector.extract_strided_slice %60 {offsets = [0, 384], sizes = [8, 128], strides = [1, 1]} : vector<8x512xf32> to vector<8x128xf32>
    %cst_43 = arith.constant 5.000000e-01 : f32
    %80 = vector.broadcast %cst_43 : f32 to vector<8x128xf32>
    %81 = arith.mulf %80, %79 : vector<8x128xf32>
    %82 = math.tanh %81 : vector<8x128xf32>
    %cst_44 = arith.constant 5.000000e-01 : f32
    %83 = vector.broadcast %cst_44 : f32 to vector<8x128xf32>
    %84 = arith.mulf %83, %82 : vector<8x128xf32>
    %cst_45 = arith.constant 5.000000e-01 : f32
    %85 = vector.broadcast %cst_45 : f32 to vector<8x128xf32>
    %86 = arith.addf %84, %85 : vector<8x128xf32>
    %87 = arith.mulf %76, %17 : vector<8x128xf32>
    %88 = arith.mulf %68, %78 : vector<8x128xf32>
    %89 = arith.addf %87, %88 : vector<8x128xf32>
    %90 = math.tanh %89 : vector<8x128xf32>
    %91 = arith.mulf %86, %90 : vector<8x128xf32>
    %c1_i32 = arith.constant 1 : i32
    %92 = vector.broadcast %c1_i32 : i32 to vector<8x1xi32>
    %93 = arith.subi %3, %92 : vector<8x1xi32>
    %94 = vector.broadcast %20 : i32 to vector<8x1xi32>
    %95 = arith.cmpi eq, %93, %94 : vector<8x1xi32>
    %96 = vector.shape_cast %95 : vector<8x1xi1> to vector<8x1xi1>
    %97 = vector.broadcast %96 : vector<8x1xi1> to vector<8x128xi1>
    %98 = arith.select %97, %91, %18 : vector<8x128xi1>, vector<8x128xf32>
    %c10_i32_46 = arith.constant 10 : i32
    %99 = arith.muli %arg1, %c10_i32_46 : i32
    %c1_i32_47 = arith.constant 1 : i32
    %100 = arith.addi %99, %c1_i32_47 : i32
    %101 = vector.extract_strided_slice %13 {offsets = [8, 0], sizes = [8, 512], strides = [1, 1]} : vector<80x512xf32> to vector<8x512xf32>
    %102 = arith.addf %101, %55 : vector<8x512xf32>
    %103 = vector.extract_strided_slice %102 {offsets = [0, 0], sizes = [8, 128], strides = [1, 1]} : vector<8x512xf32> to vector<8x128xf32>
    %cst_48 = arith.constant 5.000000e-01 : f32
    %104 = vector.broadcast %cst_48 : f32 to vector<8x128xf32>
    %105 = arith.mulf %104, %103 : vector<8x128xf32>
    %106 = math.tanh %105 : vector<8x128xf32>
    %cst_49 = arith.constant 5.000000e-01 : f32
    %107 = vector.broadcast %cst_49 : f32 to vector<8x128xf32>
    %108 = arith.mulf %107, %106 : vector<8x128xf32>
    %cst_50 = arith.constant 5.000000e-01 : f32
    %109 = vector.broadcast %cst_50 : f32 to vector<8x128xf32>
    %110 = arith.addf %108, %109 : vector<8x128xf32>
    %111 = vector.extract_strided_slice %102 {offsets = [0, 128], sizes = [8, 128], strides = [1, 1]} : vector<8x512xf32> to vector<8x128xf32>
    %cst_51 = arith.constant 5.000000e-01 : f32
    %112 = vector.broadcast %cst_51 : f32 to vector<8x128xf32>
    %113 = arith.mulf %112, %111 : vector<8x128xf32>
    %114 = math.tanh %113 : vector<8x128xf32>
    %cst_52 = arith.constant 5.000000e-01 : f32
    %115 = vector.broadcast %cst_52 : f32 to vector<8x128xf32>
    %116 = arith.mulf %115, %114 : vector<8x128xf32>
    %cst_53 = arith.constant 5.000000e-01 : f32
    %117 = vector.broadcast %cst_53 : f32 to vector<8x128xf32>
    %118 = arith.addf %116, %117 : vector<8x128xf32>
    %119 = vector.extract_strided_slice %102 {offsets = [0, 256], sizes = [8, 128], strides = [1, 1]} : vector<8x512xf32> to vector<8x128xf32>
    %120 = math.tanh %119 : vector<8x128xf32>
    %121 = vector.extract_strided_slice %102 {offsets = [0, 384], sizes = [8, 128], strides = [1, 1]} : vector<8x512xf32> to vector<8x128xf32>
    %cst_54 = arith.constant 5.000000e-01 : f32
    %122 = vector.broadcast %cst_54 : f32 to vector<8x128xf32>
    %123 = arith.mulf %122, %121 : vector<8x128xf32>
    %124 = math.tanh %123 : vector<8x128xf32>
    %cst_55 = arith.constant 5.000000e-01 : f32
    %125 = vector.broadcast %cst_55 : f32 to vector<8x128xf32>
    %126 = arith.mulf %125, %124 : vector<8x128xf32>
    %cst_56 = arith.constant 5.000000e-01 : f32
    %127 = vector.broadcast %cst_56 : f32 to vector<8x128xf32>
    %128 = arith.addf %126, %127 : vector<8x128xf32>
    %129 = arith.mulf %118, %51 : vector<8x128xf32>
    %130 = arith.mulf %110, %120 : vector<8x128xf32>
    %131 = arith.addf %129, %130 : vector<8x128xf32>
    %132 = math.tanh %131 : vector<8x128xf32>
    %133 = arith.mulf %128, %132 : vector<8x128xf32>
    %cst_57 = arith.constant dense<0.000000e+00> : vector<8x1024xf32>
    %134 = tpu.matmul %133, %4, %cst_57 {dimension_numbers = #tpu.dot_dimension_numbers<[1], [0], [0], [1], [0, 0, 1, 1], [], []>} : vector<8x128xf32>, vector<128x1024xf32>, vector<8x1024xf32> -> vector<8x1024xf32>
    %135 = vector.extract_strided_slice %134 {offsets = [0, 0], sizes = [8, 512], strides = [1, 1]} : vector<8x1024xf32> to vector<8x512xf32>
    %136 = vector.extract_strided_slice %134 {offsets = [0, 512], sizes = [8, 512], strides = [1, 1]} : vector<8x1024xf32> to vector<8x512xf32>
    %cst_58 = arith.constant dense<0.000000e+00> : vector<8x512xf32>
    %137 = tpu.matmul %91, %5, %cst_58 {dimension_numbers = #tpu.dot_dimension_numbers<[1], [0], [0], [1], [0, 0, 1, 1], [], []>} : vector<8x128xf32>, vector<128x512xf32>, vector<8x512xf32> -> vector<8x512xf32>
    %138 = arith.addf %136, %137 : vector<8x512xf32>
    %139 = vector.broadcast %6 : vector<1x512xf32> to vector<8x512xf32>
    %140 = arith.addf %138, %139 : vector<8x512xf32>
    %141 = vector.extract_strided_slice %140 {offsets = [0, 0], sizes = [8, 128], strides = [1, 1]} : vector<8x512xf32> to vector<8x128xf32>
    %cst_59 = arith.constant 5.000000e-01 : f32
    %142 = vector.broadcast %cst_59 : f32 to vector<8x128xf32>
    %143 = arith.mulf %142, %141 : vector<8x128xf32>
    %144 = math.tanh %143 : vector<8x128xf32>
    %cst_60 = arith.constant 5.000000e-01 : f32
    %145 = vector.broadcast %cst_60 : f32 to vector<8x128xf32>
    %146 = arith.mulf %145, %144 : vector<8x128xf32>
    %cst_61 = arith.constant 5.000000e-01 : f32
    %147 = vector.broadcast %cst_61 : f32 to vector<8x128xf32>
    %148 = arith.addf %146, %147 : vector<8x128xf32>
    %149 = vector.extract_strided_slice %140 {offsets = [0, 128], sizes = [8, 128], strides = [1, 1]} : vector<8x512xf32> to vector<8x128xf32>
    %cst_62 = arith.constant 5.000000e-01 : f32
    %150 = vector.broadcast %cst_62 : f32 to vector<8x128xf32>
    %151 = arith.mulf %150, %149 : vector<8x128xf32>
    %152 = math.tanh %151 : vector<8x128xf32>
    %cst_63 = arith.constant 5.000000e-01 : f32
    %153 = vector.broadcast %cst_63 : f32 to vector<8x128xf32>
    %154 = arith.mulf %153, %152 : vector<8x128xf32>
    %cst_64 = arith.constant 5.000000e-01 : f32
    %155 = vector.broadcast %cst_64 : f32 to vector<8x128xf32>
    %156 = arith.addf %154, %155 : vector<8x128xf32>
    %157 = vector.extract_strided_slice %140 {offsets = [0, 256], sizes = [8, 128], strides = [1, 1]} : vector<8x512xf32> to vector<8x128xf32>
    %158 = math.tanh %157 : vector<8x128xf32>
    %159 = vector.extract_strided_slice %140 {offsets = [0, 384], sizes = [8, 128], strides = [1, 1]} : vector<8x512xf32> to vector<8x128xf32>
    %cst_65 = arith.constant 5.000000e-01 : f32
    %160 = vector.broadcast %cst_65 : f32 to vector<8x128xf32>
    %161 = arith.mulf %160, %159 : vector<8x128xf32>
    %162 = math.tanh %161 : vector<8x128xf32>
    %cst_66 = arith.constant 5.000000e-01 : f32
    %163 = vector.broadcast %cst_66 : f32 to vector<8x128xf32>
    %164 = arith.mulf %163, %162 : vector<8x128xf32>
    %cst_67 = arith.constant 5.000000e-01 : f32
    %165 = vector.broadcast %cst_67 : f32 to vector<8x128xf32>
    %166 = arith.addf %164, %165 : vector<8x128xf32>
    %167 = arith.mulf %156, %89 : vector<8x128xf32>
    %168 = arith.mulf %148, %158 : vector<8x128xf32>
    %169 = arith.addf %167, %168 : vector<8x128xf32>
    %170 = math.tanh %169 : vector<8x128xf32>
    %171 = arith.mulf %166, %170 : vector<8x128xf32>
    %c1_i32_68 = arith.constant 1 : i32
    %172 = vector.broadcast %c1_i32_68 : i32 to vector<8x1xi32>
    %173 = arith.subi %3, %172 : vector<8x1xi32>
    %174 = vector.broadcast %100 : i32 to vector<8x1xi32>
    %175 = arith.cmpi eq, %173, %174 : vector<8x1xi32>
    %176 = vector.shape_cast %175 : vector<8x1xi1> to vector<8x1xi1>
    %177 = vector.broadcast %176 : vector<8x1xi1> to vector<8x128xi1>
    %178 = arith.select %177, %171, %98 : vector<8x128xi1>, vector<8x128xf32>
    %c10_i32_69 = arith.constant 10 : i32
    %179 = arith.muli %arg1, %c10_i32_69 : i32
    %c2_i32 = arith.constant 2 : i32
    %180 = arith.addi %179, %c2_i32 : i32
    %181 = vector.extract_strided_slice %13 {offsets = [16, 0], sizes = [8, 512], strides = [1, 1]} : vector<80x512xf32> to vector<8x512xf32>
    %182 = arith.addf %181, %135 : vector<8x512xf32>
    %183 = vector.extract_strided_slice %182 {offsets = [0, 0], sizes = [8, 128], strides = [1, 1]} : vector<8x512xf32> to vector<8x128xf32>
    %cst_70 = arith.constant 5.000000e-01 : f32
    %184 = vector.broadcast %cst_70 : f32 to vector<8x128xf32>
    %185 = arith.mulf %184, %183 : vector<8x128xf32>
    %186 = math.tanh %185 : vector<8x128xf32>
    %cst_71 = arith.constant 5.000000e-01 : f32
    %187 = vector.broadcast %cst_71 : f32 to vector<8x128xf32>
    %188 = arith.mulf %187, %186 : vector<8x128xf32>
    %cst_72 = arith.constant 5.000000e-01 : f32
    %189 = vector.broadcast %cst_72 : f32 to vector<8x128xf32>
    %190 = arith.addf %188, %189 : vector<8x128xf32>
    %191 = vector.extract_strided_slice %182 {offsets = [0, 128], sizes = [8, 128], strides = [1, 1]} : vector<8x512xf32> to vector<8x128xf32>
    %cst_73 = arith.constant 5.000000e-01 : f32
    %192 = vector.broadcast %cst_73 : f32 to vector<8x128xf32>
    %193 = arith.mulf %192, %191 : vector<8x128xf32>
    %194 = math.tanh %193 : vector<8x128xf32>
    %cst_74 = arith.constant 5.000000e-01 : f32
    %195 = vector.broadcast %cst_74 : f32 to vector<8x128xf32>
    %196 = arith.mulf %195, %194 : vector<8x128xf32>
    %cst_75 = arith.constant 5.000000e-01 : f32
    %197 = vector.broadcast %cst_75 : f32 to vector<8x128xf32>
    %198 = arith.addf %196, %197 : vector<8x128xf32>
    %199 = vector.extract_strided_slice %182 {offsets = [0, 256], sizes = [8, 128], strides = [1, 1]} : vector<8x512xf32> to vector<8x128xf32>
    %200 = math.tanh %199 : vector<8x128xf32>
    %201 = vector.extract_strided_slice %182 {offsets = [0, 384], sizes = [8, 128], strides = [1, 1]} : vector<8x512xf32> to vector<8x128xf32>
    %cst_76 = arith.constant 5.000000e-01 : f32
    %202 = vector.broadcast %cst_76 : f32 to vector<8x128xf32>
    %203 = arith.mulf %202, %201 : vector<8x128xf32>
    %204 = math.tanh %203 : vector<8x128xf32>
    %cst_77 = arith.constant 5.000000e-01 : f32
    %205 = vector.broadcast %cst_77 : f32 to vector<8x128xf32>
    %206 = arith.mulf %205, %204 : vector<8x128xf32>
    %cst_78 = arith.constant 5.000000e-01 : f32
    %207 = vector.broadcast %cst_78 : f32 to vector<8x128xf32>
    %208 = arith.addf %206, %207 : vector<8x128xf32>
    %209 = arith.mulf %198, %131 : vector<8x128xf32>
    %210 = arith.mulf %190, %200 : vector<8x128xf32>
    %211 = arith.addf %209, %210 : vector<8x128xf32>
    %212 = math.tanh %211 : vector<8x128xf32>
    %213 = arith.mulf %208, %212 : vector<8x128xf32>
    %cst_79 = arith.constant dense<0.000000e+00> : vector<8x1024xf32>
    %214 = tpu.matmul %213, %4, %cst_79 {dimension_numbers = #tpu.dot_dimension_numbers<[1], [0], [0], [1], [0, 0, 1, 1], [], []>} : vector<8x128xf32>, vector<128x1024xf32>, vector<8x1024xf32> -> vector<8x1024xf32>
    %215 = vector.extract_strided_slice %214 {offsets = [0, 0], sizes = [8, 512], strides = [1, 1]} : vector<8x1024xf32> to vector<8x512xf32>
    %216 = vector.extract_strided_slice %214 {offsets = [0, 512], sizes = [8, 512], strides = [1, 1]} : vector<8x1024xf32> to vector<8x512xf32>
    %cst_80 = arith.constant dense<0.000000e+00> : vector<8x512xf32>
    %217 = tpu.matmul %171, %5, %cst_80 {dimension_numbers = #tpu.dot_dimension_numbers<[1], [0], [0], [1], [0, 0, 1, 1], [], []>} : vector<8x128xf32>, vector<128x512xf32>, vector<8x512xf32> -> vector<8x512xf32>
    %218 = arith.addf %216, %217 : vector<8x512xf32>
    %219 = vector.broadcast %6 : vector<1x512xf32> to vector<8x512xf32>
    %220 = arith.addf %218, %219 : vector<8x512xf32>
    %221 = vector.extract_strided_slice %220 {offsets = [0, 0], sizes = [8, 128], strides = [1, 1]} : vector<8x512xf32> to vector<8x128xf32>
    %cst_81 = arith.constant 5.000000e-01 : f32
    %222 = vector.broadcast %cst_81 : f32 to vector<8x128xf32>
    %223 = arith.mulf %222, %221 : vector<8x128xf32>
    %224 = math.tanh %223 : vector<8x128xf32>
    %cst_82 = arith.constant 5.000000e-01 : f32
    %225 = vector.broadcast %cst_82 : f32 to vector<8x128xf32>
    %226 = arith.mulf %225, %224 : vector<8x128xf32>
    %cst_83 = arith.constant 5.000000e-01 : f32
    %227 = vector.broadcast %cst_83 : f32 to vector<8x128xf32>
    %228 = arith.addf %226, %227 : vector<8x128xf32>
    %229 = vector.extract_strided_slice %220 {offsets = [0, 128], sizes = [8, 128], strides = [1, 1]} : vector<8x512xf32> to vector<8x128xf32>
    %cst_84 = arith.constant 5.000000e-01 : f32
    %230 = vector.broadcast %cst_84 : f32 to vector<8x128xf32>
    %231 = arith.mulf %230, %229 : vector<8x128xf32>
    %232 = math.tanh %231 : vector<8x128xf32>
    %cst_85 = arith.constant 5.000000e-01 : f32
    %233 = vector.broadcast %cst_85 : f32 to vector<8x128xf32>
    %234 = arith.mulf %233, %232 : vector<8x128xf32>
    %cst_86 = arith.constant 5.000000e-01 : f32
    %235 = vector.broadcast %cst_86 : f32 to vector<8x128xf32>
    %236 = arith.addf %234, %235 : vector<8x128xf32>
    %237 = vector.extract_strided_slice %220 {offsets = [0, 256], sizes = [8, 128], strides = [1, 1]} : vector<8x512xf32> to vector<8x128xf32>
    %238 = math.tanh %237 : vector<8x128xf32>
    %239 = vector.extract_strided_slice %220 {offsets = [0, 384], sizes = [8, 128], strides = [1, 1]} : vector<8x512xf32> to vector<8x128xf32>
    %cst_87 = arith.constant 5.000000e-01 : f32
    %240 = vector.broadcast %cst_87 : f32 to vector<8x128xf32>
    %241 = arith.mulf %240, %239 : vector<8x128xf32>
    %242 = math.tanh %241 : vector<8x128xf32>
    %cst_88 = arith.constant 5.000000e-01 : f32
    %243 = vector.broadcast %cst_88 : f32 to vector<8x128xf32>
    %244 = arith.mulf %243, %242 : vector<8x128xf32>
    %cst_89 = arith.constant 5.000000e-01 : f32
    %245 = vector.broadcast %cst_89 : f32 to vector<8x128xf32>
    %246 = arith.addf %244, %245 : vector<8x128xf32>
    %247 = arith.mulf %236, %169 : vector<8x128xf32>
    %248 = arith.mulf %228, %238 : vector<8x128xf32>
    %249 = arith.addf %247, %248 : vector<8x128xf32>
    %250 = math.tanh %249 : vector<8x128xf32>
    %251 = arith.mulf %246, %250 : vector<8x128xf32>
    %c1_i32_90 = arith.constant 1 : i32
    %252 = vector.broadcast %c1_i32_90 : i32 to vector<8x1xi32>
    %253 = arith.subi %3, %252 : vector<8x1xi32>
    %254 = vector.broadcast %180 : i32 to vector<8x1xi32>
    %255 = arith.cmpi eq, %253, %254 : vector<8x1xi32>
    %256 = vector.shape_cast %255 : vector<8x1xi1> to vector<8x1xi1>
    %257 = vector.broadcast %256 : vector<8x1xi1> to vector<8x128xi1>
    %258 = arith.select %257, %251, %178 : vector<8x128xi1>, vector<8x128xf32>
    %c10_i32_91 = arith.constant 10 : i32
    %259 = arith.muli %arg1, %c10_i32_91 : i32
    %c3_i32 = arith.constant 3 : i32
    %260 = arith.addi %259, %c3_i32 : i32
    %261 = vector.extract_strided_slice %13 {offsets = [24, 0], sizes = [8, 512], strides = [1, 1]} : vector<80x512xf32> to vector<8x512xf32>
    %262 = arith.addf %261, %215 : vector<8x512xf32>
    %263 = vector.extract_strided_slice %262 {offsets = [0, 0], sizes = [8, 128], strides = [1, 1]} : vector<8x512xf32> to vector<8x128xf32>
    %cst_92 = arith.constant 5.000000e-01 : f32
    %264 = vector.broadcast %cst_92 : f32 to vector<8x128xf32>
    %265 = arith.mulf %264, %263 : vector<8x128xf32>
    %266 = math.tanh %265 : vector<8x128xf32>
    %cst_93 = arith.constant 5.000000e-01 : f32
    %267 = vector.broadcast %cst_93 : f32 to vector<8x128xf32>
    %268 = arith.mulf %267, %266 : vector<8x128xf32>
    %cst_94 = arith.constant 5.000000e-01 : f32
    %269 = vector.broadcast %cst_94 : f32 to vector<8x128xf32>
    %270 = arith.addf %268, %269 : vector<8x128xf32>
    %271 = vector.extract_strided_slice %262 {offsets = [0, 128], sizes = [8, 128], strides = [1, 1]} : vector<8x512xf32> to vector<8x128xf32>
    %cst_95 = arith.constant 5.000000e-01 : f32
    %272 = vector.broadcast %cst_95 : f32 to vector<8x128xf32>
    %273 = arith.mulf %272, %271 : vector<8x128xf32>
    %274 = math.tanh %273 : vector<8x128xf32>
    %cst_96 = arith.constant 5.000000e-01 : f32
    %275 = vector.broadcast %cst_96 : f32 to vector<8x128xf32>
    %276 = arith.mulf %275, %274 : vector<8x128xf32>
    %cst_97 = arith.constant 5.000000e-01 : f32
    %277 = vector.broadcast %cst_97 : f32 to vector<8x128xf32>
    %278 = arith.addf %276, %277 : vector<8x128xf32>
    %279 = vector.extract_strided_slice %262 {offsets = [0, 256], sizes = [8, 128], strides = [1, 1]} : vector<8x512xf32> to vector<8x128xf32>
    %280 = math.tanh %279 : vector<8x128xf32>
    %281 = vector.extract_strided_slice %262 {offsets = [0, 384], sizes = [8, 128], strides = [1, 1]} : vector<8x512xf32> to vector<8x128xf32>
    %cst_98 = arith.constant 5.000000e-01 : f32
    %282 = vector.broadcast %cst_98 : f32 to vector<8x128xf32>
    %283 = arith.mulf %282, %281 : vector<8x128xf32>
    %284 = math.tanh %283 : vector<8x128xf32>
    %cst_99 = arith.constant 5.000000e-01 : f32
    %285 = vector.broadcast %cst_99 : f32 to vector<8x128xf32>
    %286 = arith.mulf %285, %284 : vector<8x128xf32>
    %cst_100 = arith.constant 5.000000e-01 : f32
    %287 = vector.broadcast %cst_100 : f32 to vector<8x128xf32>
    %288 = arith.addf %286, %287 : vector<8x128xf32>
    %289 = arith.mulf %278, %211 : vector<8x128xf32>
    %290 = arith.mulf %270, %280 : vector<8x128xf32>
    %291 = arith.addf %289, %290 : vector<8x128xf32>
    %292 = math.tanh %291 : vector<8x128xf32>
    %293 = arith.mulf %288, %292 : vector<8x128xf32>
    %cst_101 = arith.constant dense<0.000000e+00> : vector<8x1024xf32>
    %294 = tpu.matmul %293, %4, %cst_101 {dimension_numbers = #tpu.dot_dimension_numbers<[1], [0], [0], [1], [0, 0, 1, 1], [], []>} : vector<8x128xf32>, vector<128x1024xf32>, vector<8x1024xf32> -> vector<8x1024xf32>
    %295 = vector.extract_strided_slice %294 {offsets = [0, 0], sizes = [8, 512], strides = [1, 1]} : vector<8x1024xf32> to vector<8x512xf32>
    %296 = vector.extract_strided_slice %294 {offsets = [0, 512], sizes = [8, 512], strides = [1, 1]} : vector<8x1024xf32> to vector<8x512xf32>
    %cst_102 = arith.constant dense<0.000000e+00> : vector<8x512xf32>
    %297 = tpu.matmul %251, %5, %cst_102 {dimension_numbers = #tpu.dot_dimension_numbers<[1], [0], [0], [1], [0, 0, 1, 1], [], []>} : vector<8x128xf32>, vector<128x512xf32>, vector<8x512xf32> -> vector<8x512xf32>
    %298 = arith.addf %296, %297 : vector<8x512xf32>
    %299 = vector.broadcast %6 : vector<1x512xf32> to vector<8x512xf32>
    %300 = arith.addf %298, %299 : vector<8x512xf32>
    %301 = vector.extract_strided_slice %300 {offsets = [0, 0], sizes = [8, 128], strides = [1, 1]} : vector<8x512xf32> to vector<8x128xf32>
    %cst_103 = arith.constant 5.000000e-01 : f32
    %302 = vector.broadcast %cst_103 : f32 to vector<8x128xf32>
    %303 = arith.mulf %302, %301 : vector<8x128xf32>
    %304 = math.tanh %303 : vector<8x128xf32>
    %cst_104 = arith.constant 5.000000e-01 : f32
    %305 = vector.broadcast %cst_104 : f32 to vector<8x128xf32>
    %306 = arith.mulf %305, %304 : vector<8x128xf32>
    %cst_105 = arith.constant 5.000000e-01 : f32
    %307 = vector.broadcast %cst_105 : f32 to vector<8x128xf32>
    %308 = arith.addf %306, %307 : vector<8x128xf32>
    %309 = vector.extract_strided_slice %300 {offsets = [0, 128], sizes = [8, 128], strides = [1, 1]} : vector<8x512xf32> to vector<8x128xf32>
    %cst_106 = arith.constant 5.000000e-01 : f32
    %310 = vector.broadcast %cst_106 : f32 to vector<8x128xf32>
    %311 = arith.mulf %310, %309 : vector<8x128xf32>
    %312 = math.tanh %311 : vector<8x128xf32>
    %cst_107 = arith.constant 5.000000e-01 : f32
    %313 = vector.broadcast %cst_107 : f32 to vector<8x128xf32>
    %314 = arith.mulf %313, %312 : vector<8x128xf32>
    %cst_108 = arith.constant 5.000000e-01 : f32
    %315 = vector.broadcast %cst_108 : f32 to vector<8x128xf32>
    %316 = arith.addf %314, %315 : vector<8x128xf32>
    %317 = vector.extract_strided_slice %300 {offsets = [0, 256], sizes = [8, 128], strides = [1, 1]} : vector<8x512xf32> to vector<8x128xf32>
    %318 = math.tanh %317 : vector<8x128xf32>
    %319 = vector.extract_strided_slice %300 {offsets = [0, 384], sizes = [8, 128], strides = [1, 1]} : vector<8x512xf32> to vector<8x128xf32>
    %cst_109 = arith.constant 5.000000e-01 : f32
    %320 = vector.broadcast %cst_109 : f32 to vector<8x128xf32>
    %321 = arith.mulf %320, %319 : vector<8x128xf32>
    %322 = math.tanh %321 : vector<8x128xf32>
    %cst_110 = arith.constant 5.000000e-01 : f32
    %323 = vector.broadcast %cst_110 : f32 to vector<8x128xf32>
    %324 = arith.mulf %323, %322 : vector<8x128xf32>
    %cst_111 = arith.constant 5.000000e-01 : f32
    %325 = vector.broadcast %cst_111 : f32 to vector<8x128xf32>
    %326 = arith.addf %324, %325 : vector<8x128xf32>
    %327 = arith.mulf %316, %249 : vector<8x128xf32>
    %328 = arith.mulf %308, %318 : vector<8x128xf32>
    %329 = arith.addf %327, %328 : vector<8x128xf32>
    %330 = math.tanh %329 : vector<8x128xf32>
    %331 = arith.mulf %326, %330 : vector<8x128xf32>
    %c1_i32_112 = arith.constant 1 : i32
    %332 = vector.broadcast %c1_i32_112 : i32 to vector<8x1xi32>
    %333 = arith.subi %3, %332 : vector<8x1xi32>
    %334 = vector.broadcast %260 : i32 to vector<8x1xi32>
    %335 = arith.cmpi eq, %333, %334 : vector<8x1xi32>
    %336 = vector.shape_cast %335 : vector<8x1xi1> to vector<8x1xi1>
    %337 = vector.broadcast %336 : vector<8x1xi1> to vector<8x128xi1>
    %338 = arith.select %337, %331, %258 : vector<8x128xi1>, vector<8x128xf32>
    %c10_i32_113 = arith.constant 10 : i32
    %339 = arith.muli %arg1, %c10_i32_113 : i32
    %c4_i32 = arith.constant 4 : i32
    %340 = arith.addi %339, %c4_i32 : i32
    %341 = vector.extract_strided_slice %13 {offsets = [32, 0], sizes = [8, 512], strides = [1, 1]} : vector<80x512xf32> to vector<8x512xf32>
    %342 = arith.addf %341, %295 : vector<8x512xf32>
    %343 = vector.extract_strided_slice %342 {offsets = [0, 0], sizes = [8, 128], strides = [1, 1]} : vector<8x512xf32> to vector<8x128xf32>
    %cst_114 = arith.constant 5.000000e-01 : f32
    %344 = vector.broadcast %cst_114 : f32 to vector<8x128xf32>
    %345 = arith.mulf %344, %343 : vector<8x128xf32>
    %346 = math.tanh %345 : vector<8x128xf32>
    %cst_115 = arith.constant 5.000000e-01 : f32
    %347 = vector.broadcast %cst_115 : f32 to vector<8x128xf32>
    %348 = arith.mulf %347, %346 : vector<8x128xf32>
    %cst_116 = arith.constant 5.000000e-01 : f32
    %349 = vector.broadcast %cst_116 : f32 to vector<8x128xf32>
    %350 = arith.addf %348, %349 : vector<8x128xf32>
    %351 = vector.extract_strided_slice %342 {offsets = [0, 128], sizes = [8, 128], strides = [1, 1]} : vector<8x512xf32> to vector<8x128xf32>
    %cst_117 = arith.constant 5.000000e-01 : f32
    %352 = vector.broadcast %cst_117 : f32 to vector<8x128xf32>
    %353 = arith.mulf %352, %351 : vector<8x128xf32>
    %354 = math.tanh %353 : vector<8x128xf32>
    %cst_118 = arith.constant 5.000000e-01 : f32
    %355 = vector.broadcast %cst_118 : f32 to vector<8x128xf32>
    %356 = arith.mulf %355, %354 : vector<8x128xf32>
    %cst_119 = arith.constant 5.000000e-01 : f32
    %357 = vector.broadcast %cst_119 : f32 to vector<8x128xf32>
    %358 = arith.addf %356, %357 : vector<8x128xf32>
    %359 = vector.extract_strided_slice %342 {offsets = [0, 256], sizes = [8, 128], strides = [1, 1]} : vector<8x512xf32> to vector<8x128xf32>
    %360 = math.tanh %359 : vector<8x128xf32>
    %361 = vector.extract_strided_slice %342 {offsets = [0, 384], sizes = [8, 128], strides = [1, 1]} : vector<8x512xf32> to vector<8x128xf32>
    %cst_120 = arith.constant 5.000000e-01 : f32
    %362 = vector.broadcast %cst_120 : f32 to vector<8x128xf32>
    %363 = arith.mulf %362, %361 : vector<8x128xf32>
    %364 = math.tanh %363 : vector<8x128xf32>
    %cst_121 = arith.constant 5.000000e-01 : f32
    %365 = vector.broadcast %cst_121 : f32 to vector<8x128xf32>
    %366 = arith.mulf %365, %364 : vector<8x128xf32>
    %cst_122 = arith.constant 5.000000e-01 : f32
    %367 = vector.broadcast %cst_122 : f32 to vector<8x128xf32>
    %368 = arith.addf %366, %367 : vector<8x128xf32>
    %369 = arith.mulf %358, %291 : vector<8x128xf32>
    %370 = arith.mulf %350, %360 : vector<8x128xf32>
    %371 = arith.addf %369, %370 : vector<8x128xf32>
    %372 = math.tanh %371 : vector<8x128xf32>
    %373 = arith.mulf %368, %372 : vector<8x128xf32>
    %cst_123 = arith.constant dense<0.000000e+00> : vector<8x1024xf32>
    %374 = tpu.matmul %373, %4, %cst_123 {dimension_numbers = #tpu.dot_dimension_numbers<[1], [0], [0], [1], [0, 0, 1, 1], [], []>} : vector<8x128xf32>, vector<128x1024xf32>, vector<8x1024xf32> -> vector<8x1024xf32>
    %375 = vector.extract_strided_slice %374 {offsets = [0, 0], sizes = [8, 512], strides = [1, 1]} : vector<8x1024xf32> to vector<8x512xf32>
    %376 = vector.extract_strided_slice %374 {offsets = [0, 512], sizes = [8, 512], strides = [1, 1]} : vector<8x1024xf32> to vector<8x512xf32>
    %cst_124 = arith.constant dense<0.000000e+00> : vector<8x512xf32>
    %377 = tpu.matmul %331, %5, %cst_124 {dimension_numbers = #tpu.dot_dimension_numbers<[1], [0], [0], [1], [0, 0, 1, 1], [], []>} : vector<8x128xf32>, vector<128x512xf32>, vector<8x512xf32> -> vector<8x512xf32>
    %378 = arith.addf %376, %377 : vector<8x512xf32>
    %379 = vector.broadcast %6 : vector<1x512xf32> to vector<8x512xf32>
    %380 = arith.addf %378, %379 : vector<8x512xf32>
    %381 = vector.extract_strided_slice %380 {offsets = [0, 0], sizes = [8, 128], strides = [1, 1]} : vector<8x512xf32> to vector<8x128xf32>
    %cst_125 = arith.constant 5.000000e-01 : f32
    %382 = vector.broadcast %cst_125 : f32 to vector<8x128xf32>
    %383 = arith.mulf %382, %381 : vector<8x128xf32>
    %384 = math.tanh %383 : vector<8x128xf32>
    %cst_126 = arith.constant 5.000000e-01 : f32
    %385 = vector.broadcast %cst_126 : f32 to vector<8x128xf32>
    %386 = arith.mulf %385, %384 : vector<8x128xf32>
    %cst_127 = arith.constant 5.000000e-01 : f32
    %387 = vector.broadcast %cst_127 : f32 to vector<8x128xf32>
    %388 = arith.addf %386, %387 : vector<8x128xf32>
    %389 = vector.extract_strided_slice %380 {offsets = [0, 128], sizes = [8, 128], strides = [1, 1]} : vector<8x512xf32> to vector<8x128xf32>
    %cst_128 = arith.constant 5.000000e-01 : f32
    %390 = vector.broadcast %cst_128 : f32 to vector<8x128xf32>
    %391 = arith.mulf %390, %389 : vector<8x128xf32>
    %392 = math.tanh %391 : vector<8x128xf32>
    %cst_129 = arith.constant 5.000000e-01 : f32
    %393 = vector.broadcast %cst_129 : f32 to vector<8x128xf32>
    %394 = arith.mulf %393, %392 : vector<8x128xf32>
    %cst_130 = arith.constant 5.000000e-01 : f32
    %395 = vector.broadcast %cst_130 : f32 to vector<8x128xf32>
    %396 = arith.addf %394, %395 : vector<8x128xf32>
    %397 = vector.extract_strided_slice %380 {offsets = [0, 256], sizes = [8, 128], strides = [1, 1]} : vector<8x512xf32> to vector<8x128xf32>
    %398 = math.tanh %397 : vector<8x128xf32>
    %399 = vector.extract_strided_slice %380 {offsets = [0, 384], sizes = [8, 128], strides = [1, 1]} : vector<8x512xf32> to vector<8x128xf32>
    %cst_131 = arith.constant 5.000000e-01 : f32
    %400 = vector.broadcast %cst_131 : f32 to vector<8x128xf32>
    %401 = arith.mulf %400, %399 : vector<8x128xf32>
    %402 = math.tanh %401 : vector<8x128xf32>
    %cst_132 = arith.constant 5.000000e-01 : f32
    %403 = vector.broadcast %cst_132 : f32 to vector<8x128xf32>
    %404 = arith.mulf %403, %402 : vector<8x128xf32>
    %cst_133 = arith.constant 5.000000e-01 : f32
    %405 = vector.broadcast %cst_133 : f32 to vector<8x128xf32>
    %406 = arith.addf %404, %405 : vector<8x128xf32>
    %407 = arith.mulf %396, %329 : vector<8x128xf32>
    %408 = arith.mulf %388, %398 : vector<8x128xf32>
    %409 = arith.addf %407, %408 : vector<8x128xf32>
    %410 = math.tanh %409 : vector<8x128xf32>
    %411 = arith.mulf %406, %410 : vector<8x128xf32>
    %c1_i32_134 = arith.constant 1 : i32
    %412 = vector.broadcast %c1_i32_134 : i32 to vector<8x1xi32>
    %413 = arith.subi %3, %412 : vector<8x1xi32>
    %414 = vector.broadcast %340 : i32 to vector<8x1xi32>
    %415 = arith.cmpi eq, %413, %414 : vector<8x1xi32>
    %416 = vector.shape_cast %415 : vector<8x1xi1> to vector<8x1xi1>
    %417 = vector.broadcast %416 : vector<8x1xi1> to vector<8x128xi1>
    %418 = arith.select %417, %411, %338 : vector<8x128xi1>, vector<8x128xf32>
    %c10_i32_135 = arith.constant 10 : i32
    %419 = arith.muli %arg1, %c10_i32_135 : i32
    %c5_i32 = arith.constant 5 : i32
    %420 = arith.addi %419, %c5_i32 : i32
    %421 = vector.extract_strided_slice %13 {offsets = [40, 0], sizes = [8, 512], strides = [1, 1]} : vector<80x512xf32> to vector<8x512xf32>
    %422 = arith.addf %421, %375 : vector<8x512xf32>
    %423 = vector.extract_strided_slice %422 {offsets = [0, 0], sizes = [8, 128], strides = [1, 1]} : vector<8x512xf32> to vector<8x128xf32>
    %cst_136 = arith.constant 5.000000e-01 : f32
    %424 = vector.broadcast %cst_136 : f32 to vector<8x128xf32>
    %425 = arith.mulf %424, %423 : vector<8x128xf32>
    %426 = math.tanh %425 : vector<8x128xf32>
    %cst_137 = arith.constant 5.000000e-01 : f32
    %427 = vector.broadcast %cst_137 : f32 to vector<8x128xf32>
    %428 = arith.mulf %427, %426 : vector<8x128xf32>
    %cst_138 = arith.constant 5.000000e-01 : f32
    %429 = vector.broadcast %cst_138 : f32 to vector<8x128xf32>
    %430 = arith.addf %428, %429 : vector<8x128xf32>
    %431 = vector.extract_strided_slice %422 {offsets = [0, 128], sizes = [8, 128], strides = [1, 1]} : vector<8x512xf32> to vector<8x128xf32>
    %cst_139 = arith.constant 5.000000e-01 : f32
    %432 = vector.broadcast %cst_139 : f32 to vector<8x128xf32>
    %433 = arith.mulf %432, %431 : vector<8x128xf32>
    %434 = math.tanh %433 : vector<8x128xf32>
    %cst_140 = arith.constant 5.000000e-01 : f32
    %435 = vector.broadcast %cst_140 : f32 to vector<8x128xf32>
    %436 = arith.mulf %435, %434 : vector<8x128xf32>
    %cst_141 = arith.constant 5.000000e-01 : f32
    %437 = vector.broadcast %cst_141 : f32 to vector<8x128xf32>
    %438 = arith.addf %436, %437 : vector<8x128xf32>
    %439 = vector.extract_strided_slice %422 {offsets = [0, 256], sizes = [8, 128], strides = [1, 1]} : vector<8x512xf32> to vector<8x128xf32>
    %440 = math.tanh %439 : vector<8x128xf32>
    %441 = vector.extract_strided_slice %422 {offsets = [0, 384], sizes = [8, 128], strides = [1, 1]} : vector<8x512xf32> to vector<8x128xf32>
    %cst_142 = arith.constant 5.000000e-01 : f32
    %442 = vector.broadcast %cst_142 : f32 to vector<8x128xf32>
    %443 = arith.mulf %442, %441 : vector<8x128xf32>
    %444 = math.tanh %443 : vector<8x128xf32>
    %cst_143 = arith.constant 5.000000e-01 : f32
    %445 = vector.broadcast %cst_143 : f32 to vector<8x128xf32>
    %446 = arith.mulf %445, %444 : vector<8x128xf32>
    %cst_144 = arith.constant 5.000000e-01 : f32
    %447 = vector.broadcast %cst_144 : f32 to vector<8x128xf32>
    %448 = arith.addf %446, %447 : vector<8x128xf32>
    %449 = arith.mulf %438, %371 : vector<8x128xf32>
    %450 = arith.mulf %430, %440 : vector<8x128xf32>
    %451 = arith.addf %449, %450 : vector<8x128xf32>
    %452 = math.tanh %451 : vector<8x128xf32>
    %453 = arith.mulf %448, %452 : vector<8x128xf32>
    %cst_145 = arith.constant dense<0.000000e+00> : vector<8x1024xf32>
    %454 = tpu.matmul %453, %4, %cst_145 {dimension_numbers = #tpu.dot_dimension_numbers<[1], [0], [0], [1], [0, 0, 1, 1], [], []>} : vector<8x128xf32>, vector<128x1024xf32>, vector<8x1024xf32> -> vector<8x1024xf32>
    %455 = vector.extract_strided_slice %454 {offsets = [0, 0], sizes = [8, 512], strides = [1, 1]} : vector<8x1024xf32> to vector<8x512xf32>
    %456 = vector.extract_strided_slice %454 {offsets = [0, 512], sizes = [8, 512], strides = [1, 1]} : vector<8x1024xf32> to vector<8x512xf32>
    %cst_146 = arith.constant dense<0.000000e+00> : vector<8x512xf32>
    %457 = tpu.matmul %411, %5, %cst_146 {dimension_numbers = #tpu.dot_dimension_numbers<[1], [0], [0], [1], [0, 0, 1, 1], [], []>} : vector<8x128xf32>, vector<128x512xf32>, vector<8x512xf32> -> vector<8x512xf32>
    %458 = arith.addf %456, %457 : vector<8x512xf32>
    %459 = vector.broadcast %6 : vector<1x512xf32> to vector<8x512xf32>
    %460 = arith.addf %458, %459 : vector<8x512xf32>
    %461 = vector.extract_strided_slice %460 {offsets = [0, 0], sizes = [8, 128], strides = [1, 1]} : vector<8x512xf32> to vector<8x128xf32>
    %cst_147 = arith.constant 5.000000e-01 : f32
    %462 = vector.broadcast %cst_147 : f32 to vector<8x128xf32>
    %463 = arith.mulf %462, %461 : vector<8x128xf32>
    %464 = math.tanh %463 : vector<8x128xf32>
    %cst_148 = arith.constant 5.000000e-01 : f32
    %465 = vector.broadcast %cst_148 : f32 to vector<8x128xf32>
    %466 = arith.mulf %465, %464 : vector<8x128xf32>
    %cst_149 = arith.constant 5.000000e-01 : f32
    %467 = vector.broadcast %cst_149 : f32 to vector<8x128xf32>
    %468 = arith.addf %466, %467 : vector<8x128xf32>
    %469 = vector.extract_strided_slice %460 {offsets = [0, 128], sizes = [8, 128], strides = [1, 1]} : vector<8x512xf32> to vector<8x128xf32>
    %cst_150 = arith.constant 5.000000e-01 : f32
    %470 = vector.broadcast %cst_150 : f32 to vector<8x128xf32>
    %471 = arith.mulf %470, %469 : vector<8x128xf32>
    %472 = math.tanh %471 : vector<8x128xf32>
    %cst_151 = arith.constant 5.000000e-01 : f32
    %473 = vector.broadcast %cst_151 : f32 to vector<8x128xf32>
    %474 = arith.mulf %473, %472 : vector<8x128xf32>
    %cst_152 = arith.constant 5.000000e-01 : f32
    %475 = vector.broadcast %cst_152 : f32 to vector<8x128xf32>
    %476 = arith.addf %474, %475 : vector<8x128xf32>
    %477 = vector.extract_strided_slice %460 {offsets = [0, 256], sizes = [8, 128], strides = [1, 1]} : vector<8x512xf32> to vector<8x128xf32>
    %478 = math.tanh %477 : vector<8x128xf32>
    %479 = vector.extract_strided_slice %460 {offsets = [0, 384], sizes = [8, 128], strides = [1, 1]} : vector<8x512xf32> to vector<8x128xf32>
    %cst_153 = arith.constant 5.000000e-01 : f32
    %480 = vector.broadcast %cst_153 : f32 to vector<8x128xf32>
    %481 = arith.mulf %480, %479 : vector<8x128xf32>
    %482 = math.tanh %481 : vector<8x128xf32>
    %cst_154 = arith.constant 5.000000e-01 : f32
    %483 = vector.broadcast %cst_154 : f32 to vector<8x128xf32>
    %484 = arith.mulf %483, %482 : vector<8x128xf32>
    %cst_155 = arith.constant 5.000000e-01 : f32
    %485 = vector.broadcast %cst_155 : f32 to vector<8x128xf32>
    %486 = arith.addf %484, %485 : vector<8x128xf32>
    %487 = arith.mulf %476, %409 : vector<8x128xf32>
    %488 = arith.mulf %468, %478 : vector<8x128xf32>
    %489 = arith.addf %487, %488 : vector<8x128xf32>
    %490 = math.tanh %489 : vector<8x128xf32>
    %491 = arith.mulf %486, %490 : vector<8x128xf32>
    %c1_i32_156 = arith.constant 1 : i32
    %492 = vector.broadcast %c1_i32_156 : i32 to vector<8x1xi32>
    %493 = arith.subi %3, %492 : vector<8x1xi32>
    %494 = vector.broadcast %420 : i32 to vector<8x1xi32>
    %495 = arith.cmpi eq, %493, %494 : vector<8x1xi32>
    %496 = vector.shape_cast %495 : vector<8x1xi1> to vector<8x1xi1>
    %497 = vector.broadcast %496 : vector<8x1xi1> to vector<8x128xi1>
    %498 = arith.select %497, %491, %418 : vector<8x128xi1>, vector<8x128xf32>
    %c10_i32_157 = arith.constant 10 : i32
    %499 = arith.muli %arg1, %c10_i32_157 : i32
    %c6_i32 = arith.constant 6 : i32
    %500 = arith.addi %499, %c6_i32 : i32
    %501 = vector.extract_strided_slice %13 {offsets = [48, 0], sizes = [8, 512], strides = [1, 1]} : vector<80x512xf32> to vector<8x512xf32>
    %502 = arith.addf %501, %455 : vector<8x512xf32>
    %503 = vector.extract_strided_slice %502 {offsets = [0, 0], sizes = [8, 128], strides = [1, 1]} : vector<8x512xf32> to vector<8x128xf32>
    %cst_158 = arith.constant 5.000000e-01 : f32
    %504 = vector.broadcast %cst_158 : f32 to vector<8x128xf32>
    %505 = arith.mulf %504, %503 : vector<8x128xf32>
    %506 = math.tanh %505 : vector<8x128xf32>
    %cst_159 = arith.constant 5.000000e-01 : f32
    %507 = vector.broadcast %cst_159 : f32 to vector<8x128xf32>
    %508 = arith.mulf %507, %506 : vector<8x128xf32>
    %cst_160 = arith.constant 5.000000e-01 : f32
    %509 = vector.broadcast %cst_160 : f32 to vector<8x128xf32>
    %510 = arith.addf %508, %509 : vector<8x128xf32>
    %511 = vector.extract_strided_slice %502 {offsets = [0, 128], sizes = [8, 128], strides = [1, 1]} : vector<8x512xf32> to vector<8x128xf32>
    %cst_161 = arith.constant 5.000000e-01 : f32
    %512 = vector.broadcast %cst_161 : f32 to vector<8x128xf32>
    %513 = arith.mulf %512, %511 : vector<8x128xf32>
    %514 = math.tanh %513 : vector<8x128xf32>
    %cst_162 = arith.constant 5.000000e-01 : f32
    %515 = vector.broadcast %cst_162 : f32 to vector<8x128xf32>
    %516 = arith.mulf %515, %514 : vector<8x128xf32>
    %cst_163 = arith.constant 5.000000e-01 : f32
    %517 = vector.broadcast %cst_163 : f32 to vector<8x128xf32>
    %518 = arith.addf %516, %517 : vector<8x128xf32>
    %519 = vector.extract_strided_slice %502 {offsets = [0, 256], sizes = [8, 128], strides = [1, 1]} : vector<8x512xf32> to vector<8x128xf32>
    %520 = math.tanh %519 : vector<8x128xf32>
    %521 = vector.extract_strided_slice %502 {offsets = [0, 384], sizes = [8, 128], strides = [1, 1]} : vector<8x512xf32> to vector<8x128xf32>
    %cst_164 = arith.constant 5.000000e-01 : f32
    %522 = vector.broadcast %cst_164 : f32 to vector<8x128xf32>
    %523 = arith.mulf %522, %521 : vector<8x128xf32>
    %524 = math.tanh %523 : vector<8x128xf32>
    %cst_165 = arith.constant 5.000000e-01 : f32
    %525 = vector.broadcast %cst_165 : f32 to vector<8x128xf32>
    %526 = arith.mulf %525, %524 : vector<8x128xf32>
    %cst_166 = arith.constant 5.000000e-01 : f32
    %527 = vector.broadcast %cst_166 : f32 to vector<8x128xf32>
    %528 = arith.addf %526, %527 : vector<8x128xf32>
    %529 = arith.mulf %518, %451 : vector<8x128xf32>
    %530 = arith.mulf %510, %520 : vector<8x128xf32>
    %531 = arith.addf %529, %530 : vector<8x128xf32>
    %532 = math.tanh %531 : vector<8x128xf32>
    %533 = arith.mulf %528, %532 : vector<8x128xf32>
    %cst_167 = arith.constant dense<0.000000e+00> : vector<8x1024xf32>
    %534 = tpu.matmul %533, %4, %cst_167 {dimension_numbers = #tpu.dot_dimension_numbers<[1], [0], [0], [1], [0, 0, 1, 1], [], []>} : vector<8x128xf32>, vector<128x1024xf32>, vector<8x1024xf32> -> vector<8x1024xf32>
    %535 = vector.extract_strided_slice %534 {offsets = [0, 0], sizes = [8, 512], strides = [1, 1]} : vector<8x1024xf32> to vector<8x512xf32>
    %536 = vector.extract_strided_slice %534 {offsets = [0, 512], sizes = [8, 512], strides = [1, 1]} : vector<8x1024xf32> to vector<8x512xf32>
    %cst_168 = arith.constant dense<0.000000e+00> : vector<8x512xf32>
    %537 = tpu.matmul %491, %5, %cst_168 {dimension_numbers = #tpu.dot_dimension_numbers<[1], [0], [0], [1], [0, 0, 1, 1], [], []>} : vector<8x128xf32>, vector<128x512xf32>, vector<8x512xf32> -> vector<8x512xf32>
    %538 = arith.addf %536, %537 : vector<8x512xf32>
    %539 = vector.broadcast %6 : vector<1x512xf32> to vector<8x512xf32>
    %540 = arith.addf %538, %539 : vector<8x512xf32>
    %541 = vector.extract_strided_slice %540 {offsets = [0, 0], sizes = [8, 128], strides = [1, 1]} : vector<8x512xf32> to vector<8x128xf32>
    %cst_169 = arith.constant 5.000000e-01 : f32
    %542 = vector.broadcast %cst_169 : f32 to vector<8x128xf32>
    %543 = arith.mulf %542, %541 : vector<8x128xf32>
    %544 = math.tanh %543 : vector<8x128xf32>
    %cst_170 = arith.constant 5.000000e-01 : f32
    %545 = vector.broadcast %cst_170 : f32 to vector<8x128xf32>
    %546 = arith.mulf %545, %544 : vector<8x128xf32>
    %cst_171 = arith.constant 5.000000e-01 : f32
    %547 = vector.broadcast %cst_171 : f32 to vector<8x128xf32>
    %548 = arith.addf %546, %547 : vector<8x128xf32>
    %549 = vector.extract_strided_slice %540 {offsets = [0, 128], sizes = [8, 128], strides = [1, 1]} : vector<8x512xf32> to vector<8x128xf32>
    %cst_172 = arith.constant 5.000000e-01 : f32
    %550 = vector.broadcast %cst_172 : f32 to vector<8x128xf32>
    %551 = arith.mulf %550, %549 : vector<8x128xf32>
    %552 = math.tanh %551 : vector<8x128xf32>
    %cst_173 = arith.constant 5.000000e-01 : f32
    %553 = vector.broadcast %cst_173 : f32 to vector<8x128xf32>
    %554 = arith.mulf %553, %552 : vector<8x128xf32>
    %cst_174 = arith.constant 5.000000e-01 : f32
    %555 = vector.broadcast %cst_174 : f32 to vector<8x128xf32>
    %556 = arith.addf %554, %555 : vector<8x128xf32>
    %557 = vector.extract_strided_slice %540 {offsets = [0, 256], sizes = [8, 128], strides = [1, 1]} : vector<8x512xf32> to vector<8x128xf32>
    %558 = math.tanh %557 : vector<8x128xf32>
    %559 = vector.extract_strided_slice %540 {offsets = [0, 384], sizes = [8, 128], strides = [1, 1]} : vector<8x512xf32> to vector<8x128xf32>
    %cst_175 = arith.constant 5.000000e-01 : f32
    %560 = vector.broadcast %cst_175 : f32 to vector<8x128xf32>
    %561 = arith.mulf %560, %559 : vector<8x128xf32>
    %562 = math.tanh %561 : vector<8x128xf32>
    %cst_176 = arith.constant 5.000000e-01 : f32
    %563 = vector.broadcast %cst_176 : f32 to vector<8x128xf32>
    %564 = arith.mulf %563, %562 : vector<8x128xf32>
    %cst_177 = arith.constant 5.000000e-01 : f32
    %565 = vector.broadcast %cst_177 : f32 to vector<8x128xf32>
    %566 = arith.addf %564, %565 : vector<8x128xf32>
    %567 = arith.mulf %556, %489 : vector<8x128xf32>
    %568 = arith.mulf %548, %558 : vector<8x128xf32>
    %569 = arith.addf %567, %568 : vector<8x128xf32>
    %570 = math.tanh %569 : vector<8x128xf32>
    %571 = arith.mulf %566, %570 : vector<8x128xf32>
    %c1_i32_178 = arith.constant 1 : i32
    %572 = vector.broadcast %c1_i32_178 : i32 to vector<8x1xi32>
    %573 = arith.subi %3, %572 : vector<8x1xi32>
    %574 = vector.broadcast %500 : i32 to vector<8x1xi32>
    %575 = arith.cmpi eq, %573, %574 : vector<8x1xi32>
    %576 = vector.shape_cast %575 : vector<8x1xi1> to vector<8x1xi1>
    %577 = vector.broadcast %576 : vector<8x1xi1> to vector<8x128xi1>
    %578 = arith.select %577, %571, %498 : vector<8x128xi1>, vector<8x128xf32>
    %c10_i32_179 = arith.constant 10 : i32
    %579 = arith.muli %arg1, %c10_i32_179 : i32
    %c7_i32 = arith.constant 7 : i32
    %580 = arith.addi %579, %c7_i32 : i32
    %581 = vector.extract_strided_slice %13 {offsets = [56, 0], sizes = [8, 512], strides = [1, 1]} : vector<80x512xf32> to vector<8x512xf32>
    %582 = arith.addf %581, %535 : vector<8x512xf32>
    %583 = vector.extract_strided_slice %582 {offsets = [0, 0], sizes = [8, 128], strides = [1, 1]} : vector<8x512xf32> to vector<8x128xf32>
    %cst_180 = arith.constant 5.000000e-01 : f32
    %584 = vector.broadcast %cst_180 : f32 to vector<8x128xf32>
    %585 = arith.mulf %584, %583 : vector<8x128xf32>
    %586 = math.tanh %585 : vector<8x128xf32>
    %cst_181 = arith.constant 5.000000e-01 : f32
    %587 = vector.broadcast %cst_181 : f32 to vector<8x128xf32>
    %588 = arith.mulf %587, %586 : vector<8x128xf32>
    %cst_182 = arith.constant 5.000000e-01 : f32
    %589 = vector.broadcast %cst_182 : f32 to vector<8x128xf32>
    %590 = arith.addf %588, %589 : vector<8x128xf32>
    %591 = vector.extract_strided_slice %582 {offsets = [0, 128], sizes = [8, 128], strides = [1, 1]} : vector<8x512xf32> to vector<8x128xf32>
    %cst_183 = arith.constant 5.000000e-01 : f32
    %592 = vector.broadcast %cst_183 : f32 to vector<8x128xf32>
    %593 = arith.mulf %592, %591 : vector<8x128xf32>
    %594 = math.tanh %593 : vector<8x128xf32>
    %cst_184 = arith.constant 5.000000e-01 : f32
    %595 = vector.broadcast %cst_184 : f32 to vector<8x128xf32>
    %596 = arith.mulf %595, %594 : vector<8x128xf32>
    %cst_185 = arith.constant 5.000000e-01 : f32
    %597 = vector.broadcast %cst_185 : f32 to vector<8x128xf32>
    %598 = arith.addf %596, %597 : vector<8x128xf32>
    %599 = vector.extract_strided_slice %582 {offsets = [0, 256], sizes = [8, 128], strides = [1, 1]} : vector<8x512xf32> to vector<8x128xf32>
    %600 = math.tanh %599 : vector<8x128xf32>
    %601 = vector.extract_strided_slice %582 {offsets = [0, 384], sizes = [8, 128], strides = [1, 1]} : vector<8x512xf32> to vector<8x128xf32>
    %cst_186 = arith.constant 5.000000e-01 : f32
    %602 = vector.broadcast %cst_186 : f32 to vector<8x128xf32>
    %603 = arith.mulf %602, %601 : vector<8x128xf32>
    %604 = math.tanh %603 : vector<8x128xf32>
    %cst_187 = arith.constant 5.000000e-01 : f32
    %605 = vector.broadcast %cst_187 : f32 to vector<8x128xf32>
    %606 = arith.mulf %605, %604 : vector<8x128xf32>
    %cst_188 = arith.constant 5.000000e-01 : f32
    %607 = vector.broadcast %cst_188 : f32 to vector<8x128xf32>
    %608 = arith.addf %606, %607 : vector<8x128xf32>
    %609 = arith.mulf %598, %531 : vector<8x128xf32>
    %610 = arith.mulf %590, %600 : vector<8x128xf32>
    %611 = arith.addf %609, %610 : vector<8x128xf32>
    %612 = math.tanh %611 : vector<8x128xf32>
    %613 = arith.mulf %608, %612 : vector<8x128xf32>
    %cst_189 = arith.constant dense<0.000000e+00> : vector<8x1024xf32>
    %614 = tpu.matmul %613, %4, %cst_189 {dimension_numbers = #tpu.dot_dimension_numbers<[1], [0], [0], [1], [0, 0, 1, 1], [], []>} : vector<8x128xf32>, vector<128x1024xf32>, vector<8x1024xf32> -> vector<8x1024xf32>
    %615 = vector.extract_strided_slice %614 {offsets = [0, 0], sizes = [8, 512], strides = [1, 1]} : vector<8x1024xf32> to vector<8x512xf32>
    %616 = vector.extract_strided_slice %614 {offsets = [0, 512], sizes = [8, 512], strides = [1, 1]} : vector<8x1024xf32> to vector<8x512xf32>
    %cst_190 = arith.constant dense<0.000000e+00> : vector<8x512xf32>
    %617 = tpu.matmul %571, %5, %cst_190 {dimension_numbers = #tpu.dot_dimension_numbers<[1], [0], [0], [1], [0, 0, 1, 1], [], []>} : vector<8x128xf32>, vector<128x512xf32>, vector<8x512xf32> -> vector<8x512xf32>
    %618 = arith.addf %616, %617 : vector<8x512xf32>
    %619 = vector.broadcast %6 : vector<1x512xf32> to vector<8x512xf32>
    %620 = arith.addf %618, %619 : vector<8x512xf32>
    %621 = vector.extract_strided_slice %620 {offsets = [0, 0], sizes = [8, 128], strides = [1, 1]} : vector<8x512xf32> to vector<8x128xf32>
    %cst_191 = arith.constant 5.000000e-01 : f32
    %622 = vector.broadcast %cst_191 : f32 to vector<8x128xf32>
    %623 = arith.mulf %622, %621 : vector<8x128xf32>
    %624 = math.tanh %623 : vector<8x128xf32>
    %cst_192 = arith.constant 5.000000e-01 : f32
    %625 = vector.broadcast %cst_192 : f32 to vector<8x128xf32>
    %626 = arith.mulf %625, %624 : vector<8x128xf32>
    %cst_193 = arith.constant 5.000000e-01 : f32
    %627 = vector.broadcast %cst_193 : f32 to vector<8x128xf32>
    %628 = arith.addf %626, %627 : vector<8x128xf32>
    %629 = vector.extract_strided_slice %620 {offsets = [0, 128], sizes = [8, 128], strides = [1, 1]} : vector<8x512xf32> to vector<8x128xf32>
    %cst_194 = arith.constant 5.000000e-01 : f32
    %630 = vector.broadcast %cst_194 : f32 to vector<8x128xf32>
    %631 = arith.mulf %630, %629 : vector<8x128xf32>
    %632 = math.tanh %631 : vector<8x128xf32>
    %cst_195 = arith.constant 5.000000e-01 : f32
    %633 = vector.broadcast %cst_195 : f32 to vector<8x128xf32>
    %634 = arith.mulf %633, %632 : vector<8x128xf32>
    %cst_196 = arith.constant 5.000000e-01 : f32
    %635 = vector.broadcast %cst_196 : f32 to vector<8x128xf32>
    %636 = arith.addf %634, %635 : vector<8x128xf32>
    %637 = vector.extract_strided_slice %620 {offsets = [0, 256], sizes = [8, 128], strides = [1, 1]} : vector<8x512xf32> to vector<8x128xf32>
    %638 = math.tanh %637 : vector<8x128xf32>
    %639 = vector.extract_strided_slice %620 {offsets = [0, 384], sizes = [8, 128], strides = [1, 1]} : vector<8x512xf32> to vector<8x128xf32>
    %cst_197 = arith.constant 5.000000e-01 : f32
    %640 = vector.broadcast %cst_197 : f32 to vector<8x128xf32>
    %641 = arith.mulf %640, %639 : vector<8x128xf32>
    %642 = math.tanh %641 : vector<8x128xf32>
    %cst_198 = arith.constant 5.000000e-01 : f32
    %643 = vector.broadcast %cst_198 : f32 to vector<8x128xf32>
    %644 = arith.mulf %643, %642 : vector<8x128xf32>
    %cst_199 = arith.constant 5.000000e-01 : f32
    %645 = vector.broadcast %cst_199 : f32 to vector<8x128xf32>
    %646 = arith.addf %644, %645 : vector<8x128xf32>
    %647 = arith.mulf %636, %569 : vector<8x128xf32>
    %648 = arith.mulf %628, %638 : vector<8x128xf32>
    %649 = arith.addf %647, %648 : vector<8x128xf32>
    %650 = math.tanh %649 : vector<8x128xf32>
    %651 = arith.mulf %646, %650 : vector<8x128xf32>
    %c1_i32_200 = arith.constant 1 : i32
    %652 = vector.broadcast %c1_i32_200 : i32 to vector<8x1xi32>
    %653 = arith.subi %3, %652 : vector<8x1xi32>
    %654 = vector.broadcast %580 : i32 to vector<8x1xi32>
    %655 = arith.cmpi eq, %653, %654 : vector<8x1xi32>
    %656 = vector.shape_cast %655 : vector<8x1xi1> to vector<8x1xi1>
    %657 = vector.broadcast %656 : vector<8x1xi1> to vector<8x128xi1>
    %658 = arith.select %657, %651, %578 : vector<8x128xi1>, vector<8x128xf32>
    %c10_i32_201 = arith.constant 10 : i32
    %659 = arith.muli %arg1, %c10_i32_201 : i32
    %c8_i32 = arith.constant 8 : i32
    %660 = arith.addi %659, %c8_i32 : i32
    %661 = vector.extract_strided_slice %13 {offsets = [64, 0], sizes = [8, 512], strides = [1, 1]} : vector<80x512xf32> to vector<8x512xf32>
    %662 = arith.addf %661, %615 : vector<8x512xf32>
    %663 = vector.extract_strided_slice %662 {offsets = [0, 0], sizes = [8, 128], strides = [1, 1]} : vector<8x512xf32> to vector<8x128xf32>
    %cst_202 = arith.constant 5.000000e-01 : f32
    %664 = vector.broadcast %cst_202 : f32 to vector<8x128xf32>
    %665 = arith.mulf %664, %663 : vector<8x128xf32>
    %666 = math.tanh %665 : vector<8x128xf32>
    %cst_203 = arith.constant 5.000000e-01 : f32
    %667 = vector.broadcast %cst_203 : f32 to vector<8x128xf32>
    %668 = arith.mulf %667, %666 : vector<8x128xf32>
    %cst_204 = arith.constant 5.000000e-01 : f32
    %669 = vector.broadcast %cst_204 : f32 to vector<8x128xf32>
    %670 = arith.addf %668, %669 : vector<8x128xf32>
    %671 = vector.extract_strided_slice %662 {offsets = [0, 128], sizes = [8, 128], strides = [1, 1]} : vector<8x512xf32> to vector<8x128xf32>
    %cst_205 = arith.constant 5.000000e-01 : f32
    %672 = vector.broadcast %cst_205 : f32 to vector<8x128xf32>
    %673 = arith.mulf %672, %671 : vector<8x128xf32>
    %674 = math.tanh %673 : vector<8x128xf32>
    %cst_206 = arith.constant 5.000000e-01 : f32
    %675 = vector.broadcast %cst_206 : f32 to vector<8x128xf32>
    %676 = arith.mulf %675, %674 : vector<8x128xf32>
    %cst_207 = arith.constant 5.000000e-01 : f32
    %677 = vector.broadcast %cst_207 : f32 to vector<8x128xf32>
    %678 = arith.addf %676, %677 : vector<8x128xf32>
    %679 = vector.extract_strided_slice %662 {offsets = [0, 256], sizes = [8, 128], strides = [1, 1]} : vector<8x512xf32> to vector<8x128xf32>
    %680 = math.tanh %679 : vector<8x128xf32>
    %681 = vector.extract_strided_slice %662 {offsets = [0, 384], sizes = [8, 128], strides = [1, 1]} : vector<8x512xf32> to vector<8x128xf32>
    %cst_208 = arith.constant 5.000000e-01 : f32
    %682 = vector.broadcast %cst_208 : f32 to vector<8x128xf32>
    %683 = arith.mulf %682, %681 : vector<8x128xf32>
    %684 = math.tanh %683 : vector<8x128xf32>
    %cst_209 = arith.constant 5.000000e-01 : f32
    %685 = vector.broadcast %cst_209 : f32 to vector<8x128xf32>
    %686 = arith.mulf %685, %684 : vector<8x128xf32>
    %cst_210 = arith.constant 5.000000e-01 : f32
    %687 = vector.broadcast %cst_210 : f32 to vector<8x128xf32>
    %688 = arith.addf %686, %687 : vector<8x128xf32>
    %689 = arith.mulf %678, %611 : vector<8x128xf32>
    %690 = arith.mulf %670, %680 : vector<8x128xf32>
    %691 = arith.addf %689, %690 : vector<8x128xf32>
    %692 = math.tanh %691 : vector<8x128xf32>
    %693 = arith.mulf %688, %692 : vector<8x128xf32>
    %cst_211 = arith.constant dense<0.000000e+00> : vector<8x1024xf32>
    %694 = tpu.matmul %693, %4, %cst_211 {dimension_numbers = #tpu.dot_dimension_numbers<[1], [0], [0], [1], [0, 0, 1, 1], [], []>} : vector<8x128xf32>, vector<128x1024xf32>, vector<8x1024xf32> -> vector<8x1024xf32>
    %695 = vector.extract_strided_slice %694 {offsets = [0, 0], sizes = [8, 512], strides = [1, 1]} : vector<8x1024xf32> to vector<8x512xf32>
    %696 = vector.extract_strided_slice %694 {offsets = [0, 512], sizes = [8, 512], strides = [1, 1]} : vector<8x1024xf32> to vector<8x512xf32>
    %cst_212 = arith.constant dense<0.000000e+00> : vector<8x512xf32>
    %697 = tpu.matmul %651, %5, %cst_212 {dimension_numbers = #tpu.dot_dimension_numbers<[1], [0], [0], [1], [0, 0, 1, 1], [], []>} : vector<8x128xf32>, vector<128x512xf32>, vector<8x512xf32> -> vector<8x512xf32>
    %698 = arith.addf %696, %697 : vector<8x512xf32>
    %699 = vector.broadcast %6 : vector<1x512xf32> to vector<8x512xf32>
    %700 = arith.addf %698, %699 : vector<8x512xf32>
    %701 = vector.extract_strided_slice %700 {offsets = [0, 0], sizes = [8, 128], strides = [1, 1]} : vector<8x512xf32> to vector<8x128xf32>
    %cst_213 = arith.constant 5.000000e-01 : f32
    %702 = vector.broadcast %cst_213 : f32 to vector<8x128xf32>
    %703 = arith.mulf %702, %701 : vector<8x128xf32>
    %704 = math.tanh %703 : vector<8x128xf32>
    %cst_214 = arith.constant 5.000000e-01 : f32
    %705 = vector.broadcast %cst_214 : f32 to vector<8x128xf32>
    %706 = arith.mulf %705, %704 : vector<8x128xf32>
    %cst_215 = arith.constant 5.000000e-01 : f32
    %707 = vector.broadcast %cst_215 : f32 to vector<8x128xf32>
    %708 = arith.addf %706, %707 : vector<8x128xf32>
    %709 = vector.extract_strided_slice %700 {offsets = [0, 128], sizes = [8, 128], strides = [1, 1]} : vector<8x512xf32> to vector<8x128xf32>
    %cst_216 = arith.constant 5.000000e-01 : f32
    %710 = vector.broadcast %cst_216 : f32 to vector<8x128xf32>
    %711 = arith.mulf %710, %709 : vector<8x128xf32>
    %712 = math.tanh %711 : vector<8x128xf32>
    %cst_217 = arith.constant 5.000000e-01 : f32
    %713 = vector.broadcast %cst_217 : f32 to vector<8x128xf32>
    %714 = arith.mulf %713, %712 : vector<8x128xf32>
    %cst_218 = arith.constant 5.000000e-01 : f32
    %715 = vector.broadcast %cst_218 : f32 to vector<8x128xf32>
    %716 = arith.addf %714, %715 : vector<8x128xf32>
    %717 = vector.extract_strided_slice %700 {offsets = [0, 256], sizes = [8, 128], strides = [1, 1]} : vector<8x512xf32> to vector<8x128xf32>
    %718 = math.tanh %717 : vector<8x128xf32>
    %719 = vector.extract_strided_slice %700 {offsets = [0, 384], sizes = [8, 128], strides = [1, 1]} : vector<8x512xf32> to vector<8x128xf32>
    %cst_219 = arith.constant 5.000000e-01 : f32
    %720 = vector.broadcast %cst_219 : f32 to vector<8x128xf32>
    %721 = arith.mulf %720, %719 : vector<8x128xf32>
    %722 = math.tanh %721 : vector<8x128xf32>
    %cst_220 = arith.constant 5.000000e-01 : f32
    %723 = vector.broadcast %cst_220 : f32 to vector<8x128xf32>
    %724 = arith.mulf %723, %722 : vector<8x128xf32>
    %cst_221 = arith.constant 5.000000e-01 : f32
    %725 = vector.broadcast %cst_221 : f32 to vector<8x128xf32>
    %726 = arith.addf %724, %725 : vector<8x128xf32>
    %727 = arith.mulf %716, %649 : vector<8x128xf32>
    %728 = arith.mulf %708, %718 : vector<8x128xf32>
    %729 = arith.addf %727, %728 : vector<8x128xf32>
    %730 = math.tanh %729 : vector<8x128xf32>
    %731 = arith.mulf %726, %730 : vector<8x128xf32>
    %c1_i32_222 = arith.constant 1 : i32
    %732 = vector.broadcast %c1_i32_222 : i32 to vector<8x1xi32>
    %733 = arith.subi %3, %732 : vector<8x1xi32>
    %734 = vector.broadcast %660 : i32 to vector<8x1xi32>
    %735 = arith.cmpi eq, %733, %734 : vector<8x1xi32>
    %736 = vector.shape_cast %735 : vector<8x1xi1> to vector<8x1xi1>
    %737 = vector.broadcast %736 : vector<8x1xi1> to vector<8x128xi1>
    %738 = arith.select %737, %731, %658 : vector<8x128xi1>, vector<8x128xf32>
    %c10_i32_223 = arith.constant 10 : i32
    %739 = arith.muli %arg1, %c10_i32_223 : i32
    %c9_i32 = arith.constant 9 : i32
    %740 = arith.addi %739, %c9_i32 : i32
    %741 = vector.extract_strided_slice %13 {offsets = [72, 0], sizes = [8, 512], strides = [1, 1]} : vector<80x512xf32> to vector<8x512xf32>
    %742 = arith.addf %741, %695 : vector<8x512xf32>
    %743 = vector.extract_strided_slice %742 {offsets = [0, 0], sizes = [8, 128], strides = [1, 1]} : vector<8x512xf32> to vector<8x128xf32>
    %cst_224 = arith.constant 5.000000e-01 : f32
    %744 = vector.broadcast %cst_224 : f32 to vector<8x128xf32>
    %745 = arith.mulf %744, %743 : vector<8x128xf32>
    %746 = math.tanh %745 : vector<8x128xf32>
    %cst_225 = arith.constant 5.000000e-01 : f32
    %747 = vector.broadcast %cst_225 : f32 to vector<8x128xf32>
    %748 = arith.mulf %747, %746 : vector<8x128xf32>
    %cst_226 = arith.constant 5.000000e-01 : f32
    %749 = vector.broadcast %cst_226 : f32 to vector<8x128xf32>
    %750 = arith.addf %748, %749 : vector<8x128xf32>
    %751 = vector.extract_strided_slice %742 {offsets = [0, 128], sizes = [8, 128], strides = [1, 1]} : vector<8x512xf32> to vector<8x128xf32>
    %cst_227 = arith.constant 5.000000e-01 : f32
    %752 = vector.broadcast %cst_227 : f32 to vector<8x128xf32>
    %753 = arith.mulf %752, %751 : vector<8x128xf32>
    %754 = math.tanh %753 : vector<8x128xf32>
    %cst_228 = arith.constant 5.000000e-01 : f32
    %755 = vector.broadcast %cst_228 : f32 to vector<8x128xf32>
    %756 = arith.mulf %755, %754 : vector<8x128xf32>
    %cst_229 = arith.constant 5.000000e-01 : f32
    %757 = vector.broadcast %cst_229 : f32 to vector<8x128xf32>
    %758 = arith.addf %756, %757 : vector<8x128xf32>
    %759 = vector.extract_strided_slice %742 {offsets = [0, 256], sizes = [8, 128], strides = [1, 1]} : vector<8x512xf32> to vector<8x128xf32>
    %760 = math.tanh %759 : vector<8x128xf32>
    %761 = vector.extract_strided_slice %742 {offsets = [0, 384], sizes = [8, 128], strides = [1, 1]} : vector<8x512xf32> to vector<8x128xf32>
    %cst_230 = arith.constant 5.000000e-01 : f32
    %762 = vector.broadcast %cst_230 : f32 to vector<8x128xf32>
    %763 = arith.mulf %762, %761 : vector<8x128xf32>
    %764 = math.tanh %763 : vector<8x128xf32>
    %cst_231 = arith.constant 5.000000e-01 : f32
    %765 = vector.broadcast %cst_231 : f32 to vector<8x128xf32>
    %766 = arith.mulf %765, %764 : vector<8x128xf32>
    %cst_232 = arith.constant 5.000000e-01 : f32
    %767 = vector.broadcast %cst_232 : f32 to vector<8x128xf32>
    %768 = arith.addf %766, %767 : vector<8x128xf32>
    %769 = arith.mulf %758, %691 : vector<8x128xf32>
    %770 = arith.mulf %750, %760 : vector<8x128xf32>
    %771 = arith.addf %769, %770 : vector<8x128xf32>
    %772 = math.tanh %771 : vector<8x128xf32>
    %773 = arith.mulf %768, %772 : vector<8x128xf32>
    %cst_233 = arith.constant dense<0.000000e+00> : vector<8x1024xf32>
    %774 = tpu.matmul %773, %4, %cst_233 {dimension_numbers = #tpu.dot_dimension_numbers<[1], [0], [0], [1], [0, 0, 1, 1], [], []>} : vector<8x128xf32>, vector<128x1024xf32>, vector<8x1024xf32> -> vector<8x1024xf32>
    %775 = vector.extract_strided_slice %774 {offsets = [0, 0], sizes = [8, 512], strides = [1, 1]} : vector<8x1024xf32> to vector<8x512xf32>
    %776 = vector.extract_strided_slice %774 {offsets = [0, 512], sizes = [8, 512], strides = [1, 1]} : vector<8x1024xf32> to vector<8x512xf32>
    %cst_234 = arith.constant dense<0.000000e+00> : vector<8x512xf32>
    %777 = tpu.matmul %731, %5, %cst_234 {dimension_numbers = #tpu.dot_dimension_numbers<[1], [0], [0], [1], [0, 0, 1, 1], [], []>} : vector<8x128xf32>, vector<128x512xf32>, vector<8x512xf32> -> vector<8x512xf32>
    %778 = arith.addf %776, %777 : vector<8x512xf32>
    %779 = vector.broadcast %6 : vector<1x512xf32> to vector<8x512xf32>
    %780 = arith.addf %778, %779 : vector<8x512xf32>
    %781 = vector.extract_strided_slice %780 {offsets = [0, 0], sizes = [8, 128], strides = [1, 1]} : vector<8x512xf32> to vector<8x128xf32>
    %cst_235 = arith.constant 5.000000e-01 : f32
    %782 = vector.broadcast %cst_235 : f32 to vector<8x128xf32>
    %783 = arith.mulf %782, %781 : vector<8x128xf32>
    %784 = math.tanh %783 : vector<8x128xf32>
    %cst_236 = arith.constant 5.000000e-01 : f32
    %785 = vector.broadcast %cst_236 : f32 to vector<8x128xf32>
    %786 = arith.mulf %785, %784 : vector<8x128xf32>
    %cst_237 = arith.constant 5.000000e-01 : f32
    %787 = vector.broadcast %cst_237 : f32 to vector<8x128xf32>
    %788 = arith.addf %786, %787 : vector<8x128xf32>
    %789 = vector.extract_strided_slice %780 {offsets = [0, 128], sizes = [8, 128], strides = [1, 1]} : vector<8x512xf32> to vector<8x128xf32>
    %cst_238 = arith.constant 5.000000e-01 : f32
    %790 = vector.broadcast %cst_238 : f32 to vector<8x128xf32>
    %791 = arith.mulf %790, %789 : vector<8x128xf32>
    %792 = math.tanh %791 : vector<8x128xf32>
    %cst_239 = arith.constant 5.000000e-01 : f32
    %793 = vector.broadcast %cst_239 : f32 to vector<8x128xf32>
    %794 = arith.mulf %793, %792 : vector<8x128xf32>
    %cst_240 = arith.constant 5.000000e-01 : f32
    %795 = vector.broadcast %cst_240 : f32 to vector<8x128xf32>
    %796 = arith.addf %794, %795 : vector<8x128xf32>
    %797 = vector.extract_strided_slice %780 {offsets = [0, 256], sizes = [8, 128], strides = [1, 1]} : vector<8x512xf32> to vector<8x128xf32>
    %798 = math.tanh %797 : vector<8x128xf32>
    %799 = vector.extract_strided_slice %780 {offsets = [0, 384], sizes = [8, 128], strides = [1, 1]} : vector<8x512xf32> to vector<8x128xf32>
    %cst_241 = arith.constant 5.000000e-01 : f32
    %800 = vector.broadcast %cst_241 : f32 to vector<8x128xf32>
    %801 = arith.mulf %800, %799 : vector<8x128xf32>
    %802 = math.tanh %801 : vector<8x128xf32>
    %cst_242 = arith.constant 5.000000e-01 : f32
    %803 = vector.broadcast %cst_242 : f32 to vector<8x128xf32>
    %804 = arith.mulf %803, %802 : vector<8x128xf32>
    %cst_243 = arith.constant 5.000000e-01 : f32
    %805 = vector.broadcast %cst_243 : f32 to vector<8x128xf32>
    %806 = arith.addf %804, %805 : vector<8x128xf32>
    %807 = arith.mulf %796, %729 : vector<8x128xf32>
    %808 = arith.mulf %788, %798 : vector<8x128xf32>
    %809 = arith.addf %807, %808 : vector<8x128xf32>
    %810 = math.tanh %809 : vector<8x128xf32>
    %811 = arith.mulf %806, %810 : vector<8x128xf32>
    %c1_i32_244 = arith.constant 1 : i32
    %812 = vector.broadcast %c1_i32_244 : i32 to vector<8x1xi32>
    %813 = arith.subi %3, %812 : vector<8x1xi32>
    %814 = vector.broadcast %740 : i32 to vector<8x1xi32>
    %815 = arith.cmpi eq, %813, %814 : vector<8x1xi32>
    %816 = vector.shape_cast %815 : vector<8x1xi1> to vector<8x1xi1>
    %817 = vector.broadcast %816 : vector<8x1xi1> to vector<8x128xi1>
    %818 = arith.select %817, %811, %738 : vector<8x128xi1>, vector<8x128xf32>
    %c0_245 = arith.constant 0 : index
    %c0_246 = arith.constant 0 : index
    %819 = vector.load %arg12[%c0_245, %c0_246] : memref<8x512xf32, #tpu.memory_space<vmem>>, vector<8x512xf32>
    tpu.vector_store %arg12[%c0_245, %c0_246], %775 {strides = array<i32>} : memref<8x512xf32, #tpu.memory_space<vmem>>, vector<8x512xf32>,
    %c0_247 = arith.constant 0 : index
    %c0_248 = arith.constant 0 : index
    %820 = vector.load %arg13[%c0_247, %c0_248] : memref<8x128xf32, #tpu.memory_space<vmem>>, vector<8x128xf32>
    tpu.vector_store %arg13[%c0_247, %c0_248], %771 {strides = array<i32>} : memref<8x128xf32, #tpu.memory_space<vmem>>, vector<8x128xf32>,
    %c0_249 = arith.constant 0 : index
    %c0_250 = arith.constant 0 : index
    %821 = vector.load %arg14[%c0_249, %c0_250] : memref<8x128xf32, #tpu.memory_space<vmem>>, vector<8x128xf32>
    tpu.vector_store %arg14[%c0_249, %c0_250], %811 {strides = array<i32>} : memref<8x128xf32, #tpu.memory_space<vmem>>, vector<8x128xf32>,
    %c0_251 = arith.constant 0 : index
    %c0_252 = arith.constant 0 : index
    %822 = vector.load %arg15[%c0_251, %c0_252] : memref<8x128xf32, #tpu.memory_space<vmem>>, vector<8x128xf32>
    tpu.vector_store %arg15[%c0_251, %c0_252], %809 {strides = array<i32>} : memref<8x128xf32, #tpu.memory_space<vmem>>, vector<8x128xf32>,
    %c0_253 = arith.constant 0 : index
    %c0_254 = arith.constant 0 : index
    %823 = vector.load %arg16[%c0_253, %c0_254] : memref<8x128xf32, #tpu.memory_space<vmem>>, vector<8x128xf32>
    tpu.vector_store %arg16[%c0_253, %c0_254], %818 {strides = array<i32>} : memref<8x128xf32, #tpu.memory_space<vmem>>, vector<8x128xf32>,
    %c1_i32_255 = arith.constant 1 : i32
    %824 = arith.cmpi eq, %arg1, %c1_i32_255 : i32
    %825 = arith.extui %824 : i1 to i32
    %c0_i32_256 = arith.constant 0 : i32
    %826 = arith.cmpi ne, %825, %c0_i32_256 : i32
    scf.if %826 {
      %c0_257 = arith.constant 0 : index
      %c0_258 = arith.constant 0 : index
      %827 = vector.load %arg9[%c0_257, %c0_258] : memref<128x128xf32, #tpu.memory_space<vmem>>, vector<128x128xf32>
      %cst_259 = arith.constant dense<0.000000e+00> : vector<8x128xf32>
      %828 = tpu.matmul %818, %827, %cst_259 {dimension_numbers = #tpu.dot_dimension_numbers<[1], [0], [0], [1], [0, 0, 1, 1], [], []>} : vector<8x128xf32>, vector<128x128xf32>, vector<8x128xf32> -> vector<8x128xf32>
      %c0_260 = arith.constant 0 : index
      %c0_261 = arith.constant 0 : index
      %829 = vector.load %arg10[%c0_260, %c0_261] : memref<1x128xf32, #tpu.memory_space<vmem>>, vector<1x128xf32>
      %830 = vector.broadcast %829 : vector<1x128xf32> to vector<8x128xf32>
      %831 = arith.addf %828, %830 : vector<8x128xf32>
      %c0_262 = arith.constant 0 : index
      %c0_263 = arith.constant 0 : index
      %832 = vector.load %arg11[%c0_262, %c0_263] : memref<8x128xf32, #tpu.memory_space<vmem>>, vector<8x128xf32>
      tpu.vector_store %arg11[%c0_262, %c0_263], %831 {strides = array<i32>} : memref<8x128xf32, #tpu.memory_space<vmem>>, vector<8x128xf32>,
    } else {
    }
    return
  }
  func.func @transform_0(%arg0: i32, %arg1: i32) -> (i32, i32, i32) {
    %c0_i32 = arith.constant 0 : i32
    %c0_i32_0 = arith.constant 0 : i32
    return %arg1, %arg0, %c0_i32 : i32, i32, i32
  }
  func.func @transform_1(%arg0: i32, %arg1: i32) -> (i32, i32) {
    %c0_i32 = arith.constant 0 : i32
    %c0_i32_0 = arith.constant 0 : i32
    return %arg0, %c0_i32 : i32, i32
  }
  func.func @transform_2(%arg0: i32, %arg1: i32) -> (i32, i32) {
    %c0_i32 = arith.constant 0 : i32
    %c0_i32_0 = arith.constant 0 : i32
    %c0_i32_1 = arith.constant 0 : i32
    return %c0_i32, %c0_i32_0 : i32, i32
  }
  func.func @transform_3(%arg0: i32, %arg1: i32) -> (i32, i32) {
    %c0_i32 = arith.constant 0 : i32
    %c0_i32_0 = arith.constant 0 : i32
    %c0_i32_1 = arith.constant 0 : i32
    return %c0_i32, %c0_i32_0 : i32, i32
  }
  func.func @transform_4(%arg0: i32, %arg1: i32) -> (i32, i32) {
    %c0_i32 = arith.constant 0 : i32
    %c0_i32_0 = arith.constant 0 : i32
    %c0_i32_1 = arith.constant 0 : i32
    return %c0_i32, %c0_i32_0 : i32, i32
  }
  func.func @transform_5(%arg0: i32, %arg1: i32) -> (i32, i32) {
    %c0_i32 = arith.constant 0 : i32
    %c0_i32_0 = arith.constant 0 : i32
    %c0_i32_1 = arith.constant 0 : i32
    return %c0_i32, %c0_i32_0 : i32, i32
  }
  func.func @transform_6(%arg0: i32, %arg1: i32) -> (i32, i32) {
    %c0_i32 = arith.constant 0 : i32
    %c0_i32_0 = arith.constant 0 : i32
    %c0_i32_1 = arith.constant 0 : i32
    return %c0_i32, %c0_i32_0 : i32, i32
  }
  func.func @transform_7(%arg0: i32, %arg1: i32) -> (i32, i32) {
    %c0_i32 = arith.constant 0 : i32
    %c0_i32_0 = arith.constant 0 : i32
    %c0_i32_1 = arith.constant 0 : i32
    return %c0_i32, %c0_i32_0 : i32, i32
  }
  func.func @transform_8(%arg0: i32, %arg1: i32) -> (i32, i32) {
    %c0_i32 = arith.constant 0 : i32
    %c0_i32_0 = arith.constant 0 : i32
    %c0_i32_1 = arith.constant 0 : i32
    return %c0_i32, %c0_i32_0 : i32, i32
  }
  func.func @transform_9(%arg0: i32, %arg1: i32) -> (i32, i32) {
    %c0_i32 = arith.constant 0 : i32
    %c0_i32_0 = arith.constant 0 : i32
    return %arg0, %c0_i32 : i32, i32
  }
}

</mosaic_0001>

<bundles_post_ra>
// kernel: tpu_custom_call.1
= control target key start
LH: loop header
LB: loop body
LE: loop exit
PB: predicated region body
PF: predicated region fallthrough
CT: control target
= control target key end

     0   :  { %s10881_s0 = inlined_call_operand.hbm [shape: f32[20,16,128], index: 0, kind: input, shape index: {}]   ;;  %s10882_s1 = inlined_call_operand.vmem [shape: s32[16,1], index: 1, kind: input, shape index: {}]   ;;  %s10883_s2 = inlined_call_operand.hbm [shape: f32[128,512], index: 2, kind: input, shape index: {}]   ;;  %s10884_s3 = inlined_call_operand.hbm [shape: f32[128,1024], index: 3, kind: input, shape index: {}]   ;;  %s10885_s4 = inlined_call_operand.hbm [shape: f32[128,512], index: 4, kind: input, shape index: {}]   ;;  %s10886_s5 = inlined_call_operand.vmem [shape: f32[1,512], index: 5, kind: input, shape index: {}]   ;;  %s10887_s6 = inlined_call_operand.vmem [shape: f32[1,512], index: 6, kind: input, shape index: {}]   ;;  %s10888_s7 = inlined_call_operand.hbm [shape: f32[128,128], index: 7, kind: input, shape index: {}]   ;;  %s10889_s8 = inlined_call_operand.vmem [shape: f32[1,128], index: 8, kind: input, shape index: {}]   ;;  %s10890_s9 = inlined_call_operand.hbm [shape: f32[16,128], index: 9, kind: output, shape index: {}]  }
   0x1   :  { %11132 = sst [smem:[#allocation126_spill]] %s10882_s1 }
   0x2   :  { %11133 = sst [smem:[#allocation127_spill]] %s10883_s2 }
   0x3   :  { %11134 = sst [smem:[#allocation128_spill]] %s10884_s3 }
   0x4   :  { %11135 = sst [smem:[#allocation129_spill]] %s10885_s4 }
   0x5   :  { %11136 = sst [smem:[#allocation130_spill]] %s10886_s5 }
   0x6   :  { %11137 = sst [smem:[#allocation131_spill]] %s10887_s6 }
   0x7   :  { %11138 = sst [smem:[#allocation132_spill]] %s10888_s7 }
   0x8   :  { %11139 = sst [smem:[#allocation133_spill]] %s10889_s8 }
   0x9   :  { %11140 = sst [smem:[#allocation134_spill]] %s10890_s9 }
   0xa   :  { %14 = vsyncpa [#allocation8], 0 }
   0xb   :  { %16 = vsyncpa [#allocation8 + $0x1], 0 }
   0xc   :  { %17 = vsyncpa [#allocation11], 0 }
   0xd   :  { %18 = vsyncpa [#allocation14], 0 }
   0xe   :  { %19 = vsyncpa [#allocation9], 0 }
   0xf   :  { %21 = vsyncpa [#allocation9 + $0x1], 0  ;;  %s9009_s30 = smov 0   ;;  %s9011_s10 = smov 0  }
  0x10   :  { %s9013_s11 = smov 0   ;;  %s9015_s12 = smov 0  }
  0x11   :  { %s9017_s13 = smov 0   ;;  %s9019_s14 = smov 0  }
  0x12   :  { %s9021_s15 = smov 0   ;;  %s9023_s16 = smov 0  }
  0x13   :  { %s9025_s17 = smov 0   ;;  %s9027_s18 = smov 0  }
  0x14   :  { %s9029_s19 = smov 0  }
  0x15 LB: > { %11141 = sst [smem:[#allocation21_spill]] %s8898_s30  ;;  %s6108_s20 = sadd.s32 4294967295, %s8938_s19   ;;  %s8938_s19 = sphi %s9029_s19, %s27_s19   ;;  %s8934_s18 = sphi %s9027_s18, %s11840_s18   ;;  %s8930_s17 = sphi %s9025_s17, %s11839_s17   ;;  %s8926_s16 = sphi %s9023_s16, %s11838_s16   ;;  %s8922_s15 = sphi %s9021_s15, %s11837_s15   ;;  %s8918_s14 = sphi %s9019_s14, %s11836_s14   ;;  %s8914_s13 = sphi %s9017_s13, %s11835_s13   ;;  %s8910_s12 = sphi %s9015_s12, %s11834_s12   ;;  %s8906_s11 = sphi %s9013_s11, %s11833_s11   ;;  %s8902_s10 = sphi %s9011_s10, %s11832_s10   ;;  %s8898_s30 = sphi %s9009_s30, %s11831_s30  }
  0x16   : > { %11142 = sst [smem:[#allocation22_spill]] %s8922_s15  ;;  %s6109_s21 = sadd.s32 4294967294, %s8938_s19  }
  0x17   : > { %11143 = sst [smem:[#allocation23_spill]] %s8926_s16  ;;  %p61_p0 = scmp.ne.s32.totalorder %s8914_s13, %s8910_s12 }
  0x18   : > { %p9065_p1 = scmp.eq.s32.totalorder %s6108_s20, 0  ;;  %p257_p2 = scmp.ne.s32.totalorder %s8906_s11, %s8902_s10 }
  0x19   : > { %p258_p4 = scmp.eq.s32.totalorder %s6108_s20, 3  ;;  %p263_p5 = scmp.ne.s32.totalorder %s8902_s10, %s8898_s30 }
  0x1a   : > { %s11144_s22 = scalar_select %p9065_p1, 1, 0 }
  0x1b   : > { %p9074_p3 = por %p9065_p1, %p61_p0  ;;  %p264_p6 = scmp.eq.s32.totalorder %s6109_s21, 3 }
  0x1c   : > { %p9080_p7 = por %p258_p4, %p257_p2  ;;  %p6110_p8 = scmp.ge.s32.totalorder %s8938_s19, 1 }
  0x1d   : > { %s11145_s24 = scalar_select %p9074_p3, 1, 0 }
  0x1e   : > { %s11146_s25 = scalar_select %p9080_p7, 1, 0 }
  0x1f   : > { %p9085_p9 = por %p264_p6, %p263_p5  ;;  %p271_p10 = scmp.lt.s32.totalorder %s8938_s19, 5 }
  0x20   : > { %11147 = sst [smem:[#allocation24_spill]] %s11146_s25  ;;  %s8940_s28 = smov [#allocation10]  }
  0x21   : > { %s11148_s26 = scalar_select %p9085_p9, 1, 0 }
  0x22   : > { %p9090_p11 = pnand %p6110_p8, %p271_p10  ;;  %s283_s29 = sshll.u32 %s8940_s28, 4  ;;  %s9094_s29 = int_to_ptr.vmem [resolvable:$true] %s283_s29 }
  0x23   : > { %11149 = sst [smem:[#allocation25_spill]] %s11148_s26  ;;  %s8941_s20 = smov [#allocation13]  }
  0x24   : > { %s11150_s27 = scalar_select %p9090_p11, 1, 0 }
  0x25   : > { %p8328_p12 = pneg %p9090_p11  ;;  %s309_s21 = sshll.u32 %s8941_s20, 4  ;;  %s9104_s21 = int_to_ptr.vmem [resolvable:$true] %s309_s21 }
  0x26   : > { %s8942_s23 = smov [#allocation12]   ;;  %s11152_s2 = sld [smem:[#allocation127_spill]] }
  0x27   : > { %p9100_p13 = pnand %p8328_p12, %p9065_p1  ;;  %s9106_s26 = sshll.u32 %s8942_s23, 4  ;;  %s297_s26 = int_to_ptr.vmem [resolvable:$true] %s9106_s26 }
  0x29   : > { %p9116_p2 = pneg %p9100_p13 }
  0x2c   : > { %s8666_s28 = scalar_lea.hbm %s11152_s2, 8192 }
  0x2d   : > { %p8667_p0 = scmp.ne.s32.totalorder %s11152_s2, %s8666_s28  ;;  %p8673_p6 = scmp.lt.u32.totalorder %s8666_s28, %s11152_s2 }
  0x2f   : > { %p8669_p4 = pnand %p9116_p2, %p8667_p0 }
  0x31   : > { %p8670_p5 = pneg %p8669_p4 }
  0x33   : > { %p8675_p8 = pnand %p8673_p6, %p8670_p5 }
  0x35   : > { %8678 = shalt.err (!%p8675_p8)
}
  0x36   : > { %s8679_s8 = scalar_lea.vmem %s9094_s29, 8192  ;;  %p8687_p7 = scmp.lt.s32.totalorder %s9094_s29, %s9094_s29 }
  0x37   : > { %p8680_p10 = scmp.ne.s32.totalorder %s9094_s29, %s8679_s8  ;;  %p8688_p1 = scmp.lt.s32.totalorder %s8679_s8, %s8679_s8 }
  0x39   : > { %p8682_p12 = pnand %p8680_p10, %p9116_p2  ;;  %p8689_p0 = por %p8688_p1, %p8687_p7 }
  0x3b   : > { %p8683_p9 = pneg %p8682_p12 }
  0x3d   : > { %p8690_p4 = pnand %p8689_p0, %p8683_p9 }
  0x3f   : > { %8693 = shalt.err (!%p8690_p4)
}
  0x40   : > { %s8943_s9 = smov 512   ;;  %s8944_s30 = smov 32  }
  0x41   : > { %8331 = dma.hbm_to_vmem [thread:$0]  (!%p9100_p13), %s11152_s2, 8192, %s9094_s29, [#allocation11], %s8943_s9, %s8943_s9, %s8944_s30  }
  0x42   : > { %s11154_s4 = sld [smem:[#allocation129_spill]] }
  0x48   : > { %s8694_s5 = scalar_lea.hbm %s11154_s4, 8192 }
  0x49   : > { %p8695_p1 = scmp.ne.s32.totalorder %s11154_s4, %s8694_s5  ;;  %p8701_p5 = scmp.lt.u32.totalorder %s8694_s5, %s11154_s4 }
  0x4b   : > { %p8697_p7 = pnand %p8695_p1, %p9116_p2 }
  0x4d   : > { %p8698_p9 = pneg %p8697_p7 }
  0x4f   : > { %p8703_p6 = pnand %p8701_p5, %p8698_p9 }
  0x51   : > { %8706 = shalt.err (!%p8703_p6)
}
  0x52   : > { %s8707_s29 = scalar_lea.vmem %s9104_s21, 8192  ;;  %p8715_p0 = scmp.lt.s32.totalorder %s9104_s21, %s9104_s21 }
  0x53   : > { %p8708_p8 = scmp.ne.s32.totalorder %s9104_s21, %s8707_s29  ;;  %p8716_p4 = scmp.lt.s32.totalorder %s8707_s29, %s8707_s29 }
  0x55   : > { %p8710_p10 = pnand %p8708_p8, %p9116_p2  ;;  %p8717_p1 = por %p8716_p4, %p8715_p0 }
  0x57   : > { %p8711_p12 = pneg %p8710_p10 }
  0x59   : > { %p8718_p7 = pnand %p8717_p1, %p8711_p12 }
  0x5b   : > { %8721 = shalt.err (!%p8718_p7)
}
  0x5c   : > { %8337 = dma.hbm_to_vmem [thread:$0]  (!%p9100_p13), %s11154_s4, 8192, %s9104_s21, [#allocation14], %s8943_s9, %s8943_s9, %s8944_s30  }
  0x5d   : > { %s11155_s3 = sld [smem:[#allocation128_spill]] }
  0x63   : > { %s8722_s25 = scalar_lea.hbm %s11155_s3, 16384 }
  0x64   : > { %p8723_p9 = scmp.ne.s32.totalorder %s11155_s3, %s8722_s25  ;;  %p8729_p8 = scmp.lt.u32.totalorder %s8722_s25, %s11155_s3 }
  0x66   : > { %p8725_p5 = pnand %p8723_p9, %p9116_p2 }
  0x68   : > { %p8726_p6 = pneg %p8725_p5 }
  0x6a   : > { %p8731_p10 = pnand %p8729_p8, %p8726_p6 }
  0x6c   : > { %8734 = shalt.err (!%p8731_p10)
}
  0x6d   : > { %s8735_s29 = scalar_lea.vmem %s297_s26, 16384  ;;  %p8743_p1 = scmp.lt.s32.totalorder %s297_s26, %s297_s26 }
  0x6e   : > { %p8736_p12 = scmp.ne.s32.totalorder %s297_s26, %s8735_s29  ;;  %p8744_p7 = scmp.lt.s32.totalorder %s8735_s29, %s8735_s29 }
  0x70   : > { %p8738_p0 = pnand %p8736_p12, %p9116_p2  ;;  %p8745_p3 = por %p8744_p7, %p8743_p1 }
  0x72   : > { %p8739_p4 = pneg %p8738_p0 }
  0x74   : > { %p8746_p11 = pnand %p8745_p3, %p8739_p4 }
  0x76   : > { %8749 = shalt.err (!%p8746_p11)
}
  0x77   : > { %s8945_s21 = smov 1024   ;;  %s8946_s9 = smov 64  }
  0x78   : > { %8334 = dma.hbm_to_vmem [thread:$0]  (!%p9100_p13), %s11155_s3, 16384, %s297_s26, [#allocation11], %s8945_s21, %s8945_s21, %s8946_s9  }
  0x79   : > { %s8947_s5 = smov [#allocation15]   ;;  %s11156_s7 = sld [smem:[#allocation132_spill]] }
  0x7a   : > { %s328_s15 = sshll.u32 %s8947_s5, 4  ;;  %s329_s15 = int_to_ptr.vmem [resolvable:$true] %s328_s15 }
  0x7f   : > { %s8750_s28 = scalar_lea.hbm %s11156_s7, 2048 }
  0x80   : > { %p8751_p3 = scmp.ne.s32.totalorder %s11156_s7, %s8750_s28  ;;  %p8757_p5 = scmp.lt.u32.totalorder %s8750_s28, %s11156_s7 }
  0x82   : > { %p8753_p11 = pnand %p8751_p3, %p9116_p2 }
  0x84   : > { %p8754_p9 = pneg %p8753_p11 }
  0x86   : > { %p8759_p6 = pnand %p8757_p5, %p8754_p9 }
  0x88   : > { %8762 = shalt.err (!%p8759_p6)
}
  0x89   : > { %s8763_s26 = scalar_lea.vmem %s329_s15, 2048  ;;  %p8771_p0 = scmp.lt.s32.totalorder %s329_s15, %s329_s15 }
  0x8a   : > { %p8764_p8 = scmp.ne.s32.totalorder %s329_s15, %s8763_s26  ;;  %p8772_p4 = scmp.lt.s32.totalorder %s8763_s26, %s8763_s26 }
  0x8c   : > { %p8766_p10 = pnand %p8764_p8, %p9116_p2  ;;  %p8773_p1 = por %p8772_p4, %p8771_p0 }
  0x8e   : > { %p8767_p12 = pneg %p8766_p10 }
  0x90   : > { %p8774_p7 = pnand %p8773_p1, %p8767_p12 }
  0x92   : > { %8777 = shalt.err (!%p8774_p7)
}
  0x93   : > { %s10903_s21 = smov 128   ;;  %s10904_s6 = smov 8  }
  0x94   : > { %8340 = dma.hbm_to_vmem [thread:$0]  (!%p9100_p13), %s11156_s7, 2048, %s329_s15, [#allocation14], %s10903_s21, %s10903_s21, %s10904_s6  }
  0x95   : > { %s36_s1 = sadd.s32 1, %s8930_s17  ;;  %s39_s5 = sadd.s32 1, %s8934_s18 }
  0x96   : > { %p37_p2 = scmp.ge.s32.totalorder %s36_s1, 2  ;;  %s48_s16 = sadd.s32 1, %s8918_s14 }
  0x97   : > { %p55_p3 = scmp.ne.s32.totalorder %s8918_s14, %s8914_s13  ;;  %p56_p11 = scmp.eq.s32.totalorder %s8938_s19, 0 }
  0x98   : > { %s11842_s1 = smov (%p37_p2, %s36_s1), 0  ;;  %s11844_s5 = smov (!%p37_p2, %s39_s5), %s8934_s18 }
  0x99   : > { %s43_s12 = ssub.s32 %s8930_s17, %s11842_s1  ;;  %p9211_p9 = por %p56_p11, %p55_p3 }
  0x9a   : > { %p41_p13 = scmp.ge.s32.totalorder %s11844_s5, 2  ;;  %p8353_p5 = scmp.lt.s32.totalorder %s8938_s19, 4 }
  0x9b   : > { %s345_s15 = sand.u32 1, %s8918_s14   ;;  %s6133_s28 = smul.u32 20, %s8930_s17 }
  0x9c   : > { %s11846_s5 = smov (%p41_p13, %s11844_s5), 0  ;;  %s8306_s20 = smul.u32 80, %s345_s15 }
  0x9d   : > { %s44_s23 = ssub.s32 %s8934_s18, %s11846_s5  ;;  %s355_s8 = sadd.s32 %s8934_s18, %s6133_s28 }
  0x9e   : > { %s45_s29 = sor.u32 %s44_s23, %s43_s12  ;;  %p245_p6 = scmp.eq.s32.totalorder %s44_s23, 0 }
  0x9f   : > { %p46_p8 = scmp.eq.s32.totalorder %s45_s29, 0  ;;  %s11158_s26 = sadd.s32 1, %s8906_s11 }
  0xa0   : > { %s9226_s9 = scalar_select %p245_p6, %s8906_s11, %s11158_s26  }
  0xa1   : > { %s9229_s30 = scalar_select %p46_p8, %s8918_s14, %s48_s16  }
  0xa2   : > { %s6117_s21 = sshll.u32 %s355_s8, 7  ;;  %s349_s6 = scalar_lea.vmem [#allocation7], %s8306_s20 }
  0xa3   : > { %s358_s2 = sshll.u32 %s349_s6, 4  ;;  %s9234_s7 = scalar_lea.hbm %s10881_s0, %s6117_s21  ;;  %s9236_s2 = int_to_ptr.vmem [resolvable:$true] %s358_s2 }
  0xa4   : > { %p9242_p10 = pnand %p8353_p5, %p9211_p9  ;;  %s9246_s6 = scalar_lea.sflag [#allocation8], %s345_s15 }
  0xa5   : > { %s8778_s16 = scalar_lea.hbm %s9234_s7, 1280  ;;  %s8783_s21 = scalar_lea.hbm %s10881_s0, 5120 }
  0xa6   : > { %p8779_p12 = scmp.ne.s32.totalorder %s9234_s7, %s8778_s16  ;;  %p8780_p0 = pneg %p9242_p10 }
  0xa7   : > { %p8784_p7 = scmp.lt.u32.totalorder %s9234_s7, %s10881_s0  ;;  %p8785_p2 = scmp.lt.u32.totalorder %s8783_s21, %s8778_s16 }
  0xa8   : > { %p8781_p4 = pnand %p8780_p0, %p8779_p12  ;;  %p8787_p11 = scmp.lt.u32.totalorder %s8778_s16, %s9234_s7 }
  0xa9   : > { %p8786_p3 = por %p8785_p2, %p8784_p7 }
  0xaa   : > { %p8782_p1 = pneg %p8781_p4 }
  0xab   : > { %p8788_p9 = por %p8787_p11, %p8786_p3 }
  0xad   : > { %p8789_p13 = pnand %p8788_p9, %p8782_p1 }
  0xaf   : > { %8792 = shalt.err (!%p8789_p13)
}
  0xb0   : > { %s8793_s15 = scalar_lea.vmem %s9236_s2, 1280  ;;  %s8950_s20 = smov [#allocation7]  }
  0xb1   : > { %p8794_p5 = scmp.ne.s32.totalorder %s9236_s2, %s8793_s15  ;;  %s8798_s23 = sshll.u32 %s8950_s20, 4  ;;  %s8799_s23 = int_to_ptr.vmem [resolvable:$false] %s8798_s23 }
  0xb2   : > { %s8800_s8 = scalar_lea.vmem %s8799_s23, 2560  ;;  %p8801_p12 = scmp.lt.s32.totalorder %s9236_s2, %s8799_s23 }
  0xb3   : > { %p8796_p6 = pnand %p8794_p5, %p8780_p0  ;;  %p8802_p4 = scmp.lt.s32.totalorder %s8800_s8, %s8793_s15 }
  0xb5   : > { %p8797_p8 = pneg %p8796_p6  ;;  %p8803_p7 = por %p8802_p4, %p8801_p12 }
  0xb7   : > { %p8804_p2 = pnand %p8803_p7, %p8797_p8 }
  0xb9   : > { %8807 = shalt.err (!%p8804_p2)
}
  0xba   : > { %s8951_s29 = smov 256   ;;  %s11160_s26 = smov 8  }
  0xbb   : > { %s11161_s16 = smov 128   ;;  %p11162_p0 = scmp.ne.s32.totalorder %s11150_s27, 0 }
  0xbc   : > { %8344 = dma.hbm_to_vmem [thread:$0]  (!%p9242_p10), %s9234_s7, 1280, %s9236_s2, %s9246_s6, %s8951_s29, %s11161_s16, %s11160_s26  }
  0xbd   : > { %377 = sbr.rel (%p11162_p0) target bundleno = 3315 (0xcf3), region = 56 }
  0xc4   : > { %s379_s3 = sand.u32 1, %s8914_s13   ;;  %p11163_p1 = scmp.ne.s32.totalorder %s11145_s24, 0 }
  0xc5   : > { %s8307_s4 = smul.u32 80, %s379_s3  ;;  %s380_s21 = scalar_lea.sflag [#allocation8], %s379_s3 }
  0xc7   : > { %s9279_s25 = scalar_lea.vmem [#allocation7], %s8307_s4 }
  0xc8   : > { %8881 = dma.done.wait (%p11163_p1), %s380_s21, 1280  }
  0xc9   : > { %8883 = vsyncadd (%p11163_p1), %s380_s21, 4294966016  ;;  %p11164_p3 = scmp.ne.s32.totalorder %s11144_s22, 0 }
  0xcb   : > { %8885 = dma.done.wait (%p11164_p3), [#allocation11], 24576  }
  0xcc   : > { %8887 = vsyncadd (%p11164_p3), [#allocation11], 4294942720 }
  0xcd   : > { %8889 = dma.done.wait (%p11164_p3), [#allocation14], 10240  }
  0xce   : > { %8891 = vsyncadd (%p11164_p3), [#allocation14], 4294957056  ;;  %s11165_s2 = sld [smem:[#allocation23_spill]]  ;;  %s435_s7 = sand.u32 1, %s8902_s10  }
  0xcf   : > { %s9297_s24 = sshll.u32 %s435_s7, 3  ;;  %s11166_s28 = sld [smem:[#allocation126_spill]] }
  0xd0   : > { %s437_s20 = scalar_lea.vmem [#allocation16], %s9297_s24  ;;  %s11167_s22 = sld [smem:[#allocation22_spill]] }
  0xd4   : > { %p439_p10 = scmp.lt.s32.totalorder %s11165_s2, 1 }
  0xd6   : > { %s11848_s2 = smov (!%p439_p10, %s11165_s2), 1  ;;  %p6125_p11 = scmp.ne.s32.totalorder %s11167_s22, 0 }
  0xd7   : > { %s6124_s27 = sshll.u32 %s11848_s2, 3  ;;  %v8952_v0 = vmov (!%p6125_p11), 0.0  }
  0xd8   : > { %s9303_s15 = scalar_lea.vmem %s11166_s28, %s6124_s27  ;;  %446 = sbr.rel (%p6125_p11) target bundleno = 223 (0xdf), region = 80  ;;  %447 = vst [vmem:[#allocation2] sm:$0xff] (!%p6125_p11), %v8952_v0  ;;  %448 = vst [vmem:[#allocation2 + $0x8] sm:$0xff] (!%p6125_p11), %v8952_v0 }
  0xd9   : > { %449 = vst [vmem:[#allocation2 + $0x10] sm:$0xff] (!%p6125_p11), %v8952_v0  ;;  %450 = vst [vmem:[#allocation2 + $0x18] sm:$0xff] (!%p6125_p11), %v8952_v0 }
  0xda   : > { %451 = vst [vmem:[#allocation3] sm:$0xff] (!%p6125_p11), %v8952_v0  ;;  %452 = vst [vmem:[#allocation4] sm:$0xff] (!%p6125_p11), %v8952_v0 }
  0xdb   : > { %453 = vst [vmem:[#allocation5] sm:$0xff] (!%p6125_p11), %v8952_v0  ;;  %454 = vst [vmem:[#allocation6] sm:$0xff] (!%p6125_p11), %v8952_v0 }
  0xdf PF: > { %v660_v1 = vld [vmem:[#allocation10 + $0x8] sm:$0xff]  ;;  %v659_v3 = vld [vmem:[#allocation10] sm:$0xff]  ;;  %v10911_v8 = vmov 0.0   ;;  %v662_v13 = vld [vmem:[#allocation10 + $0x18] sm:$0xff]  ;;  %s11200_s23 = sld [smem:[#allocation22_spill]]  ;;  %s11205_s16 = sld [smem:[#allocation130_spill]] }
  0xe0   : > { %v664_v2 = vld [vmem:[#allocation10 + $0x28] sm:$0xff]  ;;  %v663_v5 = vld [vmem:[#allocation10 + $0x20] sm:$0xff]  ;;  %809 = vmatprep.mubr.f32.mxu0 %v10911_v8  ;;  %934 = vmatprep.mubr.f32.mxu1 %v10911_v8  ;;  %v666_v14 = vld [vmem:[#allocation10 + $0x38] sm:$0xff] }
  0xe1   : > { %v6186_v4 = vpack.c.bf16 %v664_v2, %v660_v1  ;;  %v668_v6 = vld [vmem:[#allocation10 + $0x48] sm:$0xff]  ;;  %v6188_v9 = vpack.c.bf16 %v663_v5, %v659_v3  ;;  %v667_v11 = vld [vmem:[#allocation10 + $0x40] sm:$0xff]  ;;  %v661_v15 = vld [vmem:[#allocation10 + $0x10] sm:$0xff]  ;;  %v6218_v18 = vpack.c.bf16 %v666_v14, %v662_v13 }
  0xe2   : > { %v672_v7 = vld [vmem:[#allocation10 + $0x68] sm:$0xff]  ;;  %v671_v12 = vld [vmem:[#allocation10 + $0x60] sm:$0xff]  ;;  %v665_v16 = vld [vmem:[#allocation10 + $0x30] sm:$0xff] }
  0xe3   : > { %v6190_v10 = vpack.c.bf16 %v672_v7, %v668_v6  ;;  %6187 = vmatprep.subr.bf16.mxu0 %v6186_v4  ;;  %v6192_v17 = vpack.c.bf16 %v671_v12, %v667_v11  ;;  %v6220_v19 = vpack.c.bf16 %v665_v16, %v661_v15  ;;  %v676_v20 = vld [vmem:[#allocation10 + $0x88] sm:$0xff]  ;;  %v675_v22 = vld [vmem:[#allocation10 + $0x80] sm:$0xff]  ;;  %v670_v25 = vld [vmem:[#allocation10 + $0x58] sm:$0xff]  ;;  %6219 = vmatprep.subr.bf16.mxu1 %v6218_v18 }
  0xe4   : > { %6189 = vmatpush1.bf16.msra.mxu0 %v6188_v9  ;;  %v680_v21 = vld [vmem:[#allocation10 + $0xa8] sm:$0xff]  ;;  %v679_v24 = vld [vmem:[#allocation10 + $0xa0] sm:$0xff]  ;;  %v674_v26 = vld [vmem:[#allocation10 + $0x78] sm:$0xff] }
  0xe5   : > { %6191 = vmatprep.subr.bf16.mxu0 %v6190_v10  ;;  %v6194_v23 = vpack.c.bf16 %v680_v21, %v676_v20  ;;  %v6222_v27 = vpack.c.bf16 %v674_v26, %v670_v25  ;;  %v669_v28 = vld [vmem:[#allocation10 + $0x50] sm:$0xff]  ;;  %v684_v30 = vld [vmem:[#allocation10 + $0xc8] sm:$0xff]  ;;  %6221 = vmatpush1.bf16.msra.mxu1 %v6220_v19  ;;  %v6196_v33 = vpack.c.bf16 %v679_v24, %v675_v22  ;;  %v678_v34 = vld [vmem:[#allocation10 + $0x98] sm:$0xff]  ;;  %s9443_s8 = smul.u32 10, %s11200_s23  ;;  %p6127_p9 = scmp.ne.s32.totalorder %s11200_s23, 1 }
  0xe6   : > { %v673_v29 = vld [vmem:[#allocation10 + $0x70] sm:$0xff]  ;;  %v688_v32 = vld [vmem:[#allocation10 + $0xe8] sm:$0xff]  ;;  %v682_v35 = vld [vmem:[#allocation10 + $0xb8] sm:$0xff]  ;;  %s11822_s26 = sld [smem:[#allocation133_spill]] (!%p6127_p9) }
  0xe7   : > { %v6224_v31 = vpack.c.bf16 %v673_v29, %v669_v28  ;;  %6223 = vmatprep.subr.bf16.mxu1 %v6222_v27  ;;  %v677_v36 = vld [vmem:[#allocation10 + $0x90] sm:$0xff]  ;;  %v6198_v37 = vpack.c.bf16 %v688_v32, %v684_v30  ;;  %v683_v38 = vld [vmem:[#allocation10 + $0xc0] sm:$0xff]  ;;  %v6226_v40 = vpack.c.bf16 %v682_v35, %v678_v34  ;;  %v692_v42 = vld [vmem:[#allocation10 + $0x108] sm:$0xff]  ;;  %s1508_s3 = sadd.s32 1, %s9443_s8  ;;  %s1991_s2 = sadd.s32 2, %s9443_s8 }
  0xe8   : > { %6193 = vmatpush1.bf16.msra.mxu0 %v6192_v17  ;;  %v687_v39 = vld [vmem:[#allocation10 + $0xe0] sm:$0xff]  ;;  %v681_v41 = vld [vmem:[#allocation10 + $0xb0] sm:$0xff]  ;;  %v696_v43 = vld [vmem:[#allocation10 + $0x128] sm:$0xff]  ;;  %s2474_s27 = sadd.s32 3, %s9443_s8  ;;  %s2957_s12 = sadd.s32 4, %s9443_s8 }
  0xe9   : > { %6195 = vmatprep.subr.bf16.mxu0 %v6194_v23  ;;  %v686_v44 = vld [vmem:[#allocation10 + $0xd8] sm:$0xff]  ;;  %6225 = vmatpush1.bf16.msra.mxu1 %v6224_v31  ;;  %v6228_v45 = vpack.c.bf16 %v681_v41, %v677_v36  ;;  %v6200_v47 = vpack.c.bf16 %v687_v39, %v683_v38  ;;  %v691_v48 = vld [vmem:[#allocation10 + $0x100] sm:$0xff]  ;;  %v685_v50 = vld [vmem:[#allocation10 + $0xd0] sm:$0xff]  ;;  %v6202_v52 = vpack.c.bf16 %v696_v43, %v692_v42  ;;  %s3440_s6 = sadd.s32 5, %s9443_s8  ;;  %s3923_s28 = sadd.s32 6, %s9443_s8 }
  0xea   : > { %v690_v46 = vld [vmem:[#allocation10 + $0xf8] sm:$0xff]  ;;  %6227 = vmatprep.subr.bf16.mxu1 %v6226_v40  ;;  %v689_v51 = vld [vmem:[#allocation10 + $0xf0] sm:$0xff]  ;;  %v695_v53 = vld [vmem:[#allocation10 + $0x120] sm:$0xff]  ;;  %s4889_s22 = sadd.s32 8, %s9443_s8  ;;  %s5372_s29 = sadd.s32 9, %s9443_s8 }
  0xeb   : > { %v6230_v49 = vpack.c.bf16 %v690_v46, %v686_v44  ;;  %v694_v54 = vld [vmem:[#allocation10 + $0x118] sm:$0xff]  ;;  %v700_v56 = vld [vmem:[#allocation10 + $0x148] sm:$0xff]  ;;  %v6232_v58 = vpack.c.bf16 %v689_v51, %v685_v50  ;;  %v6204_v59 = vpack.c.bf16 %v695_v53, %v691_v48  ;;  %v699_v60 = vld [vmem:[#allocation10 + $0x140] sm:$0xff] }
  0xec   : > { %6197 = vmatpush1.bf16.msra.mxu0 %v6196_v33  ;;  %v698_v55 = vld [vmem:[#allocation10 + $0x138] sm:$0xff]  ;;  %v704_v57 = vld [vmem:[#allocation10 + $0x168] sm:$0xff]  ;;  %v693_v62 = vld [vmem:[#allocation10 + $0x110] sm:$0xff] }
  0xed   : > { %6199 = vmatprep.subr.bf16.mxu0 %v6198_v37  ;;  %6229 = vmatpush1.bf16.msra.mxu1 %v6228_v45  ;;  %v6234_v61 = vpack.c.bf16 %v698_v55, %v694_v54  ;;  %v697_v63 = vld [vmem:[#allocation10 + $0x130] sm:$0xff]  ;;  %v6206_v0 = vpack.c.bf16 %v704_v57, %v700_v56  ;;  %v703_v1 = vld [vmem:[#allocation10 + $0x160] sm:$0xff]  ;;  %v702_v2 = vld [vmem:[#allocation10 + $0x158] sm:$0xff] }
  0xee   : > { %6231 = vmatprep.subr.bf16.mxu1 %v6230_v49  ;;  %v706_v3 = vld [vmem:[#allocation10 + $0x178] sm:$0xff]  ;;  %v708_v4 = vld [vmem:[#allocation10 + $0x188] sm:$0xff]  ;;  %v6236_v6 = vpack.c.bf16 %v697_v63, %v693_v62  ;;  %v6208_v7 = vpack.c.bf16 %v703_v1, %v699_v60  ;;  %v707_v9 = vld [vmem:[#allocation10 + $0x180] sm:$0xff] }
  0xef   : > { %v712_v5 = vld [vmem:[#allocation10 + $0x1a8] sm:$0xff]  ;;  %v6238_v10 = vpack.c.bf16 %v706_v3, %v702_v2  ;;  %v701_v11 = vld [vmem:[#allocation10 + $0x150] sm:$0xff]  ;;  %v711_v14 = vld [vmem:[#allocation10 + $0x1a0] sm:$0xff] }
  0xf0   : > { %6201 = vmatpush1.bf16.msra.mxu0 %v6200_v47  ;;  %v705_v12 = vld [vmem:[#allocation10 + $0x170] sm:$0xff]  ;;  %v6210_v13 = vpack.c.bf16 %v712_v5, %v708_v4  ;;  %v710_v15 = vld [vmem:[#allocation10 + $0x198] sm:$0xff]  ;;  %v716_v17 = vld [vmem:[#allocation10 + $0x1c8] sm:$0xff]  ;;  %v6212_v20 = vpack.c.bf16 %v711_v14, %v707_v9 }
  0xf1   : > { %6203 = vmatprep.subr.bf16.mxu0 %v6202_v52  ;;  %6233 = vmatpush1.bf16.msra.mxu1 %v6232_v58  ;;  %v714_v16 = vld [vmem:[#allocation10 + $0x1b8] sm:$0xff]  ;;  %v720_v18 = vld [vmem:[#allocation10 + $0x1e8] sm:$0xff]  ;;  %v6240_v19 = vpack.c.bf16 %v705_v12, %v701_v11  ;;  %v715_v21 = vld [vmem:[#allocation10 + $0x1c0] sm:$0xff] }
  0xf2   : > { %6235 = vmatprep.subr.bf16.mxu1 %v6234_v61  ;;  %v6242_v22 = vpack.c.bf16 %v714_v16, %v710_v15  ;;  %v709_v23 = vld [vmem:[#allocation10 + $0x190] sm:$0xff]  ;;  %v6214_v25 = vpack.c.bf16 %v720_v18, %v716_v17  ;;  %v719_v26 = vld [vmem:[#allocation10 + $0x1e0] sm:$0xff]  ;;  %v718_v27 = vld [vmem:[#allocation10 + $0x1d8] sm:$0xff] }
  0xf3   : > { %v713_v24 = vld [vmem:[#allocation10 + $0x1b0] sm:$0xff]  ;;  %v722_v28 = vld [vmem:[#allocation10 + $0x1f8] sm:$0xff]  ;;  %v457_v29 = vld [vmem:[#allocation12 + $0x8] sm:$0xff]  ;;  %v6216_v32 = vpack.c.bf16 %v719_v26, %v715_v21 }
  0xf4   : > { %6205 = vmatpush1.bf16.msra.mxu0 %v6204_v59  ;;  %v465_v30 = vld [vmem:[#allocation12 + $0x48] sm:$0xff]  ;;  %v6244_v31 = vpack.c.bf16 %v713_v24, %v709_v23  ;;  %v6246_v33 = vpack.c.bf16 %v722_v28, %v718_v27  ;;  %v717_v34 = vld [vmem:[#allocation10 + $0x1d0] sm:$0xff]  ;;  %v459_v40 = vld [vmem:[#allocation12 + $0x18] sm:$0xff] }
  0xf5   : > { %6207 = vmatprep.subr.bf16.mxu0 %v6206_v0  ;;  %6237 = vmatpush1.bf16.msra.mxu1 %v6236_v6  ;;  %v721_v35 = vld [vmem:[#allocation10 + $0x1f0] sm:$0xff]  ;;  %v9309_v36 = vpack.c.bf16 %v465_v30, %v457_v29  ;;  %v650_v39 = vld [vmem:[%s9279_s25 + $0x8] sm:$0xff]  ;;  %v456_v42 = vld [vmem:[#allocation12] sm:$0xff] }
  0xf6   : > { %6239 = vmatprep.subr.bf16.mxu1 %v6238_v10  ;;  %v6248_v37 = vpack.c.bf16 %v721_v35, %v717_v34  ;;  %v649_v38 = vld [vmem:[%s9279_s25] sm:$0xff]  ;;  %v467_v41 = vld [vmem:[#allocation12 + $0x58] sm:$0xff]  ;;  %v651_v49 = vld [vmem:[%s9279_s25 + $0x10] sm:$0xff] }
  0xf7   : > { %11168 = vst [vmem:[#allocation26_spill] sm:$0xff] %v9309_v36  ;;  %v464_v43 = vld [vmem:[#allocation12 + $0x40] sm:$0xff]  ;;  %v9316_v44 = vpack.c.bf16 %v467_v41, %v459_v40  ;;  %v458_v45 = vld [vmem:[#allocation12 + $0x10] sm:$0xff]  ;;  %v473_v50 = vld [vmem:[#allocation12 + $0x88] sm:$0xff] }
  0xf8   : > { %6209 = vmatpush1.bf16.msra.mxu0 %v6208_v7  ;;  %v9320_v46 = vpack.c.bf16 %v464_v43, %v456_v42  ;;  %v466_v47 = vld [vmem:[#allocation12 + $0x50] sm:$0xff]  ;;  %v481_v51 = vld [vmem:[#allocation12 + $0xc8] sm:$0xff]  ;;  %v472_v53 = vld [vmem:[#allocation12 + $0x80] sm:$0xff] }
  0xf9   : > { %6211 = vmatprep.subr.bf16.mxu0 %v6210_v13  ;;  %6241 = vmatpush1.bf16.msra.mxu1 %v6240_v19  ;;  %11169 = vst [vmem:[#allocation27_spill] sm:$0xff] %v9316_v44  ;;  %v9323_v48 = vpack.c.bf16 %v466_v47, %v458_v45  ;;  %v9327_v52 = vpack.c.bf16 %v481_v51, %v473_v50  ;;  %v480_v54 = vld [vmem:[#allocation12 + $0xc0] sm:$0xff]  ;;  %v475_v56 = vld [vmem:[#allocation12 + $0x98] sm:$0xff]  ;;  %v474_v58 = vld [vmem:[#allocation12 + $0x90] sm:$0xff] }
  0xfa   : > { %6243 = vmatprep.subr.bf16.mxu1 %v6242_v22  ;;  %11170 = vst [vmem:[#allocation28_spill] sm:$0xff] %v9320_v46  ;;  %v9330_v55 = vpack.c.bf16 %v480_v54, %v472_v53  ;;  %v483_v57 = vld [vmem:[#allocation12 + $0xd8] sm:$0xff]  ;;  %v482_v61 = vld [vmem:[#allocation12 + $0xd0] sm:$0xff]  ;;  %v489_v62 = vld [vmem:[#allocation12 + $0x108] sm:$0xff] }
  0xfb   : > { %11171 = vst [vmem:[#allocation29_spill] sm:$0xff] %v9323_v48  ;;  %11172 = vst [vmem:[#allocation30_spill] sm:$0xff] %v9327_v52  ;;  %v9335_v59 = vpack.c.bf16 %v483_v57, %v475_v56  ;;  %v652_v60 = vld [vmem:[%s9279_s25 + $0x18] sm:$0xff]  ;;  %v9339_v0 = vpack.c.bf16 %v482_v61, %v474_v58  ;;  %v488_v3 = vld [vmem:[#allocation12 + $0x100] sm:$0xff] }
  0xfc   : > { %6213 = vmatpush1.bf16.msra.mxu0 %v6212_v20  ;;  %11173 = vst [vmem:[#allocation31_spill] sm:$0xff] %v9330_v55  ;;  %v497_v63 = vld [vmem:[#allocation12 + $0x148] sm:$0xff]  ;;  %v491_v1 = vld [vmem:[#allocation12 + $0x118] sm:$0xff]  ;;  %v496_v4 = vld [vmem:[#allocation12 + $0x140] sm:$0xff] }
  0xfd   : > { %6215 = vmatprep.subr.bf16.mxu0 %v6214_v25  ;;  %6245 = vmatpush1.bf16.msra.mxu1 %v6244_v31  ;;  %11174 = vst [vmem:[#allocation32_spill] sm:$0xff] %v9335_v59  ;;  %11175 = vst [vmem:[#allocation33_spill] sm:$0xff] %v9339_v0  ;;  %v9341_v2 = vpack.c.bf16 %v497_v63, %v489_v62  ;;  %v499_v5 = vld [vmem:[#allocation12 + $0x158] sm:$0xff]  ;;  %v9344_v6 = vpack.c.bf16 %v496_v4, %v488_v3  ;;  %v490_v9 = vld [vmem:[#allocation12 + $0x110] sm:$0xff] }
  0xfe   : > { %6247 = vmatprep.subr.bf16.mxu1 %v6246_v33  ;;  %v9348_v7 = vpack.c.bf16 %v499_v5, %v491_v1  ;;  %v498_v10 = vld [vmem:[#allocation12 + $0x150] sm:$0xff]  ;;  %v505_v13 = vld [vmem:[#allocation12 + $0x188] sm:$0xff]  ;;  %v507_v15 = vld [vmem:[#allocation12 + $0x198] sm:$0xff] }
  0xff   : > { %11176 = vst [vmem:[#allocation34_spill] sm:$0xff] %v9341_v2  ;;  %11177 = vst [vmem:[#allocation35_spill] sm:$0xff] %v9344_v6  ;;  %v653_v11 = vld [vmem:[%s9279_s25 + $0x20] sm:$0xff]  ;;  %v9353_v12 = vpack.c.bf16 %v498_v10, %v490_v9  ;;  %v513_v14 = vld [vmem:[#allocation12 + $0x1c8] sm:$0xff] }
 0x100   : > { %6217 = vmatpush1.bf16.msra.mxu0 %v6216_v32  ;;  %11178 = vst [vmem:[#allocation36_spill] sm:$0xff] %v9348_v7  ;;  %v9357_v16 = vpack.c.bf16 %v513_v14, %v505_v13  ;;  %v504_v17 = vld [vmem:[#allocation12 + $0x180] sm:$0xff]  ;;  %v515_v19 = vld [vmem:[#allocation12 + $0x1d8] sm:$0xff]  ;;  %v506_v22 = vld [vmem:[#allocation12 + $0x190] sm:$0xff] }
 0x101   : > { %6251 = vmatprep.subr.bf16.mxu0 %v9309_v36  ;;  %6249 = vmatpush1.bf16.msra.mxu1 %v6248_v37  ;;  %11179 = vst [vmem:[#allocation37_spill] sm:$0xff] %v9353_v12  ;;  %v512_v18 = vld [vmem:[#allocation12 + $0x1c0] sm:$0xff]  ;;  %v9363_v21 = vpack.c.bf16 %v515_v19, %v507_v15  ;;  %v514_v23 = vld [vmem:[#allocation12 + $0x1d0] sm:$0xff]  ;;  %v654_v24 = vld [vmem:[%s9279_s25 + $0x28] sm:$0xff] }
 0x102   : > { %6283 = vmatprep.subr.bf16.mxu1 %v9316_v44  ;;  %11180 = vst [vmem:[#allocation38_spill] sm:$0xff] %v9357_v16  ;;  %v9359_v20 = vpack.c.bf16 %v512_v18, %v504_v17  ;;  %v9368_v25 = vpack.c.bf16 %v514_v23, %v506_v22  ;;  %v521_v26 = vld [vmem:[#allocation12 + $0x208] sm:$0xff]  ;;  %v520_v29 = vld [vmem:[#allocation12 + $0x200] sm:$0xff]  ;;  %v523_v31 = vld [vmem:[#allocation12 + $0x218] sm:$0xff] }
 0x103   : > { %810 = vmatmul.mubr.f32.vlgmr.msra.gmra.mrb[0].mxu0 %v649_v38  ;;  %11182 = vst [vmem:[#allocation40_spill] sm:$0xff] %v9363_v21  ;;  %v529_v27 = vld [vmem:[#allocation12 + $0x248] sm:$0xff]  ;;  %v528_v30 = vld [vmem:[#allocation12 + $0x240] sm:$0xff]  ;;  %v531_v33 = vld [vmem:[#allocation12 + $0x258] sm:$0xff] }
 0x104   : > { %815 = vmatprep.mubr.f32.mxu0 %v10911_v8  ;;  %935 = vmatmul.mubr.f32.vlgmr.msra.gmra.mrb[0].mxu1 %v649_v38  ;;  %11181 = vst [vmem:[#allocation39_spill] sm:$0xff] %v9359_v20  ;;  %11183 = vst [vmem:[#allocation41_spill] sm:$0xff] %v9368_v25  ;;  %v9372_v28 = vpack.c.bf16 %v529_v27, %v521_v26  ;;  %v9374_v32 = vpack.c.bf16 %v528_v30, %v520_v29  ;;  %v522_v34 = vld [vmem:[#allocation12 + $0x210] sm:$0xff]  ;;  %v537_v40 = vld [vmem:[#allocation12 + $0x288] sm:$0xff] }
 0x105   : > { %940 = vmatprep.mubr.f32.mxu1 %v10911_v8  ;;  %6253 = vmatpush1.bf16.msra.mxu0 %v9320_v46  ;;  %v530_v35 = vld [vmem:[#allocation12 + $0x250] sm:$0xff]  ;;  %v9380_v37 = vpack.c.bf16 %v531_v33, %v523_v31  ;;  %v545_v41 = vld [vmem:[#allocation12 + $0x2c8] sm:$0xff]  ;;  %v539_v42 = vld [vmem:[#allocation12 + $0x298] sm:$0xff] }
 0x106   : > { %6285 = vmatpush1.bf16.msra.mxu1 %v9323_v48  ;;  %6255 = vmatprep.subr.bf16.mxu0 %v9327_v52  ;;  %11184 = vst [vmem:[#allocation42_spill] sm:$0xff] %v9372_v28  ;;  %11185 = vst [vmem:[#allocation43_spill] sm:$0xff] %v9374_v32  ;;  %v655_v38 = vld [vmem:[%s9279_s25 + $0x30] sm:$0xff]  ;;  %v9387_v43 = vpack.c.bf16 %v545_v41, %v537_v40  ;;  %v656_v56 = vld [vmem:[%s9279_s25 + $0x38] sm:$0xff] }
 0x107   : > { %816 = vmatmul.mubr.f32.gmra.mrb[2].mxu0 %v650_v39  ;;  %6287 = vmatprep.subr.bf16.mxu1 %v9335_v59  ;;  %11186 = vst [vmem:[#allocation44_spill] sm:$0xff] %v9380_v37  ;;  %v536_v45 = vld [vmem:[#allocation12 + $0x280] sm:$0xff]  ;;  %v538_v53 = vld [vmem:[#allocation12 + $0x290] sm:$0xff]  ;;  %v553_v58 = vld [vmem:[#allocation12 + $0x308] sm:$0xff] }
 0x108   : > { %941 = vmatmul.mubr.f32.gmra.mrb[2].mxu1 %v650_v39  ;;  %821 = vmatprep.mubr.f32.mxu0 %v10911_v8  ;;  %v9383_v39 = vpack.c.bf16 %v530_v35, %v522_v34  ;;  %11188 = vst [vmem:[#allocation46_spill] sm:$0xff] %v9387_v43  ;;  %v544_v47 = vld [vmem:[#allocation12 + $0x2c0] sm:$0xff]  ;;  %v546_v54 = vld [vmem:[#allocation12 + $0x2d0] sm:$0xff]  ;;  %v555_v61 = vld [vmem:[#allocation12 + $0x318] sm:$0xff] }
 0x109   : > { %946 = vmatprep.mubr.f32.mxu1 %v10911_v8  ;;  %6257 = vmatpush1.bf16.msra.mxu0 %v9330_v55  ;;  %v9389_v50 = vpack.c.bf16 %v544_v47, %v536_v45  ;;  %v9397_v57 = vpack.c.bf16 %v546_v54, %v538_v53  ;;  %v552_v63 = vld [vmem:[#allocation12 + $0x300] sm:$0xff]  ;;  %v563_v3 = vld [vmem:[#allocation12 + $0x358] sm:$0xff]  ;;  %v554_v9 = vld [vmem:[#allocation12 + $0x310] sm:$0xff]  ;;  %v10909_v45 = vmov 0   ;;  %v725_v54 = vlaneseq }
 0x10a   : > { %6289 = vmatpush1.bf16.msra.mxu1 %v9339_v0  ;;  %6259 = vmatprep.subr.bf16.mxu0 %v9341_v2  ;;  %11187 = vst [vmem:[#allocation45_spill] sm:$0xff] %v9383_v39  ;;  %v560_v1 = vld [vmem:[#allocation12 + $0x340] sm:$0xff]  ;;  %v9407_v5 = vpack.c.bf16 %v563_v3, %v555_v61  ;;  %v562_v10 = vld [vmem:[#allocation12 + $0x350] sm:$0xff]  ;;  %v569_v14 = vld [vmem:[#allocation12 + $0x388] sm:$0xff] }
 0x10b   : > { %822 = vmatmul.mubr.f32.gmra.mrb[4].mxu0 %v651_v49  ;;  %6291 = vmatprep.subr.bf16.mxu1 %v9348_v7  ;;  %11189 = vst [vmem:[#allocation47_spill] sm:$0xff] %v9389_v50  ;;  %11191 = vst [vmem:[#allocation49_spill] sm:$0xff] %v9397_v57  ;;  %v9404_v4 = vpack.c.bf16 %v560_v1, %v552_v63  ;;  %v9412_v13 = vpack.c.bf16 %v562_v10, %v554_v9  ;;  %v577_v15 = vld [vmem:[#allocation12 + $0x3c8] sm:$0xff]  ;;  %v571_v17 = vld [vmem:[#allocation12 + $0x398] sm:$0xff] }
 0x10c   : > { %947 = vmatmul.mubr.f32.gmra.mrb[4].mxu1 %v651_v49  ;;  %827 = vmatprep.mubr.f32.mxu0 %v10911_v8  ;;  %v547_v49 = vld [vmem:[#allocation12 + $0x2d8] sm:$0xff]  ;;  %11194 = vst [vmem:[#allocation52_spill] sm:$0xff] %v9407_v5  ;;  %v9417_v18 = vpack.c.bf16 %v577_v15, %v569_v14  ;;  %v568_v19 = vld [vmem:[#allocation12 + $0x380] sm:$0xff]  ;;  %v570_v27 = vld [vmem:[#allocation12 + $0x390] sm:$0xff] }
 0x10d   : > { %952 = vmatprep.mubr.f32.mxu1 %v10911_v8  ;;  %6261 = vmatpush1.bf16.msra.mxu0 %v9344_v6  ;;  %v9392_v51 = vpack.c.bf16 %v547_v49, %v539_v42  ;;  %11193 = vst [vmem:[#allocation51_spill] sm:$0xff] %v9404_v4  ;;  %11195 = vst [vmem:[#allocation53_spill] sm:$0xff] %v9412_v13  ;;  %v576_v22 = vld [vmem:[#allocation12 + $0x3c0] sm:$0xff]  ;;  %v579_v23 = vld [vmem:[#allocation12 + $0x3d8] sm:$0xff]  ;;  %v1500_v49 = vstv %s9443_s8 }
 0x10e   : > { %6293 = vmatpush1.bf16.msra.mxu1 %v9353_v12  ;;  %6263 = vmatprep.subr.bf16.mxu0 %v9357_v16  ;;  %11196 = vst [vmem:[#allocation54_spill] sm:$0xff] %v9417_v18  ;;  %v9422_v26 = vpack.c.bf16 %v579_v23, %v571_v17  ;;  %v578_v29 = vld [vmem:[#allocation12 + $0x3d0] sm:$0xff]  ;;  %v658_v30 = vld [vmem:[%s9279_s25 + $0x48] sm:$0xff]  ;;  %v455_v42 = vld [vmem:[%s9303_s15] sm:$0xff]  ;;  %s4406_s15 = sadd.s32 7, %s9443_s8 }
 0x10f   : > { %828 = vmatmul.mubr.f32.gmra.mrb[6].mxu0 %v652_v60  ;;  %6295 = vmatprep.subr.bf16.mxu1 %v9363_v21  ;;  %11190 = vst [vmem:[#allocation48_spill] sm:$0xff] %v9392_v51  ;;  %v9427_v31 = vpack.c.bf16 %v578_v29, %v570_v27  ;;  %v461_v33 = vld [vmem:[#allocation12 + $0x28] sm:$0xff]  ;;  %v463_v35 = vld [vmem:[#allocation12 + $0x38] sm:$0xff]  ;;  %v9446_v47 = vadd.s32 4294967295, %v455_v42  ;;  %v997_v29 = vld [vmem:[#allocation2 + $0x10] sm:$0xff] }
 0x110   : > { %953 = vmatmul.mubr.f32.gmra.mrb[6].mxu1 %v652_v60  ;;  %833 = vmatprep.mubr.f32.mxu0 %v10911_v8  ;;  %v561_v60 = vld [vmem:[#allocation12 + $0x348] sm:$0xff]  ;;  %11198 = vst [vmem:[#allocation56_spill] sm:$0xff] %v9422_v26  ;;  %v471_v40 = vld [vmem:[#allocation12 + $0x78] sm:$0xff] }
 0x111   : > { %958 = vmatprep.mubr.f32.mxu1 %v10911_v8  ;;  %6265 = vmatpush1.bf16.msra.mxu0 %v9359_v20  ;;  %v9402_v62 = vpack.c.bf16 %v561_v60, %v553_v58  ;;  %11199 = vst [vmem:[#allocation57_spill] sm:$0xff] %v9427_v31  ;;  %v469_v34 = vld [vmem:[#allocation12 + $0x68] sm:$0xff]  ;;  %v9435_v41 = vpack.c.bf16 %v471_v40, %v463_v35  ;;  %11203 = vst [vmem:[#allocation60_spill] sm:$0xff] %v9446_v47  ;;  %v723_v60 = vld [vmem:[%s11205_s16] sm:$0xf] }
 0x112   : > { %6297 = vmatpush1.bf16.msra.mxu1 %v9368_v25  ;;  %6267 = vmatprep.subr.bf16.mxu0 %v9372_v28  ;;  %vm1501_vm0 = vcmp.eq.s32.totalorder %v9446_v47, %v1500_v49 }
 0x113   : > { %834 = vmatmul.mubr.f32.gmra.mrb[8].mxu0 %v653_v11  ;;  %6299 = vmatprep.subr.bf16.mxu1 %v9380_v37  ;;  %11192 = vst [vmem:[#allocation50_spill] sm:$0xff] %v9402_v62  ;;  %11202 = vst [vmem:[#allocation59_spill] sm:$0xff] %v9435_v41  ;;  %v1502_v53 = vsel %vm1501_vm0, 1, %v10909_v45 }
 0x114   : > { %959 = vmatmul.mubr.f32.gmra.mrb[8].mxu1 %v653_v11  ;;  %839 = vmatprep.mubr.f32.mxu0 %v10911_v8  ;;  %v657_v11 = vld [vmem:[%s9279_s25 + $0x40] sm:$0xff]  ;;  %s11292_s25 = sld [smem:[#allocation131_spill]] }
 0x115   : > { %964 = vmatprep.mubr.f32.mxu1 %v10911_v8  ;;  %6269 = vmatpush1.bf16.msra.mxu0 %v9374_v32 }
 0x116   : > { %6271 = vmatprep.subr.bf16.mxu0 %v9387_v43  ;;  %6301 = vmatpush1.bf16.msra.mxu1 %v9383_v39 }
 0x117   : > { %840 = vmatmul.mubr.f32.gmra.mrb[10].mxu0 %v654_v24  ;;  %6303 = vmatprep.subr.bf16.mxu1 %v9392_v51 }
 0x118   : > { %965 = vmatmul.mubr.f32.gmra.mrb[10].mxu1 %v654_v24  ;;  %845 = vmatprep.mubr.f32.mxu0 %v10911_v8  ;;  %v9420_v24 = vpack.c.bf16 %v576_v22, %v568_v19  ;;  %v996_v19 = vld [vmem:[#allocation2 + $0x8] sm:$0xff] }
 0x119   : > { %970 = vmatprep.mubr.f32.mxu1 %v10911_v8  ;;  %6273 = vmatpush1.bf16.msra.mxu0 %v9389_v50 }
 0x11a   : > { %6305 = vmatpush1.bf16.msra.mxu1 %v9397_v57  ;;  %6275 = vmatprep.subr.bf16.mxu0 %v9402_v62  ;;  %11197 = vst [vmem:[#allocation55_spill] sm:$0xff] %v9420_v24 }
 0x11b   : > { %846 = vmatmul.mubr.f32.gmra.mrb[12].mxu0 %v655_v38  ;;  %6307 = vmatprep.subr.bf16.mxu1 %v9407_v5 }
 0x11c   : > { %971 = vmatmul.mubr.f32.gmra.mrb[12].mxu1 %v655_v38  ;;  %851 = vmatprep.mubr.f32.mxu0 %v10911_v8  ;;  %v9432_v38 = vpack.c.bf16 %v469_v34, %v461_v33 }
 0x11d   : > { %976 = vmatprep.mubr.f32.mxu1 %v10911_v8  ;;  %6277 = vmatpush1.bf16.msra.mxu0 %v9404_v4 }
 0x11e   : > { %6309 = vmatpush1.bf16.msra.mxu1 %v9412_v13  ;;  %6279 = vmatprep.subr.bf16.mxu0 %v9417_v18  ;;  %11201 = vst [vmem:[#allocation58_spill] sm:$0xff] %v9432_v38 }
 0x11f   : > { %852 = vmatmul.mubr.f32.gmra.mrb[14].mxu0 %v656_v56  ;;  %6311 = vmatprep.subr.bf16.mxu1 %v9422_v26 }
 0x120   : > { %977 = vmatmul.mubr.f32.gmra.mrb[14].mxu1 %v656_v56  ;;  %857 = vmatprep.mubr.f32.mxu0 %v10911_v8  ;;  %v9452_v56 = vshrl.u32 %v725_v54, 7  ;;  %v998_v54 = vld [vmem:[#allocation2 + $0x18] sm:$0xff] }
 0x121   : > { %982 = vmatprep.mubr.f32.mxu1 %v10911_v8  ;;  %6281 = vmatpush1.bf16.msra.mxu0 %v9420_v24 }
 0x122   : > { %6313 = vmatpush1.bf16.msra.mxu1 %v9427_v31  ;;  %6315 = vmatprep.subr.bf16.mxu0 %v9432_v38  ;;  %11204 = vst [vmem:[#allocation61_spill] sm:$0xff] %v9452_v56  ;;  %v10908_v58 = vsub.s32 0, %v9452_v56  ;;  %v10907_v61 = vsub.s32 1, %v9452_v56  ;;  %v10905_v63 = vsub.s32 2, %v9452_v56  ;;  %v10906_v9 = vsub.s32 3, %v9452_v56  ;;  %v503_v56 = vld [vmem:[#allocation12 + $0x178] sm:$0xff] }
 0x123   : > { %858 = vmatmul.mubr.f32.gmra.mrb[16].mxu0 %v657_v11  ;;  %6347 = vmatprep.subr.bf16.mxu1 %v9435_v41 }
 0x124   : > { %983 = vmatmul.mubr.f32.gmra.mrb[16].mxu1 %v657_v11  ;;  %863 = vmatprep.mubr.f32.mxu0 %v10911_v8  ;;  %v9462_v1 = vrot.slane %v723_v60, %v10908_v58  ;;  %v9466_v3 = vrot.slane %v723_v60, %v10907_v61  ;;  %v995_v11 = vld [vmem:[#allocation2] sm:$0xff]  ;;  %v9471_v14 = vrot.slane %v723_v60, %v10905_v63  ;;  %v493_v58 = vld [vmem:[#allocation12 + $0x128] sm:$0xff] }
 0x125   : > { %988 = vmatprep.mubr.f32.mxu1 %v10911_v8  ;;  %8464 = vset.pattern.permute.xlu0 %v10909_v45 }
 0x126   : > { %8465 = vset.pattern.permute.xlu1 %v10909_v45  ;;  %1504 = vperm.xlu0 %8464, %v1502_v53   ;;  %11206 = vst [vmem:[#allocation62_spill] sm:$0xff] %v9462_v1  ;;  %v501_v45 = vld [vmem:[#allocation12 + $0x168] sm:$0xff] }
 0x127   : > { %864 = vmatmul.mubr.f32.gmra.mrb[18].mxu0 %v658_v30 }
 0x128   : > { %989 = vmatmul.mubr.f32.gmra.mrb[18].mxu1 %v658_v30  ;;  %1090 = vmatprep.mubr.f32.mxu0 %v10911_v8  ;;  %v9477_v30 = vrot.slane %v723_v60, %v10906_v9 }
 0x129   : > { %1161 = vmatprep.mubr.f32.mxu1 %v10911_v8  ;;  %v495_v8 = vld [vmem:[#allocation12 + $0x138] sm:$0xff] }
 0x1d6   : > { %v811_v10 = vpop.f32.mrb[0].mxu0 }
 0x1d7   : > { %v812_v15 = vadd.f32 %v811_v10, %v9462_v1  ;;  %v813_v17 = vpop.f32.mrb[1].mxu0  ;;  %v936_v27 = vpop.f32.mrb[0].mxu1 }
 0x1d8   : > { %v814_v22 = vadd.f32 %v813_v17, %v9466_v3  ;;  %v937_v34 = vadd.f32 %v936_v27, %v9471_v14  ;;  %v938_v35 = vpop.f32.mrb[1].mxu1 }
 0x1d9   : > { %v1004_v23 = vadd.f32 %v995_v11, %v812_v15  ;;  %v939_v53 = vadd.f32 %v938_v35, %v9477_v30 }
 0x1da   : > { %v1005_v33 = vadd.f32 %v996_v19, %v814_v22  ;;  %v1006_v49 = vadd.f32 %v997_v29, %v937_v34  ;;  %v999_v22 = vld [vmem:[#allocation3] sm:$0xff] }
 0x1db   : > { %v1008_v40 = vmul.f32 0.5, %v1004_v23  ;;  %v1007_v10 = vadd.f32 %v998_v54, %v939_v53  ;;  %v470_v53 = vld [vmem:[#allocation12 + $0x70] sm:$0xff]  ;;  %v477_v54 = vld [vmem:[#allocation12 + $0xa8] sm:$0xff] }
 0x1dc   : > { %v1012_v42 = vmul.f32 0.5, %v1005_v33 }
 0x1dd   : > { %8466 = vtanh.f32 %v1008_v40  ;;  %v1017_v11 = vmul.f32 0.5, %v1007_v10  ;;  %v460_v40 = vld [vmem:[#allocation12 + $0x20] sm:$0xff]  ;;  %v485_v10 = vld [vmem:[#allocation12 + $0xe8] sm:$0xff] }
 0x1de   : > { %8468 = vtanh.f32 %v1012_v42  ;;  %v468_v42 = vld [vmem:[#allocation12 + $0x60] sm:$0xff] }
 0x1df   : > { %8470 = vtanh.f32 %v1006_v49  ;;  %v462_v49 = vld [vmem:[#allocation12 + $0x30] sm:$0xff]  ;;  %v9484_v61 = vpack.c.bf16 %v468_v42, %v460_v40  ;;  %v492_v42 = vld [vmem:[#allocation12 + $0x120] sm:$0xff] }
 0x1e0   : > { %8472 = vtanh.f32 %v1017_v11 }
 0x1e1   : > { %11207 = vst [vmem:[#allocation63_spill] sm:$0xff] %v9484_v61 }
 0x1e7   : > { %v8467_v15 = vpop.eup %8466 }
 0x1e8   : > { %v8469_v17 = vpop.eup %8468  ;;  %v1010_v63 = vmul.f32 0.5, %v8467_v15  ;;  %v479_v15 = vld [vmem:[#allocation12 + $0xb8] sm:$0xff] }
 0x1e9   : > { %v8471_v60 = vpop.eup %8470  ;;  %v1014_v9 = vmul.f32 0.5, %v8469_v17  ;;  %v487_v17 = vld [vmem:[#allocation12 + $0xf8] sm:$0xff] }
 0x1ea   : > { %v1011_v19 = vadd.f32 0.5, %v1010_v63  ;;  %v8473_v34 = vpop.eup %8472 }
 0x1eb   : > { %v1015_v27 = vadd.f32 0.5, %v1014_v9  ;;  %v1019_v35 = vmul.f32 0.5, %v8473_v34  ;;  %v9486_v9 = vpack.c.bf16 %v470_v53, %v462_v49  ;;  %v486_v34 = vld [vmem:[#allocation12 + $0xf0] sm:$0xff]  ;;  %v500_v49 = vld [vmem:[#allocation12 + $0x160] sm:$0xff]  ;;  %v9504_v53 = vpack.c.bf16 %v501_v45, %v493_v58 }
 0x1ec   : > { %v1022_v23 = vmul.f32 %v8471_v60, %v1011_v19  ;;  %v476_v60 = vld [vmem:[#allocation12 + $0xa0] sm:$0xff] }
 0x1ed   : > { %v1021_v33 = vmul.f32 %v1015_v27, %v999_v22  ;;  %v1020_v11 = vadd.f32 0.5, %v1019_v35  ;;  %11208 = vst [vmem:[#allocation64_spill] sm:$0xff] %v9486_v9  ;;  %v484_v19 = vld [vmem:[#allocation12 + $0xe0] sm:$0xff]  ;;  %v9490_v27 = vpack.c.bf16 %v485_v10, %v477_v54  ;;  %11213 = vst [vmem:[#allocation69_spill] sm:$0xff] %v9504_v53  ;;  %v9506_v54 = vpack.c.bf16 %v503_v56, %v495_v8  ;;  %v494_v10 = vld [vmem:[#allocation12 + $0x130] sm:$0xff] }
 0x1ee   : > { %v9498_v35 = vpack.c.bf16 %v484_v19, %v476_v60  ;;  %v11215_v60 = vmov 0.0   ;;  %v9512_v19 = vpack.c.bf16 %v500_v49, %v492_v42  ;;  %v508_v8 = vld [vmem:[#allocation12 + $0x1a0] sm:$0xff] }
 0x1ef   : > { %v9481_v29 = vadd.f32 %v1022_v23, %v1021_v33  ;;  %11209 = vst [vmem:[#allocation65_spill] sm:$0xff] %v9490_v27  ;;  %v9492_v23 = vpack.c.bf16 %v487_v17, %v479_v15  ;;  %v478_v33 = vld [vmem:[#allocation12 + $0xb0] sm:$0xff]  ;;  %11214 = vst [vmem:[#allocation70_spill] sm:$0xff] %v9506_v54  ;;  %v509_v17 = vld [vmem:[#allocation12 + $0x1a8] sm:$0xff] }
 0x1f0   : > { %11211 = vst [vmem:[#allocation67_spill] sm:$0xff] %v9498_v35  ;;  %v9500_v40 = vpack.c.bf16 %v486_v34, %v478_v33  ;;  %v502_v15 = vld [vmem:[#allocation12 + $0x170] sm:$0xff]  ;;  %11216 = vst [vmem:[#allocation71_spill] sm:$0xff] %v9512_v19  ;;  %v516_v56 = vld [vmem:[#allocation12 + $0x1e0] sm:$0xff] }
 0x1f1   : > { %8474 = vtanh.f32 %v9481_v29  ;;  %11210 = vst [vmem:[#allocation66_spill] sm:$0xff] %v9492_v23  ;;  %v9514_v45 = vpack.c.bf16 %v502_v15, %v494_v10  ;;  %v510_v34 = vld [vmem:[#allocation12 + $0x1b0] sm:$0xff]  ;;  %v9524_v42 = vpack.c.bf16 %v516_v56, %v508_v8  ;;  %v524_v10 = vld [vmem:[#allocation12 + $0x220] sm:$0xff] }
 0x1f2   : > { %11212 = vst [vmem:[#allocation68_spill] sm:$0xff] %v9500_v40  ;;  %v532_v15 = vld [vmem:[#allocation12 + $0x260] sm:$0xff] }
 0x1f3   : > { %11217 = vst [vmem:[#allocation72_spill] sm:$0xff] %v9514_v45  ;;  %11220 = vst [vmem:[#allocation75_spill] sm:$0xff] %v9524_v42  ;;  %v540_v56 = vld [vmem:[#allocation12 + $0x2a0] sm:$0xff] }
 0x1fb   : > { %v8475_v63 = vpop.eup %8474 }
 0x1fc   : > { %v9488_v22 = vmul.f32 %v8475_v63, %v1020_v11  ;;  %v517_v11 = vld [vmem:[#allocation12 + $0x1e8] sm:$0xff]  ;;  %v511_v63 = vld [vmem:[#allocation12 + $0x1b8] sm:$0xff] }
 0x1fd   : > { %v9518_v58 = vpack.c.bf16 %v517_v11, %v509_v17  ;;  %v526_v11 = vld [vmem:[#allocation12 + $0x230] sm:$0xff] }
 0x1fe   : > { %1091 = vmatmul.mubr.f32.vlgmr.msra.gmra.mrb[2].mxu0 %v9488_v22  ;;  %1162 = vmatmul.mubr.f32.vlgmr.msra.gmra.mrb[2].mxu1 %v9488_v22 }
 0x1ff   : > { %6317 = vmatpush1.bf16.msra.mxu0 %v9484_v61  ;;  %6349 = vmatpush1.bf16.msra.mxu1 %v9486_v9  ;;  %v519_v9 = vld [vmem:[#allocation12 + $0x1f8] sm:$0xff]  ;;  %11218 = vst [vmem:[#allocation73_spill] sm:$0xff] %v9518_v58 }
 0x200   : > { %6319 = vmatprep.subr.bf16.mxu0 %v9490_v27  ;;  %6351 = vmatprep.subr.bf16.mxu1 %v9492_v23  ;;  %v9520_v33 = vpack.c.bf16 %v519_v9, %v511_v63  ;;  %v518_v23 = vld [vmem:[#allocation12 + $0x1f0] sm:$0xff]  ;;  %v525_v27 = vld [vmem:[#allocation12 + $0x228] sm:$0xff]  ;;  %v527_v61 = vld [vmem:[#allocation12 + $0x238] sm:$0xff] }
 0x201   : > { %1232 = vmatprep.mubr.f32.mxu0 %v11215_v60  ;;  %1303 = vmatprep.mubr.f32.mxu1 %v11215_v60  ;;  %v9526_v49 = vpack.c.bf16 %v518_v23, %v510_v34  ;;  %v534_v63 = vld [vmem:[#allocation12 + $0x270] sm:$0xff]  ;;  %v9536_v23 = vpack.c.bf16 %v532_v15, %v524_v10  ;;  %v548_v34 = vld [vmem:[#allocation12 + $0x2e0] sm:$0xff] }
 0x202   : > { %11219 = vst [vmem:[#allocation74_spill] sm:$0xff] %v9520_v33  ;;  %v9538_v8 = vpack.c.bf16 %v534_v63, %v526_v11  ;;  %v9548_v10 = vpack.c.bf16 %v548_v34, %v540_v56  ;;  %v556_v11 = vld [vmem:[#allocation12 + $0x320] sm:$0xff] }
 0x203   : > { %6321 = vmatpush1.bf16.msra.mxu0 %v9498_v35  ;;  %6353 = vmatpush1.bf16.msra.mxu1 %v9500_v40  ;;  %v533_v35 = vld [vmem:[#allocation12 + $0x268] sm:$0xff]  ;;  %v535_v40 = vld [vmem:[#allocation12 + $0x278] sm:$0xff]  ;;  %11221 = vst [vmem:[#allocation76_spill] sm:$0xff] %v9526_v49  ;;  %11224 = vst [vmem:[#allocation79_spill] sm:$0xff] %v9536_v23 }
 0x204   : > { %6323 = vmatprep.subr.bf16.mxu0 %v9504_v53  ;;  %6355 = vmatprep.subr.bf16.mxu1 %v9506_v54  ;;  %v9530_v9 = vpack.c.bf16 %v533_v35, %v525_v27  ;;  %v9532_v17 = vpack.c.bf16 %v535_v40, %v527_v61  ;;  %v541_v54 = vld [vmem:[#allocation12 + $0x2a8] sm:$0xff]  ;;  %v543_v53 = vld [vmem:[#allocation12 + $0x2b8] sm:$0xff]  ;;  %11225 = vst [vmem:[#allocation80_spill] sm:$0xff] %v9538_v8  ;;  %v542_v35 = vld [vmem:[#allocation12 + $0x2b0] sm:$0xff] }
 0x205   : > { %v550_v40 = vld [vmem:[#allocation12 + $0x2f0] sm:$0xff]  ;;  %11228 = vst [vmem:[#allocation83_spill] sm:$0xff] %v9548_v10  ;;  %v564_v63 = vld [vmem:[#allocation12 + $0x360] sm:$0xff] }
 0x206   : > { %11222 = vst [vmem:[#allocation77_spill] sm:$0xff] %v9530_v9  ;;  %11223 = vst [vmem:[#allocation78_spill] sm:$0xff] %v9532_v17  ;;  %v9550_v15 = vpack.c.bf16 %v550_v40, %v542_v35  ;;  %v9560_v56 = vpack.c.bf16 %v564_v63, %v556_v11  ;;  %v572_v35 = vld [vmem:[#allocation12 + $0x3a0] sm:$0xff] }
 0x207   : > { %6325 = vmatpush1.bf16.msra.mxu0 %v9512_v19  ;;  %6357 = vmatpush1.bf16.msra.mxu1 %v9514_v45  ;;  %v549_v19 = vld [vmem:[#allocation12 + $0x2e8] sm:$0xff]  ;;  %v551_v45 = vld [vmem:[#allocation12 + $0x2f8] sm:$0xff]  ;;  %v580_v40 = vld [vmem:[#allocation12 + $0x3e0] sm:$0xff] }
 0x208   : > { %6327 = vmatprep.subr.bf16.mxu0 %v9518_v58  ;;  %6359 = vmatprep.subr.bf16.mxu1 %v9520_v33  ;;  %v9542_v61 = vpack.c.bf16 %v549_v19, %v541_v54  ;;  %v9544_v27 = vpack.c.bf16 %v551_v45, %v543_v53  ;;  %v557_v33 = vld [vmem:[#allocation12 + $0x328] sm:$0xff]  ;;  %v559_v58 = vld [vmem:[#allocation12 + $0x338] sm:$0xff]  ;;  %11229 = vst [vmem:[#allocation84_spill] sm:$0xff] %v9550_v15  ;;  %v558_v19 = vld [vmem:[#allocation12 + $0x330] sm:$0xff] }
 0x209   : > { %v566_v45 = vld [vmem:[#allocation12 + $0x370] sm:$0xff]  ;;  %11232 = vst [vmem:[#allocation87_spill] sm:$0xff] %v9560_v56  ;;  %v9572_v11 = vpack.c.bf16 %v580_v40, %v572_v35 }
 0x20a   : > { %11226 = vst [vmem:[#allocation81_spill] sm:$0xff] %v9542_v61  ;;  %11227 = vst [vmem:[#allocation82_spill] sm:$0xff] %v9544_v27  ;;  %v9562_v34 = vpack.c.bf16 %v566_v45, %v558_v19  ;;  %v584_v19 = vld [vmem:[#allocation13] sm:$0xff] }
 0x20b   : > { %6329 = vmatpush1.bf16.msra.mxu0 %v9524_v42  ;;  %6361 = vmatpush1.bf16.msra.mxu1 %v9526_v49  ;;  %v565_v42 = vld [vmem:[#allocation12 + $0x368] sm:$0xff]  ;;  %v567_v49 = vld [vmem:[#allocation12 + $0x378] sm:$0xff]  ;;  %11236 = vst [vmem:[#allocation91_spill] sm:$0xff] %v9572_v11  ;;  %v588_v45 = vld [vmem:[#allocation13 + $0x20] sm:$0xff] }
 0x20c   : > { %6331 = vmatprep.subr.bf16.mxu0 %v9530_v9  ;;  %6363 = vmatprep.subr.bf16.mxu1 %v9532_v17  ;;  %v9554_v53 = vpack.c.bf16 %v565_v42, %v557_v33  ;;  %v9556_v54 = vpack.c.bf16 %v567_v49, %v559_v58  ;;  %v573_v17 = vld [vmem:[#allocation12 + $0x3a8] sm:$0xff]  ;;  %v575_v9 = vld [vmem:[#allocation12 + $0x3b8] sm:$0xff]  ;;  %11233 = vst [vmem:[#allocation88_spill] sm:$0xff] %v9562_v34  ;;  %v574_v42 = vld [vmem:[#allocation12 + $0x3b0] sm:$0xff] }
 0x20d   : > { %v582_v49 = vld [vmem:[#allocation12 + $0x3f0] sm:$0xff]  ;;  %v9584_v35 = vpack.c.bf16 %v588_v45, %v584_v19 }
 0x20e   : > { %11230 = vst [vmem:[#allocation85_spill] sm:$0xff] %v9554_v53  ;;  %11231 = vst [vmem:[#allocation86_spill] sm:$0xff] %v9556_v54  ;;  %v9574_v63 = vpack.c.bf16 %v582_v49, %v574_v42  ;;  %v592_v42 = vld [vmem:[#allocation13 + $0x40] sm:$0xff] }
 0x20f   : > { %6333 = vmatpush1.bf16.msra.mxu0 %v9536_v23  ;;  %6365 = vmatpush1.bf16.msra.mxu1 %v9538_v8  ;;  %v581_v23 = vld [vmem:[#allocation12 + $0x3e8] sm:$0xff]  ;;  %v583_v8 = vld [vmem:[#allocation12 + $0x3f8] sm:$0xff]  ;;  %11240 = vst [vmem:[#allocation95_spill] sm:$0xff] %v9584_v35  ;;  %v596_v49 = vld [vmem:[#allocation13 + $0x60] sm:$0xff] }
 0x210   : > { %6335 = vmatprep.subr.bf16.mxu0 %v9542_v61  ;;  %6367 = vmatprep.subr.bf16.mxu1 %v9544_v27  ;;  %v9566_v58 = vpack.c.bf16 %v581_v23, %v573_v17  ;;  %v9568_v33 = vpack.c.bf16 %v583_v8, %v575_v9  ;;  %v585_v27 = vld [vmem:[#allocation13 + $0x8] sm:$0xff]  ;;  %v587_v61 = vld [vmem:[#allocation13 + $0x18] sm:$0xff]  ;;  %11237 = vst [vmem:[#allocation92_spill] sm:$0xff] %v9574_v63  ;;  %v586_v23 = vld [vmem:[#allocation13 + $0x10] sm:$0xff] }
 0x211   : > { %v590_v8 = vld [vmem:[#allocation13 + $0x30] sm:$0xff]  ;;  %v9598_v19 = vpack.c.bf16 %v596_v49, %v592_v42 }
 0x212   : > { %11234 = vst [vmem:[#allocation89_spill] sm:$0xff] %v9566_v58  ;;  %11235 = vst [vmem:[#allocation90_spill] sm:$0xff] %v9568_v33  ;;  %v9586_v40 = vpack.c.bf16 %v590_v8, %v586_v23  ;;  %v602_v23 = vld [vmem:[#allocation13 + $0x90] sm:$0xff]  ;;  %v609_v8 = vld [vmem:[#allocation13 + $0xc8] sm:$0xff] }
 0x213   : > { %6337 = vmatpush1.bf16.msra.mxu0 %v9548_v10  ;;  %6369 = vmatpush1.bf16.msra.mxu1 %v9550_v15  ;;  %v589_v10 = vld [vmem:[#allocation13 + $0x28] sm:$0xff]  ;;  %v591_v15 = vld [vmem:[#allocation13 + $0x38] sm:$0xff]  ;;  %11244 = vst [vmem:[#allocation99_spill] sm:$0xff] %v9598_v19 }
 0x214   : > { %6339 = vmatprep.subr.bf16.mxu0 %v9554_v53  ;;  %6371 = vmatprep.subr.bf16.mxu1 %v9556_v54  ;;  %v9578_v9 = vpack.c.bf16 %v589_v10, %v585_v27  ;;  %v9580_v17 = vpack.c.bf16 %v591_v15, %v587_v61  ;;  %v593_v54 = vld [vmem:[#allocation13 + $0x48] sm:$0xff]  ;;  %v595_v53 = vld [vmem:[#allocation13 + $0x58] sm:$0xff]  ;;  %11241 = vst [vmem:[#allocation96_spill] sm:$0xff] %v9586_v40  ;;  %v594_v10 = vld [vmem:[#allocation13 + $0x50] sm:$0xff] }
 0x215   : > { %v598_v15 = vld [vmem:[#allocation13 + $0x70] sm:$0xff] }
 0x216   : > { %11238 = vst [vmem:[#allocation93_spill] sm:$0xff] %v9578_v9  ;;  %11239 = vst [vmem:[#allocation94_spill] sm:$0xff] %v9580_v17 }
 0x217   : > { %6341 = vmatpush1.bf16.msra.mxu0 %v9560_v56  ;;  %6373 = vmatpush1.bf16.msra.mxu1 %v9562_v34  ;;  %v597_v56 = vld [vmem:[#allocation13 + $0x68] sm:$0xff]  ;;  %v599_v34 = vld [vmem:[#allocation13 + $0x78] sm:$0xff] }
 0x218   : > { %6343 = vmatprep.subr.bf16.mxu0 %v9566_v58  ;;  %6375 = vmatprep.subr.bf16.mxu1 %v9568_v33  ;;  %v9590_v61 = vpack.c.bf16 %v597_v56, %v593_v54  ;;  %v9592_v27 = vpack.c.bf16 %v599_v34, %v595_v53  ;;  %v601_v33 = vld [vmem:[#allocation13 + $0x88] sm:$0xff]  ;;  %v603_v58 = vld [vmem:[#allocation13 + $0x98] sm:$0xff]  ;;  %v9600_v54 = vpack.c.bf16 %v598_v15, %v594_v10  ;;  %v600_v53 = vld [vmem:[#allocation13 + $0x80] sm:$0xff] }
 0x219   : > { %v604_v56 = vld [vmem:[#allocation13 + $0xa0] sm:$0xff]  ;;  %v610_v10 = vld [vmem:[#allocation13 + $0xd0] sm:$0xff] }
 0x21a   : > { %11242 = vst [vmem:[#allocation97_spill] sm:$0xff] %v9590_v61  ;;  %11243 = vst [vmem:[#allocation98_spill] sm:$0xff] %v9592_v27  ;;  %v9612_v42 = vpack.c.bf16 %v604_v56, %v600_v53  ;;  %v614_v15 = vld [vmem:[#allocation13 + $0xf0] sm:$0xff] }
 0x21b   : > { %6345 = vmatpush1.bf16.msra.mxu0 %v9572_v11  ;;  %6377 = vmatpush1.bf16.msra.mxu1 %v9574_v63  ;;  %v605_v11 = vld [vmem:[#allocation13 + $0xa8] sm:$0xff]  ;;  %v607_v63 = vld [vmem:[#allocation13 + $0xb8] sm:$0xff]  ;;  %11245 = vst [vmem:[#allocation100_spill] sm:$0xff] %v9600_v54  ;;  %v9626_v56 = vpack.c.bf16 %v614_v15, %v610_v10  ;;  %v624_v10 = vld [vmem:[#allocation13 + $0x140] sm:$0xff] }
 0x21c   : > { %6379 = vmatprep.subr.bf16.mxu0 %v9578_v9  ;;  %6411 = vmatprep.subr.bf16.mxu1 %v9580_v17  ;;  %v9604_v34 = vpack.c.bf16 %v605_v11, %v601_v33  ;;  %v9606_v45 = vpack.c.bf16 %v607_v63, %v603_v58  ;;  %v611_v17 = vld [vmem:[#allocation13 + $0xd8] sm:$0xff]  ;;  %11248 = vst [vmem:[#allocation103_spill] sm:$0xff] %v9612_v42  ;;  %v608_v58 = vld [vmem:[#allocation13 + $0xc0] sm:$0xff] }
 0x21d   : > { %v612_v11 = vld [vmem:[#allocation13 + $0xe0] sm:$0xff]  ;;  %11253 = vst [vmem:[#allocation108_spill] sm:$0xff] %v9626_v56 }
 0x21e   : > { %1233 = vmatmul.mubr.f32.vlgmr.msra.gmra.mrb[20].mxu0 %v9488_v22  ;;  %1304 = vmatmul.mubr.f32.vlgmr.msra.gmra.mrb[20].mxu1 %v9488_v22  ;;  %11246 = vst [vmem:[#allocation101_spill] sm:$0xff] %v9604_v34  ;;  %11247 = vst [vmem:[#allocation102_spill] sm:$0xff] %v9606_v45  ;;  %v606_v22 = vld [vmem:[#allocation13 + $0xb0] sm:$0xff]  ;;  %v9624_v53 = vpack.c.bf16 %v612_v11, %v608_v58  ;;  %v628_v15 = vld [vmem:[#allocation13 + $0x160] sm:$0xff] }
 0x21f   : > { %6381 = vmatpush1.bf16.msra.mxu0 %v9584_v35  ;;  %6413 = vmatpush1.bf16.msra.mxu1 %v9586_v40  ;;  %v613_v35 = vld [vmem:[#allocation13 + $0xe8] sm:$0xff]  ;;  %v615_v40 = vld [vmem:[#allocation13 + $0xf8] sm:$0xff]  ;;  %v9614_v33 = vpack.c.bf16 %v606_v22, %v602_v23  ;;  %v616_v23 = vld [vmem:[#allocation13 + $0x100] sm:$0xff] }
 0x220   : > { %6383 = vmatprep.subr.bf16.mxu0 %v9590_v61  ;;  %6415 = vmatprep.subr.bf16.mxu1 %v9592_v27  ;;  %v9618_v63 = vpack.c.bf16 %v613_v35, %v609_v8  ;;  %v9620_v49 = vpack.c.bf16 %v615_v40, %v611_v17  ;;  %v617_v27 = vld [vmem:[#allocation13 + $0x108] sm:$0xff]  ;;  %v619_v61 = vld [vmem:[#allocation13 + $0x118] sm:$0xff]  ;;  %11252 = vst [vmem:[#allocation107_spill] sm:$0xff] %v9624_v53  ;;  %v620_v22 = vld [vmem:[#allocation13 + $0x120] sm:$0xff] }
 0x221   : > { %1374 = vmatprep.mubr.f32.mxu0 %v11215_v60  ;;  %1445 = vmatprep.mubr.f32.mxu1 %v11215_v60  ;;  %11249 = vst [vmem:[#allocation104_spill] sm:$0xff] %v9614_v33  ;;  %v618_v40 = vld [vmem:[#allocation13 + $0x110] sm:$0xff]  ;;  %v9636_v58 = vpack.c.bf16 %v620_v22, %v616_v23  ;;  %v9648_v23 = vpack.c.bf16 %v628_v15, %v624_v10 }
 0x222   : > { %11250 = vst [vmem:[#allocation105_spill] sm:$0xff] %v9618_v63  ;;  %11251 = vst [vmem:[#allocation106_spill] sm:$0xff] %v9620_v49  ;;  %v622_v8 = vld [vmem:[#allocation13 + $0x130] sm:$0xff] }
 0x223   : > { %6385 = vmatpush1.bf16.msra.mxu0 %v9598_v19  ;;  %6417 = vmatpush1.bf16.msra.mxu1 %v9600_v54  ;;  %v621_v19 = vld [vmem:[#allocation13 + $0x128] sm:$0xff]  ;;  %v623_v54 = vld [vmem:[#allocation13 + $0x138] sm:$0xff]  ;;  %11256 = vst [vmem:[#allocation111_spill] sm:$0xff] %v9636_v58  ;;  %v9638_v11 = vpack.c.bf16 %v622_v8, %v618_v40  ;;  %11260 = vst [vmem:[#allocation115_spill] sm:$0xff] %v9648_v23 }
 0x224   : > { %6387 = vmatprep.subr.bf16.mxu0 %v9604_v34  ;;  %6419 = vmatprep.subr.bf16.mxu1 %v9606_v45  ;;  %v9630_v17 = vpack.c.bf16 %v621_v19, %v617_v27  ;;  %v9632_v35 = vpack.c.bf16 %v623_v54, %v619_v61  ;;  %v625_v45 = vld [vmem:[#allocation13 + $0x148] sm:$0xff]  ;;  %v627_v34 = vld [vmem:[#allocation13 + $0x158] sm:$0xff]  ;;  %v626_v19 = vld [vmem:[#allocation13 + $0x150] sm:$0xff] }
 0x225   : > { %11257 = vst [vmem:[#allocation112_spill] sm:$0xff] %v9638_v11  ;;  %v630_v54 = vld [vmem:[#allocation13 + $0x170] sm:$0xff]  ;;  %v632_v40 = vld [vmem:[#allocation13 + $0x180] sm:$0xff] }
 0x226   : > { %11254 = vst [vmem:[#allocation109_spill] sm:$0xff] %v9630_v17  ;;  %11255 = vst [vmem:[#allocation110_spill] sm:$0xff] %v9632_v35  ;;  %v9650_v22 = vpack.c.bf16 %v630_v54, %v626_v19  ;;  %v636_v8 = vld [vmem:[#allocation13 + $0x1a0] sm:$0xff]  ;;  %v646_v54 = vld [vmem:[#allocation13 + $0x1f0] sm:$0xff] }
 0x227   : > { %6389 = vmatpush1.bf16.msra.mxu0 %v9612_v42  ;;  %6421 = vmatpush1.bf16.msra.mxu1 %v9614_v33  ;;  %v629_v42 = vld [vmem:[#allocation13 + $0x168] sm:$0xff]  ;;  %v631_v33 = vld [vmem:[#allocation13 + $0x178] sm:$0xff]  ;;  %v9660_v10 = vpack.c.bf16 %v636_v8, %v632_v40  ;;  %v640_v19 = vld [vmem:[#allocation13 + $0x1c0] sm:$0xff] }
 0x228   : > { %6391 = vmatprep.subr.bf16.mxu0 %v9618_v63  ;;  %6423 = vmatprep.subr.bf16.mxu1 %v9620_v49  ;;  %v9642_v61 = vpack.c.bf16 %v629_v42, %v625_v45  ;;  %v9644_v27 = vpack.c.bf16 %v631_v33, %v627_v34  ;;  %v633_v49 = vld [vmem:[#allocation13 + $0x188] sm:$0xff]  ;;  %v635_v63 = vld [vmem:[#allocation13 + $0x198] sm:$0xff]  ;;  %11261 = vst [vmem:[#allocation116_spill] sm:$0xff] %v9650_v22  ;;  %v634_v42 = vld [vmem:[#allocation13 + $0x190] sm:$0xff] }
 0x229   : > { %v638_v33 = vld [vmem:[#allocation13 + $0x1b0] sm:$0xff]  ;;  %11264 = vst [vmem:[#allocation119_spill] sm:$0xff] %v9660_v10 }
 0x22a   : > { %11258 = vst [vmem:[#allocation113_spill] sm:$0xff] %v9642_v61  ;;  %11259 = vst [vmem:[#allocation114_spill] sm:$0xff] %v9644_v27  ;;  %v9662_v15 = vpack.c.bf16 %v638_v33, %v634_v42 }
 0x22b   : > { %6393 = vmatpush1.bf16.msra.mxu0 %v9624_v53  ;;  %6425 = vmatpush1.bf16.msra.mxu1 %v9626_v56  ;;  %v637_v53 = vld [vmem:[#allocation13 + $0x1a8] sm:$0xff]  ;;  %v639_v56 = vld [vmem:[#allocation13 + $0x1b8] sm:$0xff] }
 0x22c   : > { %6395 = vmatprep.subr.bf16.mxu0 %v9630_v17  ;;  %6427 = vmatprep.subr.bf16.mxu1 %v9632_v35  ;;  %v9654_v34 = vpack.c.bf16 %v637_v53, %v633_v49  ;;  %v9656_v45 = vpack.c.bf16 %v639_v56, %v635_v63  ;;  %v641_v35 = vld [vmem:[#allocation13 + $0x1c8] sm:$0xff]  ;;  %v643_v17 = vld [vmem:[#allocation13 + $0x1d8] sm:$0xff]  ;;  %11265 = vst [vmem:[#allocation120_spill] sm:$0xff] %v9662_v15  ;;  %v644_v53 = vld [vmem:[#allocation13 + $0x1e0] sm:$0xff] }
 0x22d   : > { %v642_v56 = vld [vmem:[#allocation13 + $0x1d0] sm:$0xff]  ;;  %v9672_v40 = vpack.c.bf16 %v644_v53, %v640_v19 }
 0x22e   : > { %11262 = vst [vmem:[#allocation117_spill] sm:$0xff] %v9654_v34  ;;  %11263 = vst [vmem:[#allocation118_spill] sm:$0xff] %v9656_v45  ;;  %v9674_v8 = vpack.c.bf16 %v646_v54, %v642_v56 }
 0x22f   : > { %6397 = vmatpush1.bf16.msra.mxu0 %v9636_v58  ;;  %6429 = vmatpush1.bf16.msra.mxu1 %v9638_v11  ;;  %v645_v58 = vld [vmem:[#allocation13 + $0x1e8] sm:$0xff]  ;;  %v647_v11 = vld [vmem:[#allocation13 + $0x1f8] sm:$0xff]  ;;  %11268 = vst [vmem:[#allocation123_spill] sm:$0xff] %v9672_v40 }
 0x230   : > { %6399 = vmatprep.subr.bf16.mxu0 %v9642_v61  ;;  %6431 = vmatprep.subr.bf16.mxu1 %v9644_v27  ;;  %v9666_v63 = vpack.c.bf16 %v645_v58, %v641_v35  ;;  %v9668_v49 = vpack.c.bf16 %v647_v11, %v643_v17  ;;  %11269 = vst [vmem:[#allocation124_spill] sm:$0xff] %v9674_v8  ;;  %v1000_v17 = vld [vmem:[#allocation4] sm:$0xff]  ;;  %v1983_v35 = vstv %s1508_s3  ;;  %v11270_v58 = vmov 0  }
 0x231   : > { %vm1984_vm1 = vcmp.eq.s32.totalorder %v9446_v47, %v1983_v35 }
 0x232   : > { %11266 = vst [vmem:[#allocation121_spill] sm:$0xff] %v9666_v63  ;;  %11267 = vst [vmem:[#allocation122_spill] sm:$0xff] %v9668_v49  ;;  %v1985_v11 = vsel %vm1984_vm1, 1, %v11270_v58 }
 0x233   : > { %6401 = vmatpush1.bf16.msra.mxu0 %v9648_v23  ;;  %6433 = vmatpush1.bf16.msra.mxu1 %v9650_v22 }
 0x234   : > { %6403 = vmatprep.subr.bf16.mxu0 %v9654_v34  ;;  %6435 = vmatprep.subr.bf16.mxu1 %v9656_v45 }
 0x235   : > { %1987 = vperm.xlu0 %8464, %v1985_v11  }
 0x237   : > { %6405 = vmatpush1.bf16.msra.mxu0 %v9660_v10  ;;  %6437 = vmatpush1.bf16.msra.mxu1 %v9662_v15 }
 0x238   : > { %6407 = vmatprep.subr.bf16.mxu0 %v9666_v63  ;;  %6439 = vmatprep.subr.bf16.mxu1 %v9668_v49 }
 0x23b   : > { %6409 = vmatpush1.bf16.msra.mxu0 %v9672_v40  ;;  %6441 = vmatpush1.bf16.msra.mxu1 %v9674_v8 }
 0x23c   : > { %6443 = vmatprep.subr.bf16.mxu0 %v9309_v36  ;;  %6475 = vmatprep.subr.bf16.mxu1 %v9316_v44 }
 0x23e   : > { %1375 = vmatmul.mubr.f32.vlgmr.msra.gmra.mrb[20].mxu0 %v1000_v17  ;;  %1446 = vmatmul.mubr.f32.vlgmr.msra.gmra.mrb[20].mxu1 %v1000_v17 }
 0x23f   : > { %6445 = vmatpush1.bf16.msra.mxu0 %v9320_v46  ;;  %6477 = vmatpush1.bf16.msra.mxu1 %v9323_v48 }
 0x240   : > { %6447 = vmatprep.subr.bf16.mxu0 %v9327_v52  ;;  %6479 = vmatprep.subr.bf16.mxu1 %v9335_v59 }
 0x241   : > { %1595 = vmatprep.mubr.f32.mxu0 %v11215_v60  ;;  %1666 = vmatprep.mubr.f32.mxu1 %v11215_v60 }
 0x243   : > { %6449 = vmatpush1.bf16.msra.mxu0 %v9330_v55  ;;  %6481 = vmatpush1.bf16.msra.mxu1 %v9339_v0 }
 0x244   : > { %6451 = vmatprep.subr.bf16.mxu0 %v9341_v2  ;;  %6483 = vmatprep.subr.bf16.mxu1 %v9348_v7 }
 0x247   : > { %6453 = vmatpush1.bf16.msra.mxu0 %v9344_v6  ;;  %6485 = vmatpush1.bf16.msra.mxu1 %v9353_v12 }
 0x248   : > { %6455 = vmatprep.subr.bf16.mxu0 %v9357_v16  ;;  %6487 = vmatprep.subr.bf16.mxu1 %v9363_v21 }
 0x24b   : > { %6457 = vmatpush1.bf16.msra.mxu0 %v9359_v20  ;;  %6489 = vmatpush1.bf16.msra.mxu1 %v9368_v25 }
 0x24c   : > { %6459 = vmatprep.subr.bf16.mxu0 %v9372_v28  ;;  %6491 = vmatprep.subr.bf16.mxu1 %v9380_v37 }
 0x24f   : > { %6461 = vmatpush1.bf16.msra.mxu0 %v9374_v32  ;;  %6493 = vmatpush1.bf16.msra.mxu1 %v9383_v39 }
 0x250   : > { %6463 = vmatprep.subr.bf16.mxu0 %v9387_v43  ;;  %6495 = vmatprep.subr.bf16.mxu1 %v9392_v51 }
 0x253   : > { %6465 = vmatpush1.bf16.msra.mxu0 %v9389_v50  ;;  %6497 = vmatpush1.bf16.msra.mxu1 %v9397_v57 }
 0x254   : > { %6467 = vmatprep.subr.bf16.mxu0 %v9402_v62  ;;  %6499 = vmatprep.subr.bf16.mxu1 %v9407_v5 }
 0x257   : > { %6469 = vmatpush1.bf16.msra.mxu0 %v9404_v4  ;;  %6501 = vmatpush1.bf16.msra.mxu1 %v9412_v13 }
 0x258   : > { %6471 = vmatprep.subr.bf16.mxu0 %v9417_v18  ;;  %6503 = vmatprep.subr.bf16.mxu1 %v9422_v26 }
 0x25b   : > { %6473 = vmatpush1.bf16.msra.mxu0 %v9420_v24  ;;  %6505 = vmatpush1.bf16.msra.mxu1 %v9427_v31 }
 0x25c   : > { %6507 = vmatprep.subr.bf16.mxu0 %v9432_v38  ;;  %6539 = vmatprep.subr.bf16.mxu1 %v9435_v41 }
 0x2d1   : > { %v1092_v42 = vpop.f32.mrb[2].mxu0  ;;  %v1163_v33 = vpop.f32.mrb[2].mxu1 }
 0x2d2   : > { %v8194_v19 = vadd.f32 %v1092_v42, %v9462_v1  ;;  %v1094_v53 = vpop.f32.mrb[3].mxu0  ;;  %v1165_v56 = vpop.f32.mrb[3].mxu1  ;;  %v8212_v41 = vadd.f32 %v1163_v33, %v9471_v14 }
 0x2d3   : > { %v8195_v54 = vadd.f32 %v1094_v53, %v9466_v3  ;;  %v8213_v35 = vadd.f32 %v1165_v56, %v9477_v30 }
 0x2d4   : > { %v1513_v17 = vmul.f32 0.5, %v8194_v19 }
 0x2d5   : > { %v1517_v31 = vmul.f32 0.5, %v8195_v54  ;;  %v1522_v47 = vmul.f32 0.5, %v8213_v35  ;;  %v11281_v35 = vld [vmem:[#allocation72_spill] sm:$0xff] }
 0x2d6   : > { %8476 = vtanh.f32 %v1513_v17  ;;  %v11280_v17 = vld [vmem:[#allocation71_spill] sm:$0xff] }
 0x2d7   : > { %8478 = vtanh.f32 %v1517_v31 }
 0x2d8   : > { %8480 = vtanh.f32 %v8212_v41 }
 0x2d9   : > { %8482 = vtanh.f32 %v1522_v47  ;;  %v11273_v47 = vld [vmem:[#allocation64_spill] sm:$0xff] }
 0x2e0   : > { %v8477_v58 = vpop.eup %8476 }
 0x2e1   : > { %v8479_v11 = vpop.eup %8478  ;;  %v1515_v38 = vmul.f32 0.5, %v8477_v58  ;;  %v11272_v58 = vld [vmem:[#allocation63_spill] sm:$0xff] }
 0x2e2   : > { %v1519_v24 = vmul.f32 0.5, %v8479_v11  ;;  %v8481_v1 = vpop.eup %8480  ;;  %v11282_v11 = vld [vmem:[#allocation73_spill] sm:$0xff] }
 0x2e3   : > { %v1516_v42 = vadd.f32 0.5, %v1515_v38  ;;  %v8483_v31 = vpop.eup %8482  ;;  %v11274_v38 = vld [vmem:[#allocation65_spill] sm:$0xff] }
 0x2e4   : > { %v1520_v26 = vadd.f32 0.5, %v1519_v24  ;;  %v1524_v41 = vmul.f32 0.5, %v8483_v31  ;;  %v11275_v24 = vld [vmem:[#allocation66_spill] sm:$0xff]  ;;  %v11285_v31 = vld [vmem:[#allocation76_spill] sm:$0xff] }
 0x2e5   : > { %v1527_v18 = vmul.f32 %v8481_v1, %v1516_v42  ;;  %v11278_v1 = vld [vmem:[#allocation69_spill] sm:$0xff]  ;;  %v11283_v42 = vld [vmem:[#allocation74_spill] sm:$0xff] }
 0x2e6   : > { %v1526_v19 = vmul.f32 %v1520_v26, %v9481_v29  ;;  %v1525_v33 = vadd.f32 0.5, %v1524_v41  ;;  %v11277_v26 = vld [vmem:[#allocation68_spill] sm:$0xff]  ;;  %v11279_v29 = vld [vmem:[#allocation70_spill] sm:$0xff]  ;;  %v11286_v41 = vld [vmem:[#allocation77_spill] sm:$0xff] }
 0x2e8   : > { %v9724_v53 = vadd.f32 %v1527_v18, %v1526_v19  ;;  %v11276_v18 = vld [vmem:[#allocation67_spill] sm:$0xff] }
 0x2e9   : > { %v11284_v19 = vld [vmem:[#allocation75_spill] sm:$0xff] }
 0x2ea   : > { %11271 = vst [vmem:[#allocation125_spill] sm:$0xff] %v9724_v53  ;;  %8484 = vtanh.f32 %v9724_v53 }
 0x2f4   : > { %v8485_v56 = vpop.eup %8484 }
 0x2f5   : > { %v1530_v54 = vmul.f32 %v8485_v56, %v1525_v33  ;;  %v11287_v33 = vld [vmem:[#allocation78_spill] sm:$0xff]  ;;  %v11288_v56 = vld [vmem:[#allocation79_spill] sm:$0xff] }
 0x2f7   : > { %1596 = vmatmul.mubr.f32.vlgmr.msra.gmra.mrb[4].mxu0 %v1530_v54  ;;  %1667 = vmatmul.mubr.f32.vlgmr.msra.gmra.mrb[4].mxu1 %v1530_v54 }
 0x2f8   : > { %6509 = vmatpush1.bf16.msra.mxu0 %v11272_v58  ;;  %6541 = vmatpush1.bf16.msra.mxu1 %v11273_v47 }
 0x2f9   : > { %6511 = vmatprep.subr.bf16.mxu0 %v11274_v38  ;;  %6543 = vmatprep.subr.bf16.mxu1 %v11275_v24  ;;  %v11303_v24 = vld [vmem:[#allocation89_spill] sm:$0xff] }
 0x2fa   : > { %1737 = vmatprep.mubr.f32.mxu0 %v11215_v60  ;;  %1808 = vmatprep.mubr.f32.mxu1 %v11215_v60 }
 0x2fc   : > { %6513 = vmatpush1.bf16.msra.mxu0 %v11276_v18  ;;  %6545 = vmatpush1.bf16.msra.mxu1 %v11277_v26  ;;  %v11302_v26 = vld [vmem:[#allocation88_spill] sm:$0xff] }
 0x2fd   : > { %6515 = vmatprep.subr.bf16.mxu0 %v11278_v1  ;;  %6547 = vmatprep.subr.bf16.mxu1 %v11279_v29  ;;  %v11289_v1 = vld [vmem:[#allocation80_spill] sm:$0xff]  ;;  %v11290_v29 = vld [vmem:[#allocation81_spill] sm:$0xff] }
 0x300   : > { %6517 = vmatpush1.bf16.msra.mxu0 %v11280_v17  ;;  %6549 = vmatpush1.bf16.msra.mxu1 %v11281_v35  ;;  %v11291_v17 = vld [vmem:[#allocation82_spill] sm:$0xff] }
 0x301   : > { %6519 = vmatprep.subr.bf16.mxu0 %v11282_v11  ;;  %6551 = vmatprep.subr.bf16.mxu1 %v11283_v42  ;;  %v648_v42 = vld [vmem:[%s11292_s25] sm:$0xf]  ;;  %v11293_v11 = vld [vmem:[#allocation83_spill] sm:$0xff] }
 0x304   : > { %6521 = vmatpush1.bf16.msra.mxu0 %v11284_v19  ;;  %6553 = vmatpush1.bf16.msra.mxu1 %v11285_v31  ;;  %v11294_v19 = vld [vmem:[#allocation84_spill] sm:$0xff]  ;;  %v11295_v31 = vld [vmem:[#allocation85_spill] sm:$0xff] }
 0x305   : > { %6523 = vmatprep.subr.bf16.mxu0 %v11286_v41  ;;  %6555 = vmatprep.subr.bf16.mxu1 %v11287_v33  ;;  %v11296_v41 = vld [vmem:[#allocation86_spill] sm:$0xff]  ;;  %v11297_v33 = vld [vmem:[#allocation61_spill] sm:$0xff] }
 0x308   : > { %6525 = vmatpush1.bf16.msra.mxu0 %v11288_v56  ;;  %6557 = vmatpush1.bf16.msra.mxu1 %v11289_v1  ;;  %v11298_v56 = vsub.s32 0, %v11297_v33 }
 0x309   : > { %6527 = vmatprep.subr.bf16.mxu0 %v11290_v29  ;;  %6559 = vmatprep.subr.bf16.mxu1 %v11291_v17  ;;  %v11300_v29 = vsub.s32 1, %v11297_v33  ;;  %v11301_v17 = vld [vmem:[#allocation87_spill] sm:$0xff] }
 0x30a   : > { %v9758_v35 = vrot.slane %v648_v42, %v11298_v56 }
 0x30b   : > { %v9762_v1 = vrot.slane %v648_v42, %v11300_v29 }
 0x30c   : > { %6529 = vmatpush1.bf16.msra.mxu0 %v11293_v11  ;;  %6561 = vmatpush1.bf16.msra.mxu1 %v11294_v19  ;;  %11299 = vst [vmem:[#allocation61_spill] sm:$0xff] %v9758_v35  ;;  %v11304_v19 = vld [vmem:[#allocation90_spill] sm:$0xff] }
 0x30d   : > { %6531 = vmatprep.subr.bf16.mxu0 %v11295_v31  ;;  %6563 = vmatprep.subr.bf16.mxu1 %v11296_v41  ;;  %v11305_v31 = vsub.s32 2, %v11297_v33 }
 0x30f   : > { %v9771_v56 = vrot.slane %v648_v42, %v11305_v31  ;;  %v11310_v31 = vsub.s32 3, %v11297_v33 }
 0x310   : > { %6533 = vmatpush1.bf16.msra.mxu0 %v11301_v17  ;;  %6565 = vmatpush1.bf16.msra.mxu1 %v11302_v26  ;;  %v11307_v17 = vld [vmem:[#allocation91_spill] sm:$0xff]  ;;  %v11308_v26 = vld [vmem:[#allocation92_spill] sm:$0xff] }
 0x311   : > { %v1376_v18 = vpop.f32.mrb[20].mxu0  ;;  %v1447_v11 = vpop.f32.mrb[20].mxu1  ;;  %6535 = vmatprep.subr.bf16.mxu0 %v11303_v24  ;;  %6567 = vmatprep.subr.bf16.mxu1 %v11304_v19  ;;  %11306 = vst [vmem:[#allocation90_spill] sm:$0xff] %v9771_v56  ;;  %v11309_v24 = vld [vmem:[#allocation94_spill] sm:$0xff] }
 0x312   : > { %v1477_v41 = vadd.f32 %v9758_v35, %v1376_v18  ;;  %v1378_v38 = vpop.f32.mrb[21].mxu0  ;;  %v1449_v47 = vpop.f32.mrb[21].mxu1  ;;  %v1479_v18 = vadd.f32 %v9771_v56, %v1447_v11  ;;  %v9781_v35 = vrot.slane %v648_v42, %v11310_v31  ;;  %v11316_v11 = vld [vmem:[#allocation99_spill] sm:$0xff]  ;;  %v11319_v42 = vld [vmem:[#allocation102_spill] sm:$0xff] }
 0x313   : > { %v1478_v29 = vadd.f32 %v9762_v1, %v1378_v38  ;;  %v11312_v38 = vld [vmem:[#allocation95_spill] sm:$0xff] }
 0x314   : > { %v1481_v58 = vmul.f32 0.5, %v1477_v41  ;;  %6537 = vmatpush1.bf16.msra.mxu0 %v11307_v17  ;;  %6569 = vmatpush1.bf16.msra.mxu1 %v11308_v26  ;;  %11311 = vst [vmem:[#allocation91_spill] sm:$0xff] %v9781_v35  ;;  %v11313_v41 = vld [vmem:[#allocation96_spill] sm:$0xff]  ;;  %v11314_v26 = vld [vmem:[#allocation97_spill] sm:$0xff] }
 0x315   : > { %v1485_v53 = vmul.f32 0.5, %v1478_v29  ;;  %6571 = vmatprep.subr.bf16.mxu0 %v9578_v9  ;;  %6603 = vmatprep.subr.bf16.mxu1 %v11309_v24  ;;  %v11315_v29 = vld [vmem:[#allocation98_spill] sm:$0xff]  ;;  %v11324_v24 = vld [vmem:[#allocation107_spill] sm:$0xff] }
 0x316   : > { %8486 = vtanh.f32 %v1481_v58  ;;  %v1480_v58 = vadd.f32 %v9781_v35, %v1449_v47  ;;  %v11322_v35 = vld [vmem:[#allocation105_spill] sm:$0xff] }
 0x317   : > { %8488 = vtanh.f32 %v1485_v53  ;;  %1738 = vmatmul.mubr.f32.vlgmr.msra.gmra.mrb[22].mxu0 %v1530_v54  ;;  %1809 = vmatmul.mubr.f32.vlgmr.msra.gmra.mrb[22].mxu1 %v1530_v54  ;;  %v11317_v53 = vld [vmem:[#allocation100_spill] sm:$0xff]  ;;  %v11318_v54 = vld [vmem:[#allocation101_spill] sm:$0xff] }
 0x318   : > { %6573 = vmatpush1.bf16.msra.mxu0 %v11312_v38  ;;  %6605 = vmatpush1.bf16.msra.mxu1 %v11313_v41  ;;  %8490 = vtanh.f32 %v1479_v18  ;;  %v1490_v33 = vmul.f32 0.5, %v1480_v58  ;;  %v11323_v41 = vld [vmem:[#allocation106_spill] sm:$0xff]  ;;  %v11325_v58 = vld [vmem:[#allocation108_spill] sm:$0xff] }
 0x319   : > { %6575 = vmatprep.subr.bf16.mxu0 %v11314_v26  ;;  %6607 = vmatprep.subr.bf16.mxu1 %v11315_v29  ;;  %v11320_v26 = vld [vmem:[#allocation103_spill] sm:$0xff]  ;;  %v11321_v29 = vld [vmem:[#allocation104_spill] sm:$0xff] }
 0x31a   : > { %1879 = vmatprep.mubr.f32.mxu0 %v11215_v60  ;;  %1950 = vmatprep.mubr.f32.mxu1 %v11215_v60  ;;  %8492 = vtanh.f32 %v1490_v33  ;;  %v11331_v33 = vld [vmem:[#allocation56_spill] sm:$0xff] }
 0x31c   : > { %6577 = vmatpush1.bf16.msra.mxu0 %v11316_v11  ;;  %6609 = vmatpush1.bf16.msra.mxu1 %v11317_v53  ;;  %v1001_v53 = vld [vmem:[#allocation5] sm:$0xff] }
 0x31d   : > { %6579 = vmatprep.subr.bf16.mxu0 %v11318_v54  ;;  %6611 = vmatprep.subr.bf16.mxu1 %v11319_v42 }
 0x320   : > { %v8487_v31 = vpop.eup %8486  ;;  %6581 = vmatpush1.bf16.msra.mxu0 %v11320_v26  ;;  %6613 = vmatpush1.bf16.msra.mxu1 %v11321_v29  ;;  %v11326_v26 = vld [vmem:[#allocation109_spill] sm:$0xff]  ;;  %v11327_v29 = vld [vmem:[#allocation110_spill] sm:$0xff] }
 0x321   : > { %v8489_v18 = vpop.eup %8488  ;;  %v1483_v47 = vmul.f32 0.5, %v8487_v31  ;;  %6583 = vmatprep.subr.bf16.mxu0 %v11322_v35  ;;  %6615 = vmatprep.subr.bf16.mxu1 %v11323_v41  ;;  %v11328_v35 = vld [vmem:[#allocation111_spill] sm:$0xff] }
 0x322   : > { %v1487_v38 = vmul.f32 0.5, %v8489_v18  ;;  %v8491_v56 = vpop.eup %8490  ;;  %v11329_v18 = vld [vmem:[#allocation112_spill] sm:$0xff] }
 0x323   : > { %v1484_v11 = vadd.f32 0.5, %v1483_v47  ;;  %v11332_v47 = vld [vmem:[#allocation55_spill] sm:$0xff] }
 0x324   : > { %v1488_v54 = vadd.f32 0.5, %v1487_v38  ;;  %6585 = vmatpush1.bf16.msra.mxu0 %v11324_v24  ;;  %6617 = vmatpush1.bf16.msra.mxu1 %v11325_v58  ;;  %v8493_v38 = vpop.eup %8492 }
 0x325   : > { %v1495_v42 = vmul.f32 %v8491_v56, %v1484_v11  ;;  %6587 = vmatprep.subr.bf16.mxu0 %v11326_v26  ;;  %6619 = vmatprep.subr.bf16.mxu1 %v11327_v29  ;;  %v1492_v56 = vmul.f32 0.5, %v8493_v38  ;;  %v11334_v38 = vld [vmem:[#allocation58_spill] sm:$0xff] }
 0x326   : > { %v1494_v31 = vmul.f32 %v1488_v54, %v1001_v53 }
 0x327   : > { %v1493_v11 = vadd.f32 0.5, %v1492_v56  ;;  %v11335_v56 = vld [vmem:[#allocation59_spill] sm:$0xff] }
 0x328   : > { %v9802_v9 = vadd.f32 %v1495_v42, %v1494_v31  ;;  %6589 = vmatpush1.bf16.msra.mxu0 %v11328_v35  ;;  %6621 = vmatpush1.bf16.msra.mxu1 %v11329_v18  ;;  %v11330_v42 = vld [vmem:[#allocation54_spill] sm:$0xff]  ;;  %v11333_v31 = vld [vmem:[#allocation57_spill] sm:$0xff] }
 0x329   : > { %6591 = vmatprep.subr.bf16.mxu0 %v9642_v61  ;;  %6623 = vmatprep.subr.bf16.mxu1 %v9644_v27 }
 0x32a   : > { %8494 = vtanh.f32 %v9802_v9 }
 0x32c   : > { %6593 = vmatpush1.bf16.msra.mxu0 %v9648_v23  ;;  %6625 = vmatpush1.bf16.msra.mxu1 %v9650_v22 }
 0x32d   : > { %6595 = vmatprep.subr.bf16.mxu0 %v9654_v34  ;;  %6627 = vmatprep.subr.bf16.mxu1 %v9656_v45 }
 0x330   : > { %6597 = vmatpush1.bf16.msra.mxu0 %v9660_v10  ;;  %6629 = vmatpush1.bf16.msra.mxu1 %v9662_v15 }
 0x331   : > { %6599 = vmatprep.subr.bf16.mxu0 %v9666_v63  ;;  %6631 = vmatprep.subr.bf16.mxu1 %v9668_v49 }
 0x334   : > { %v8495_v53 = vpop.eup %8494  ;;  %6601 = vmatpush1.bf16.msra.mxu0 %v9672_v40  ;;  %6633 = vmatpush1.bf16.msra.mxu1 %v9674_v8 }
 0x335   : > { %v9819_v54 = vmul.f32 %v8495_v53, %v1493_v11  ;;  %6635 = vmatprep.subr.bf16.mxu0 %v9309_v36  ;;  %6667 = vmatprep.subr.bf16.mxu1 %v9316_v44  ;;  %v2466_v11 = vstv %s1991_s2  ;;  %v11336_v53 = vld [vmem:[#allocation60_spill] sm:$0xff] }
 0x336   : > { %vm2467_vm2 = vcmp.eq.s32.totalorder %v11336_v53, %v2466_v11 }
 0x337   : > { %1880 = vmatmul.mubr.f32.vlgmr.msra.gmra.mrb[22].mxu0 %v9819_v54  ;;  %1951 = vmatmul.mubr.f32.vlgmr.msra.gmra.mrb[22].mxu1 %v9819_v54 }
 0x338   : > { %6637 = vmatpush1.bf16.msra.mxu0 %v9320_v46  ;;  %6669 = vmatpush1.bf16.msra.mxu1 %v9323_v48 }
 0x339   : > { %6639 = vmatprep.subr.bf16.mxu0 %v9327_v52  ;;  %6671 = vmatprep.subr.bf16.mxu1 %v9335_v59 }
 0x33a   : > { %2078 = vmatprep.mubr.f32.mxu0 %v11215_v60  ;;  %2149 = vmatprep.mubr.f32.mxu1 %v11215_v60 }
 0x33c   : > { %6641 = vmatpush1.bf16.msra.mxu0 %v9330_v55  ;;  %6673 = vmatpush1.bf16.msra.mxu1 %v9339_v0 }
 0x33d   : > { %6643 = vmatprep.subr.bf16.mxu0 %v9341_v2  ;;  %6675 = vmatprep.subr.bf16.mxu1 %v9348_v7 }
 0x340   : > { %6645 = vmatpush1.bf16.msra.mxu0 %v9344_v6  ;;  %6677 = vmatpush1.bf16.msra.mxu1 %v9353_v12 }
 0x341   : > { %6647 = vmatprep.subr.bf16.mxu0 %v9357_v16  ;;  %6679 = vmatprep.subr.bf16.mxu1 %v9363_v21 }
 0x344   : > { %6649 = vmatpush1.bf16.msra.mxu0 %v9359_v20  ;;  %6681 = vmatpush1.bf16.msra.mxu1 %v9368_v25 }
 0x345   : > { %6651 = vmatprep.subr.bf16.mxu0 %v9372_v28  ;;  %6683 = vmatprep.subr.bf16.mxu1 %v9380_v37 }
 0x348   : > { %6653 = vmatpush1.bf16.msra.mxu0 %v9374_v32  ;;  %6685 = vmatpush1.bf16.msra.mxu1 %v9383_v39 }
 0x349   : > { %6655 = vmatprep.subr.bf16.mxu0 %v9387_v43  ;;  %6687 = vmatprep.subr.bf16.mxu1 %v9392_v51 }
 0x34c   : > { %6657 = vmatpush1.bf16.msra.mxu0 %v9389_v50  ;;  %6689 = vmatpush1.bf16.msra.mxu1 %v9397_v57 }
 0x34d   : > { %6659 = vmatprep.subr.bf16.mxu0 %v9402_v62  ;;  %6691 = vmatprep.subr.bf16.mxu1 %v9407_v5  ;;  %v11337_v5 = vmov 0  }
 0x350   : > { %6661 = vmatpush1.bf16.msra.mxu0 %v9404_v4  ;;  %6693 = vmatpush1.bf16.msra.mxu1 %v9412_v13  ;;  %v2468_v4 = vsel %vm2467_vm2, 1, %v11337_v5 }
 0x351   : > { %6663 = vmatprep.subr.bf16.mxu0 %v11330_v42  ;;  %6695 = vmatprep.subr.bf16.mxu1 %v11331_v33  ;;  %v11338_v42 = vld [vmem:[#allocation62_spill] sm:$0xff] }
 0x352   : > { %2470 = vperm.xlu1 %8465, %v2468_v4  }
 0x354   : > { %6665 = vmatpush1.bf16.msra.mxu0 %v11332_v47  ;;  %6697 = vmatpush1.bf16.msra.mxu1 %v11333_v31 }
 0x355   : > { %6699 = vmatprep.subr.bf16.mxu0 %v11334_v38  ;;  %6731 = vmatprep.subr.bf16.mxu1 %v11335_v56 }
 0x3ca   : > { %v1597_v13 = vpop.f32.mrb[4].mxu0  ;;  %v1668_v62 = vpop.f32.mrb[4].mxu1 }
 0x3cb   : > { %v8196_v57 = vadd.f32 %v1597_v13, %v11338_v42  ;;  %v1599_v33 = vpop.f32.mrb[5].mxu0  ;;  %v1670_v50 = vpop.f32.mrb[5].mxu1  ;;  %v8214_v56 = vadd.f32 %v1668_v62, %v9471_v14 }
 0x3cc   : > { %v8197_v47 = vadd.f32 %v1599_v33, %v9466_v3  ;;  %v8215_v11 = vadd.f32 %v1670_v50, %v9477_v30  ;;  %v11339_v33 = vld [vmem:[#allocation125_spill] sm:$0xff] }
 0x3cd   : > { %v1996_v31 = vmul.f32 0.5, %v8196_v57 }
 0x3ce   : > { %v2000_v51 = vmul.f32 0.5, %v8197_v47  ;;  %v2005_v53 = vmul.f32 0.5, %v8215_v11  ;;  %v11347_v11 = vld [vmem:[#allocation70_spill] sm:$0xff] }
 0x3cf   : > { %8496 = vtanh.f32 %v1996_v31 }
 0x3d0   : > { %8498 = vtanh.f32 %v2000_v51 }
 0x3d1   : > { %8500 = vtanh.f32 %v8214_v56 }
 0x3d2   : > { %8502 = vtanh.f32 %v2005_v53  ;;  %v11341_v53 = vld [vmem:[#allocation64_spill] sm:$0xff] }
 0x3d9   : > { %v8497_v5 = vpop.eup %8496 }
 0x3da   : > { %v8499_v4 = vpop.eup %8498  ;;  %v1998_v38 = vmul.f32 0.5, %v8497_v5  ;;  %v11340_v5 = vld [vmem:[#allocation63_spill] sm:$0xff] }
 0x3db   : > { %v2002_v43 = vmul.f32 0.5, %v8499_v4  ;;  %v8501_v42 = vpop.eup %8500  ;;  %v11348_v4 = vld [vmem:[#allocation71_spill] sm:$0xff] }
 0x3dc   : > { %v1999_v13 = vadd.f32 0.5, %v1998_v38  ;;  %v8503_v51 = vpop.eup %8502  ;;  %v11342_v38 = vld [vmem:[#allocation65_spill] sm:$0xff] }
 0x3dd   : > { %v2003_v39 = vadd.f32 0.5, %v2002_v43  ;;  %v2007_v62 = vmul.f32 0.5, %v8503_v51  ;;  %v11343_v43 = vld [vmem:[#allocation66_spill] sm:$0xff]  ;;  %v11352_v51 = vld [vmem:[#allocation75_spill] sm:$0xff] }
 0x3de   : > { %v2010_v32 = vmul.f32 %v8501_v42, %v1999_v13  ;;  %v11346_v42 = vld [vmem:[#allocation69_spill] sm:$0xff]  ;;  %v11349_v13 = vld [vmem:[#allocation72_spill] sm:$0xff] }
 0x3df   : > { %v2009_v57 = vmul.f32 %v2003_v39, %v11339_v33  ;;  %v2008_v31 = vadd.f32 0.5, %v2007_v62  ;;  %v11345_v39 = vld [vmem:[#allocation68_spill] sm:$0xff]  ;;  %v11350_v33 = vld [vmem:[#allocation73_spill] sm:$0xff] }
 0x3e0   : > { %v11353_v62 = vld [vmem:[#allocation76_spill] sm:$0xff] }
 0x3e1   : > { %v9867_v47 = vadd.f32 %v2010_v32, %v2009_v57  ;;  %v11344_v32 = vld [vmem:[#allocation67_spill] sm:$0xff]  ;;  %v11351_v57 = vld [vmem:[#allocation74_spill] sm:$0xff] }
 0x3e3   : > { %8504 = vtanh.f32 %v9867_v47 }
 0x3ed   : > { %v8505_v50 = vpop.eup %8504 }
 0x3ee   : > { %v2013_v56 = vmul.f32 %v8505_v50, %v2008_v31  ;;  %v11354_v31 = vld [vmem:[#allocation77_spill] sm:$0xff]  ;;  %v11355_v50 = vld [vmem:[#allocation78_spill] sm:$0xff] }
 0x3f0   : > { %2079 = vmatmul.mubr.f32.vlgmr.msra.gmra.mrb[6].mxu0 %v2013_v56  ;;  %2150 = vmatmul.mubr.f32.vlgmr.msra.gmra.mrb[6].mxu1 %v2013_v56 }
 0x3f1   : > { %6701 = vmatpush1.bf16.msra.mxu0 %v11340_v5  ;;  %6733 = vmatpush1.bf16.msra.mxu1 %v11341_v53 }
 0x3f2   : > { %6703 = vmatprep.subr.bf16.mxu0 %v11342_v38  ;;  %6735 = vmatprep.subr.bf16.mxu1 %v11343_v43 }
 0x3f3   : > { %2220 = vmatprep.mubr.f32.mxu0 %v11215_v60  ;;  %2291 = vmatprep.mubr.f32.mxu1 %v11215_v60 }
 0x3f5   : > { %6705 = vmatpush1.bf16.msra.mxu0 %v11344_v32  ;;  %6737 = vmatpush1.bf16.msra.mxu1 %v11345_v39  ;;  %v11356_v39 = vld [vmem:[#allocation79_spill] sm:$0xff]  ;;  %v11366_v32 = vld [vmem:[#allocation89_spill] sm:$0xff] }
 0x3f6   : > { %6707 = vmatprep.subr.bf16.mxu0 %v11346_v42  ;;  %6739 = vmatprep.subr.bf16.mxu1 %v11347_v11  ;;  %v11357_v42 = vld [vmem:[#allocation80_spill] sm:$0xff]  ;;  %v11358_v11 = vld [vmem:[#allocation81_spill] sm:$0xff] }
 0x3f9   : > { %6709 = vmatpush1.bf16.msra.mxu0 %v11348_v4  ;;  %6741 = vmatpush1.bf16.msra.mxu1 %v11349_v13  ;;  %v11359_v4 = vld [vmem:[#allocation82_spill] sm:$0xff]  ;;  %v11360_v13 = vld [vmem:[#allocation83_spill] sm:$0xff] }
 0x3fa   : > { %6711 = vmatprep.subr.bf16.mxu0 %v11350_v33  ;;  %6743 = vmatprep.subr.bf16.mxu1 %v11351_v57  ;;  %v11361_v33 = vld [vmem:[#allocation84_spill] sm:$0xff]  ;;  %v11362_v57 = vld [vmem:[#allocation85_spill] sm:$0xff] }
 0x3fd   : > { %6713 = vmatpush1.bf16.msra.mxu0 %v11352_v51  ;;  %6745 = vmatpush1.bf16.msra.mxu1 %v11353_v62  ;;  %v11363_v51 = vld [vmem:[#allocation86_spill] sm:$0xff]  ;;  %v11364_v62 = vld [vmem:[#allocation87_spill] sm:$0xff] }
 0x3fe   : > { %6715 = vmatprep.subr.bf16.mxu0 %v11354_v31  ;;  %6747 = vmatprep.subr.bf16.mxu1 %v11355_v50  ;;  %v11365_v31 = vld [vmem:[#allocation88_spill] sm:$0xff] }
 0x401   : > { %6717 = vmatpush1.bf16.msra.mxu0 %v11356_v39  ;;  %6749 = vmatpush1.bf16.msra.mxu1 %v11357_v42 }
 0x402   : > { %6719 = vmatprep.subr.bf16.mxu0 %v11358_v11  ;;  %6751 = vmatprep.subr.bf16.mxu1 %v11359_v4  ;;  %v11367_v11 = vld [vmem:[#allocation61_spill] sm:$0xff] }
 0x405   : > { %6721 = vmatpush1.bf16.msra.mxu0 %v11360_v13  ;;  %6753 = vmatpush1.bf16.msra.mxu1 %v11361_v33 }
 0x406   : > { %6723 = vmatprep.subr.bf16.mxu0 %v11362_v57  ;;  %6755 = vmatprep.subr.bf16.mxu1 %v11363_v51  ;;  %v11368_v51 = vld [vmem:[#allocation92_spill] sm:$0xff]  ;;  %v11369_v57 = vld [vmem:[#allocation93_spill] sm:$0xff] }
 0x409   : > { %6725 = vmatpush1.bf16.msra.mxu0 %v11364_v62  ;;  %6757 = vmatpush1.bf16.msra.mxu1 %v11365_v31  ;;  %v11370_v31 = vld [vmem:[#allocation94_spill] sm:$0xff] }
 0x40a   : > { %v1881_v50 = vpop.f32.mrb[22].mxu0  ;;  %v1952_v39 = vpop.f32.mrb[22].mxu1  ;;  %6727 = vmatprep.subr.bf16.mxu0 %v11366_v32  ;;  %6759 = vmatprep.subr.bf16.mxu1 %v11304_v19  ;;  %v11371_v32 = vld [vmem:[#allocation90_spill] sm:$0xff] }
 0x40b   : > { %v1961_v4 = vadd.f32 %v1881_v50, %v11367_v11  ;;  %v1883_v42 = vpop.f32.mrb[23].mxu0  ;;  %v1954_v13 = vpop.f32.mrb[23].mxu1  ;;  %v1963_v38 = vadd.f32 %v1952_v39, %v11371_v32  ;;  %v11372_v50 = vld [vmem:[#allocation95_spill] sm:$0xff]  ;;  %v11373_v11 = vld [vmem:[#allocation96_spill] sm:$0xff] }
 0x40c   : > { %v1962_v33 = vadd.f32 %v1883_v42, %v9762_v1  ;;  %v11374_v42 = vld [vmem:[#allocation97_spill] sm:$0xff]  ;;  %v11378_v39 = vld [vmem:[#allocation100_spill] sm:$0xff] }
 0x40d   : > { %v1965_v43 = vmul.f32 0.5, %v1961_v4  ;;  %6729 = vmatpush1.bf16.msra.mxu0 %v11307_v17  ;;  %6761 = vmatpush1.bf16.msra.mxu1 %v11368_v51  ;;  %v11375_v4 = vld [vmem:[#allocation98_spill] sm:$0xff] }
 0x40e   : > { %v1969_v62 = vmul.f32 0.5, %v1962_v33  ;;  %6763 = vmatprep.subr.bf16.mxu0 %v11369_v57  ;;  %6795 = vmatprep.subr.bf16.mxu1 %v11370_v31  ;;  %v11376_v33 = vld [vmem:[#allocation91_spill] sm:$0xff] }
 0x40f   : > { %8506 = vtanh.f32 %v1965_v43  ;;  %v1964_v51 = vadd.f32 %v1954_v13, %v11376_v33  ;;  %v11377_v43 = vld [vmem:[#allocation99_spill] sm:$0xff]  ;;  %v11383_v33 = vld [vmem:[#allocation105_spill] sm:$0xff] }
 0x410   : > { %8508 = vtanh.f32 %v1969_v62  ;;  %2221 = vmatmul.mubr.f32.vlgmr.msra.gmra.mrb[24].mxu0 %v2013_v56  ;;  %2292 = vmatmul.mubr.f32.vlgmr.msra.gmra.mrb[24].mxu1 %v2013_v56  ;;  %v11379_v56 = vld [vmem:[#allocation101_spill] sm:$0xff]  ;;  %v11380_v62 = vld [vmem:[#allocation102_spill] sm:$0xff] }
 0x411   : > { %6765 = vmatpush1.bf16.msra.mxu0 %v11372_v50  ;;  %6797 = vmatpush1.bf16.msra.mxu1 %v11373_v11  ;;  %8510 = vtanh.f32 %v1963_v38  ;;  %v1974_v11 = vmul.f32 0.5, %v1964_v51 }
 0x412   : > { %6767 = vmatprep.subr.bf16.mxu0 %v11374_v42  ;;  %6799 = vmatprep.subr.bf16.mxu1 %v11375_v4  ;;  %v11381_v42 = vld [vmem:[#allocation103_spill] sm:$0xff]  ;;  %v11382_v4 = vld [vmem:[#allocation104_spill] sm:$0xff] }
 0x413   : > { %2362 = vmatprep.mubr.f32.mxu0 %v11215_v60  ;;  %2433 = vmatprep.mubr.f32.mxu1 %v11215_v60  ;;  %8512 = vtanh.f32 %v1974_v11  ;;  %v1505_v11 = vpop.permute.xlu0 %1504 }
 0x414   : > { %vm1506_vm3 = vcmp.eq.s32.totalorder %v1505_v11, 1  ;;  %v11386_v11 = vld [vmem:[#allocation46_spill] sm:$0xff] }
 0x415   : > { %6769 = vmatpush1.bf16.msra.mxu0 %v11377_v43  ;;  %6801 = vmatpush1.bf16.msra.mxu1 %v11378_v39 }
 0x416   : > { %6771 = vmatprep.subr.bf16.mxu0 %v11379_v56  ;;  %6803 = vmatprep.subr.bf16.mxu1 %v11380_v62 }
 0x419   : > { %v8507_v50 = vpop.eup %8506  ;;  %6773 = vmatpush1.bf16.msra.mxu0 %v11381_v42  ;;  %6805 = vmatpush1.bf16.msra.mxu1 %v11382_v4 }
 0x41a   : > { %v8509_v38 = vpop.eup %8508  ;;  %v1967_v13 = vmul.f32 0.5, %v8507_v50  ;;  %6775 = vmatprep.subr.bf16.mxu0 %v11383_v33  ;;  %6807 = vmatprep.subr.bf16.mxu1 %v11323_v41 }
 0x41b   : > { %v1971_v32 = vmul.f32 0.5, %v8509_v38  ;;  %v8511_v39 = vpop.eup %8510 }
 0x41c   : > { %v1968_v43 = vadd.f32 0.5, %v1967_v13 }
 0x41d   : > { %v1972_v31 = vadd.f32 0.5, %v1971_v32  ;;  %6777 = vmatpush1.bf16.msra.mxu0 %v11324_v24  ;;  %6809 = vmatpush1.bf16.msra.mxu1 %v11325_v58  ;;  %v8513_v32 = vpop.eup %8512 }
 0x41e   : > { %v1979_v51 = vmul.f32 %v8511_v39, %v1968_v43  ;;  %6779 = vmatprep.subr.bf16.mxu0 %v11326_v26  ;;  %6811 = vmatprep.subr.bf16.mxu1 %v11327_v29  ;;  %v1002_v43 = vld [vmem:[#allocation6] sm:$0xff] }
 0x41f   : > { %v1978_v50 = vmul.f32 %v1972_v31, %v9802_v9  ;;  %v1976_v9 = vmul.f32 0.5, %v8513_v32  ;;  %v1988_v31 = vpop.permute.xlu0 %1987  ;;  %v11385_v32 = vld [vmem:[#allocation45_spill] sm:$0xff] }
 0x420   : > { %vm1989_vm4 = vcmp.eq.s32.totalorder %v1988_v31, 1  ;;  %v11388_v31 = vld [vmem:[#allocation47_spill] sm:$0xff] }
 0x421   : > { %v9927_v4 = vadd.f32 %v1979_v51, %v1978_v50  ;;  %6781 = vmatpush1.bf16.msra.mxu0 %v11328_v35  ;;  %6813 = vmatpush1.bf16.msra.mxu1 %v11329_v18  ;;  %v1977_v39 = vadd.f32 0.5, %v1976_v9  ;;  %v1507_v51 = vsel %vm1506_vm3, %v9819_v54, %v1002_v43  ;;  %v11384_v54 = vld [vmem:[#allocation43_spill] sm:$0xff]  ;;  %v11387_v9 = vld [vmem:[#allocation48_spill] sm:$0xff]  ;;  %v11389_v43 = vld [vmem:[#allocation49_spill] sm:$0xff] }
 0x422   : > { %6783 = vmatprep.subr.bf16.mxu0 %v9642_v61  ;;  %6815 = vmatprep.subr.bf16.mxu1 %v9644_v27 }
 0x423   : > { %8514 = vtanh.f32 %v9927_v4 }
 0x425   : > { %6785 = vmatpush1.bf16.msra.mxu0 %v9648_v23  ;;  %6817 = vmatpush1.bf16.msra.mxu1 %v9650_v22 }
 0x426   : > { %6787 = vmatprep.subr.bf16.mxu0 %v9654_v34  ;;  %6819 = vmatprep.subr.bf16.mxu1 %v9656_v45 }
 0x429   : > { %6789 = vmatpush1.bf16.msra.mxu0 %v9660_v10  ;;  %6821 = vmatpush1.bf16.msra.mxu1 %v9662_v15 }
 0x42a   : > { %6791 = vmatprep.subr.bf16.mxu0 %v9666_v63  ;;  %6823 = vmatprep.subr.bf16.mxu1 %v9668_v49 }
 0x42d   : > { %v8515_v38 = vpop.eup %8514  ;;  %6793 = vmatpush1.bf16.msra.mxu0 %v9672_v40  ;;  %6825 = vmatpush1.bf16.msra.mxu1 %v9674_v8 }
 0x42e   : > { %v1982_v13 = vmul.f32 %v8515_v38, %v1977_v39  ;;  %6827 = vmatprep.subr.bf16.mxu0 %v9309_v36  ;;  %6859 = vmatprep.subr.bf16.mxu1 %v9316_v44  ;;  %v11390_v39 = vld [vmem:[#allocation50_spill] sm:$0xff]  ;;  %v11391_v38 = vld [vmem:[#allocation52_spill] sm:$0xff] }
 0x430   : > { %v9947_v50 = vsel %vm1989_vm4, %v1982_v13, %v1507_v51  ;;  %2363 = vmatmul.mubr.f32.vlgmr.msra.gmra.mrb[24].mxu0 %v1982_v13  ;;  %2434 = vmatmul.mubr.f32.vlgmr.msra.gmra.mrb[24].mxu1 %v1982_v13  ;;  %v11392_v13 = vld [vmem:[#allocation51_spill] sm:$0xff]  ;;  %v11393_v51 = vld [vmem:[#allocation53_spill] sm:$0xff]  ;;  %vm8956_vm4 = vmmov (!%p6127_p9), 0  }
 0x431   : > { %6829 = vmatpush1.bf16.msra.mxu0 %v9320_v46  ;;  %6861 = vmatpush1.bf16.msra.mxu1 %v9323_v48 }
 0x432   : > { %6831 = vmatprep.subr.bf16.mxu0 %v9327_v52  ;;  %6863 = vmatprep.subr.bf16.mxu1 %v9335_v59 }
 0x433   : > { %2561 = vmatprep.mubr.f32.mxu0 %v11215_v60  ;;  %2632 = vmatprep.mubr.f32.mxu1 %v11215_v60 }
 0x435   : > { %6833 = vmatpush1.bf16.msra.mxu0 %v9330_v55  ;;  %6865 = vmatpush1.bf16.msra.mxu1 %v9339_v0 }
 0x436   : > { %6835 = vmatprep.subr.bf16.mxu0 %v9341_v2  ;;  %6867 = vmatprep.subr.bf16.mxu1 %v9348_v7 }
 0x439   : > { %6837 = vmatpush1.bf16.msra.mxu0 %v9344_v6  ;;  %6869 = vmatpush1.bf16.msra.mxu1 %v9353_v12 }
 0x43a   : > { %6839 = vmatprep.subr.bf16.mxu0 %v9357_v16  ;;  %6871 = vmatprep.subr.bf16.mxu1 %v9363_v21 }
 0x43d   : > { %6841 = vmatpush1.bf16.msra.mxu0 %v9359_v20  ;;  %6873 = vmatpush1.bf16.msra.mxu1 %v9368_v25 }
 0x43e   : > { %6843 = vmatprep.subr.bf16.mxu0 %v9372_v28  ;;  %6875 = vmatprep.subr.bf16.mxu1 %v9380_v37  ;;  %v11395_v37 = vld [vmem:[#allocation56_spill] sm:$0xff] }
 0x441   : > { %6845 = vmatpush1.bf16.msra.mxu0 %v11384_v54  ;;  %6877 = vmatpush1.bf16.msra.mxu1 %v11385_v32  ;;  %v11394_v54 = vld [vmem:[#allocation54_spill] sm:$0xff]  ;;  %v11396_v32 = vld [vmem:[#allocation55_spill] sm:$0xff] }
 0x442   : > { %6847 = vmatprep.subr.bf16.mxu0 %v11386_v11  ;;  %6879 = vmatprep.subr.bf16.mxu1 %v11387_v9  ;;  %v11397_v11 = vld [vmem:[#allocation57_spill] sm:$0xff]  ;;  %v11398_v9 = vld [vmem:[#allocation58_spill] sm:$0xff] }
 0x445   : > { %6849 = vmatpush1.bf16.msra.mxu0 %v11388_v31  ;;  %6881 = vmatpush1.bf16.msra.mxu1 %v11389_v43  ;;  %v11399_v31 = vld [vmem:[#allocation59_spill] sm:$0xff]  ;;  %v11400_v43 = vld [vmem:[#allocation60_spill] sm:$0xff] }
 0x446   : > { %6851 = vmatprep.subr.bf16.mxu0 %v11390_v39  ;;  %6883 = vmatprep.subr.bf16.mxu1 %v11391_v38  ;;  %v2949_v39 = vstv %s2474_s27  ;;  %v11401_v38 = vmov 0  }
 0x447   : > { %vm2950_vm5 = vcmp.eq.s32.totalorder %v11400_v43, %v2949_v39 }
 0x449   : > { %6853 = vmatpush1.bf16.msra.mxu0 %v11392_v13  ;;  %6885 = vmatpush1.bf16.msra.mxu1 %v11393_v51  ;;  %v2951_v13 = vsel %vm2950_vm5, 1, %v11401_v38 }
 0x44a   : > { %6855 = vmatprep.subr.bf16.mxu0 %v11394_v54  ;;  %6887 = vmatprep.subr.bf16.mxu1 %v11395_v37  ;;  %v11402_v54 = vld [vmem:[#allocation62_spill] sm:$0xff] }
 0x44b   : > { %2953 = vperm.xlu1 %8465, %v2951_v13  }
 0x44d   : > { %6857 = vmatpush1.bf16.msra.mxu0 %v11396_v32  ;;  %6889 = vmatpush1.bf16.msra.mxu1 %v11397_v11 }
 0x44e   : > { %6891 = vmatprep.subr.bf16.mxu0 %v11398_v9  ;;  %6923 = vmatprep.subr.bf16.mxu1 %v11399_v31 }
 0x4c3   : > { %v2080_v51 = vpop.f32.mrb[6].mxu0  ;;  %v2151_v28 = vpop.f32.mrb[6].mxu1 }
 0x4c4   : > { %v8198_v25 = vadd.f32 %v2080_v51, %v11402_v54  ;;  %v2082_v37 = vpop.f32.mrb[7].mxu0  ;;  %v2153_v20 = vpop.f32.mrb[7].mxu1  ;;  %v8216_v31 = vadd.f32 %v2151_v28, %v9471_v14 }
 0x4c5   : > { %v8199_v32 = vadd.f32 %v2082_v37, %v9466_v3  ;;  %v8217_v39 = vadd.f32 %v2153_v20, %v9477_v30 }
 0x4c6   : > { %v2479_v11 = vmul.f32 0.5, %v8198_v25 }
 0x4c7   : > { %v2483_v21 = vmul.f32 0.5, %v8199_v32  ;;  %v2488_v43 = vmul.f32 0.5, %v8217_v39  ;;  %v11412_v39 = vld [vmem:[#allocation74_spill] sm:$0xff] }
 0x4c8   : > { %8516 = vtanh.f32 %v2479_v11 }
 0x4c9   : > { %8518 = vtanh.f32 %v2483_v21 }
 0x4ca   : > { %8520 = vtanh.f32 %v8216_v31  ;;  %v11409_v31 = vld [vmem:[#allocation71_spill] sm:$0xff] }
 0x4cb   : > { %8522 = vtanh.f32 %v2488_v43  ;;  %v11410_v43 = vld [vmem:[#allocation72_spill] sm:$0xff] }
 0x4d2   : > { %v8517_v38 = vpop.eup %8516 }
 0x4d3   : > { %v8519_v13 = vpop.eup %8518  ;;  %v2481_v9 = vmul.f32 0.5, %v8517_v38  ;;  %v11411_v38 = vld [vmem:[#allocation73_spill] sm:$0xff] }
 0x4d4   : > { %v2485_v16 = vmul.f32 0.5, %v8519_v13  ;;  %v8521_v54 = vpop.eup %8520  ;;  %v11413_v13 = vld [vmem:[#allocation75_spill] sm:$0xff] }
 0x4d5   : > { %v2482_v51 = vadd.f32 0.5, %v2481_v9  ;;  %v8523_v21 = vpop.eup %8522  ;;  %v11403_v9 = vld [vmem:[#allocation65_spill] sm:$0xff] }
 0x4d6   : > { %v2486_v12 = vadd.f32 0.5, %v2485_v16  ;;  %v2490_v28 = vmul.f32 0.5, %v8523_v21  ;;  %v11404_v16 = vld [vmem:[#allocation66_spill] sm:$0xff] }
 0x4d7   : > { %v2493_v6 = vmul.f32 %v8521_v54, %v2482_v51  ;;  %v11408_v54 = vld [vmem:[#allocation70_spill] sm:$0xff]  ;;  %v11414_v51 = vld [vmem:[#allocation76_spill] sm:$0xff] }
 0x4d8   : > { %v2492_v25 = vmul.f32 %v2486_v12, %v9867_v47  ;;  %v2491_v32 = vadd.f32 0.5, %v2490_v28  ;;  %v11406_v12 = vld [vmem:[#allocation68_spill] sm:$0xff]  ;;  %v11407_v47 = vld [vmem:[#allocation69_spill] sm:$0xff]  ;;  %v11416_v21 = vld [vmem:[#allocation78_spill] sm:$0xff] }
 0x4d9   : > { %v11417_v28 = vld [vmem:[#allocation79_spill] sm:$0xff] }
 0x4da   : > { %v9991_v37 = vadd.f32 %v2493_v6, %v2492_v25  ;;  %v11405_v6 = vld [vmem:[#allocation67_spill] sm:$0xff]  ;;  %v11415_v25 = vld [vmem:[#allocation77_spill] sm:$0xff] }
 0x4dc   : > { %8524 = vtanh.f32 %v9991_v37 }
 0x4e6   : > { %v8525_v20 = vpop.eup %8524 }
 0x4e7   : > { %v2496_v11 = vmul.f32 %v8525_v20, %v2491_v32  ;;  %v11418_v32 = vld [vmem:[#allocation80_spill] sm:$0xff]  ;;  %v11419_v20 = vld [vmem:[#allocation81_spill] sm:$0xff] }
 0x4e9   : > { %2562 = vmatmul.mubr.f32.vlgmr.msra.gmra.mrb[8].mxu0 %v2496_v11  ;;  %2633 = vmatmul.mubr.f32.vlgmr.msra.gmra.mrb[8].mxu1 %v2496_v11 }
 0x4ea   : > { %6893 = vmatpush1.bf16.msra.mxu0 %v11340_v5  ;;  %6925 = vmatpush1.bf16.msra.mxu1 %v11341_v53 }
 0x4eb   : > { %6895 = vmatprep.subr.bf16.mxu0 %v11403_v9  ;;  %6927 = vmatprep.subr.bf16.mxu1 %v11404_v16 }
 0x4ec   : > { %2703 = vmatprep.mubr.f32.mxu0 %v11215_v60  ;;  %2774 = vmatprep.mubr.f32.mxu1 %v11215_v60 }
 0x4ee   : > { %6897 = vmatpush1.bf16.msra.mxu0 %v11405_v6  ;;  %6929 = vmatpush1.bf16.msra.mxu1 %v11406_v12 }
 0x4ef   : > { %6899 = vmatprep.subr.bf16.mxu0 %v11407_v47  ;;  %6931 = vmatprep.subr.bf16.mxu1 %v11408_v54  ;;  %v11427_v54 = vld [vmem:[#allocation89_spill] sm:$0xff] }
 0x4f2   : > { %6901 = vmatpush1.bf16.msra.mxu0 %v11409_v31  ;;  %6933 = vmatpush1.bf16.msra.mxu1 %v11410_v43  ;;  %v11420_v31 = vld [vmem:[#allocation82_spill] sm:$0xff]  ;;  %v11421_v43 = vld [vmem:[#allocation83_spill] sm:$0xff] }
 0x4f3   : > { %6903 = vmatprep.subr.bf16.mxu0 %v11411_v38  ;;  %6935 = vmatprep.subr.bf16.mxu1 %v11412_v39  ;;  %v11422_v38 = vld [vmem:[#allocation84_spill] sm:$0xff]  ;;  %v11423_v39 = vld [vmem:[#allocation85_spill] sm:$0xff] }
 0x4f6   : > { %6905 = vmatpush1.bf16.msra.mxu0 %v11413_v13  ;;  %6937 = vmatpush1.bf16.msra.mxu1 %v11414_v51  ;;  %v11424_v13 = vld [vmem:[#allocation86_spill] sm:$0xff]  ;;  %v11425_v51 = vld [vmem:[#allocation87_spill] sm:$0xff] }
 0x4f7   : > { %6907 = vmatprep.subr.bf16.mxu0 %v11415_v25  ;;  %6939 = vmatprep.subr.bf16.mxu1 %v11416_v21  ;;  %v11426_v25 = vld [vmem:[#allocation88_spill] sm:$0xff] }
 0x4fa   : > { %6909 = vmatpush1.bf16.msra.mxu0 %v11417_v28  ;;  %6941 = vmatpush1.bf16.msra.mxu1 %v11418_v32 }
 0x4fb   : > { %6911 = vmatprep.subr.bf16.mxu0 %v11419_v20  ;;  %6943 = vmatprep.subr.bf16.mxu1 %v11420_v31  ;;  %v11428_v20 = vld [vmem:[#allocation61_spill] sm:$0xff] }
 0x4fe   : > { %6913 = vmatpush1.bf16.msra.mxu0 %v11421_v43  ;;  %6945 = vmatpush1.bf16.msra.mxu1 %v11422_v38 }
 0x4ff   : > { %6915 = vmatprep.subr.bf16.mxu0 %v11423_v39  ;;  %6947 = vmatprep.subr.bf16.mxu1 %v11424_v13  ;;  %v11429_v13 = vld [vmem:[#allocation92_spill] sm:$0xff] }
 0x502   : > { %6917 = vmatpush1.bf16.msra.mxu0 %v11425_v51  ;;  %6949 = vmatpush1.bf16.msra.mxu1 %v11426_v25  ;;  %v11430_v25 = vld [vmem:[#allocation94_spill] sm:$0xff] }
 0x503   : > { %v2364_v21 = vpop.f32.mrb[24].mxu0  ;;  %v2435_v28 = vpop.f32.mrb[24].mxu1  ;;  %6919 = vmatprep.subr.bf16.mxu0 %v11427_v54  ;;  %6951 = vmatprep.subr.bf16.mxu1 %v11304_v19  ;;  %v11431_v54 = vld [vmem:[#allocation90_spill] sm:$0xff] }
 0x504   : > { %v2444_v31 = vadd.f32 %v2364_v21, %v11428_v20  ;;  %v2366_v32 = vpop.f32.mrb[25].mxu0  ;;  %v2437_v43 = vpop.f32.mrb[25].mxu1  ;;  %v2446_v39 = vadd.f32 %v2435_v28, %v11431_v54  ;;  %v11432_v21 = vld [vmem:[#allocation95_spill] sm:$0xff]  ;;  %v11433_v20 = vld [vmem:[#allocation96_spill] sm:$0xff] }
 0x505   : > { %v2445_v38 = vadd.f32 %v2366_v32, %v9762_v1  ;;  %v11435_v32 = vld [vmem:[#allocation98_spill] sm:$0xff] }
 0x506   : > { %v2448_v47 = vmul.f32 0.5, %v2444_v31  ;;  %6921 = vmatpush1.bf16.msra.mxu0 %v11307_v17  ;;  %6953 = vmatpush1.bf16.msra.mxu1 %v11429_v13  ;;  %v11434_v31 = vld [vmem:[#allocation97_spill] sm:$0xff] }
 0x507   : > { %v2452_v51 = vmul.f32 0.5, %v2445_v38  ;;  %6955 = vmatprep.subr.bf16.mxu0 %v11369_v57  ;;  %6987 = vmatprep.subr.bf16.mxu1 %v11430_v25  ;;  %v11436_v38 = vld [vmem:[#allocation91_spill] sm:$0xff] }
 0x508   : > { %8526 = vtanh.f32 %v2448_v47  ;;  %v2447_v13 = vadd.f32 %v2437_v43, %v11436_v38  ;;  %v11437_v47 = vld [vmem:[#allocation99_spill] sm:$0xff] }
 0x509   : > { %8528 = vtanh.f32 %v2452_v51  ;;  %2704 = vmatmul.mubr.f32.vlgmr.msra.gmra.mrb[26].mxu0 %v2496_v11  ;;  %2775 = vmatmul.mubr.f32.vlgmr.msra.gmra.mrb[26].mxu1 %v2496_v11  ;;  %v11438_v51 = vld [vmem:[#allocation100_spill] sm:$0xff] }
 0x50a   : > { %6957 = vmatpush1.bf16.msra.mxu0 %v11432_v21  ;;  %6989 = vmatpush1.bf16.msra.mxu1 %v11433_v20  ;;  %8530 = vtanh.f32 %v2446_v39  ;;  %v2457_v11 = vmul.f32 0.5, %v2447_v13 }
 0x50b   : > { %6959 = vmatprep.subr.bf16.mxu0 %v11434_v31  ;;  %6991 = vmatprep.subr.bf16.mxu1 %v11435_v32  ;;  %v11439_v32 = vld [vmem:[#allocation104_spill] sm:$0xff] }
 0x50c   : > { %2845 = vmatprep.mubr.f32.mxu0 %v11215_v60  ;;  %2916 = vmatprep.mubr.f32.mxu1 %v11215_v60  ;;  %8532 = vtanh.f32 %v2457_v11 }
 0x50e   : > { %6961 = vmatpush1.bf16.msra.mxu0 %v11437_v47  ;;  %6993 = vmatpush1.bf16.msra.mxu1 %v11438_v51 }
 0x50f   : > { %6963 = vmatprep.subr.bf16.mxu0 %v11379_v56  ;;  %6995 = vmatprep.subr.bf16.mxu1 %v11380_v62 }
 0x512   : > { %v8527_v28 = vpop.eup %8526  ;;  %6965 = vmatpush1.bf16.msra.mxu0 %v11381_v42  ;;  %6997 = vmatpush1.bf16.msra.mxu1 %v11439_v32 }
 0x513   : > { %v8529_v39 = vpop.eup %8528  ;;  %v2450_v43 = vmul.f32 0.5, %v8527_v28  ;;  %6967 = vmatprep.subr.bf16.mxu0 %v11383_v33  ;;  %6999 = vmatprep.subr.bf16.mxu1 %v11323_v41 }
 0x514   : > { %v2454_v38 = vmul.f32 0.5, %v8529_v39  ;;  %v8531_v51 = vpop.eup %8530 }
 0x515   : > { %v2451_v47 = vadd.f32 0.5, %v2450_v43  ;;  %v11441_v43 = vld [vmem:[#allocation37_spill] sm:$0xff] }
 0x516   : > { %v2455_v31 = vadd.f32 0.5, %v2454_v38  ;;  %6969 = vmatpush1.bf16.msra.mxu0 %v11324_v24  ;;  %7001 = vmatpush1.bf16.msra.mxu1 %v11325_v58  ;;  %v8533_v38 = vpop.eup %8532 }
 0x517   : > { %v2462_v13 = vmul.f32 %v8531_v51, %v2451_v47  ;;  %6971 = vmatprep.subr.bf16.mxu0 %v11326_v26  ;;  %7003 = vmatprep.subr.bf16.mxu1 %v11327_v29 }
 0x518   : > { %v2461_v28 = vmul.f32 %v2455_v31, %v9927_v4  ;;  %v2459_v4 = vmul.f32 0.5, %v8533_v38  ;;  %v2471_v31 = vpop.permute.xlu1 %2470  ;;  %v11444_v38 = vld [vmem:[#allocation39_spill] sm:$0xff] }
 0x519   : > { %vm2472_vm6 = vcmp.eq.s32.totalorder %v2471_v31, 1  ;;  %v11446_v31 = vld [vmem:[#allocation42_spill] sm:$0xff] }
 0x51a   : > { %v10051_v32 = vadd.f32 %v2462_v13, %v2461_v28  ;;  %6973 = vmatpush1.bf16.msra.mxu0 %v11328_v35  ;;  %7005 = vmatpush1.bf16.msra.mxu1 %v11329_v18  ;;  %v2460_v47 = vadd.f32 0.5, %v2459_v4  ;;  %v11442_v13 = vld [vmem:[#allocation38_spill] sm:$0xff]  ;;  %v11443_v28 = vld [vmem:[#allocation40_spill] sm:$0xff]  ;;  %v11445_v4 = vld [vmem:[#allocation41_spill] sm:$0xff] }
 0x51b   : > { %6975 = vmatprep.subr.bf16.mxu0 %v9642_v61  ;;  %7007 = vmatprep.subr.bf16.mxu1 %v9644_v27 }
 0x51c   : > { %8534 = vtanh.f32 %v10051_v32 }
 0x51e   : > { %6977 = vmatpush1.bf16.msra.mxu0 %v9648_v23  ;;  %7009 = vmatpush1.bf16.msra.mxu1 %v9650_v22 }
 0x51f   : > { %6979 = vmatprep.subr.bf16.mxu0 %v9654_v34  ;;  %7011 = vmatprep.subr.bf16.mxu1 %v9656_v45 }
 0x522   : > { %6981 = vmatpush1.bf16.msra.mxu0 %v9660_v10  ;;  %7013 = vmatpush1.bf16.msra.mxu1 %v9662_v15 }
 0x523   : > { %6983 = vmatprep.subr.bf16.mxu0 %v9666_v63  ;;  %7015 = vmatprep.subr.bf16.mxu1 %v9668_v49 }
 0x526   : > { %v8535_v51 = vpop.eup %8534  ;;  %6985 = vmatpush1.bf16.msra.mxu0 %v9672_v40  ;;  %7017 = vmatpush1.bf16.msra.mxu1 %v9674_v8 }
 0x527   : > { %v2465_v11 = vmul.f32 %v8535_v51, %v2460_v47  ;;  %7019 = vmatprep.subr.bf16.mxu0 %v9309_v36  ;;  %7051 = vmatprep.subr.bf16.mxu1 %v9316_v44  ;;  %v11447_v47 = vld [vmem:[#allocation44_spill] sm:$0xff]  ;;  %v11448_v51 = vld [vmem:[#allocation43_spill] sm:$0xff] }
 0x529   : > { %v10071_v39 = vsel %vm2472_vm6, %v2465_v11, %v9947_v50  ;;  %2846 = vmatmul.mubr.f32.vlgmr.msra.gmra.mrb[26].mxu0 %v2465_v11  ;;  %2917 = vmatmul.mubr.f32.vlgmr.msra.gmra.mrb[26].mxu1 %v2465_v11  ;;  %v11440_v50 = vld [vmem:[#allocation35_spill] sm:$0xff]  ;;  %v11449_v11 = vld [vmem:[#allocation45_spill] sm:$0xff] }
 0x52a   : > { %7021 = vmatpush1.bf16.msra.mxu0 %v9320_v46  ;;  %7053 = vmatpush1.bf16.msra.mxu1 %v9323_v48 }
 0x52b   : > { %7023 = vmatprep.subr.bf16.mxu0 %v9327_v52  ;;  %7055 = vmatprep.subr.bf16.mxu1 %v9335_v59 }
 0x52c   : > { %3044 = vmatprep.mubr.f32.mxu0 %v11215_v60  ;;  %3115 = vmatprep.mubr.f32.mxu1 %v11215_v60 }
 0x52e   : > { %7025 = vmatpush1.bf16.msra.mxu0 %v9330_v55  ;;  %7057 = vmatpush1.bf16.msra.mxu1 %v9339_v0 }
 0x52f   : > { %7027 = vmatprep.subr.bf16.mxu0 %v9341_v2  ;;  %7059 = vmatprep.subr.bf16.mxu1 %v9348_v7  ;;  %v11459_v7 = vld [vmem:[#allocation56_spill] sm:$0xff] }
 0x532   : > { %7029 = vmatpush1.bf16.msra.mxu0 %v11440_v50  ;;  %7061 = vmatpush1.bf16.msra.mxu1 %v11441_v43  ;;  %v11450_v50 = vld [vmem:[#allocation46_spill] sm:$0xff]  ;;  %v11451_v43 = vld [vmem:[#allocation48_spill] sm:$0xff] }
 0x533   : > { %7031 = vmatprep.subr.bf16.mxu0 %v11442_v13  ;;  %7063 = vmatprep.subr.bf16.mxu1 %v11443_v28  ;;  %v11452_v13 = vld [vmem:[#allocation47_spill] sm:$0xff]  ;;  %v11453_v28 = vld [vmem:[#allocation49_spill] sm:$0xff] }
 0x536   : > { %7033 = vmatpush1.bf16.msra.mxu0 %v11444_v38  ;;  %7065 = vmatpush1.bf16.msra.mxu1 %v11445_v4  ;;  %v11454_v38 = vld [vmem:[#allocation50_spill] sm:$0xff]  ;;  %v11455_v4 = vld [vmem:[#allocation52_spill] sm:$0xff] }
 0x537   : > { %7035 = vmatprep.subr.bf16.mxu0 %v11446_v31  ;;  %7067 = vmatprep.subr.bf16.mxu1 %v11447_v47  ;;  %v11456_v31 = vld [vmem:[#allocation51_spill] sm:$0xff]  ;;  %v11457_v47 = vld [vmem:[#allocation53_spill] sm:$0xff] }
 0x53a   : > { %7037 = vmatpush1.bf16.msra.mxu0 %v11448_v51  ;;  %7069 = vmatpush1.bf16.msra.mxu1 %v11449_v11  ;;  %v11458_v51 = vld [vmem:[#allocation54_spill] sm:$0xff]  ;;  %v11460_v11 = vld [vmem:[#allocation55_spill] sm:$0xff] }
 0x53b   : > { %7039 = vmatprep.subr.bf16.mxu0 %v11450_v50  ;;  %7071 = vmatprep.subr.bf16.mxu1 %v11451_v43  ;;  %v11461_v50 = vld [vmem:[#allocation57_spill] sm:$0xff]  ;;  %v11462_v43 = vld [vmem:[#allocation58_spill] sm:$0xff] }
 0x53e   : > { %7041 = vmatpush1.bf16.msra.mxu0 %v11452_v13  ;;  %7073 = vmatpush1.bf16.msra.mxu1 %v11453_v28  ;;  %v11463_v13 = vld [vmem:[#allocation59_spill] sm:$0xff]  ;;  %v11464_v28 = vld [vmem:[#allocation60_spill] sm:$0xff] }
 0x53f   : > { %7043 = vmatprep.subr.bf16.mxu0 %v11454_v38  ;;  %7075 = vmatprep.subr.bf16.mxu1 %v11455_v4  ;;  %v3432_v38 = vstv %s2957_s12  ;;  %v11465_v4 = vmov 0  }
 0x540   : > { %vm3433_vm7 = vcmp.eq.s32.totalorder %v11464_v28, %v3432_v38 }
 0x542   : > { %7045 = vmatpush1.bf16.msra.mxu0 %v11456_v31  ;;  %7077 = vmatpush1.bf16.msra.mxu1 %v11457_v47  ;;  %v3434_v31 = vsel %vm3433_vm7, 1, %v11465_v4 }
 0x543   : > { %7047 = vmatprep.subr.bf16.mxu0 %v11458_v51  ;;  %7079 = vmatprep.subr.bf16.mxu1 %v11459_v7  ;;  %v11466_v51 = vld [vmem:[#allocation62_spill] sm:$0xff] }
 0x544   : > { %3436 = vperm.xlu0 %8464, %v3434_v31  }
 0x546   : > { %7049 = vmatpush1.bf16.msra.mxu0 %v11460_v11  ;;  %7081 = vmatpush1.bf16.msra.mxu1 %v11461_v50 }
 0x547   : > { %7083 = vmatprep.subr.bf16.mxu0 %v11462_v43  ;;  %7115 = vmatprep.subr.bf16.mxu1 %v11463_v13 }
 0x5bc   : > { %v2563_v47 = vpop.f32.mrb[8].mxu0  ;;  %v2634_v2 = vpop.f32.mrb[8].mxu1 }
 0x5bd   : > { %v8200_v0 = vadd.f32 %v2563_v47, %v11466_v51  ;;  %v2565_v7 = vpop.f32.mrb[9].mxu0  ;;  %v2636_v55 = vpop.f32.mrb[9].mxu1  ;;  %v8218_v13 = vadd.f32 %v2634_v2, %v9471_v14 }
 0x5be   : > { %v8201_v11 = vadd.f32 %v2565_v7, %v9466_v3  ;;  %v8219_v38 = vadd.f32 %v2636_v55, %v9477_v30 }
 0x5bf   : > { %v2962_v50 = vmul.f32 0.5, %v8200_v0 }
 0x5c0   : > { %v2966_v59 = vmul.f32 0.5, %v8201_v11  ;;  %v2971_v28 = vmul.f32 0.5, %v8219_v38  ;;  %v11475_v11 = vld [vmem:[#allocation77_spill] sm:$0xff]  ;;  %v11476_v38 = vld [vmem:[#allocation78_spill] sm:$0xff] }
 0x5c1   : > { %8536 = vtanh.f32 %v2962_v50 }
 0x5c2   : > { %8538 = vtanh.f32 %v2966_v59 }
 0x5c3   : > { %8540 = vtanh.f32 %v8218_v13 }
 0x5c4   : > { %8542 = vtanh.f32 %v2971_v28  ;;  %v11472_v28 = vld [vmem:[#allocation74_spill] sm:$0xff] }
 0x5cb   : > { %v8537_v4 = vpop.eup %8536 }
 0x5cc   : > { %v8539_v31 = vpop.eup %8538  ;;  %v2964_v43 = vmul.f32 0.5, %v8537_v4  ;;  %v11473_v4 = vld [vmem:[#allocation75_spill] sm:$0xff] }
 0x5cd   : > { %v2968_v52 = vmul.f32 0.5, %v8539_v31  ;;  %v8541_v51 = vpop.eup %8540  ;;  %v11477_v31 = vld [vmem:[#allocation79_spill] sm:$0xff] }
 0x5ce   : > { %v2965_v47 = vadd.f32 0.5, %v2964_v43  ;;  %v8543_v59 = vpop.eup %8542  ;;  %v11471_v43 = vld [vmem:[#allocation73_spill] sm:$0xff] }
 0x5cf   : > { %v2969_v48 = vadd.f32 0.5, %v2968_v52  ;;  %v2973_v2 = vmul.f32 0.5, %v8543_v59  ;;  %v11469_v52 = vld [vmem:[#allocation71_spill] sm:$0xff]  ;;  %v11480_v59 = vld [vmem:[#allocation82_spill] sm:$0xff] }
 0x5d0   : > { %v2976_v46 = vmul.f32 %v8541_v51, %v2965_v47  ;;  %v11474_v51 = vld [vmem:[#allocation76_spill] sm:$0xff] }
 0x5d1   : > { %v2975_v0 = vmul.f32 %v2969_v48, %v9991_v37  ;;  %v2974_v50 = vadd.f32 0.5, %v2973_v2  ;;  %v11468_v48 = vld [vmem:[#allocation70_spill] sm:$0xff]  ;;  %v11470_v37 = vld [vmem:[#allocation72_spill] sm:$0xff]  ;;  %v11481_v2 = vld [vmem:[#allocation83_spill] sm:$0xff] }
 0x5d2   : > { %v11478_v47 = vld [vmem:[#allocation80_spill] sm:$0xff] }
 0x5d3   : > { %v10115_v7 = vadd.f32 %v2976_v46, %v2975_v0  ;;  %v11467_v46 = vld [vmem:[#allocation69_spill] sm:$0xff] }
 0x5d4   : > { %v11479_v0 = vld [vmem:[#allocation81_spill] sm:$0xff] }
 0x5d5   : > { %8544 = vtanh.f32 %v10115_v7 }
 0x5df   : > { %v8545_v55 = vpop.eup %8544 }
 0x5e0   : > { %v2979_v13 = vmul.f32 %v8545_v55, %v2974_v50  ;;  %v11482_v50 = vld [vmem:[#allocation84_spill] sm:$0xff]  ;;  %v11483_v55 = vld [vmem:[#allocation85_spill] sm:$0xff] }
 0x5e2   : > { %3045 = vmatmul.mubr.f32.vlgmr.msra.gmra.mrb[10].mxu0 %v2979_v13  ;;  %3116 = vmatmul.mubr.f32.vlgmr.msra.gmra.mrb[10].mxu1 %v2979_v13 }
 0x5e3   : > { %7085 = vmatpush1.bf16.msra.mxu0 %v11340_v5  ;;  %7117 = vmatpush1.bf16.msra.mxu1 %v11341_v53 }
 0x5e4   : > { %7087 = vmatprep.subr.bf16.mxu0 %v11403_v9  ;;  %7119 = vmatprep.subr.bf16.mxu1 %v11404_v16 }
 0x5e5   : > { %3186 = vmatprep.mubr.f32.mxu0 %v11215_v60  ;;  %3257 = vmatprep.mubr.f32.mxu1 %v11215_v60 }
 0x5e7   : > { %7089 = vmatpush1.bf16.msra.mxu0 %v11405_v6  ;;  %7121 = vmatpush1.bf16.msra.mxu1 %v11406_v12 }
 0x5e8   : > { %7091 = vmatprep.subr.bf16.mxu0 %v11467_v46  ;;  %7123 = vmatprep.subr.bf16.mxu1 %v11468_v48 }
 0x5eb   : > { %7093 = vmatpush1.bf16.msra.mxu0 %v11469_v52  ;;  %7125 = vmatpush1.bf16.msra.mxu1 %v11470_v37 }
 0x5ec   : > { %7095 = vmatprep.subr.bf16.mxu0 %v11471_v43  ;;  %7127 = vmatprep.subr.bf16.mxu1 %v11472_v28  ;;  %v11487_v28 = vld [vmem:[#allocation89_spill] sm:$0xff] }
 0x5ef   : > { %7097 = vmatpush1.bf16.msra.mxu0 %v11473_v4  ;;  %7129 = vmatpush1.bf16.msra.mxu1 %v11474_v51  ;;  %v11484_v4 = vld [vmem:[#allocation86_spill] sm:$0xff]  ;;  %v11485_v51 = vld [vmem:[#allocation87_spill] sm:$0xff] }
 0x5f0   : > { %7099 = vmatprep.subr.bf16.mxu0 %v11475_v11  ;;  %7131 = vmatprep.subr.bf16.mxu1 %v11476_v38  ;;  %v11486_v11 = vld [vmem:[#allocation88_spill] sm:$0xff] }
 0x5f3   : > { %7101 = vmatpush1.bf16.msra.mxu0 %v11477_v31  ;;  %7133 = vmatpush1.bf16.msra.mxu1 %v11478_v47 }
 0x5f4   : > { %7103 = vmatprep.subr.bf16.mxu0 %v11479_v0  ;;  %7135 = vmatprep.subr.bf16.mxu1 %v11480_v59  ;;  %v11488_v0 = vld [vmem:[#allocation61_spill] sm:$0xff] }
 0x5f7   : > { %7105 = vmatpush1.bf16.msra.mxu0 %v11481_v2  ;;  %7137 = vmatpush1.bf16.msra.mxu1 %v11482_v50 }
 0x5f8   : > { %7107 = vmatprep.subr.bf16.mxu0 %v11483_v55  ;;  %7139 = vmatprep.subr.bf16.mxu1 %v11484_v4  ;;  %v11489_v4 = vld [vmem:[#allocation92_spill] sm:$0xff] }
 0x5fb   : > { %7109 = vmatpush1.bf16.msra.mxu0 %v11485_v51  ;;  %7141 = vmatpush1.bf16.msra.mxu1 %v11486_v11 }
 0x5fc   : > { %v2847_v38 = vpop.f32.mrb[26].mxu0  ;;  %v2918_v31 = vpop.f32.mrb[26].mxu1  ;;  %7111 = vmatprep.subr.bf16.mxu0 %v11487_v28  ;;  %7143 = vmatprep.subr.bf16.mxu1 %v11304_v19 }
 0x5fd   : > { %v2927_v59 = vadd.f32 %v2847_v38, %v11488_v0  ;;  %v2849_v47 = vpop.f32.mrb[27].mxu0  ;;  %v2920_v2 = vpop.f32.mrb[27].mxu1  ;;  %v2929_v28 = vadd.f32 %v2918_v31, %v11431_v54  ;;  %v11490_v38 = vld [vmem:[#allocation97_spill] sm:$0xff] }
 0x5fe   : > { %v2928_v50 = vadd.f32 %v2849_v47, %v9762_v1  ;;  %v11491_v47 = vld [vmem:[#allocation98_spill] sm:$0xff] }
 0x5ff   : > { %v2931_v43 = vmul.f32 0.5, %v2927_v59  ;;  %7113 = vmatpush1.bf16.msra.mxu0 %v11307_v17  ;;  %7145 = vmatpush1.bf16.msra.mxu1 %v11489_v4  ;;  %v11492_v59 = vld [vmem:[#allocation91_spill] sm:$0xff] }
 0x600   : > { %v2935_v51 = vmul.f32 0.5, %v2928_v50  ;;  %7147 = vmatprep.subr.bf16.mxu0 %v11369_v57  ;;  %7179 = vmatprep.subr.bf16.mxu1 %v11430_v25  ;;  %v2930_v50 = vadd.f32 %v2920_v2, %v11492_v59 }
 0x601   : > { %8546 = vtanh.f32 %v2931_v43  ;;  %v11493_v43 = vld [vmem:[#allocation99_spill] sm:$0xff] }
 0x602   : > { %8548 = vtanh.f32 %v2935_v51  ;;  %3187 = vmatmul.mubr.f32.vlgmr.msra.gmra.mrb[28].mxu0 %v2979_v13  ;;  %3258 = vmatmul.mubr.f32.vlgmr.msra.gmra.mrb[28].mxu1 %v2979_v13  ;;  %v11494_v51 = vld [vmem:[#allocation100_spill] sm:$0xff]  ;;  %v2940_v13 = vmul.f32 0.5, %v2930_v50 }
 0x603   : > { %7149 = vmatpush1.bf16.msra.mxu0 %v11432_v21  ;;  %7181 = vmatpush1.bf16.msra.mxu1 %v11433_v20  ;;  %8550 = vtanh.f32 %v2929_v28 }
 0x604   : > { %7151 = vmatprep.subr.bf16.mxu0 %v11490_v38  ;;  %7183 = vmatprep.subr.bf16.mxu1 %v11491_v47  ;;  %v11495_v47 = vld [vmem:[#allocation104_spill] sm:$0xff]  ;;  %8552 = vtanh.f32 %v2940_v13 }
 0x605   : > { %3328 = vmatprep.mubr.f32.mxu0 %v11215_v60  ;;  %3399 = vmatprep.mubr.f32.mxu1 %v11215_v60 }
 0x607   : > { %7153 = vmatpush1.bf16.msra.mxu0 %v11493_v43  ;;  %7185 = vmatpush1.bf16.msra.mxu1 %v11494_v51 }
 0x608   : > { %7155 = vmatprep.subr.bf16.mxu0 %v11379_v56  ;;  %7187 = vmatprep.subr.bf16.mxu1 %v11380_v62 }
 0x60b   : > { %v8547_v31 = vpop.eup %8546  ;;  %7157 = vmatpush1.bf16.msra.mxu0 %v11381_v42  ;;  %7189 = vmatpush1.bf16.msra.mxu1 %v11495_v47 }
 0x60c   : > { %v8549_v28 = vpop.eup %8548  ;;  %v2933_v2 = vmul.f32 0.5, %v8547_v31  ;;  %7159 = vmatprep.subr.bf16.mxu0 %v11383_v33  ;;  %7191 = vmatprep.subr.bf16.mxu1 %v11323_v41 }
 0x60d   : > { %v2937_v59 = vmul.f32 0.5, %v8549_v28  ;;  %v8551_v51 = vpop.eup %8550 }
 0x60e   : > { %v2934_v43 = vadd.f32 0.5, %v2933_v2  ;;  %v11497_v2 = vld [vmem:[#allocation28_spill] sm:$0xff] }
 0x60f   : > { %v2938_v38 = vadd.f32 0.5, %v2937_v59  ;;  %7161 = vmatpush1.bf16.msra.mxu0 %v11324_v24  ;;  %7193 = vmatpush1.bf16.msra.mxu1 %v11325_v58  ;;  %v8553_v59 = vpop.eup %8552 }
 0x610   : > { %v2945_v50 = vmul.f32 %v8551_v51, %v2934_v43  ;;  %7163 = vmatprep.subr.bf16.mxu0 %v11326_v26  ;;  %7195 = vmatprep.subr.bf16.mxu1 %v11327_v29 }
 0x611   : > { %v2944_v31 = vmul.f32 %v2938_v38, %v10051_v32  ;;  %v2942_v32 = vmul.f32 0.5, %v8553_v59  ;;  %v2954_v38 = vpop.permute.xlu1 %2953  ;;  %v11500_v59 = vld [vmem:[#allocation32_spill] sm:$0xff] }
 0x612   : > { %vm2955_vm8 = vcmp.eq.s32.totalorder %v2954_v38, 1  ;;  %v11502_v38 = vld [vmem:[#allocation33_spill] sm:$0xff] }
 0x613   : > { %v10175_v47 = vadd.f32 %v2945_v50, %v2944_v31  ;;  %7165 = vmatpush1.bf16.msra.mxu0 %v11328_v35  ;;  %7197 = vmatpush1.bf16.msra.mxu1 %v11329_v18  ;;  %v2943_v43 = vadd.f32 0.5, %v2942_v32  ;;  %v11498_v50 = vld [vmem:[#allocation29_spill] sm:$0xff]  ;;  %v11499_v31 = vld [vmem:[#allocation30_spill] sm:$0xff]  ;;  %v11501_v32 = vld [vmem:[#allocation31_spill] sm:$0xff] }
 0x614   : > { %7167 = vmatprep.subr.bf16.mxu0 %v9642_v61  ;;  %7199 = vmatprep.subr.bf16.mxu1 %v9644_v27 }
 0x615   : > { %8554 = vtanh.f32 %v10175_v47 }
 0x617   : > { %7169 = vmatpush1.bf16.msra.mxu0 %v9648_v23  ;;  %7201 = vmatpush1.bf16.msra.mxu1 %v9650_v22 }
 0x618   : > { %7171 = vmatprep.subr.bf16.mxu0 %v9654_v34  ;;  %7203 = vmatprep.subr.bf16.mxu1 %v9656_v45 }
 0x61b   : > { %7173 = vmatpush1.bf16.msra.mxu0 %v9660_v10  ;;  %7205 = vmatpush1.bf16.msra.mxu1 %v9662_v15 }
 0x61c   : > { %7175 = vmatprep.subr.bf16.mxu0 %v9666_v63  ;;  %7207 = vmatprep.subr.bf16.mxu1 %v9668_v49 }
 0x61f   : > { %v8555_v51 = vpop.eup %8554  ;;  %7177 = vmatpush1.bf16.msra.mxu0 %v9672_v40  ;;  %7209 = vmatpush1.bf16.msra.mxu1 %v9674_v8 }
 0x620   : > { %v2948_v13 = vmul.f32 %v8555_v51, %v2943_v43  ;;  %7211 = vmatprep.subr.bf16.mxu0 %v9309_v36  ;;  %7243 = vmatprep.subr.bf16.mxu1 %v9316_v44  ;;  %v11504_v43 = vld [vmem:[#allocation36_spill] sm:$0xff]  ;;  %v11505_v51 = vld [vmem:[#allocation35_spill] sm:$0xff] }
 0x622   : > { %v10195_v28 = vsel %vm2955_vm8, %v2948_v13, %v10071_v39  ;;  %3329 = vmatmul.mubr.f32.vlgmr.msra.gmra.mrb[28].mxu0 %v2948_v13  ;;  %3400 = vmatmul.mubr.f32.vlgmr.msra.gmra.mrb[28].mxu1 %v2948_v13  ;;  %v11503_v39 = vld [vmem:[#allocation34_spill] sm:$0xff]  ;;  %v11506_v13 = vld [vmem:[#allocation37_spill] sm:$0xff] }
 0x623   : > { %11496 = vst [vmem:[#allocation125_spill] sm:$0xff] %v10195_v28  ;;  %7213 = vmatpush1.bf16.msra.mxu0 %v11497_v2  ;;  %7245 = vmatpush1.bf16.msra.mxu1 %v11498_v50  ;;  %v11507_v50 = vld [vmem:[#allocation38_spill] sm:$0xff]  ;;  %v11510_v2 = vld [vmem:[#allocation41_spill] sm:$0xff] }
 0x624   : > { %7215 = vmatprep.subr.bf16.mxu0 %v11499_v31  ;;  %7247 = vmatprep.subr.bf16.mxu1 %v11500_v59  ;;  %v11508_v31 = vld [vmem:[#allocation40_spill] sm:$0xff]  ;;  %v11509_v59 = vld [vmem:[#allocation39_spill] sm:$0xff]  ;;  %v11511_v28 = vld [vmem:[#allocation42_spill] sm:$0xff] }
 0x625   : > { %3527 = vmatprep.mubr.f32.mxu0 %v11215_v60  ;;  %3598 = vmatprep.mubr.f32.mxu1 %v11215_v60 }
 0x627   : > { %7217 = vmatpush1.bf16.msra.mxu0 %v11501_v32  ;;  %7249 = vmatpush1.bf16.msra.mxu1 %v11502_v38  ;;  %v11512_v32 = vld [vmem:[#allocation44_spill] sm:$0xff]  ;;  %v11513_v38 = vld [vmem:[#allocation43_spill] sm:$0xff] }
 0x628   : > { %7219 = vmatprep.subr.bf16.mxu0 %v11503_v39  ;;  %7251 = vmatprep.subr.bf16.mxu1 %v11504_v43  ;;  %v11514_v39 = vld [vmem:[#allocation45_spill] sm:$0xff]  ;;  %v11524_v43 = vld [vmem:[#allocation56_spill] sm:$0xff] }
 0x62b   : > { %7221 = vmatpush1.bf16.msra.mxu0 %v11505_v51  ;;  %7253 = vmatpush1.bf16.msra.mxu1 %v11506_v13  ;;  %v11515_v51 = vld [vmem:[#allocation46_spill] sm:$0xff]  ;;  %v11516_v13 = vld [vmem:[#allocation48_spill] sm:$0xff] }
 0x62c   : > { %7223 = vmatprep.subr.bf16.mxu0 %v11507_v50  ;;  %7255 = vmatprep.subr.bf16.mxu1 %v11508_v31  ;;  %v11517_v50 = vld [vmem:[#allocation47_spill] sm:$0xff]  ;;  %v11518_v31 = vld [vmem:[#allocation49_spill] sm:$0xff] }
 0x62f   : > { %7225 = vmatpush1.bf16.msra.mxu0 %v11509_v59  ;;  %7257 = vmatpush1.bf16.msra.mxu1 %v11510_v2  ;;  %v11519_v59 = vld [vmem:[#allocation50_spill] sm:$0xff]  ;;  %v11520_v2 = vld [vmem:[#allocation52_spill] sm:$0xff] }
 0x630   : > { %7227 = vmatprep.subr.bf16.mxu0 %v11511_v28  ;;  %7259 = vmatprep.subr.bf16.mxu1 %v11512_v32  ;;  %v11521_v28 = vld [vmem:[#allocation51_spill] sm:$0xff]  ;;  %v11522_v32 = vld [vmem:[#allocation53_spill] sm:$0xff] }
 0x633   : > { %7229 = vmatpush1.bf16.msra.mxu0 %v11513_v38  ;;  %7261 = vmatpush1.bf16.msra.mxu1 %v11514_v39  ;;  %v11523_v38 = vld [vmem:[#allocation54_spill] sm:$0xff]  ;;  %v11525_v39 = vld [vmem:[#allocation55_spill] sm:$0xff] }
 0x634   : > { %7231 = vmatprep.subr.bf16.mxu0 %v11515_v51  ;;  %7263 = vmatprep.subr.bf16.mxu1 %v11516_v13  ;;  %v11526_v51 = vld [vmem:[#allocation57_spill] sm:$0xff]  ;;  %v11527_v13 = vld [vmem:[#allocation58_spill] sm:$0xff] }
 0x637   : > { %7233 = vmatpush1.bf16.msra.mxu0 %v11517_v50  ;;  %7265 = vmatpush1.bf16.msra.mxu1 %v11518_v31  ;;  %v11528_v50 = vld [vmem:[#allocation59_spill] sm:$0xff]  ;;  %v11529_v31 = vld [vmem:[#allocation60_spill] sm:$0xff] }
 0x638   : > { %7235 = vmatprep.subr.bf16.mxu0 %v11519_v59  ;;  %7267 = vmatprep.subr.bf16.mxu1 %v11520_v2  ;;  %v3915_v59 = vstv %s3440_s6  ;;  %v11530_v2 = vmov 0  }
 0x639   : > { %vm3916_vm9 = vcmp.eq.s32.totalorder %v11529_v31, %v3915_v59 }
 0x63b   : > { %7237 = vmatpush1.bf16.msra.mxu0 %v11521_v28  ;;  %7269 = vmatpush1.bf16.msra.mxu1 %v11522_v32  ;;  %v3917_v28 = vsel %vm3916_vm9, 1, %v11530_v2 }
 0x63c   : > { %7239 = vmatprep.subr.bf16.mxu0 %v11523_v38  ;;  %7271 = vmatprep.subr.bf16.mxu1 %v11524_v43  ;;  %v11531_v38 = vld [vmem:[#allocation62_spill] sm:$0xff] }
 0x63d   : > { %3919 = vperm.xlu1 %8465, %v3917_v28  }
 0x63f   : > { %7241 = vmatpush1.bf16.msra.mxu0 %v11525_v39  ;;  %7273 = vmatpush1.bf16.msra.mxu1 %v11526_v51 }
 0x640   : > { %7275 = vmatprep.subr.bf16.mxu0 %v11527_v13  ;;  %7307 = vmatprep.subr.bf16.mxu1 %v11528_v50 }
 0x6b5   : > { %v3046_v32 = vpop.f32.mrb[10].mxu0  ;;  %v3117_v44 = vpop.f32.mrb[10].mxu1 }
 0x6b6   : > { %v8202_v36 = vadd.f32 %v3046_v32, %v11531_v38  ;;  %v3048_v43 = vpop.f32.mrb[11].mxu0  ;;  %v3119_v8 = vpop.f32.mrb[11].mxu1  ;;  %v8220_v50 = vadd.f32 %v3117_v44, %v9471_v14 }
 0x6b7   : > { %v8203_v39 = vadd.f32 %v3048_v43, %v9466_v3  ;;  %v8221_v59 = vadd.f32 %v3119_v8, %v9477_v30 }
 0x6b8   : > { %v3445_v51 = vmul.f32 0.5, %v8202_v36 }
 0x6b9   : > { %v3449_v40 = vmul.f32 0.5, %v8203_v39  ;;  %v3454_v31 = vmul.f32 0.5, %v8221_v59  ;;  %v11541_v59 = vld [vmem:[#allocation82_spill] sm:$0xff] }
 0x6ba   : > { %8556 = vtanh.f32 %v3445_v51  ;;  %v11539_v51 = vld [vmem:[#allocation80_spill] sm:$0xff] }
 0x6bb   : > { %8558 = vtanh.f32 %v3449_v40 }
 0x6bc   : > { %8560 = vtanh.f32 %v8220_v50 }
 0x6bd   : > { %8562 = vtanh.f32 %v3454_v31  ;;  %v11537_v31 = vld [vmem:[#allocation78_spill] sm:$0xff] }
 0x6c4   : > { %v8557_v2 = vpop.eup %8556 }
 0x6c5   : > { %v8559_v28 = vpop.eup %8558  ;;  %v3447_v13 = vmul.f32 0.5, %v8557_v2  ;;  %v11536_v2 = vld [vmem:[#allocation77_spill] sm:$0xff] }
 0x6c6   : > { %v3451_v49 = vmul.f32 0.5, %v8559_v28  ;;  %v8561_v38 = vpop.eup %8560  ;;  %v11542_v28 = vld [vmem:[#allocation83_spill] sm:$0xff] }
 0x6c7   : > { %v3448_v32 = vadd.f32 0.5, %v3447_v13  ;;  %v8563_v44 = vpop.eup %8562  ;;  %v11540_v13 = vld [vmem:[#allocation81_spill] sm:$0xff] }
 0x6c8   : > { %v3452_v63 = vadd.f32 0.5, %v3451_v49  ;;  %v3456_v40 = vmul.f32 0.5, %v8563_v44  ;;  %v11534_v49 = vld [vmem:[#allocation75_spill] sm:$0xff] }
 0x6c9   : > { %v3459_v15 = vmul.f32 %v8561_v38, %v3448_v32  ;;  %v11538_v38 = vld [vmem:[#allocation79_spill] sm:$0xff]  ;;  %v11543_v32 = vld [vmem:[#allocation84_spill] sm:$0xff] }
 0x6ca   : > { %v3458_v36 = vmul.f32 %v3452_v63, %v10115_v7  ;;  %v3457_v50 = vadd.f32 0.5, %v3456_v40  ;;  %v11533_v63 = vld [vmem:[#allocation74_spill] sm:$0xff]  ;;  %v11535_v7 = vld [vmem:[#allocation76_spill] sm:$0xff]  ;;  %v11545_v44 = vld [vmem:[#allocation87_spill] sm:$0xff] }
 0x6cc   : > { %v10239_v39 = vadd.f32 %v3459_v15, %v3458_v36  ;;  %v11532_v15 = vld [vmem:[#allocation73_spill] sm:$0xff]  ;;  %v11544_v36 = vld [vmem:[#allocation86_spill] sm:$0xff] }
 0x6ce   : > { %8564 = vtanh.f32 %v10239_v39 }
 0x6d8   : > { %v8565_v8 = vpop.eup %8564 }
 0x6d9   : > { %v3462_v43 = vmul.f32 %v8565_v8, %v3457_v50  ;;  %v11546_v8 = vld [vmem:[#allocation89_spill] sm:$0xff] }
 0x6db   : > { %3528 = vmatmul.mubr.f32.vlgmr.msra.gmra.mrb[12].mxu0 %v3462_v43  ;;  %3599 = vmatmul.mubr.f32.vlgmr.msra.gmra.mrb[12].mxu1 %v3462_v43 }
 0x6dc   : > { %7277 = vmatpush1.bf16.msra.mxu0 %v11340_v5  ;;  %7309 = vmatpush1.bf16.msra.mxu1 %v11341_v53 }
 0x6dd   : > { %7279 = vmatprep.subr.bf16.mxu0 %v11403_v9  ;;  %7311 = vmatprep.subr.bf16.mxu1 %v11404_v16 }
 0x6de   : > { %3669 = vmatprep.mubr.f32.mxu0 %v11215_v60  ;;  %3740 = vmatprep.mubr.f32.mxu1 %v11215_v60 }
 0x6e0   : > { %7281 = vmatpush1.bf16.msra.mxu0 %v11405_v6  ;;  %7313 = vmatpush1.bf16.msra.mxu1 %v11406_v12 }
 0x6e1   : > { %7283 = vmatprep.subr.bf16.mxu0 %v11467_v46  ;;  %7315 = vmatprep.subr.bf16.mxu1 %v11468_v48 }
 0x6e4   : > { %7285 = vmatpush1.bf16.msra.mxu0 %v11469_v52  ;;  %7317 = vmatpush1.bf16.msra.mxu1 %v11470_v37 }
 0x6e5   : > { %7287 = vmatprep.subr.bf16.mxu0 %v11532_v15  ;;  %7319 = vmatprep.subr.bf16.mxu1 %v11533_v63 }
 0x6e8   : > { %7289 = vmatpush1.bf16.msra.mxu0 %v11534_v49  ;;  %7321 = vmatpush1.bf16.msra.mxu1 %v11535_v7 }
 0x6e9   : > { %7291 = vmatprep.subr.bf16.mxu0 %v11536_v2  ;;  %7323 = vmatprep.subr.bf16.mxu1 %v11537_v31 }
 0x6ec   : > { %7293 = vmatpush1.bf16.msra.mxu0 %v11538_v38  ;;  %7325 = vmatpush1.bf16.msra.mxu1 %v11539_v51 }
 0x6ed   : > { %7295 = vmatprep.subr.bf16.mxu0 %v11540_v13  ;;  %7327 = vmatprep.subr.bf16.mxu1 %v11541_v59 }
 0x6f0   : > { %7297 = vmatpush1.bf16.msra.mxu0 %v11542_v28  ;;  %7329 = vmatpush1.bf16.msra.mxu1 %v11543_v32 }
 0x6f1   : > { %7299 = vmatprep.subr.bf16.mxu0 %v11483_v55  ;;  %7331 = vmatprep.subr.bf16.mxu1 %v11544_v36 }
 0x6f4   : > { %7301 = vmatpush1.bf16.msra.mxu0 %v11545_v44  ;;  %7333 = vmatpush1.bf16.msra.mxu1 %v11486_v11 }
 0x6f5   : > { %v3330_v40 = vpop.f32.mrb[28].mxu0  ;;  %v3401_v50 = vpop.f32.mrb[28].mxu1  ;;  %7303 = vmatprep.subr.bf16.mxu0 %v11546_v8  ;;  %7335 = vmatprep.subr.bf16.mxu1 %v11304_v19 }
 0x6f6   : > { %v3410_v59 = vadd.f32 %v3330_v40, %v11488_v0  ;;  %v3332_v13 = vpop.f32.mrb[29].mxu0  ;;  %v3403_v28 = vpop.f32.mrb[29].mxu1  ;;  %v3412_v8 = vadd.f32 %v3401_v50, %v11431_v54 }
 0x6f7   : > { %v3411_v32 = vadd.f32 %v3332_v13, %v9762_v1  ;;  %v11547_v13 = vld [vmem:[#allocation97_spill] sm:$0xff] }
 0x6f8   : > { %v3414_v51 = vmul.f32 0.5, %v3410_v59  ;;  %7305 = vmatpush1.bf16.msra.mxu0 %v11307_v17  ;;  %7337 = vmatpush1.bf16.msra.mxu1 %v11489_v4  ;;  %v11548_v59 = vld [vmem:[#allocation98_spill] sm:$0xff] }
 0x6f9   : > { %v3418_v44 = vmul.f32 0.5, %v3411_v32  ;;  %7339 = vmatprep.subr.bf16.mxu0 %v11369_v57  ;;  %7371 = vmatprep.subr.bf16.mxu1 %v11430_v25  ;;  %v11549_v32 = vld [vmem:[#allocation91_spill] sm:$0xff] }
 0x6fa   : > { %8566 = vtanh.f32 %v3414_v51  ;;  %v3413_v40 = vadd.f32 %v3403_v28, %v11549_v32  ;;  %v11550_v51 = vld [vmem:[#allocation99_spill] sm:$0xff] }
 0x6fb   : > { %8568 = vtanh.f32 %v3418_v44  ;;  %3670 = vmatmul.mubr.f32.vlgmr.msra.gmra.mrb[30].mxu0 %v3462_v43  ;;  %3741 = vmatmul.mubr.f32.vlgmr.msra.gmra.mrb[30].mxu1 %v3462_v43  ;;  %v11551_v44 = vld [vmem:[#allocation100_spill] sm:$0xff] }
 0x6fc   : > { %7341 = vmatpush1.bf16.msra.mxu0 %v11432_v21  ;;  %7373 = vmatpush1.bf16.msra.mxu1 %v11433_v20  ;;  %8570 = vtanh.f32 %v3412_v8  ;;  %v3423_v43 = vmul.f32 0.5, %v3413_v40 }
 0x6fd   : > { %7343 = vmatprep.subr.bf16.mxu0 %v11547_v13  ;;  %7375 = vmatprep.subr.bf16.mxu1 %v11548_v59  ;;  %v11552_v59 = vld [vmem:[#allocation104_spill] sm:$0xff] }
 0x6fe   : > { %3811 = vmatprep.mubr.f32.mxu0 %v11215_v60  ;;  %3882 = vmatprep.mubr.f32.mxu1 %v11215_v60  ;;  %8572 = vtanh.f32 %v3423_v43  ;;  %v3437_v43 = vpop.permute.xlu0 %3436 }
 0x6ff   : > { %vm3438_vm10 = vcmp.eq.s32.totalorder %v3437_v43, 1  ;;  %v11566_v43 = vld [vmem:[#allocation31_spill] sm:$0xff] }
 0x700   : > { %7345 = vmatpush1.bf16.msra.mxu0 %v11550_v51  ;;  %7377 = vmatpush1.bf16.msra.mxu1 %v11551_v44 }
 0x701   : > { %7347 = vmatprep.subr.bf16.mxu0 %v11379_v56  ;;  %7379 = vmatprep.subr.bf16.mxu1 %v11380_v62 }
 0x704   : > { %v8567_v50 = vpop.eup %8566  ;;  %7349 = vmatpush1.bf16.msra.mxu0 %v11381_v42  ;;  %7381 = vmatpush1.bf16.msra.mxu1 %v11552_v59 }
 0x705   : > { %v8569_v8 = vpop.eup %8568  ;;  %v3416_v28 = vmul.f32 0.5, %v8567_v50  ;;  %7351 = vmatprep.subr.bf16.mxu0 %v11383_v33  ;;  %7383 = vmatprep.subr.bf16.mxu1 %v11323_v41 }
 0x706   : > { %v3420_v32 = vmul.f32 0.5, %v8569_v8  ;;  %v8571_v44 = vpop.eup %8570 }
 0x707   : > { %v3417_v51 = vadd.f32 0.5, %v3416_v28 }
 0x708   : > { %v3421_v13 = vadd.f32 0.5, %v3420_v32  ;;  %7353 = vmatpush1.bf16.msra.mxu0 %v11324_v24  ;;  %7385 = vmatpush1.bf16.msra.mxu1 %v11325_v58  ;;  %v8573_v32 = vpop.eup %8572 }
 0x709   : > { %v3428_v40 = vmul.f32 %v8571_v44, %v3417_v51  ;;  %7355 = vmatprep.subr.bf16.mxu0 %v11326_v26  ;;  %7387 = vmatprep.subr.bf16.mxu1 %v11327_v29  ;;  %v11554_v51 = vld [vmem:[#allocation121_spill] sm:$0xff]  ;;  %v11555_v44 = vld [vmem:[#allocation122_spill] sm:$0xff] }
 0x70a   : > { %v3427_v50 = vmul.f32 %v3421_v13, %v10175_v47  ;;  %v3425_v47 = vmul.f32 0.5, %v8573_v32  ;;  %v11553_v13 = vld [vmem:[#allocation120_spill] sm:$0xff]  ;;  %v11559_v32 = vld [vmem:[#allocation27_spill] sm:$0xff] }
 0x70c   : > { %v10299_v59 = vadd.f32 %v3428_v40, %v3427_v50  ;;  %7357 = vmatpush1.bf16.msra.mxu0 %v11328_v35  ;;  %7389 = vmatpush1.bf16.msra.mxu1 %v11329_v18  ;;  %v3426_v8 = vadd.f32 0.5, %v3425_v47  ;;  %v11556_v40 = vld [vmem:[#allocation123_spill] sm:$0xff]  ;;  %v11557_v50 = vld [vmem:[#allocation124_spill] sm:$0xff]  ;;  %v11564_v47 = vld [vmem:[#allocation30_spill] sm:$0xff] }
 0x70d   : > { %7359 = vmatprep.subr.bf16.mxu0 %v9642_v61  ;;  %7391 = vmatprep.subr.bf16.mxu1 %v9644_v27 }
 0x70e   : > { %8574 = vtanh.f32 %v10299_v59 }
 0x710   : > { %7361 = vmatpush1.bf16.msra.mxu0 %v9648_v23  ;;  %7393 = vmatpush1.bf16.msra.mxu1 %v9650_v22  ;;  %v11558_v22 = vld [vmem:[#allocation26_spill] sm:$0xff] }
 0x711   : > { %7363 = vmatprep.subr.bf16.mxu0 %v9654_v34  ;;  %7395 = vmatprep.subr.bf16.mxu1 %v9656_v45 }
 0x714   : > { %7365 = vmatpush1.bf16.msra.mxu0 %v9660_v10  ;;  %7397 = vmatpush1.bf16.msra.mxu1 %v11553_v13  ;;  %v11560_v10 = vld [vmem:[#allocation125_spill] sm:$0xff] }
 0x715   : > { %7367 = vmatprep.subr.bf16.mxu0 %v11554_v51  ;;  %7399 = vmatprep.subr.bf16.mxu1 %v11555_v44  ;;  %v11562_v51 = vld [vmem:[#allocation28_spill] sm:$0xff]  ;;  %v11563_v44 = vld [vmem:[#allocation29_spill] sm:$0xff] }
 0x718   : > { %v8575_v28 = vpop.eup %8574  ;;  %7369 = vmatpush1.bf16.msra.mxu0 %v11556_v40  ;;  %7401 = vmatpush1.bf16.msra.mxu1 %v11557_v50  ;;  %v11565_v40 = vld [vmem:[#allocation32_spill] sm:$0xff] }
 0x719   : > { %v3431_v34 = vmul.f32 %v8575_v28, %v3426_v8  ;;  %7403 = vmatprep.subr.bf16.mxu0 %v11558_v22  ;;  %7435 = vmatprep.subr.bf16.mxu1 %v11559_v32  ;;  %v11567_v8 = vld [vmem:[#allocation33_spill] sm:$0xff]  ;;  %v11569_v28 = vld [vmem:[#allocation36_spill] sm:$0xff]  ;;  %v11576_v32 = vld [vmem:[#allocation42_spill] sm:$0xff] }
 0x71b   : > { %v10319_v45 = vsel %vm3438_vm10, %v3431_v34, %v11560_v10  ;;  %3812 = vmatmul.mubr.f32.vlgmr.msra.gmra.mrb[30].mxu0 %v3431_v34  ;;  %3883 = vmatmul.mubr.f32.vlgmr.msra.gmra.mrb[30].mxu1 %v3431_v34  ;;  %v11568_v10 = vld [vmem:[#allocation34_spill] sm:$0xff]  ;;  %v11570_v34 = vld [vmem:[#allocation35_spill] sm:$0xff] }
 0x71c   : > { %11561 = vst [vmem:[#allocation63_spill] sm:$0xff] %v10319_v45  ;;  %7405 = vmatpush1.bf16.msra.mxu0 %v11562_v51  ;;  %7437 = vmatpush1.bf16.msra.mxu1 %v11563_v44  ;;  %v11571_v51 = vld [vmem:[#allocation37_spill] sm:$0xff]  ;;  %v11572_v44 = vld [vmem:[#allocation38_spill] sm:$0xff] }
 0x71d   : > { %7407 = vmatprep.subr.bf16.mxu0 %v11564_v47  ;;  %7439 = vmatprep.subr.bf16.mxu1 %v11565_v40  ;;  %v11573_v47 = vld [vmem:[#allocation40_spill] sm:$0xff]  ;;  %v11574_v40 = vld [vmem:[#allocation39_spill] sm:$0xff]  ;;  %v11575_v45 = vld [vmem:[#allocation41_spill] sm:$0xff] }
 0x71e   : > { %4010 = vmatprep.mubr.f32.mxu0 %v11215_v60  ;;  %4081 = vmatprep.mubr.f32.mxu1 %v11215_v60 }
 0x720   : > { %7409 = vmatpush1.bf16.msra.mxu0 %v11566_v43  ;;  %7441 = vmatpush1.bf16.msra.mxu1 %v11567_v8  ;;  %v11577_v43 = vld [vmem:[#allocation44_spill] sm:$0xff]  ;;  %v11578_v8 = vld [vmem:[#allocation43_spill] sm:$0xff] }
 0x721   : > { %7411 = vmatprep.subr.bf16.mxu0 %v11568_v10  ;;  %7443 = vmatprep.subr.bf16.mxu1 %v11569_v28  ;;  %v11579_v10 = vld [vmem:[#allocation45_spill] sm:$0xff]  ;;  %v11589_v28 = vld [vmem:[#allocation56_spill] sm:$0xff] }
 0x724   : > { %7413 = vmatpush1.bf16.msra.mxu0 %v11570_v34  ;;  %7445 = vmatpush1.bf16.msra.mxu1 %v11571_v51  ;;  %v11580_v34 = vld [vmem:[#allocation46_spill] sm:$0xff]  ;;  %v11581_v51 = vld [vmem:[#allocation48_spill] sm:$0xff] }
 0x725   : > { %7415 = vmatprep.subr.bf16.mxu0 %v11572_v44  ;;  %7447 = vmatprep.subr.bf16.mxu1 %v11573_v47  ;;  %v11582_v44 = vld [vmem:[#allocation47_spill] sm:$0xff]  ;;  %v11583_v47 = vld [vmem:[#allocation49_spill] sm:$0xff] }
 0x728   : > { %7417 = vmatpush1.bf16.msra.mxu0 %v11574_v40  ;;  %7449 = vmatpush1.bf16.msra.mxu1 %v11575_v45  ;;  %v11584_v40 = vld [vmem:[#allocation50_spill] sm:$0xff]  ;;  %v11585_v45 = vld [vmem:[#allocation52_spill] sm:$0xff] }
 0x729   : > { %7419 = vmatprep.subr.bf16.mxu0 %v11576_v32  ;;  %7451 = vmatprep.subr.bf16.mxu1 %v11577_v43  ;;  %v11586_v32 = vld [vmem:[#allocation51_spill] sm:$0xff]  ;;  %v11587_v43 = vld [vmem:[#allocation53_spill] sm:$0xff] }
 0x72c   : > { %7421 = vmatpush1.bf16.msra.mxu0 %v11578_v8  ;;  %7453 = vmatpush1.bf16.msra.mxu1 %v11579_v10  ;;  %v11588_v8 = vld [vmem:[#allocation54_spill] sm:$0xff]  ;;  %v11590_v10 = vld [vmem:[#allocation55_spill] sm:$0xff] }
 0x72d   : > { %7423 = vmatprep.subr.bf16.mxu0 %v11580_v34  ;;  %7455 = vmatprep.subr.bf16.mxu1 %v11581_v51  ;;  %v11591_v34 = vld [vmem:[#allocation57_spill] sm:$0xff]  ;;  %v11592_v51 = vld [vmem:[#allocation58_spill] sm:$0xff] }
 0x730   : > { %7425 = vmatpush1.bf16.msra.mxu0 %v11582_v44  ;;  %7457 = vmatpush1.bf16.msra.mxu1 %v11583_v47  ;;  %v11593_v44 = vld [vmem:[#allocation59_spill] sm:$0xff]  ;;  %v11594_v47 = vld [vmem:[#allocation60_spill] sm:$0xff] }
 0x731   : > { %7427 = vmatprep.subr.bf16.mxu0 %v11584_v40  ;;  %7459 = vmatprep.subr.bf16.mxu1 %v11585_v45  ;;  %v4398_v40 = vstv %s3923_s28  ;;  %v11595_v45 = vmov 0  }
 0x732   : > { %vm4399_vm11 = vcmp.eq.s32.totalorder %v11594_v47, %v4398_v40 }
 0x734   : > { %7429 = vmatpush1.bf16.msra.mxu0 %v11586_v32  ;;  %7461 = vmatpush1.bf16.msra.mxu1 %v11587_v43  ;;  %v4400_v32 = vsel %vm4399_vm11, 1, %v11595_v45 }
 0x735   : > { %7431 = vmatprep.subr.bf16.mxu0 %v11588_v8  ;;  %7463 = vmatprep.subr.bf16.mxu1 %v11589_v28  ;;  %v11596_v8 = vld [vmem:[#allocation62_spill] sm:$0xff] }
 0x736   : > { %4402 = vperm.xlu0 %8464, %v4400_v32  }
 0x738   : > { %7433 = vmatpush1.bf16.msra.mxu0 %v11590_v10  ;;  %7465 = vmatpush1.bf16.msra.mxu1 %v11591_v34 }
 0x739   : > { %7467 = vmatprep.subr.bf16.mxu0 %v11592_v51  ;;  %7499 = vmatprep.subr.bf16.mxu1 %v11593_v44 }
 0x7ae   : > { %v3529_v43 = vpop.f32.mrb[12].mxu0  ;;  %v3600_v22 = vpop.f32.mrb[12].mxu1 }
 0x7af   : > { %v8204_v50 = vadd.f32 %v3529_v43, %v11596_v8  ;;  %v3531_v28 = vpop.f32.mrb[13].mxu0  ;;  %v3602_v13 = vpop.f32.mrb[13].mxu1  ;;  %v8222_v44 = vadd.f32 %v3600_v22, %v9471_v14 }
 0x7b0   : > { %v8205_v10 = vadd.f32 %v3531_v28, %v9466_v3  ;;  %v8223_v40 = vadd.f32 %v3602_v13, %v9477_v30 }
 0x7b1   : > { %v3928_v34 = vmul.f32 0.5, %v8204_v50 }
 0x7b2   : > { %v3932_v23 = vmul.f32 0.5, %v8205_v10  ;;  %v3937_v47 = vmul.f32 0.5, %v8223_v40 }
 0x7b3   : > { %8576 = vtanh.f32 %v3928_v34  ;;  %v11603_v34 = vld [vmem:[#allocation89_spill] sm:$0xff] }
 0x7b4   : > { %8578 = vtanh.f32 %v3932_v23 }
 0x7b5   : > { %8580 = vtanh.f32 %v8222_v44 }
 0x7b6   : > { %8582 = vtanh.f32 %v3937_v47 }
 0x7bd   : > { %v8577_v45 = vpop.eup %8576 }
 0x7be   : > { %v8579_v32 = vpop.eup %8578  ;;  %v3930_v51 = vmul.f32 0.5, %v8577_v45  ;;  %v11599_v45 = vld [vmem:[#allocation82_spill] sm:$0xff] }
 0x7bf   : > { %v3934_v27 = vmul.f32 0.5, %v8579_v32  ;;  %v8581_v8 = vpop.eup %8580 }
 0x7c0   : > { %v3931_v43 = vadd.f32 0.5, %v3930_v51  ;;  %v8583_v23 = vpop.eup %8582  ;;  %v11602_v51 = vld [vmem:[#allocation87_spill] sm:$0xff] }
 0x7c1   : > { %v3935_v61 = vadd.f32 0.5, %v3934_v27  ;;  %v3939_v22 = vmul.f32 0.5, %v8583_v23  ;;  %v11598_v27 = vld [vmem:[#allocation81_spill] sm:$0xff] }
 0x7c2   : > { %v3942_v18 = vmul.f32 %v8581_v8, %v3931_v43 }
 0x7c3   : > { %v3941_v50 = vmul.f32 %v3935_v61, %v10239_v39  ;;  %v3940_v44 = vadd.f32 0.5, %v3939_v22  ;;  %v11597_v61 = vld [vmem:[#allocation80_spill] sm:$0xff] }
 0x7c4   : > { %v11601_v39 = vld [vmem:[#allocation84_spill] sm:$0xff] }
 0x7c5   : > { %v10363_v10 = vadd.f32 %v3942_v18, %v3941_v50  ;;  %v11600_v18 = vld [vmem:[#allocation83_spill] sm:$0xff] }
 0x7c7   : > { %8584 = vtanh.f32 %v10363_v10 }
 0x7d1   : > { %v8585_v13 = vpop.eup %8584 }
 0x7d2   : > { %v3945_v28 = vmul.f32 %v8585_v13, %v3940_v44  ;;  %v11604_v13 = vld [vmem:[#allocation97_spill] sm:$0xff] }
 0x7d4   : > { %4011 = vmatmul.mubr.f32.vlgmr.msra.gmra.mrb[14].mxu0 %v3945_v28  ;;  %4082 = vmatmul.mubr.f32.vlgmr.msra.gmra.mrb[14].mxu1 %v3945_v28 }
 0x7d5   : > { %7469 = vmatpush1.bf16.msra.mxu0 %v11340_v5  ;;  %7501 = vmatpush1.bf16.msra.mxu1 %v11341_v53 }
 0x7d6   : > { %7471 = vmatprep.subr.bf16.mxu0 %v11403_v9  ;;  %7503 = vmatprep.subr.bf16.mxu1 %v11404_v16 }
 0x7d7   : > { %4152 = vmatprep.mubr.f32.mxu0 %v11215_v60  ;;  %4223 = vmatprep.mubr.f32.mxu1 %v11215_v60 }
 0x7d9   : > { %7473 = vmatpush1.bf16.msra.mxu0 %v11405_v6  ;;  %7505 = vmatpush1.bf16.msra.mxu1 %v11406_v12 }
 0x7da   : > { %7475 = vmatprep.subr.bf16.mxu0 %v11467_v46  ;;  %7507 = vmatprep.subr.bf16.mxu1 %v11468_v48 }
 0x7dd   : > { %7477 = vmatpush1.bf16.msra.mxu0 %v11469_v52  ;;  %7509 = vmatpush1.bf16.msra.mxu1 %v11470_v37 }
 0x7de   : > { %7479 = vmatprep.subr.bf16.mxu0 %v11532_v15  ;;  %7511 = vmatprep.subr.bf16.mxu1 %v11533_v63 }
 0x7e1   : > { %7481 = vmatpush1.bf16.msra.mxu0 %v11534_v49  ;;  %7513 = vmatpush1.bf16.msra.mxu1 %v11535_v7 }
 0x7e2   : > { %7483 = vmatprep.subr.bf16.mxu0 %v11536_v2  ;;  %7515 = vmatprep.subr.bf16.mxu1 %v11537_v31 }
 0x7e5   : > { %7485 = vmatpush1.bf16.msra.mxu0 %v11538_v38  ;;  %7517 = vmatpush1.bf16.msra.mxu1 %v11597_v61 }
 0x7e6   : > { %7487 = vmatprep.subr.bf16.mxu0 %v11598_v27  ;;  %7519 = vmatprep.subr.bf16.mxu1 %v11599_v45 }
 0x7e9   : > { %7489 = vmatpush1.bf16.msra.mxu0 %v11600_v18  ;;  %7521 = vmatpush1.bf16.msra.mxu1 %v11601_v39 }
 0x7ea   : > { %7491 = vmatprep.subr.bf16.mxu0 %v11483_v55  ;;  %7523 = vmatprep.subr.bf16.mxu1 %v11544_v36 }
 0x7ed   : > { %7493 = vmatpush1.bf16.msra.mxu0 %v11602_v51  ;;  %7525 = vmatpush1.bf16.msra.mxu1 %v11486_v11 }
 0x7ee   : > { %v3813_v47 = vpop.f32.mrb[30].mxu0  ;;  %v3884_v8 = vpop.f32.mrb[30].mxu1  ;;  %7495 = vmatprep.subr.bf16.mxu0 %v11603_v34  ;;  %7527 = vmatprep.subr.bf16.mxu1 %v11304_v19 }
 0x7ef   : > { %v3893_v40 = vadd.f32 %v3813_v47, %v11488_v0  ;;  %v3815_v32 = vpop.f32.mrb[31].mxu0  ;;  %v3886_v43 = vpop.f32.mrb[31].mxu1  ;;  %v3895_v44 = vadd.f32 %v3884_v8, %v11431_v54  ;;  %v11605_v47 = vld [vmem:[#allocation98_spill] sm:$0xff]  ;;  %v11608_v8 = vld [vmem:[#allocation100_spill] sm:$0xff] }
 0x7f0   : > { %v3894_v50 = vadd.f32 %v3815_v32, %v9762_v1 }
 0x7f1   : > { %v3897_v23 = vmul.f32 0.5, %v3893_v40  ;;  %7497 = vmatpush1.bf16.msra.mxu0 %v11307_v17  ;;  %7529 = vmatpush1.bf16.msra.mxu1 %v11489_v4  ;;  %v11606_v40 = vld [vmem:[#allocation91_spill] sm:$0xff] }
 0x7f2   : > { %v3901_v22 = vmul.f32 0.5, %v3894_v50  ;;  %7531 = vmatprep.subr.bf16.mxu0 %v11369_v57  ;;  %7563 = vmatprep.subr.bf16.mxu1 %v11430_v25  ;;  %v3896_v32 = vadd.f32 %v3886_v43, %v11606_v40  ;;  %v11607_v50 = vld [vmem:[#allocation99_spill] sm:$0xff] }
 0x7f3   : > { %8586 = vtanh.f32 %v3897_v23 }
 0x7f4   : > { %8588 = vtanh.f32 %v3901_v22  ;;  %4153 = vmatmul.mubr.f32.vlgmr.msra.gmra.mrb[32].mxu0 %v3945_v28  ;;  %4224 = vmatmul.mubr.f32.vlgmr.msra.gmra.mrb[32].mxu1 %v3945_v28  ;;  %v3906_v28 = vmul.f32 0.5, %v3896_v32  ;;  %v11609_v22 = vld [vmem:[#allocation104_spill] sm:$0xff] }
 0x7f5   : > { %7533 = vmatpush1.bf16.msra.mxu0 %v11432_v21  ;;  %7565 = vmatpush1.bf16.msra.mxu1 %v11433_v20  ;;  %8590 = vtanh.f32 %v3895_v44 }
 0x7f6   : > { %7535 = vmatprep.subr.bf16.mxu0 %v11604_v13  ;;  %7567 = vmatprep.subr.bf16.mxu1 %v11605_v47  ;;  %8592 = vtanh.f32 %v3906_v28  ;;  %v11612_v28 = vld [vmem:[#allocation113_spill] sm:$0xff] }
 0x7f7   : > { %4294 = vmatprep.mubr.f32.mxu0 %v11215_v60  ;;  %4365 = vmatprep.mubr.f32.mxu1 %v11215_v60 }
 0x7f9   : > { %7537 = vmatpush1.bf16.msra.mxu0 %v11607_v50  ;;  %7569 = vmatpush1.bf16.msra.mxu1 %v11608_v8 }
 0x7fa   : > { %7539 = vmatprep.subr.bf16.mxu0 %v11379_v56  ;;  %7571 = vmatprep.subr.bf16.mxu1 %v11380_v62 }
 0x7fd   : > { %v8587_v23 = vpop.eup %8586  ;;  %7541 = vmatpush1.bf16.msra.mxu0 %v11381_v42  ;;  %7573 = vmatpush1.bf16.msra.mxu1 %v11609_v22 }
 0x7fe   : > { %v8589_v44 = vpop.eup %8588  ;;  %v3899_v43 = vmul.f32 0.5, %v8587_v23  ;;  %7543 = vmatprep.subr.bf16.mxu0 %v11383_v33  ;;  %7575 = vmatprep.subr.bf16.mxu1 %v11323_v41 }
 0x7ff   : > { %v3903_v40 = vmul.f32 0.5, %v8589_v44  ;;  %v8591_v8 = vpop.eup %8590  ;;  %v11611_v44 = vld [vmem:[#allocation112_spill] sm:$0xff] }
 0x800   : > { %v3900_v50 = vadd.f32 0.5, %v3899_v43  ;;  %v8593_v43 = vpop.eup %8592 }
 0x801   : > { %v3904_v47 = vadd.f32 0.5, %v3903_v40  ;;  %7545 = vmatpush1.bf16.msra.mxu0 %v11324_v24  ;;  %7577 = vmatpush1.bf16.msra.mxu1 %v11325_v58  ;;  %v11613_v40 = vld [vmem:[#allocation114_spill] sm:$0xff] }
 0x802   : > { %v3911_v32 = vmul.f32 %v8591_v8, %v3900_v50  ;;  %7547 = vmatprep.subr.bf16.mxu0 %v11326_v26  ;;  %7579 = vmatprep.subr.bf16.mxu1 %v11327_v29  ;;  %v11614_v50 = vld [vmem:[#allocation115_spill] sm:$0xff]  ;;  %v11615_v8 = vld [vmem:[#allocation116_spill] sm:$0xff]  ;;  %v11616_v29 = vld [vmem:[#allocation117_spill] sm:$0xff] }
 0x803   : > { %v3910_v23 = vmul.f32 %v3904_v47, %v10299_v59  ;;  %v11617_v59 = vld [vmem:[#allocation118_spill] sm:$0xff]  ;;  %v3908_v47 = vmul.f32 0.5, %v8593_v43  ;;  %v11622_v26 = vld [vmem:[#allocation123_spill] sm:$0xff] }
 0x804   : > { %v11625_v43 = vld [vmem:[#allocation27_spill] sm:$0xff] }
 0x805   : > { %v10423_v22 = vadd.f32 %v3911_v32, %v3910_v23  ;;  %7549 = vmatpush1.bf16.msra.mxu0 %v11328_v35  ;;  %7581 = vmatpush1.bf16.msra.mxu1 %v11611_v44  ;;  %v11618_v32 = vld [vmem:[#allocation119_spill] sm:$0xff]  ;;  %v11619_v23 = vld [vmem:[#allocation120_spill] sm:$0xff]  ;;  %v11620_v44 = vld [vmem:[#allocation121_spill] sm:$0xff]  ;;  %v3909_v35 = vadd.f32 0.5, %v3908_v47 }
 0x806   : > { %7551 = vmatprep.subr.bf16.mxu0 %v11612_v28  ;;  %7583 = vmatprep.subr.bf16.mxu1 %v11613_v40  ;;  %v11621_v28 = vld [vmem:[#allocation122_spill] sm:$0xff]  ;;  %v3920_v40 = vpop.permute.xlu1 %3919 }
 0x807   : > { %11610 = vst [vmem:[#allocation64_spill] sm:$0xff] %v10423_v22  ;;  %8594 = vtanh.f32 %v10423_v22  ;;  %vm3921_vm12 = vcmp.eq.s32.totalorder %v3920_v40, 1  ;;  %v11630_v47 = vld [vmem:[#allocation30_spill] sm:$0xff] }
 0x808   : > { %v11634_v40 = vld [vmem:[#allocation34_spill] sm:$0xff] }
 0x809   : > { %7553 = vmatpush1.bf16.msra.mxu0 %v11614_v50  ;;  %7585 = vmatpush1.bf16.msra.mxu1 %v11615_v8  ;;  %v11623_v50 = vld [vmem:[#allocation124_spill] sm:$0xff]  ;;  %v11624_v8 = vld [vmem:[#allocation26_spill] sm:$0xff] }
 0x80a   : > { %7555 = vmatprep.subr.bf16.mxu0 %v11616_v29  ;;  %7587 = vmatprep.subr.bf16.mxu1 %v11617_v59 }
 0x80d   : > { %7557 = vmatpush1.bf16.msra.mxu0 %v11618_v32  ;;  %7589 = vmatpush1.bf16.msra.mxu1 %v11619_v23  ;;  %v11626_v32 = vld [vmem:[#allocation63_spill] sm:$0xff] }
 0x80e   : > { %7559 = vmatprep.subr.bf16.mxu0 %v11620_v44  ;;  %7591 = vmatprep.subr.bf16.mxu1 %v11621_v28  ;;  %v11628_v44 = vld [vmem:[#allocation28_spill] sm:$0xff]  ;;  %v11629_v28 = vld [vmem:[#allocation29_spill] sm:$0xff] }
 0x811   : > { %v8595_v22 = vpop.eup %8594  ;;  %7561 = vmatpush1.bf16.msra.mxu0 %v11622_v26  ;;  %7593 = vmatpush1.bf16.msra.mxu1 %v11623_v50  ;;  %v11631_v26 = vld [vmem:[#allocation32_spill] sm:$0xff] }
 0x812   : > { %v3914_v29 = vmul.f32 %v8595_v22, %v3909_v35  ;;  %7595 = vmatprep.subr.bf16.mxu0 %v11624_v8  ;;  %7627 = vmatprep.subr.bf16.mxu1 %v11625_v43  ;;  %v11632_v35 = vld [vmem:[#allocation31_spill] sm:$0xff]  ;;  %v11633_v22 = vld [vmem:[#allocation33_spill] sm:$0xff]  ;;  %v11642_v43 = vld [vmem:[#allocation42_spill] sm:$0xff] }
 0x814   : > { %v10443_v59 = vsel %vm3921_vm12, %v3914_v29, %v11626_v32  ;;  %4295 = vmatmul.mubr.f32.vlgmr.msra.gmra.mrb[32].mxu0 %v3914_v29  ;;  %4366 = vmatmul.mubr.f32.vlgmr.msra.gmra.mrb[32].mxu1 %v3914_v29  ;;  %v11635_v32 = vld [vmem:[#allocation36_spill] sm:$0xff]  ;;  %v11636_v29 = vld [vmem:[#allocation35_spill] sm:$0xff] }
 0x815   : > { %11627 = vst [vmem:[#allocation93_spill] sm:$0xff] %v10443_v59  ;;  %7597 = vmatpush1.bf16.msra.mxu0 %v11628_v44  ;;  %7629 = vmatpush1.bf16.msra.mxu1 %v11629_v28  ;;  %v11637_v44 = vld [vmem:[#allocation37_spill] sm:$0xff]  ;;  %v11638_v28 = vld [vmem:[#allocation38_spill] sm:$0xff] }
 0x816   : > { %7599 = vmatprep.subr.bf16.mxu0 %v11630_v47  ;;  %7631 = vmatprep.subr.bf16.mxu1 %v11631_v26  ;;  %v11639_v47 = vld [vmem:[#allocation40_spill] sm:$0xff]  ;;  %v11640_v26 = vld [vmem:[#allocation39_spill] sm:$0xff]  ;;  %v11641_v59 = vld [vmem:[#allocation41_spill] sm:$0xff] }
 0x817   : > { %4493 = vmatprep.mubr.f32.mxu0 %v11215_v60  ;;  %4564 = vmatprep.mubr.f32.mxu1 %v11215_v60 }
 0x819   : > { %7601 = vmatpush1.bf16.msra.mxu0 %v11632_v35  ;;  %7633 = vmatpush1.bf16.msra.mxu1 %v11633_v22  ;;  %v11643_v35 = vld [vmem:[#allocation44_spill] sm:$0xff]  ;;  %v11644_v22 = vld [vmem:[#allocation43_spill] sm:$0xff] }
 0x81a   : > { %7603 = vmatprep.subr.bf16.mxu0 %v11634_v40  ;;  %7635 = vmatprep.subr.bf16.mxu1 %v11635_v32  ;;  %v11645_v40 = vld [vmem:[#allocation45_spill] sm:$0xff]  ;;  %v11655_v32 = vld [vmem:[#allocation56_spill] sm:$0xff] }
 0x81d   : > { %7605 = vmatpush1.bf16.msra.mxu0 %v11636_v29  ;;  %7637 = vmatpush1.bf16.msra.mxu1 %v11637_v44  ;;  %v11646_v29 = vld [vmem:[#allocation46_spill] sm:$0xff]  ;;  %v11647_v44 = vld [vmem:[#allocation48_spill] sm:$0xff] }
 0x81e   : > { %7607 = vmatprep.subr.bf16.mxu0 %v11638_v28  ;;  %7639 = vmatprep.subr.bf16.mxu1 %v11639_v47  ;;  %v11648_v28 = vld [vmem:[#allocation47_spill] sm:$0xff]  ;;  %v11649_v47 = vld [vmem:[#allocation49_spill] sm:$0xff] }
 0x821   : > { %7609 = vmatpush1.bf16.msra.mxu0 %v11640_v26  ;;  %7641 = vmatpush1.bf16.msra.mxu1 %v11641_v59  ;;  %v11650_v26 = vld [vmem:[#allocation50_spill] sm:$0xff]  ;;  %v11651_v59 = vld [vmem:[#allocation52_spill] sm:$0xff] }
 0x822   : > { %7611 = vmatprep.subr.bf16.mxu0 %v11642_v43  ;;  %7643 = vmatprep.subr.bf16.mxu1 %v11643_v35  ;;  %v11652_v43 = vld [vmem:[#allocation51_spill] sm:$0xff]  ;;  %v11653_v35 = vld [vmem:[#allocation53_spill] sm:$0xff] }
 0x825   : > { %7613 = vmatpush1.bf16.msra.mxu0 %v11644_v22  ;;  %7645 = vmatpush1.bf16.msra.mxu1 %v11645_v40  ;;  %v11654_v22 = vld [vmem:[#allocation54_spill] sm:$0xff]  ;;  %v11656_v40 = vld [vmem:[#allocation55_spill] sm:$0xff] }
 0x826   : > { %7615 = vmatprep.subr.bf16.mxu0 %v11646_v29  ;;  %7647 = vmatprep.subr.bf16.mxu1 %v11647_v44  ;;  %v11657_v29 = vld [vmem:[#allocation57_spill] sm:$0xff]  ;;  %v11658_v44 = vld [vmem:[#allocation58_spill] sm:$0xff] }
 0x829   : > { %7617 = vmatpush1.bf16.msra.mxu0 %v11648_v28  ;;  %7649 = vmatpush1.bf16.msra.mxu1 %v11649_v47  ;;  %v11659_v28 = vld [vmem:[#allocation59_spill] sm:$0xff]  ;;  %v11660_v47 = vld [vmem:[#allocation60_spill] sm:$0xff] }
 0x82a   : > { %7619 = vmatprep.subr.bf16.mxu0 %v11650_v26  ;;  %7651 = vmatprep.subr.bf16.mxu1 %v11651_v59  ;;  %v4881_v26 = vstv %s4406_s15  ;;  %v11661_v59 = vmov 0  }
 0x82b   : > { %vm4882_vm13 = vcmp.eq.s32.totalorder %v11660_v47, %v4881_v26 }
 0x82d   : > { %7621 = vmatpush1.bf16.msra.mxu0 %v11652_v43  ;;  %7653 = vmatpush1.bf16.msra.mxu1 %v11653_v35  ;;  %v4883_v43 = vsel %vm4882_vm13, 1, %v11661_v59 }
 0x82e   : > { %7623 = vmatprep.subr.bf16.mxu0 %v11654_v22  ;;  %7655 = vmatprep.subr.bf16.mxu1 %v11655_v32  ;;  %v11662_v22 = vld [vmem:[#allocation62_spill] sm:$0xff] }
 0x82f   : > { %4885 = vperm.xlu1 %8465, %v4883_v43  }
 0x831   : > { %7625 = vmatpush1.bf16.msra.mxu0 %v11656_v40  ;;  %7657 = vmatpush1.bf16.msra.mxu1 %v11657_v29 }
 0x832   : > { %7659 = vmatprep.subr.bf16.mxu0 %v11658_v44  ;;  %7691 = vmatprep.subr.bf16.mxu1 %v11659_v28 }
 0x8a7   : > { %v4012_v35 = vpop.f32.mrb[14].mxu0  ;;  %v4083_v8 = vpop.f32.mrb[14].mxu1 }
 0x8a8   : > { %v8206_v50 = vadd.f32 %v4012_v35, %v11662_v22  ;;  %v4014_v32 = vpop.f32.mrb[15].mxu0  ;;  %v4085_v23 = vpop.f32.mrb[15].mxu1  ;;  %v8224_v28 = vadd.f32 %v4083_v8, %v9471_v14 }
 0x8a9   : > { %v8207_v40 = vadd.f32 %v4014_v32, %v9466_v3  ;;  %v8225_v26 = vadd.f32 %v4085_v23, %v9477_v30 }
 0x8aa   : > { %v4411_v29 = vmul.f32 0.5, %v8206_v50 }
 0x8ab   : > { %v4415_v58 = vmul.f32 0.5, %v8207_v40  ;;  %v4420_v47 = vmul.f32 0.5, %v8225_v26  ;;  %v11663_v26 = vld [vmem:[#allocation98_spill] sm:$0xff] }
 0x8ac   : > { %8596 = vtanh.f32 %v4411_v29 }
 0x8ad   : > { %8598 = vtanh.f32 %v4415_v58 }
 0x8ae   : > { %8600 = vtanh.f32 %v8224_v28 }
 0x8af   : > { %8602 = vtanh.f32 %v4420_v47 }
 0x8b6   : > { %v8597_v59 = vpop.eup %8596 }
 0x8b7   : > { %v8599_v43 = vpop.eup %8598  ;;  %v4413_v44 = vmul.f32 0.5, %v8597_v59 }
 0x8b8   : > { %v4417_v24 = vmul.f32 0.5, %v8599_v43  ;;  %v8601_v22 = vpop.eup %8600  ;;  %v11664_v43 = vld [vmem:[#allocation91_spill] sm:$0xff] }
 0x8b9   : > { %v4414_v35 = vadd.f32 0.5, %v4413_v44  ;;  %v8603_v58 = vpop.eup %8602 }
 0x8ba   : > { %v4418_v41 = vadd.f32 0.5, %v4417_v24  ;;  %v4422_v28 = vmul.f32 0.5, %v8603_v58  ;;  %v11666_v58 = vld [vmem:[#allocation100_spill] sm:$0xff] }
 0x8bb   : > { %v4425_v33 = vmul.f32 %v8601_v22, %v4414_v35 }
 0x8bc   : > { %v4424_v50 = vmul.f32 %v4418_v41, %v10363_v10  ;;  %v4423_v8 = vadd.f32 0.5, %v4422_v28 }
 0x8be   : > { %v10487_v40 = vadd.f32 %v4425_v33, %v4424_v50  ;;  %v11665_v50 = vld [vmem:[#allocation99_spill] sm:$0xff] }
 0x8c0   : > { %8604 = vtanh.f32 %v10487_v40 }
 0x8ca   : > { %v8605_v23 = vpop.eup %8604 }
 0x8cb   : > { %v4428_v32 = vmul.f32 %v8605_v23, %v4423_v8  ;;  %v11667_v23 = vld [vmem:[#allocation104_spill] sm:$0xff] }
 0x8cd   : > { %4494 = vmatmul.mubr.f32.vlgmr.msra.gmra.mrb[16].mxu0 %v4428_v32  ;;  %4565 = vmatmul.mubr.f32.vlgmr.msra.gmra.mrb[16].mxu1 %v4428_v32 }
 0x8ce   : > { %7661 = vmatpush1.bf16.msra.mxu0 %v11340_v5  ;;  %7693 = vmatpush1.bf16.msra.mxu1 %v11341_v53 }
 0x8cf   : > { %7663 = vmatprep.subr.bf16.mxu0 %v11403_v9  ;;  %7695 = vmatprep.subr.bf16.mxu1 %v11404_v16 }
 0x8d0   : > { %4635 = vmatprep.mubr.f32.mxu0 %v11215_v60  ;;  %4706 = vmatprep.mubr.f32.mxu1 %v11215_v60 }
 0x8d2   : > { %7665 = vmatpush1.bf16.msra.mxu0 %v11405_v6  ;;  %7697 = vmatpush1.bf16.msra.mxu1 %v11406_v12 }
 0x8d3   : > { %7667 = vmatprep.subr.bf16.mxu0 %v11467_v46  ;;  %7699 = vmatprep.subr.bf16.mxu1 %v11468_v48 }
 0x8d6   : > { %7669 = vmatpush1.bf16.msra.mxu0 %v11469_v52  ;;  %7701 = vmatpush1.bf16.msra.mxu1 %v11470_v37 }
 0x8d7   : > { %7671 = vmatprep.subr.bf16.mxu0 %v11532_v15  ;;  %7703 = vmatprep.subr.bf16.mxu1 %v11533_v63 }
 0x8da   : > { %7673 = vmatpush1.bf16.msra.mxu0 %v11534_v49  ;;  %7705 = vmatpush1.bf16.msra.mxu1 %v11535_v7 }
 0x8db   : > { %7675 = vmatprep.subr.bf16.mxu0 %v11536_v2  ;;  %7707 = vmatprep.subr.bf16.mxu1 %v11537_v31 }
 0x8de   : > { %7677 = vmatpush1.bf16.msra.mxu0 %v11538_v38  ;;  %7709 = vmatpush1.bf16.msra.mxu1 %v11597_v61 }
 0x8df   : > { %7679 = vmatprep.subr.bf16.mxu0 %v11598_v27  ;;  %7711 = vmatprep.subr.bf16.mxu1 %v11599_v45 }
 0x8e2   : > { %7681 = vmatpush1.bf16.msra.mxu0 %v11600_v18  ;;  %7713 = vmatpush1.bf16.msra.mxu1 %v11601_v39 }
 0x8e3   : > { %7683 = vmatprep.subr.bf16.mxu0 %v11483_v55  ;;  %7715 = vmatprep.subr.bf16.mxu1 %v11544_v36 }
 0x8e6   : > { %7685 = vmatpush1.bf16.msra.mxu0 %v11602_v51  ;;  %7717 = vmatpush1.bf16.msra.mxu1 %v11486_v11 }
 0x8e7   : > { %v4296_v24 = vpop.f32.mrb[32].mxu0  ;;  %v4367_v41 = vpop.f32.mrb[32].mxu1  ;;  %7687 = vmatprep.subr.bf16.mxu0 %v11603_v34  ;;  %7719 = vmatprep.subr.bf16.mxu1 %v11304_v19 }
 0x8e8   : > { %v4376_v33 = vadd.f32 %v4296_v24, %v11488_v0  ;;  %v4298_v10 = vpop.f32.mrb[33].mxu0  ;;  %v4369_v44 = vpop.f32.mrb[33].mxu1  ;;  %v4378_v29 = vadd.f32 %v4367_v41, %v11431_v54  ;;  %v11668_v41 = vld [vmem:[#allocation105_spill] sm:$0xff] }
 0x8e9   : > { %v4377_v59 = vadd.f32 %v4298_v10, %v9762_v1  ;;  %v4379_v35 = vadd.f32 %v4369_v44, %v11664_v43 }
 0x8ea   : > { %v4380_v47 = vmul.f32 0.5, %v4376_v33  ;;  %7689 = vmatpush1.bf16.msra.mxu0 %v11307_v17  ;;  %7721 = vmatpush1.bf16.msra.mxu1 %v11489_v4  ;;  %v11669_v33 = vld [vmem:[#allocation106_spill] sm:$0xff] }
 0x8eb   : > { %v4384_v22 = vmul.f32 0.5, %v4377_v59  ;;  %7723 = vmatprep.subr.bf16.mxu0 %v11369_v57  ;;  %7755 = vmatprep.subr.bf16.mxu1 %v11430_v25  ;;  %v4389_v28 = vmul.f32 0.5, %v4379_v35 }
 0x8ec   : > { %8606 = vtanh.f32 %v4380_v47 }
 0x8ed   : > { %8608 = vtanh.f32 %v4384_v22  ;;  %4636 = vmatmul.mubr.f32.vlgmr.msra.gmra.mrb[34].mxu0 %v4428_v32  ;;  %4707 = vmatmul.mubr.f32.vlgmr.msra.gmra.mrb[34].mxu1 %v4428_v32  ;;  %v11670_v22 = vld [vmem:[#allocation107_spill] sm:$0xff] }
 0x8ee   : > { %7725 = vmatpush1.bf16.msra.mxu0 %v11432_v21  ;;  %7757 = vmatpush1.bf16.msra.mxu1 %v11433_v20  ;;  %8610 = vtanh.f32 %v4378_v29  ;;  %v11671_v29 = vld [vmem:[#allocation108_spill] sm:$0xff] }
 0x8ef   : > { %7727 = vmatprep.subr.bf16.mxu0 %v11604_v13  ;;  %7759 = vmatprep.subr.bf16.mxu1 %v11663_v26  ;;  %8612 = vtanh.f32 %v4389_v28  ;;  %v11678_v28 = vld [vmem:[#allocation113_spill] sm:$0xff] }
 0x8f0   : > { %4777 = vmatprep.mubr.f32.mxu0 %v11215_v60  ;;  %4848 = vmatprep.mubr.f32.mxu1 %v11215_v60 }
 0x8f2   : > { %7729 = vmatpush1.bf16.msra.mxu0 %v11665_v50  ;;  %7761 = vmatpush1.bf16.msra.mxu1 %v11666_v58 }
 0x8f3   : > { %7731 = vmatprep.subr.bf16.mxu0 %v11379_v56  ;;  %7763 = vmatprep.subr.bf16.mxu1 %v11380_v62  ;;  %v11672_v62 = vld [vmem:[#allocation109_spill] sm:$0xff] }
 0x8f6   : > { %v8607_v8 = vpop.eup %8606  ;;  %7733 = vmatpush1.bf16.msra.mxu0 %v11381_v42  ;;  %7765 = vmatpush1.bf16.msra.mxu1 %v11667_v23  ;;  %v11673_v42 = vld [vmem:[#allocation110_spill] sm:$0xff]  ;;  %v11674_v23 = vld [vmem:[#allocation64_spill] sm:$0xff] }
 0x8f7   : > { %v8609_v32 = vpop.eup %8608  ;;  %v4382_v24 = vmul.f32 0.5, %v8607_v8  ;;  %7735 = vmatprep.subr.bf16.mxu0 %v11668_v41  ;;  %7767 = vmatprep.subr.bf16.mxu1 %v11669_v33  ;;  %v11676_v41 = vld [vmem:[#allocation111_spill] sm:$0xff] }
 0x8f8   : > { %v4386_v10 = vmul.f32 0.5, %v8609_v32  ;;  %v8611_v59 = vpop.eup %8610  ;;  %v11677_v32 = vld [vmem:[#allocation112_spill] sm:$0xff] }
 0x8f9   : > { %v4383_v44 = vadd.f32 0.5, %v4382_v24  ;;  %v11679_v24 = vld [vmem:[#allocation114_spill] sm:$0xff] }
 0x8fa   : > { %v4387_v47 = vadd.f32 0.5, %v4386_v10  ;;  %7737 = vmatpush1.bf16.msra.mxu0 %v11670_v22  ;;  %7769 = vmatpush1.bf16.msra.mxu1 %v11671_v29  ;;  %v8613_v10 = vpop.eup %8612 }
 0x8fb   : > { %v4394_v35 = vmul.f32 %v8611_v59, %v4383_v44  ;;  %7739 = vmatprep.subr.bf16.mxu0 %v11672_v62  ;;  %7771 = vmatprep.subr.bf16.mxu1 %v11673_v42  ;;  %v11680_v44 = vld [vmem:[#allocation115_spill] sm:$0xff]  ;;  %v11681_v59 = vld [vmem:[#allocation116_spill] sm:$0xff]  ;;  %v11682_v42 = vld [vmem:[#allocation117_spill] sm:$0xff] }
 0x8fc   : > { %v4393_v8 = vmul.f32 %v4387_v47, %v11674_v23  ;;  %v11683_v23 = vld [vmem:[#allocation118_spill] sm:$0xff]  ;;  %v4391_v47 = vmul.f32 0.5, %v8613_v10  ;;  %v11688_v62 = vld [vmem:[#allocation123_spill] sm:$0xff] }
 0x8fd   : > { %v11691_v10 = vld [vmem:[#allocation27_spill] sm:$0xff] }
 0x8fe   : > { %v10547_v56 = vadd.f32 %v4394_v35, %v4393_v8  ;;  %7741 = vmatpush1.bf16.msra.mxu0 %v11676_v41  ;;  %7773 = vmatpush1.bf16.msra.mxu1 %v11677_v32  ;;  %v11684_v35 = vld [vmem:[#allocation119_spill] sm:$0xff]  ;;  %v11685_v8 = vld [vmem:[#allocation120_spill] sm:$0xff]  ;;  %v11686_v32 = vld [vmem:[#allocation121_spill] sm:$0xff]  ;;  %v4392_v41 = vadd.f32 0.5, %v4391_v47 }
 0x8ff   : > { %7743 = vmatprep.subr.bf16.mxu0 %v11678_v28  ;;  %7775 = vmatprep.subr.bf16.mxu1 %v11679_v24  ;;  %v11687_v28 = vld [vmem:[#allocation122_spill] sm:$0xff]  ;;  %v4403_v24 = vpop.permute.xlu0 %4402 }
 0x900   : > { %11675 = vst [vmem:[#allocation65_spill] sm:$0xff] %v10547_v56  ;;  %8614 = vtanh.f32 %v10547_v56  ;;  %vm4404_vm14 = vcmp.eq.s32.totalorder %v4403_v24, 1  ;;  %v11696_v47 = vld [vmem:[#allocation30_spill] sm:$0xff] }
 0x901   : > { %v11700_v24 = vld [vmem:[#allocation34_spill] sm:$0xff] }
 0x902   : > { %7745 = vmatpush1.bf16.msra.mxu0 %v11680_v44  ;;  %7777 = vmatpush1.bf16.msra.mxu1 %v11681_v59  ;;  %v11689_v44 = vld [vmem:[#allocation124_spill] sm:$0xff]  ;;  %v11690_v59 = vld [vmem:[#allocation26_spill] sm:$0xff] }
 0x903   : > { %7747 = vmatprep.subr.bf16.mxu0 %v11682_v42  ;;  %7779 = vmatprep.subr.bf16.mxu1 %v11683_v23 }
 0x906   : > { %7749 = vmatpush1.bf16.msra.mxu0 %v11684_v35  ;;  %7781 = vmatpush1.bf16.msra.mxu1 %v11685_v8  ;;  %v11692_v35 = vld [vmem:[#allocation93_spill] sm:$0xff] }
 0x907   : > { %7751 = vmatprep.subr.bf16.mxu0 %v11686_v32  ;;  %7783 = vmatprep.subr.bf16.mxu1 %v11687_v28  ;;  %v11694_v32 = vld [vmem:[#allocation28_spill] sm:$0xff]  ;;  %v11695_v28 = vld [vmem:[#allocation29_spill] sm:$0xff] }
 0x90a   : > { %v8615_v56 = vpop.eup %8614  ;;  %7753 = vmatpush1.bf16.msra.mxu0 %v11688_v62  ;;  %7785 = vmatpush1.bf16.msra.mxu1 %v11689_v44  ;;  %v11697_v62 = vld [vmem:[#allocation32_spill] sm:$0xff] }
 0x90b   : > { %v4397_v42 = vmul.f32 %v8615_v56, %v4392_v41  ;;  %7787 = vmatprep.subr.bf16.mxu0 %v11690_v59  ;;  %7819 = vmatprep.subr.bf16.mxu1 %v11691_v10  ;;  %v11698_v56 = vld [vmem:[#allocation31_spill] sm:$0xff]  ;;  %v11699_v41 = vld [vmem:[#allocation33_spill] sm:$0xff]  ;;  %v11708_v10 = vld [vmem:[#allocation42_spill] sm:$0xff] }
 0x90d   : > { %v10567_v23 = vsel %vm4404_vm14, %v4397_v42, %v11692_v35  ;;  %4778 = vmatmul.mubr.f32.vlgmr.msra.gmra.mrb[34].mxu0 %v4397_v42  ;;  %4849 = vmatmul.mubr.f32.vlgmr.msra.gmra.mrb[34].mxu1 %v4397_v42  ;;  %v11701_v35 = vld [vmem:[#allocation36_spill] sm:$0xff]  ;;  %v11702_v42 = vld [vmem:[#allocation35_spill] sm:$0xff] }
 0x90e   : > { %11693 = vst [vmem:[#allocation66_spill] sm:$0xff] %v10567_v23  ;;  %7789 = vmatpush1.bf16.msra.mxu0 %v11694_v32  ;;  %7821 = vmatpush1.bf16.msra.mxu1 %v11695_v28  ;;  %v11703_v32 = vld [vmem:[#allocation37_spill] sm:$0xff]  ;;  %v11704_v28 = vld [vmem:[#allocation38_spill] sm:$0xff] }
 0x90f   : > { %7791 = vmatprep.subr.bf16.mxu0 %v11696_v47  ;;  %7823 = vmatprep.subr.bf16.mxu1 %v11697_v62  ;;  %v11705_v47 = vld [vmem:[#allocation40_spill] sm:$0xff]  ;;  %v11706_v62 = vld [vmem:[#allocation39_spill] sm:$0xff]  ;;  %v11707_v23 = vld [vmem:[#allocation41_spill] sm:$0xff] }
 0x910   : > { %4976 = vmatprep.mubr.f32.mxu0 %v11215_v60  ;;  %5047 = vmatprep.mubr.f32.mxu1 %v11215_v60 }
 0x912   : > { %7793 = vmatpush1.bf16.msra.mxu0 %v11698_v56  ;;  %7825 = vmatpush1.bf16.msra.mxu1 %v11699_v41  ;;  %v11709_v56 = vld [vmem:[#allocation44_spill] sm:$0xff]  ;;  %v11710_v41 = vld [vmem:[#allocation43_spill] sm:$0xff] }
 0x913   : > { %7795 = vmatprep.subr.bf16.mxu0 %v11700_v24  ;;  %7827 = vmatprep.subr.bf16.mxu1 %v11701_v35  ;;  %v11711_v24 = vld [vmem:[#allocation45_spill] sm:$0xff]  ;;  %v11721_v35 = vld [vmem:[#allocation56_spill] sm:$0xff] }
 0x916   : > { %7797 = vmatpush1.bf16.msra.mxu0 %v11702_v42  ;;  %7829 = vmatpush1.bf16.msra.mxu1 %v11703_v32  ;;  %v11712_v42 = vld [vmem:[#allocation46_spill] sm:$0xff]  ;;  %v11713_v32 = vld [vmem:[#allocation48_spill] sm:$0xff] }
 0x917   : > { %7799 = vmatprep.subr.bf16.mxu0 %v11704_v28  ;;  %7831 = vmatprep.subr.bf16.mxu1 %v11705_v47  ;;  %v11714_v28 = vld [vmem:[#allocation47_spill] sm:$0xff]  ;;  %v11715_v47 = vld [vmem:[#allocation49_spill] sm:$0xff] }
 0x91a   : > { %7801 = vmatpush1.bf16.msra.mxu0 %v11706_v62  ;;  %7833 = vmatpush1.bf16.msra.mxu1 %v11707_v23  ;;  %v11716_v62 = vld [vmem:[#allocation50_spill] sm:$0xff]  ;;  %v11717_v23 = vld [vmem:[#allocation52_spill] sm:$0xff] }
 0x91b   : > { %7803 = vmatprep.subr.bf16.mxu0 %v11708_v10  ;;  %7835 = vmatprep.subr.bf16.mxu1 %v11709_v56  ;;  %v11718_v10 = vld [vmem:[#allocation51_spill] sm:$0xff]  ;;  %v11719_v56 = vld [vmem:[#allocation53_spill] sm:$0xff] }
 0x91e   : > { %7805 = vmatpush1.bf16.msra.mxu0 %v11710_v41  ;;  %7837 = vmatpush1.bf16.msra.mxu1 %v11711_v24  ;;  %v11720_v41 = vld [vmem:[#allocation54_spill] sm:$0xff]  ;;  %v11722_v24 = vld [vmem:[#allocation55_spill] sm:$0xff] }
 0x91f   : > { %7807 = vmatprep.subr.bf16.mxu0 %v11712_v42  ;;  %7839 = vmatprep.subr.bf16.mxu1 %v11713_v32  ;;  %v11723_v42 = vld [vmem:[#allocation57_spill] sm:$0xff]  ;;  %v11724_v32 = vld [vmem:[#allocation58_spill] sm:$0xff] }
 0x922   : > { %7809 = vmatpush1.bf16.msra.mxu0 %v11714_v28  ;;  %7841 = vmatpush1.bf16.msra.mxu1 %v11715_v47  ;;  %v11725_v28 = vld [vmem:[#allocation59_spill] sm:$0xff]  ;;  %v11726_v47 = vld [vmem:[#allocation60_spill] sm:$0xff] }
 0x923   : > { %7811 = vmatprep.subr.bf16.mxu0 %v11716_v62  ;;  %7843 = vmatprep.subr.bf16.mxu1 %v11717_v23  ;;  %v5364_v62 = vstv %s4889_s22  ;;  %v11727_v23 = vmov 0  }
 0x924   : > { %vm5365_vm15 = vcmp.eq.s32.totalorder %v11726_v47, %v5364_v62 }
 0x926   : > { %7813 = vmatpush1.bf16.msra.mxu0 %v11718_v10  ;;  %7845 = vmatpush1.bf16.msra.mxu1 %v11719_v56  ;;  %v5366_v10 = vsel %vm5365_vm15, 1, %v11727_v23 }
 0x927   : > { %7815 = vmatprep.subr.bf16.mxu0 %v11720_v41  ;;  %7847 = vmatprep.subr.bf16.mxu1 %v11721_v35  ;;  %v11728_v41 = vld [vmem:[#allocation62_spill] sm:$0xff] }
 0x928   : > { %5368 = vperm.xlu0 %8464, %v5366_v10  }
 0x92a   : > { %7817 = vmatpush1.bf16.msra.mxu0 %v11722_v24  ;;  %7849 = vmatpush1.bf16.msra.mxu1 %v11723_v42 }
 0x92b   : > { %7851 = vmatprep.subr.bf16.mxu0 %v11724_v32  ;;  %7883 = vmatprep.subr.bf16.mxu1 %v11725_v28 }
 0x9a0   : > { %v4495_v56 = vpop.f32.mrb[16].mxu0  ;;  %v4566_v59 = vpop.f32.mrb[16].mxu1 }
 0x9a1   : > { %v8208_v44 = vadd.f32 %v4495_v56, %v11728_v41  ;;  %v4497_v35 = vpop.f32.mrb[17].mxu0  ;;  %v4568_v8 = vpop.f32.mrb[17].mxu1  ;;  %v8226_v28 = vadd.f32 %v4566_v59, %v9471_v14 }
 0x9a2   : > { %v8209_v24 = vadd.f32 %v4497_v35, %v9466_v3  ;;  %v8227_v62 = vadd.f32 %v4568_v8, %v9477_v30 }
 0x9a3   : > { %v4894_v42 = vmul.f32 0.5, %v8208_v44 }
 0x9a4   : > { %v4898_v29 = vmul.f32 0.5, %v8209_v24  ;;  %v4903_v47 = vmul.f32 0.5, %v8227_v62 }
 0x9a5   : > { %8616 = vtanh.f32 %v4894_v42 }
 0x9a6   : > { %8618 = vtanh.f32 %v4898_v29 }
 0x9a7   : > { %8620 = vtanh.f32 %v8226_v28 }
 0x9a8   : > { %8622 = vtanh.f32 %v4903_v47 }
 0x9af   : > { %v8617_v23 = vpop.eup %8616 }
 0x9b0   : > { %v8619_v10 = vpop.eup %8618  ;;  %v4896_v32 = vmul.f32 0.5, %v8617_v23 }
 0x9b1   : > { %v4900_v22 = vmul.f32 0.5, %v8619_v10  ;;  %v8621_v41 = vpop.eup %8620  ;;  %v11729_v10 = vld [vmem:[#allocation100_spill] sm:$0xff] }
 0x9b2   : > { %v4897_v56 = vadd.f32 0.5, %v4896_v32  ;;  %v8623_v29 = vpop.eup %8622 }
 0x9b3   : > { %v4901_v33 = vadd.f32 0.5, %v4900_v22  ;;  %v4905_v28 = vmul.f32 0.5, %v8623_v29 }
 0x9b4   : > { %v4908_v58 = vmul.f32 %v8621_v41, %v4897_v56  ;;  %v11730_v56 = vld [vmem:[#allocation101_spill] sm:$0xff] }
 0x9b5   : > { %v4907_v44 = vmul.f32 %v4901_v33, %v10487_v40  ;;  %v4906_v59 = vadd.f32 0.5, %v4905_v28 }
 0x9b7   : > { %v10611_v24 = vadd.f32 %v4908_v58, %v4907_v44  ;;  %v11731_v44 = vld [vmem:[#allocation102_spill] sm:$0xff] }
 0x9b9   : > { %8624 = vtanh.f32 %v10611_v24 }
 0x9c3   : > { %v8625_v8 = vpop.eup %8624 }
 0x9c4   : > { %v4911_v35 = vmul.f32 %v8625_v8, %v4906_v59  ;;  %v11732_v59 = vld [vmem:[#allocation103_spill] sm:$0xff]  ;;  %v11733_v8 = vld [vmem:[#allocation104_spill] sm:$0xff] }
 0x9c6   : > { %4977 = vmatmul.mubr.f32.vlgmr.msra.gmra.mrb[18].mxu0 %v4911_v35  ;;  %5048 = vmatmul.mubr.f32.vlgmr.msra.gmra.mrb[18].mxu1 %v4911_v35 }
 0x9c7   : > { %7853 = vmatpush1.bf16.msra.mxu0 %v11340_v5  ;;  %7885 = vmatpush1.bf16.msra.mxu1 %v11341_v53 }
 0x9c8   : > { %7855 = vmatprep.subr.bf16.mxu0 %v11403_v9  ;;  %7887 = vmatprep.subr.bf16.mxu1 %v11404_v16 }
 0x9c9   : > { %5118 = vmatprep.mubr.f32.mxu0 %v11215_v60  ;;  %5189 = vmatprep.mubr.f32.mxu1 %v11215_v60 }
 0x9cb   : > { %7857 = vmatpush1.bf16.msra.mxu0 %v11405_v6  ;;  %7889 = vmatpush1.bf16.msra.mxu1 %v11406_v12 }
 0x9cc   : > { %7859 = vmatprep.subr.bf16.mxu0 %v11467_v46  ;;  %7891 = vmatprep.subr.bf16.mxu1 %v11468_v48 }
 0x9cf   : > { %7861 = vmatpush1.bf16.msra.mxu0 %v11469_v52  ;;  %7893 = vmatpush1.bf16.msra.mxu1 %v11470_v37 }
 0x9d0   : > { %7863 = vmatprep.subr.bf16.mxu0 %v11532_v15  ;;  %7895 = vmatprep.subr.bf16.mxu1 %v11533_v63 }
 0x9d3   : > { %7865 = vmatpush1.bf16.msra.mxu0 %v11534_v49  ;;  %7897 = vmatpush1.bf16.msra.mxu1 %v11535_v7 }
 0x9d4   : > { %7867 = vmatprep.subr.bf16.mxu0 %v11536_v2  ;;  %7899 = vmatprep.subr.bf16.mxu1 %v11537_v31 }
 0x9d7   : > { %7869 = vmatpush1.bf16.msra.mxu0 %v11538_v38  ;;  %7901 = vmatpush1.bf16.msra.mxu1 %v11597_v61 }
 0x9d8   : > { %7871 = vmatprep.subr.bf16.mxu0 %v11598_v27  ;;  %7903 = vmatprep.subr.bf16.mxu1 %v11599_v45 }
 0x9db   : > { %7873 = vmatpush1.bf16.msra.mxu0 %v11600_v18  ;;  %7905 = vmatpush1.bf16.msra.mxu1 %v11601_v39 }
 0x9dc   : > { %7875 = vmatprep.subr.bf16.mxu0 %v11483_v55  ;;  %7907 = vmatprep.subr.bf16.mxu1 %v11544_v36 }
 0x9df   : > { %7877 = vmatpush1.bf16.msra.mxu0 %v11602_v51  ;;  %7909 = vmatpush1.bf16.msra.mxu1 %v11486_v11 }
 0x9e0   : > { %v4779_v40 = vpop.f32.mrb[34].mxu0  ;;  %v4850_v58 = vpop.f32.mrb[34].mxu1  ;;  %7879 = vmatprep.subr.bf16.mxu0 %v11603_v34  ;;  %7911 = vmatprep.subr.bf16.mxu1 %v11304_v19 }
 0x9e1   : > { %v4859_v33 = vadd.f32 %v4779_v40, %v11488_v0  ;;  %v4781_v22 = vpop.f32.mrb[35].mxu0  ;;  %v4852_v32 = vpop.f32.mrb[35].mxu1  ;;  %v4861_v42 = vadd.f32 %v4850_v58, %v11431_v54  ;;  %v11734_v58 = vld [vmem:[#allocation105_spill] sm:$0xff] }
 0x9e2   : > { %v4860_v23 = vadd.f32 %v4781_v22, %v9762_v1  ;;  %v4862_v62 = vadd.f32 %v4852_v32, %v11664_v43 }
 0x9e3   : > { %v4863_v47 = vmul.f32 0.5, %v4859_v33  ;;  %7881 = vmatpush1.bf16.msra.mxu0 %v11307_v17  ;;  %7913 = vmatpush1.bf16.msra.mxu1 %v11489_v4  ;;  %v11735_v33 = vld [vmem:[#allocation106_spill] sm:$0xff] }
 0x9e4   : > { %v4867_v41 = vmul.f32 0.5, %v4860_v23  ;;  %7915 = vmatprep.subr.bf16.mxu0 %v11369_v57  ;;  %7947 = vmatprep.subr.bf16.mxu1 %v11430_v25  ;;  %v4872_v29 = vmul.f32 0.5, %v4862_v62 }
 0x9e5   : > { %8626 = vtanh.f32 %v4863_v47 }
 0x9e6   : > { %8628 = vtanh.f32 %v4867_v41  ;;  %5119 = vmatmul.mubr.f32.vlgmr.msra.gmra.mrb[36].mxu0 %v4911_v35  ;;  %5190 = vmatmul.mubr.f32.vlgmr.msra.gmra.mrb[36].mxu1 %v4911_v35  ;;  %v11736_v41 = vld [vmem:[#allocation107_spill] sm:$0xff] }
 0x9e7   : > { %7917 = vmatpush1.bf16.msra.mxu0 %v11432_v21  ;;  %7949 = vmatpush1.bf16.msra.mxu1 %v11433_v20  ;;  %8630 = vtanh.f32 %v4861_v42  ;;  %v11737_v42 = vld [vmem:[#allocation108_spill] sm:$0xff] }
 0x9e8   : > { %7919 = vmatprep.subr.bf16.mxu0 %v11604_v13  ;;  %7951 = vmatprep.subr.bf16.mxu1 %v11663_v26  ;;  %8632 = vtanh.f32 %v4872_v29  ;;  %v11744_v29 = vld [vmem:[#allocation113_spill] sm:$0xff] }
 0x9e9   : > { %5260 = vmatprep.mubr.f32.mxu0 %v11215_v60  ;;  %5331 = vmatprep.mubr.f32.mxu1 %v11215_v60 }
 0x9eb   : > { %7921 = vmatpush1.bf16.msra.mxu0 %v11665_v50  ;;  %7953 = vmatpush1.bf16.msra.mxu1 %v11729_v10 }
 0x9ec   : > { %7923 = vmatprep.subr.bf16.mxu0 %v11730_v56  ;;  %7955 = vmatprep.subr.bf16.mxu1 %v11731_v44  ;;  %v11738_v44 = vld [vmem:[#allocation109_spill] sm:$0xff] }
 0x9ef   : > { %v8627_v28 = vpop.eup %8626  ;;  %7925 = vmatpush1.bf16.msra.mxu0 %v11732_v59  ;;  %7957 = vmatpush1.bf16.msra.mxu1 %v11733_v8  ;;  %v11739_v59 = vld [vmem:[#allocation110_spill] sm:$0xff]  ;;  %v11740_v8 = vld [vmem:[#allocation65_spill] sm:$0xff] }
 0x9f0   : > { %v8629_v35 = vpop.eup %8628  ;;  %v4865_v40 = vmul.f32 0.5, %v8627_v28  ;;  %7927 = vmatprep.subr.bf16.mxu0 %v11734_v58  ;;  %7959 = vmatprep.subr.bf16.mxu1 %v11735_v33  ;;  %v11742_v58 = vld [vmem:[#allocation111_spill] sm:$0xff] }
 0x9f1   : > { %v4869_v22 = vmul.f32 0.5, %v8629_v35  ;;  %v8631_v23 = vpop.eup %8630  ;;  %v11743_v35 = vld [vmem:[#allocation112_spill] sm:$0xff] }
 0x9f2   : > { %v4866_v32 = vadd.f32 0.5, %v4865_v40  ;;  %v11745_v40 = vld [vmem:[#allocation114_spill] sm:$0xff] }
 0x9f3   : > { %v4870_v47 = vadd.f32 0.5, %v4869_v22  ;;  %7929 = vmatpush1.bf16.msra.mxu0 %v11736_v41  ;;  %7961 = vmatpush1.bf16.msra.mxu1 %v11737_v42  ;;  %v8633_v22 = vpop.eup %8632 }
 0x9f4   : > { %v4877_v62 = vmul.f32 %v8631_v23, %v4866_v32  ;;  %7931 = vmatprep.subr.bf16.mxu0 %v11738_v44  ;;  %7963 = vmatprep.subr.bf16.mxu1 %v11739_v59  ;;  %v11746_v32 = vld [vmem:[#allocation115_spill] sm:$0xff]  ;;  %v11747_v23 = vld [vmem:[#allocation116_spill] sm:$0xff]  ;;  %v11748_v59 = vld [vmem:[#allocation117_spill] sm:$0xff] }
 0x9f5   : > { %v4876_v28 = vmul.f32 %v4870_v47, %v11740_v8  ;;  %v11749_v8 = vld [vmem:[#allocation118_spill] sm:$0xff]  ;;  %v4874_v47 = vmul.f32 0.5, %v8633_v22  ;;  %v11754_v44 = vld [vmem:[#allocation123_spill] sm:$0xff] }
 0x9f6   : > { %v11757_v22 = vld [vmem:[#allocation27_spill] sm:$0xff] }
 0x9f7   : > { %v10671_v56 = vadd.f32 %v4877_v62, %v4876_v28  ;;  %7933 = vmatpush1.bf16.msra.mxu0 %v11742_v58  ;;  %7965 = vmatpush1.bf16.msra.mxu1 %v11743_v35  ;;  %v11750_v62 = vld [vmem:[#allocation119_spill] sm:$0xff]  ;;  %v11751_v28 = vld [vmem:[#allocation120_spill] sm:$0xff]  ;;  %v11752_v35 = vld [vmem:[#allocation121_spill] sm:$0xff]  ;;  %v4875_v58 = vadd.f32 0.5, %v4874_v47 }
 0x9f8   : > { %7935 = vmatprep.subr.bf16.mxu0 %v11744_v29  ;;  %7967 = vmatprep.subr.bf16.mxu1 %v11745_v40  ;;  %v11753_v29 = vld [vmem:[#allocation122_spill] sm:$0xff]  ;;  %v4886_v40 = vpop.permute.xlu1 %4885 }
 0x9f9   : > { %11741 = vst [vmem:[#allocation67_spill] sm:$0xff] %v10671_v56  ;;  %8634 = vtanh.f32 %v10671_v56  ;;  %vm4887_vm0 = vcmp.eq.s32.totalorder %v4886_v40, 1  ;;  %v11762_v47 = vld [vmem:[#allocation30_spill] sm:$0xff] }
 0x9fa   : > { %v11766_v40 = vld [vmem:[#allocation34_spill] sm:$0xff] }
 0x9fb   : > { %7937 = vmatpush1.bf16.msra.mxu0 %v11746_v32  ;;  %7969 = vmatpush1.bf16.msra.mxu1 %v11747_v23  ;;  %v11755_v32 = vld [vmem:[#allocation124_spill] sm:$0xff]  ;;  %v11756_v23 = vld [vmem:[#allocation26_spill] sm:$0xff] }
 0x9fc   : > { %7939 = vmatprep.subr.bf16.mxu0 %v11748_v59  ;;  %7971 = vmatprep.subr.bf16.mxu1 %v11749_v8 }
 0x9ff   : > { %7941 = vmatpush1.bf16.msra.mxu0 %v11750_v62  ;;  %7973 = vmatpush1.bf16.msra.mxu1 %v11751_v28  ;;  %v11758_v62 = vld [vmem:[#allocation66_spill] sm:$0xff] }
 0xa00   : > { %7943 = vmatprep.subr.bf16.mxu0 %v11752_v35  ;;  %7975 = vmatprep.subr.bf16.mxu1 %v11753_v29  ;;  %v11760_v35 = vld [vmem:[#allocation28_spill] sm:$0xff]  ;;  %v11761_v29 = vld [vmem:[#allocation29_spill] sm:$0xff] }
 0xa03   : > { %v8635_v56 = vpop.eup %8634  ;;  %7945 = vmatpush1.bf16.msra.mxu0 %v11754_v44  ;;  %7977 = vmatpush1.bf16.msra.mxu1 %v11755_v32  ;;  %v11763_v44 = vld [vmem:[#allocation32_spill] sm:$0xff] }
 0xa04   : > { %v4880_v59 = vmul.f32 %v8635_v56, %v4875_v58  ;;  %7979 = vmatprep.subr.bf16.mxu0 %v11756_v23  ;;  %8011 = vmatprep.subr.bf16.mxu1 %v11757_v22  ;;  %v11764_v56 = vld [vmem:[#allocation31_spill] sm:$0xff]  ;;  %v11765_v58 = vld [vmem:[#allocation33_spill] sm:$0xff]  ;;  %v11767_v23 = vld [vmem:[#allocation36_spill] sm:$0xff] }
 0xa05   : > { %v11773_v22 = vld [vmem:[#allocation41_spill] sm:$0xff] }
 0xa06   : > { %v10691_v8 = vsel %vm4887_vm0, %v4880_v59, %v11758_v62  ;;  %5261 = vmatmul.mubr.f32.vlgmr.msra.gmra.mrb[36].mxu0 %v4880_v59  ;;  %5332 = vmatmul.mubr.f32.vlgmr.msra.gmra.mrb[36].mxu1 %v4880_v59  ;;  %v11768_v59 = vld [vmem:[#allocation35_spill] sm:$0xff]  ;;  %v11771_v62 = vld [vmem:[#allocation40_spill] sm:$0xff] }
 0xa07   : > { %11759 = vst [vmem:[#allocation68_spill] sm:$0xff] %v10691_v8  ;;  %7981 = vmatpush1.bf16.msra.mxu0 %v11760_v35  ;;  %8013 = vmatpush1.bf16.msra.mxu1 %v11761_v29  ;;  %v11769_v35 = vld [vmem:[#allocation37_spill] sm:$0xff]  ;;  %v11770_v29 = vld [vmem:[#allocation38_spill] sm:$0xff] }
 0xa08   : > { %7983 = vmatprep.subr.bf16.mxu0 %v11762_v47  ;;  %8015 = vmatprep.subr.bf16.mxu1 %v11763_v44  ;;  %v11772_v44 = vld [vmem:[#allocation39_spill] sm:$0xff]  ;;  %v11774_v47 = vld [vmem:[#allocation42_spill] sm:$0xff] }
 0xa09   : > { %5459 = vmatprep.mubr.f32.mxu0 %v11215_v60  ;;  %5530 = vmatprep.mubr.f32.mxu1 %v11215_v60 }
 0xa0b   : > { %7985 = vmatpush1.bf16.msra.mxu0 %v11764_v56  ;;  %8017 = vmatpush1.bf16.msra.mxu1 %v11765_v58  ;;  %v11775_v56 = vld [vmem:[#allocation44_spill] sm:$0xff]  ;;  %v11776_v58 = vld [vmem:[#allocation43_spill] sm:$0xff] }
 0xa0c   : > { %7987 = vmatprep.subr.bf16.mxu0 %v11766_v40  ;;  %8019 = vmatprep.subr.bf16.mxu1 %v11767_v23  ;;  %v11777_v40 = vld [vmem:[#allocation45_spill] sm:$0xff]  ;;  %v11778_v23 = vld [vmem:[#allocation46_spill] sm:$0xff] }
 0xa0f   : > { %7989 = vmatpush1.bf16.msra.mxu0 %v11768_v59  ;;  %8021 = vmatpush1.bf16.msra.mxu1 %v11769_v35  ;;  %v11779_v59 = vld [vmem:[#allocation48_spill] sm:$0xff]  ;;  %v11780_v35 = vld [vmem:[#allocation47_spill] sm:$0xff] }
 0xa10   : > { %7991 = vmatprep.subr.bf16.mxu0 %v11770_v29  ;;  %8023 = vmatprep.subr.bf16.mxu1 %v11771_v62  ;;  %v11781_v29 = vld [vmem:[#allocation49_spill] sm:$0xff]  ;;  %v11782_v62 = vld [vmem:[#allocation50_spill] sm:$0xff] }
 0xa13   : > { %7993 = vmatpush1.bf16.msra.mxu0 %v11772_v44  ;;  %8025 = vmatpush1.bf16.msra.mxu1 %v11773_v22  ;;  %v11783_v44 = vld [vmem:[#allocation52_spill] sm:$0xff]  ;;  %v11784_v22 = vld [vmem:[#allocation51_spill] sm:$0xff] }
 0xa14   : > { %7995 = vmatprep.subr.bf16.mxu0 %v11774_v47  ;;  %8027 = vmatprep.subr.bf16.mxu1 %v11775_v56  ;;  %v11785_v47 = vld [vmem:[#allocation53_spill] sm:$0xff]  ;;  %v11786_v56 = vld [vmem:[#allocation54_spill] sm:$0xff] }
 0xa17   : > { %7997 = vmatpush1.bf16.msra.mxu0 %v11776_v58  ;;  %8029 = vmatpush1.bf16.msra.mxu1 %v11777_v40  ;;  %v11787_v58 = vld [vmem:[#allocation56_spill] sm:$0xff]  ;;  %v11788_v40 = vld [vmem:[#allocation55_spill] sm:$0xff] }
 0xa18   : > { %7999 = vmatprep.subr.bf16.mxu0 %v11778_v23  ;;  %8031 = vmatprep.subr.bf16.mxu1 %v11779_v59  ;;  %v11789_v23 = vld [vmem:[#allocation57_spill] sm:$0xff]  ;;  %v11790_v59 = vld [vmem:[#allocation58_spill] sm:$0xff] }
 0xa1b   : > { %8001 = vmatpush1.bf16.msra.mxu0 %v11780_v35  ;;  %8033 = vmatpush1.bf16.msra.mxu1 %v11781_v29  ;;  %v11791_v35 = vld [vmem:[#allocation59_spill] sm:$0xff]  ;;  %v5847_v29 = vstv %s5372_s29 }
 0xa1c   : > { %8003 = vmatprep.subr.bf16.mxu0 %v11782_v62  ;;  %8035 = vmatprep.subr.bf16.mxu1 %v11783_v44  ;;  %v11792_v62 = vld [vmem:[#allocation60_spill] sm:$0xff]  ;;  %v11793_v44 = vmov 0  }
 0xa1d   : > { %vm5848_vm1 = vcmp.eq.s32.totalorder %v11792_v62, %v5847_v29 }
 0xa1f   : > { %8005 = vmatpush1.bf16.msra.mxu0 %v11784_v22  ;;  %8037 = vmatpush1.bf16.msra.mxu1 %v11785_v47  ;;  %v5849_v22 = vsel %vm5848_vm1, 1, %v11793_v44 }
 0xa20   : > { %8007 = vmatprep.subr.bf16.mxu0 %v11786_v56  ;;  %8039 = vmatprep.subr.bf16.mxu1 %v11787_v58  ;;  %v11794_v56 = vld [vmem:[#allocation62_spill] sm:$0xff] }
 0xa21   : > { %5851 = vperm.xlu1 %8465, %v5849_v22  }
 0xa23   : > { %8009 = vmatpush1.bf16.msra.mxu0 %v11788_v40  ;;  %8041 = vmatpush1.bf16.msra.mxu1 %v11789_v23 }
 0xa24   : > { %8043 = vmatprep.subr.bf16.mxu0 %v11790_v59  ;;  %8075 = vmatprep.subr.bf16.mxu1 %v11791_v35 }
 0xa99   : > { %v4978_v47 = vpop.f32.mrb[18].mxu0  ;;  %v5049_v8 = vpop.f32.mrb[18].mxu1 }
 0xa9a   : > { %v8210_v32 = vadd.f32 %v4978_v47, %v11794_v56  ;;  %v4980_v58 = vpop.f32.mrb[19].mxu0  ;;  %v5051_v28 = vpop.f32.mrb[19].mxu1  ;;  %v8228_v59 = vadd.f32 %v5049_v8, %v9471_v14 }
 0xa9b   : > { %v8211_v40 = vadd.f32 %v4980_v58, %v9466_v3  ;;  %v8229_v35 = vadd.f32 %v5051_v28, %v9477_v30 }
 0xa9c   : > { %v5377_v23 = vmul.f32 0.5, %v8210_v32 }
 0xa9d   : > { %v5381_v42 = vmul.f32 0.5, %v8211_v40  ;;  %v5386_v29 = vmul.f32 0.5, %v8229_v35  ;;  %v11815_v40 = vld [vmem:[#allocation119_spill] sm:$0xff]  ;;  %v11818_v35 = vld [vmem:[#allocation122_spill] sm:$0xff] }
 0xa9e   : > { %8636 = vtanh.f32 %v5377_v23  ;;  %v11816_v23 = vld [vmem:[#allocation120_spill] sm:$0xff] }
 0xa9f   : > { %8638 = vtanh.f32 %v5381_v42 }
 0xaa0   : > { %8640 = vtanh.f32 %v8228_v59  ;;  %v11817_v59 = vld [vmem:[#allocation121_spill] sm:$0xff] }
 0xaa1   : > { %8642 = vtanh.f32 %v5386_v29  ;;  %v5369_v29 = vpop.permute.xlu0 %5368 }
 0xaa2   : > { %vm5370_vm2 = vcmp.eq.s32.totalorder %v5369_v29, 1  ;;  %v5882_v29 = vld [vmem:[#allocation15 + $0x78] sm:$0xff] (!%p6127_p9) }
 0xaa8   : > { %v8637_v62 = vpop.eup %8636 }
 0xaa9   : > { %v8639_v44 = vpop.eup %8638  ;;  %v5379_v22 = vmul.f32 0.5, %v8637_v62 }
 0xaaa   : > { %v5383_v41 = vmul.f32 0.5, %v8639_v44  ;;  %v8641_v56 = vpop.eup %8640 }
 0xaab   : > { %v5380_v47 = vadd.f32 0.5, %v5379_v22  ;;  %v8643_v14 = vpop.eup %8642  ;;  %v11819_v22 = vld [vmem:[#allocation123_spill] sm:$0xff] }
 0xaac   : > { %v5384_v33 = vadd.f32 0.5, %v5383_v41  ;;  %v5388_v42 = vmul.f32 0.5, %v8643_v14  ;;  %v11814_v41 = vld [vmem:[#allocation118_spill] sm:$0xff] }
 0xaad   : > { %v5391_v10 = vmul.f32 %v8641_v56, %v5380_v47  ;;  %v11820_v47 = vld [vmem:[#allocation124_spill] sm:$0xff] }
 0xaae   : > { %v5390_v3 = vmul.f32 %v5384_v33, %v10611_v24  ;;  %v5389_v8 = vadd.f32 0.5, %v5388_v42  ;;  %v11811_v24 = vld [vmem:[#allocation115_spill] sm:$0xff]  ;;  %v11813_v33 = vld [vmem:[#allocation117_spill] sm:$0xff] }
 0xab0   : > { %v5392_v32 = vadd.f32 %v5391_v10, %v5390_v3  ;;  %v11812_v10 = vld [vmem:[#allocation116_spill] sm:$0xff] }
 0xab1   : > { %v11821_v3 = vld [vmem:[#allocation68_spill] sm:$0xff] }
 0xab2   : > { %8644 = vtanh.f32 %v5392_v32  ;;  %5859 = vst [vmem:[#allocation3] sm:$0xff] %v5392_v32 }
 0xabc   : > { %v8645_v58 = vpop.eup %8644 }
 0xabd   : > { %v5394_v30 = vmul.f32 %v8645_v58, %v5389_v8 }
 0xabf   : > { %5460 = vmatmul.mubr.f32.vlgmr.msra.gmra.mrb[38].mxu0 %v5394_v30  ;;  %5531 = vmatmul.mubr.f32.vlgmr.msra.gmra.mrb[38].mxu1 %v5394_v30 }
 0xac0   : > { %8045 = vmatpush1.bf16.msra.mxu0 %v11340_v5  ;;  %8077 = vmatpush1.bf16.msra.mxu1 %v11341_v53 }
 0xac1   : > { %8047 = vmatprep.subr.bf16.mxu0 %v11403_v9  ;;  %8079 = vmatprep.subr.bf16.mxu1 %v11404_v16 }
 0xac2   : > { %5601 = vmatprep.mubr.f32.mxu0 %v11215_v60  ;;  %5672 = vmatprep.mubr.f32.mxu1 %v11215_v60 }
 0xac4   : > { %8049 = vmatpush1.bf16.msra.mxu0 %v11405_v6  ;;  %8081 = vmatpush1.bf16.msra.mxu1 %v11406_v12 }
 0xac5   : > { %8051 = vmatprep.subr.bf16.mxu0 %v11467_v46  ;;  %8083 = vmatprep.subr.bf16.mxu1 %v11468_v48 }
 0xac8   : > { %8053 = vmatpush1.bf16.msra.mxu0 %v11469_v52  ;;  %8085 = vmatpush1.bf16.msra.mxu1 %v11470_v37  ;;  %v11798_v37 = vld [vmem:[#allocation103_spill] sm:$0xff] }
 0xac9   : > { %8055 = vmatprep.subr.bf16.mxu0 %v11532_v15  ;;  %8087 = vmatprep.subr.bf16.mxu1 %v11533_v63  ;;  %v11800_v15 = vld [vmem:[#allocation105_spill] sm:$0xff]  ;;  %v11801_v63 = vld [vmem:[#allocation106_spill] sm:$0xff] }
 0xacc   : > { %8057 = vmatpush1.bf16.msra.mxu0 %v11534_v49  ;;  %8089 = vmatpush1.bf16.msra.mxu1 %v11535_v7 }
 0xacd   : > { %8059 = vmatprep.subr.bf16.mxu0 %v11536_v2  ;;  %8091 = vmatprep.subr.bf16.mxu1 %v11537_v31  ;;  %v11802_v31 = vld [vmem:[#allocation107_spill] sm:$0xff] }
 0xad0   : > { %8061 = vmatpush1.bf16.msra.mxu0 %v11538_v38  ;;  %8093 = vmatpush1.bf16.msra.mxu1 %v11597_v61  ;;  %v11803_v38 = vld [vmem:[#allocation108_spill] sm:$0xff]  ;;  %v11804_v61 = vld [vmem:[#allocation109_spill] sm:$0xff] }
 0xad1   : > { %8063 = vmatprep.subr.bf16.mxu0 %v11598_v27  ;;  %8095 = vmatprep.subr.bf16.mxu1 %v11599_v45  ;;  %v11805_v27 = vld [vmem:[#allocation110_spill] sm:$0xff]  ;;  %v11806_v45 = vld [vmem:[#allocation67_spill] sm:$0xff] }
 0xad4   : > { %8065 = vmatpush1.bf16.msra.mxu0 %v11600_v18  ;;  %8097 = vmatpush1.bf16.msra.mxu1 %v11601_v39 }
 0xad5   : > { %8067 = vmatprep.subr.bf16.mxu0 %v11483_v55  ;;  %8099 = vmatprep.subr.bf16.mxu1 %v11544_v36 }
 0xad8   : > { %8069 = vmatpush1.bf16.msra.mxu0 %v11602_v51  ;;  %8101 = vmatpush1.bf16.msra.mxu1 %v11486_v11  ;;  %v11807_v51 = vld [vmem:[#allocation111_spill] sm:$0xff] }
 0xad9   : > { %v5262_v5 = vpop.f32.mrb[36].mxu0  ;;  %v5333_v53 = vpop.f32.mrb[36].mxu1  ;;  %8071 = vmatprep.subr.bf16.mxu0 %v11603_v34  ;;  %8103 = vmatprep.subr.bf16.mxu1 %v11304_v19  ;;  %v11795_v19 = vld [vmem:[#allocation100_spill] sm:$0xff] }
 0xada   : > { %v5342_v9 = vadd.f32 %v5262_v5, %v11488_v0  ;;  %v5264_v16 = vpop.f32.mrb[37].mxu0  ;;  %v5335_v6 = vpop.f32.mrb[37].mxu1  ;;  %v5344_v52 = vadd.f32 %v5333_v53, %v11431_v54  ;;  %v11808_v34 = vld [vmem:[#allocation112_spill] sm:$0xff] }
 0xadb   : > { %v5343_v12 = vadd.f32 %v5264_v16, %v9762_v1 }
 0xadc   : > { %v5346_v46 = vmul.f32 0.5, %v5342_v9  ;;  %8073 = vmatpush1.bf16.msra.mxu0 %v11307_v17  ;;  %8105 = vmatpush1.bf16.msra.mxu1 %v11489_v4  ;;  %v5345_v17 = vadd.f32 %v5335_v6, %v11664_v43  ;;  %v11799_v4 = vld [vmem:[#allocation104_spill] sm:$0xff] }
 0xadd   : > { %v5350_v48 = vmul.f32 0.5, %v5343_v12  ;;  %8107 = vmatprep.subr.bf16.mxu0 %v11369_v57  ;;  %8139 = vmatprep.subr.bf16.mxu1 %v11430_v25  ;;  %v11796_v57 = vld [vmem:[#allocation101_spill] sm:$0xff]  ;;  %v11797_v25 = vld [vmem:[#allocation102_spill] sm:$0xff] }
 0xade   : > { %8646 = vtanh.f32 %v5346_v46 }
 0xadf   : > { %8648 = vtanh.f32 %v5350_v48  ;;  %5602 = vmatmul.mubr.f32.vlgmr.msra.gmra.mrb[40].mxu0 %v5394_v30  ;;  %5673 = vmatmul.mubr.f32.vlgmr.msra.gmra.mrb[40].mxu1 %v5394_v30 }
 0xae0   : > { %8109 = vmatpush1.bf16.msra.mxu0 %v11432_v21  ;;  %8141 = vmatpush1.bf16.msra.mxu1 %v11433_v20  ;;  %8650 = vtanh.f32 %v5344_v52  ;;  %v5355_v20 = vmul.f32 0.5, %v5345_v17 }
 0xae1   : > { %8111 = vmatprep.subr.bf16.mxu0 %v11604_v13  ;;  %8143 = vmatprep.subr.bf16.mxu1 %v11663_v26  ;;  %v11809_v13 = vld [vmem:[#allocation113_spill] sm:$0xff]  ;;  %v11810_v26 = vld [vmem:[#allocation114_spill] sm:$0xff] }
 0xae2   : > { %5743 = vmatprep.mubr.f32.mxu0 %v11215_v60  ;;  %5814 = vmatprep.mubr.f32.mxu1 %v11215_v60  ;;  %8652 = vtanh.f32 %v5355_v20 }
 0xae4   : > { %8113 = vmatpush1.bf16.msra.mxu0 %v11665_v50  ;;  %8145 = vmatpush1.bf16.msra.mxu1 %v11795_v19 }
 0xae5   : > { %8115 = vmatprep.subr.bf16.mxu0 %v11796_v57  ;;  %8147 = vmatprep.subr.bf16.mxu1 %v11797_v25 }
 0xae8   : > { %v8647_v21 = vpop.eup %8646  ;;  %8117 = vmatpush1.bf16.msra.mxu0 %v11798_v37  ;;  %8149 = vmatpush1.bf16.msra.mxu1 %v11799_v4 }
 0xae9   : > { %v8649_v11 = vpop.eup %8648  ;;  %v5348_v55 = vmul.f32 0.5, %v8647_v21  ;;  %8119 = vmatprep.subr.bf16.mxu0 %v11800_v15  ;;  %8151 = vmatprep.subr.bf16.mxu1 %v11801_v63  ;;  %v5852_v63 = vpop.permute.xlu1 %5851 }
 0xaea   : > { %v5352_v60 = vmul.f32 0.5, %v8649_v11  ;;  %v8651_v7 = vpop.eup %8650  ;;  %vm5853_vm3 = vcmp.eq.s32.totalorder %v5852_v63, 1 }
 0xaeb   : > { %v5349_v49 = vadd.f32 0.5, %v5348_v55 }
 0xaec   : > { %v5353_v2 = vadd.f32 0.5, %v5352_v60  ;;  %8121 = vmatpush1.bf16.msra.mxu0 %v11802_v31  ;;  %8153 = vmatpush1.bf16.msra.mxu1 %v11803_v38  ;;  %v8653_v50 = vpop.eup %8652  ;;  %v5869_v31 = vld [vmem:[#allocation15 + $0x10] sm:$0xff] (!%p6127_p9)  ;;  %v8955_v38 = vmov (!%p6127_p9), 0.0|0.0  }
 0xaed   : > { %v5360_v36 = vmul.f32 %v8651_v7, %v5349_v49  ;;  %8123 = vmatprep.subr.bf16.mxu0 %v11804_v61  ;;  %8155 = vmatprep.subr.bf16.mxu1 %v11805_v27  ;;  %v5357_v28 = vmul.f32 0.5, %v8653_v50  ;;  %v5867_v7 = vld [vmem:[#allocation15] sm:$0xff] (!%p6127_p9)  ;;  %v5870_v61 = vld [vmem:[#allocation15 + $0x18] sm:$0xff] (!%p6127_p9)  ;;  %v8957_v27 = vmov (!%p6127_p9), 0.0  }
 0xaee   : > { %v5359_v18 = vmul.f32 %v5353_v2, %v11806_v45  ;;  %v5868_v2 = vld [vmem:[#allocation15 + $0x8] sm:$0xff] (!%p6127_p9)  ;;  %v8174_v45 = vpack.c.bf16 (!%p6127_p9), %v5870_v61, %v5869_v31  ;;  %v5875_v50 = vld [vmem:[#allocation15 + $0x40] sm:$0xff] (!%p6127_p9) }
 0xaef   : > { %v5358_v62 = vadd.f32 0.5, %v5357_v28 }
 0xaf0   : > { %v5361_v39 = vadd.f32 %v5360_v36, %v5359_v18  ;;  %8125 = vmatpush1.bf16.msra.mxu0 %v11807_v51  ;;  %8157 = vmatpush1.bf16.msra.mxu1 %v11808_v34  ;;  %v8171_v36 = vpack.c.bf16 (!%p6127_p9), %v5868_v2, %v5867_v7  ;;  %v5871_v18 = vld [vmem:[#allocation15 + $0x20] sm:$0xff] (!%p6127_p9)  ;;  %v5873_v34 = vld [vmem:[#allocation15 + $0x30] sm:$0xff] (!%p6127_p9) }
 0xaf1   : > { %8127 = vmatprep.subr.bf16.mxu0 %v11809_v13  ;;  %8159 = vmatprep.subr.bf16.mxu1 %v11810_v26  ;;  %v5874_v13 = vld [vmem:[#allocation15 + $0x38] sm:$0xff] (!%p6127_p9) }
 0xaf2   : > { %8654 = vtanh.f32 %v5361_v39  ;;  %v8180_v26 = vpack.c.bf16 (!%p6127_p9), %v5874_v13, %v5873_v34 }
 0xaf4   : > { %8129 = vmatpush1.bf16.msra.mxu0 %v11811_v24  ;;  %8161 = vmatpush1.bf16.msra.mxu1 %v11812_v10  ;;  %v5876_v24 = vld [vmem:[#allocation15 + $0x48] sm:$0xff] (!%p6127_p9) }
 0xaf5   : > { %8131 = vmatprep.subr.bf16.mxu0 %v11813_v33  ;;  %8163 = vmatprep.subr.bf16.mxu1 %v11814_v41  ;;  %v8183_v10 = vpack.c.bf16 (!%p6127_p9), %v5876_v24, %v5875_v50  ;;  %v5877_v33 = vld [vmem:[#allocation15 + $0x50] sm:$0xff] (!%p6127_p9)  ;;  %v5878_v41 = vld [vmem:[#allocation15 + $0x58] sm:$0xff] (!%p6127_p9) }
 0xaf6   : > { %v8186_v28 = vpack.c.bf16 (!%p6127_p9), %v5878_v41, %v5877_v33 }
 0xaf8   : > { %8133 = vmatpush1.bf16.msra.mxu0 %v11815_v40  ;;  %8165 = vmatpush1.bf16.msra.mxu1 %v11816_v23  ;;  %v5879_v40 = vld [vmem:[#allocation15 + $0x60] sm:$0xff] (!%p6127_p9)  ;;  %v5880_v23 = vld [vmem:[#allocation15 + $0x68] sm:$0xff] (!%p6127_p9) }
 0xaf9   : > { %8135 = vmatprep.subr.bf16.mxu0 %v11817_v59  ;;  %8167 = vmatprep.subr.bf16.mxu1 %v11818_v35  ;;  %v8189_v59 = vpack.c.bf16 (!%p6127_p9), %v5880_v23, %v5879_v40  ;;  %v5881_v35 = vld [vmem:[#allocation15 + $0x70] sm:$0xff] (!%p6127_p9) }
 0xafc   : > { %v8655_v44 = vpop.eup %8654  ;;  %8137 = vmatpush1.bf16.msra.mxu0 %v11819_v22  ;;  %8169 = vmatpush1.bf16.msra.mxu1 %v11820_v47 }
 0xafd   : > { %v5363_v56 = vmul.f32 %v8655_v44, %v5358_v62  ;;  %8170 = vmatprep.subr.bf16.mxu0 (!%p6127_p9), %v8955_v38  ;;  %v8192_v62 = vpack.c.bf16 (!%p6127_p9), %v5882_v29, %v5881_v35  ;;  %v6128_v44 = vld [vmem:[%s11822_s26] ss:$0 sm:$0xff] (!%p6127_p9) }
 0xaff   : > { %v5371_v32 = vsel %vm5370_vm2, %v5363_v56, %v11821_v3  ;;  %5744 = vmatmul.mubr.f32.vlgmr.msra.gmra.mrb[40].mxu0 %v5363_v56  ;;  %5815 = vmatmul.mubr.f32.vlgmr.msra.gmra.mrb[40].mxu1 %v5363_v56 }
 0xb00   : > { %6183 = vmatprep.mubr.msk.f32.mxu0 (!%p6127_p9), %vm8956_vm4, %v8957_v27  ;;  %8172 = vmatpush3.bf16.msra.mxu0 (!%p6127_p9), %v8171_v36 }
 0xb01   : > { %8173 = vmatprep.subr.bf16.mxu0 (!%p6127_p9), %v8955_v38 }
 0xb04   : > { %8175 = vmatpush3.bf16.msra.mxu0 (!%p6127_p9), %v8174_v45 }
 0xb05   : > { %8176 = vmatprep.subr.bf16.mxu0 (!%p6127_p9), %v8955_v38 }
 0xb92   : > { %v5461_v14 = vpop.f32.mrb[38].mxu0  ;;  %v5532_v42 = vpop.f32.mrb[38].mxu1 }
 0xb93   : > { %5855 = vst [vmem:[#allocation2] sm:$0xff] %v5461_v14  ;;  %5857 = vst [vmem:[#allocation2 + $0x10] sm:$0xff] %v5532_v42  ;;  %v5463_v8 = vpop.f32.mrb[39].mxu0  ;;  %v5534_v58 = vpop.f32.mrb[39].mxu1 }
 0xb94   : > { %5856 = vst [vmem:[#allocation2 + $0x8] sm:$0xff] %v5463_v8  ;;  %5858 = vst [vmem:[#allocation2 + $0x18] sm:$0xff] %v5534_v58 }
 0xbd2   : > { %v5745_v30 = vpop.f32.mrb[40].mxu0  ;;  %v5816_v5 = vpop.f32.mrb[40].mxu1 }
 0xbd3   : > { %v5825_v53 = vadd.f32 %v5745_v30, %v11488_v0  ;;  %v5747_v9 = vpop.f32.mrb[41].mxu0  ;;  %v5818_v16 = vpop.f32.mrb[41].mxu1  ;;  %v5827_v48 = vadd.f32 %v5816_v5, %v11431_v54 }
 0xbd4   : > { %v5826_v6 = vadd.f32 %v5747_v9, %v9762_v1  ;;  %v5828_v52 = vadd.f32 %v5818_v16, %v11664_v43 }
 0xbd5   : > { %v5829_v12 = vmul.f32 0.5, %v5825_v53 }
 0xbd6   : > { %v5833_v46 = vmul.f32 0.5, %v5826_v6  ;;  %v5838_v17 = vmul.f32 0.5, %v5828_v52 }
 0xbd7   : > { %8656 = vtanh.f32 %v5829_v12 }
 0xbd8   : > { %8658 = vtanh.f32 %v5833_v46 }
 0xbd9   : > { %8660 = vtanh.f32 %v5827_v48 }
 0xbda   : > { %8662 = vtanh.f32 %v5838_v17 }
 0xbe1   : > { %v8657_v19 = vpop.eup %8656 }
 0xbe2   : > { %v8659_v57 = vpop.eup %8658  ;;  %v5831_v25 = vmul.f32 0.5, %v8657_v19 }
 0xbe3   : > { %v5835_v20 = vmul.f32 0.5, %v8659_v57  ;;  %v8661_v21 = vpop.eup %8660 }
 0xbe4   : > { %v5832_v0 = vadd.f32 0.5, %v5831_v25  ;;  %v8663_v55 = vpop.eup %8662 }
 0xbe5   : > { %v5836_v37 = vadd.f32 0.5, %v5835_v20  ;;  %v5840_v54 = vmul.f32 0.5, %v8663_v55 }
 0xbe6   : > { %v5843_v4 = vmul.f32 %v8661_v21, %v5832_v0 }
 0xbe7   : > { %v5842_v1 = vmul.f32 %v5836_v37, %v5361_v39  ;;  %v5841_v15 = vadd.f32 0.5, %v5840_v54  ;;  %v5872_v39 = vld [vmem:[#allocation15 + $0x28] sm:$0xff] (!%p6127_p9) }
 0xbe8   : > { %v8177_v51 = vpack.c.bf16 (!%p6127_p9), %v5872_v39, %v5871_v18 }
 0xbe9   : > { %v5844_v11 = vadd.f32 %v5843_v4, %v5842_v1 }
 0xbea   : > { %8178 = vmatpush3.bf16.msra.mxu0 (!%p6127_p9), %v8177_v51 }
 0xbeb   : > { %8664 = vtanh.f32 %v5844_v11  ;;  %5861 = vst [vmem:[#allocation5] sm:$0xff] %v5844_v11  ;;  %8179 = vmatprep.subr.bf16.mxu0 (!%p6127_p9), %v8955_v38 }
 0xbee   : > { %8181 = vmatpush3.bf16.msra.mxu0 (!%p6127_p9), %v8180_v26 }
 0xbef   : > { %8182 = vmatprep.subr.bf16.mxu0 (!%p6127_p9), %v8955_v38 }
 0xbf2   : > { %8184 = vmatpush3.bf16.msra.mxu0 (!%p6127_p9), %v8183_v10 }
 0xbf3   : > { %5866 = sbr.rel (%p6127_p9) target bundleno = 3288 (0xcd8), region = 84  ;;  %8185 = vmatprep.subr.bf16.mxu0 (!%p6127_p9), %v8955_v38 }
 0xbf5   : > { %v8665_v60 = vpop.eup %8664 }
 0xbf6   : > { %v5846_v43 = vmul.f32 %v8665_v60, %v5841_v15  ;;  %8187 = vmatpush3.bf16.msra.mxu0 (!%p6127_p9), %v8186_v28 }
 0xbf7   : > { %8188 = vmatprep.subr.bf16.mxu0 (!%p6127_p9), %v8955_v38 }
 0xbf8   : > { %5860 = vst [vmem:[#allocation4] sm:$0xff] %v5846_v43  ;;  %v5854_v49 = vsel %vm5853_vm3, %v5846_v43, %v5371_v32 }
 0xbf9   : > { %5862 = vst [vmem:[#allocation6] sm:$0xff] %v5854_v49 }
 0xbfa   : > { %8190 = vmatpush3.bf16.msra.mxu0 %v8189_v59 }
 0xbfb   : > { %8191 = vmatprep.subr.bf16.mxu0 %v8955_v38 }
 0xbfe   : > { %8193 = vmatpush3.bf16.msra.mxu0 %v8192_v62 }
 0xc01   : > { %6184 = vmatmul.mubr.f32.vlgmr.msra.gmra.mrb[0].mxu0 %v5854_v49 }
 0xcd4   : > { %v5956_v22 = vpop.f32.mrb[0].mxu0 }
 0xcd5   : > { %v5957_v47 = vadd.f32 %v6128_v44, %v5956_v22  ;;  %v6185_v56 = vpop.f32.mrb[1].mxu0 }
 0xcd7   : > { %5960 = vst [vmem:[%s437_s20] sm:$0xff] %v5957_v47 }
 0xcd8 PF: > { %s11823_s16 = sld [smem:[#allocation23_spill]]  ;;  %s11824_s3 = sld [smem:[#allocation24_spill]] }
 0xcd9   : > { %s11825_s2 = sld [smem:[#allocation134_spill]]  ;;  %s5975_s12 = sshll.u32 %s437_s20, 4  ;;  %s5976_s12 = int_to_ptr.vmem [resolvable:$true] %s5975_s12 }
 0xcda   : > { %s5962_s6 = scalar_lea.sflag [#allocation9], %s435_s7  ;;  %s8808_s28 = scalar_lea.vmem %s5976_s12, 128 }
 0xcdb   : > { %p8809_p13 = scmp.ne.s32.totalorder %s5976_s12, %s8808_s28  ;;  %s8958_s15 = smov [#allocation16]  }
 0xcdc   : > { %s8812_s22 = sshll.u32 %s8958_s15, 4  ;;  %s8813_s22 = int_to_ptr.vmem [resolvable:$false] %s8812_s22 }
 0xcdd   : > { %s8814_s29 = scalar_lea.vmem %s8813_s22, 256  ;;  %p8815_p12 = scmp.lt.s32.totalorder %s5976_s12, %s8813_s22 }
 0xcde   : > { %s6130_s4 = sshll.u32 %s11823_s16, 7  ;;  %p11826_p5 = scmp.ne.s32.totalorder %s11824_s3, 0 }
 0xcdf   : > { %s10821_s27 = scalar_lea.hbm %s11825_s2, %s6130_s4  ;;  %p8816_p4 = scmp.lt.s32.totalorder %s8814_s29, %s8808_s28 }
 0xce0   : > { %p8810_p6 = pnand %p8809_p13, %p11826_p5 }
 0xce1   : > { %p8817_p7 = por %p8816_p4, %p8815_p12 }
 0xce2   : > { %p8811_p8 = pneg %p8810_p6 }
 0xce4   : > { %p8818_p2 = pnand %p8817_p7, %p8811_p8 }
 0xce6   : > { %8821 = shalt.err (!%p8818_p2)
}
 0xce7   : > { %s8822_s7 = scalar_lea.hbm %s10821_s27, 128  ;;  %s8826_s23 = scalar_lea.hbm %s11825_s2, 256 }
 0xce8   : > { %p8823_p0 = scmp.ne.s32.totalorder %s10821_s27, %s8822_s7  ;;  %p8827_p10 = scmp.lt.u32.totalorder %s10821_s27, %s11825_s2 }
 0xce9   : > { %p8828_p11 = scmp.lt.u32.totalorder %s8826_s23, %s8822_s7  ;;  %p8830_p13 = scmp.lt.u32.totalorder %s8822_s7, %s10821_s27 }
 0xcea   : > { %p8824_p1 = pnand %p8823_p0, %p11826_p5 }
 0xceb   : > { %p8829_p9 = por %p8828_p11, %p8827_p10 }
 0xcec   : > { %p8825_p3 = pneg %p8824_p1 }
 0xced   : > { %p8831_p6 = por %p8830_p13, %p8829_p9 }
 0xcef   : > { %p8832_p8 = pnand %p8831_p6, %p8825_p3 }
 0xcf1   : > { %8835 = shalt.err (!%p8832_p8)
}
 0xcf2   : > { %8326 = dma.vmem_to_hbm [thread:$0]  (%p11826_p5), %s5976_s12, 128, %s10821_s27, %s5962_s6  }
 0xcf3 PF: > { %s11827_s16 = sld [smem:[#allocation21_spill]]  ;;  %s11828_s4 = sld [smem:[#allocation25_spill]] }
 0xcf4   : > { %p8358_p12 = scmp.ge.s32.totalorder %s8938_s19, 2 }
 0xcf9   : > { %s5987_s21 = sand.u32 1, %s11827_s16   ;;  %p11829_p4 = scmp.ne.s32.totalorder %s11828_s4, 0 }
 0xcfa   : > { %s5988_s25 = scalar_lea.sflag [#allocation9], %s5987_s21 }
 0xcfb   : > { %p8346_p7 = pnand %p8358_p12, %p11829_p4 }
 0xcfd   : > { %8893 = dma.done.wait (!%p8346_p7), %s5988_s25, 128  }
 0xcfe   : > { %8895 = vsyncadd (!%p8346_p7), %s5988_s25, 4294967168  ;;  %s27_s19 = sadd.s32 1, %s8938_s19   ;;  %s11830_s3 = smov %s9229_s30 }
 0xcff   : > { %p24_p2 = scmp.ge.s32.totalorder %s27_s19, 6   ;;  %s11831_s30 = smov %s8902_s10 }
 0xd00   : > { %s11832_s10 = smov %s8906_s11  ;;  %s11833_s11 = smov %s9226_s9 }
 0xd01   : > { %s11834_s12 = smov %s8914_s13  ;;  %s11835_s13 = smov %s8918_s14 }
 0xd02   : > { %s11836_s14 = smov %s11830_s3  ;;  %s11837_s15 = smov %s8930_s17 }
 0xd03   : > { %s11838_s16 = smov %s8934_s18  ;;  %s11839_s17 = smov %s11842_s1 }
 0xd04   : > { %s11840_s18 = smov %s11846_s5  ;;  %26 = sbr.rel (!%p24_p2) target bundleno = 21 (0x15), region = 128 }
 0xd0b   :  { %5993 = vsyncpa [#allocation8], 1 }
 0xd0c   :  { %5995 = vsyncpa [#allocation8 + $0x1], 1 }
 0xd0d   :  { %5996 = vsyncpa [#allocation11], 1 }
 0xd0e   :  { %5997 = vsyncpa [#allocation14], 1 }
 0xd0f   :  { %5998 = vsyncpa [#allocation9], 1 }
 0xd10   :  { %6000 = vsyncpa [#allocation9 + $0x1], 1 }

</bundles_post_ra>
